<compile_context>
chip_gen: v6e
topology: v6e:2x2x1
jax: 0.10.0
libtpu: 0.0.40
codegen_flags: <defaults>
</compile_context>

<pallas_src>
import jax
import jax.numpy as jnp
from jax.experimental import pallas as pl
from jax.experimental.pallas import tpu as pltpu

SEQ = 8            # sequence length
INPUT = 1          # input_size
HIDDEN = 24        # hidden_layer_size
LAYERS = 3         # num_layers
OUTPUT = 1         # output_size
GATES = 4 * HIDDEN
PAD = 128          # lane-aligned per-gate stride
GP = 4 * PAD       # padded gate width (512)


def lstm_kernel(x_ref, wih0_ref, whh0_ref, wf1_ref, wf2_ref, b_ref,
                wlin_ref, blin_ref, out_ref):
    # Load parameters once (all tiny, stay in vregs / VMEM).
    b_all = b_ref[...]                       # (LAYERS, GP)
    b0 = b_all[0:1, :]
    b1 = b_all[1:2, :]
    b2 = b_all[2:3, :]
    wih0 = wih0_ref[...]                     # (1, GP)       layer-0 input row
    whh0 = whh0_ref[...]                     # (PAD, GP)     layer-0 recurrent
    wf1 = wf1_ref[...]                       # (2*PAD, GP)   layer-1 fused [ih; hh]
    wf2 = wf2_ref[...]                       # (2*PAD, GP)   layer-2 fused [ih; hh]

    zero = jnp.zeros((1, PAD), jnp.float32)
    h0 = h1 = h2 = zero                      # state carried as SSA values (vregs)
    c0 = c1 = c2 = zero

    def cell(gates, c):
        # Slab activations: one sigmoid + one tanh over the whole padded gate
        # vector, then lane-aligned (free) sub-slices.
        sig = jax.nn.sigmoid(gates)
        th = jnp.tanh(gates)
        i = sig[:, 0 * PAD:1 * PAD]
        f = sig[:, 1 * PAD:2 * PAD]
        g = th[:, 2 * PAD:3 * PAD]
        o = sig[:, 3 * PAD:4 * PAD]
        c_new = f * c + i * g
        h_new = o * jnp.tanh(c_new)
        return h_new, c_new

    h_tops = []
    for t in range(SEQ):                     # static unroll, all indices static
        # Layer 0: INPUT == 1, so the input projection is scalar * row.
        g0 = (x_ref[t] * wih0
              + jnp.dot(h0, whh0, preferred_element_type=jnp.float32) + b0)
        h0, c0 = cell(g0, c0)
        # Layer 1: fused [input ; hidden] matmul (single MXU push).
        g1 = jnp.dot(jnp.concatenate([h0, h1], axis=1), wf1,
                     preferred_element_type=jnp.float32) + b1
        h1, c1 = cell(g1, c1)
        # Layer 2.
        g2 = jnp.dot(jnp.concatenate([h1, h2], axis=1), wf2,
                     preferred_element_type=jnp.float32) + b2
        h2, c2 = cell(g2, c2)
        h_tops.append(h2)

    # Final Linear hoisted out of the time loop: one M=SEQ matmul and a single
    # lane-dense (SEQ, 128) store.  Column 0 holds the prediction.
    h_top = jnp.concatenate(h_tops, axis=0)                      # (SEQ, PAD)
    out_ref[...] = (jnp.dot(h_top, wlin_ref[...],
                            preferred_element_type=jnp.float32)
                    + blin_ref[...])


def lstm_forward(x_scalars, wih0_row, whh0_pad, wf1, wf2, bias, wlin_pad, blin_pad):
    smem = pl.BlockSpec(memory_space=pltpu.MemorySpace.SMEM)
    vmem = lambda: pl.BlockSpec(memory_space=pltpu.MemorySpace.VMEM)
    out = pl.pallas_call(
        lstm_kernel,
        out_shape=jax.ShapeDtypeStruct((SEQ, PAD), jnp.float32),
        in_specs=[smem] + [vmem() for _ in range(7)],
        out_specs=vmem(),
    )(x_scalars, wih0_row, whh0_pad, wf1, wf2, bias, wlin_pad, blin_pad)
    # Extract the real output column and restore torch's (seq, batch=1, output).
    return out[:, :OUTPUT].reshape(SEQ, 1, OUTPUT)


def lstm_reference(x, wih, whh, bih, bhh, wlin, blin):
    # Pure-JAX reference with exact torch.nn.LSTM + Linear semantics (unpadded).
    h = [jnp.zeros((HIDDEN,), jnp.float32) for _ in range(LAYERS)]
    c = [jnp.zeros((HIDDEN,), jnp.float32) for _ in range(LAYERS)]
    outs = []
    for t in range(SEQ):
        inp = x[t]                                               # (INPUT,)
        for l in range(LAYERS):
            g = wih[l] @ inp + whh[l] @ h[l] + bih[l] + bhh[l]   # (4*HIDDEN,)
            i = jax.nn.sigmoid(g[0 * HIDDEN:1 * HIDDEN])
            f = jax.nn.sigmoid(g[1 * HIDDEN:2 * HIDDEN])
            gg = jnp.tanh(g[2 * HIDDEN:3 * HIDDEN])
            o = jax.nn.sigmoid(g[3 * HIDDEN:4 * HIDDEN])
            c[l] = f * c[l] + i * gg
            h[l] = o * jnp.tanh(c[l])
            inp = h[l]
        outs.append(wlin @ inp + blin)
    return jnp.stack(outs)[:, None, :]                           # (SEQ, 1, OUTPUT)


def _pad_gate_cols(w):
    # (rows, 4*HIDDEN) torch gate order (i,f,g,o) -> (rows, GP) with each gate
    # block placed at a 128-lane-aligned offset; padded lanes are zero.
    rows = w.shape[0]
    out = jnp.zeros((rows, GP), jnp.float32)
    for k in range(4):
        out = out.at[:, k * PAD:k * PAD + HIDDEN].set(
            w[:, k * HIDDEN:(k + 1) * HIDDEN])
    return out


if __name__ == "__main__":
    key = jax.random.PRNGKey(0)
    ks = jax.random.split(key, 16)
    bound = 1.0 / (HIDDEN ** 0.5)   # PyTorch default uniform(-1/sqrt(H), 1/sqrt(H))

    def u(k, shape):
        return jax.random.uniform(k, shape, jnp.float32, -bound, bound)

    # torch.nn.LSTM parameters (gate order i, f, g, o)
    wih = [u(ks[0], (GATES, INPUT)), u(ks[1], (GATES, HIDDEN)), u(ks[2], (GATES, HIDDEN))]
    whh = [u(ks[3], (GATES, HIDDEN)), u(ks[4], (GATES, HIDDEN)), u(ks[5], (GATES, HIDDEN))]
    bih = [u(ks[6], (GATES,)), u(ks[7], (GATES,)), u(ks[8], (GATES,))]
    bhh = [u(ks[9], (GATES,)), u(ks[10], (GATES,)), u(ks[11], (GATES,))]
    # torch.nn.Linear parameters
    wlin = u(ks[12], (OUTPUT, HIDDEN))
    blin = u(ks[13], (OUTPUT,))

    # The module's input_seq: shape (seq_len, input_size); forward views it as (seq, 1, 1).
    x = jax.random.normal(ks[14], (SEQ, INPUT), jnp.float32)

    # ---- Glue: pack parameters into the lane-aligned kernel layout ----------
    # Layer 0: input weight is a single (1, GP) row (INPUT == 1); recurrent
    # weight rows padded to PAD.
    wih0_row = _pad_gate_cols(wih[0].T)                                  # (1, GP)
    whh0_pad = jnp.zeros((PAD, GP), jnp.float32).at[:HIDDEN, :].set(
        _pad_gate_cols(whh[0].T))                                        # (PAD, GP)
    # Layers 1, 2: fused [ih ; hh] weights; input rows at 0..HIDDEN-1,
    # hidden rows at PAD..PAD+HIDDEN-1, all other rows zero.
    def fuse(l):
        w = jnp.zeros((2 * PAD, GP), jnp.float32)
        w = w.at[:HIDDEN, :].set(_pad_gate_cols(wih[l].T))
        w = w.at[PAD:PAD + HIDDEN, :].set(_pad_gate_cols(whh[l].T))
        return w
    wf1 = fuse(1)
    wf2 = fuse(2)
    bias = jnp.stack([_pad_gate_cols((bih[l] + bhh[l])[None, :])[0]
                      for l in range(LAYERS)])                           # (LAYERS, GP)
    wlin_pad = jnp.zeros((PAD, PAD), jnp.float32).at[:HIDDEN, :OUTPUT].set(wlin.T)
    blin_pad = jnp.zeros((1, PAD), jnp.float32).at[0, :OUTPUT].set(blin)
    x_scalars = x[:, 0]                                                  # (SEQ,) -> SMEM

    out = lstm_forward(x_scalars, wih0_row, whh0_pad, wf1, wf2, bias,
                       wlin_pad, blin_pad)
    out = jax.block_until_ready(out)

    ref = lstm_reference(x, wih, whh, bih, bhh, wlin, blin)
    assert out.shape == (SEQ, 1, OUTPUT)
    assert float(jnp.max(jnp.abs(out - ref))) < 1e-3, "mismatch vs pure-JAX reference"
    print("KERNEL_OK")
</pallas_src>

<mosaic_0001>
module attributes {stable_mosaic.version = 11 : i64} {
  func.func @lstm_kernel(%arg0: memref<8xf32, #tpu.memory_space<smem>>, %arg1: memref<1x512xf32, #tpu.memory_space<vmem>>, %arg2: memref<128x512xf32, #tpu.memory_space<vmem>>, %arg3: memref<256x512xf32, #tpu.memory_space<vmem>>, %arg4: memref<256x512xf32, #tpu.memory_space<vmem>>, %arg5: memref<3x512xf32, #tpu.memory_space<vmem>>, %arg6: memref<128x128xf32, #tpu.memory_space<vmem>>, %arg7: memref<1x128xf32, #tpu.memory_space<vmem>>, %arg8: memref<8x128xf32, #tpu.memory_space<vmem>>) attributes {dimension_semantics = [], scalar_prefetch = 0 : i64, scratch_operands = 0 : i64, tpu.core_type = #tpu.core_type<tc>} {
    %c0 = arith.constant 0 : index
    %c0_0 = arith.constant 0 : index
    %0 = vector.load %arg5[%c0, %c0_0] : memref<3x512xf32, #tpu.memory_space<vmem>>, vector<3x512xf32>
    %1 = vector.extract_strided_slice %0 {offsets = [0, 0], sizes = [1, 512], strides = [1, 1]} : vector<3x512xf32> to vector<1x512xf32>
    %2 = vector.extract_strided_slice %0 {offsets = [1, 0], sizes = [1, 512], strides = [1, 1]} : vector<3x512xf32> to vector<1x512xf32>
    %3 = vector.extract_strided_slice %0 {offsets = [2, 0], sizes = [1, 512], strides = [1, 1]} : vector<3x512xf32> to vector<1x512xf32>
    %c0_1 = arith.constant 0 : index
    %c0_2 = arith.constant 0 : index
    %4 = vector.load %arg1[%c0_1, %c0_2] : memref<1x512xf32, #tpu.memory_space<vmem>>, vector<1x512xf32>
    %c0_3 = arith.constant 0 : index
    %c0_4 = arith.constant 0 : index
    %5 = vector.load %arg2[%c0_3, %c0_4] : memref<128x512xf32, #tpu.memory_space<vmem>>, vector<128x512xf32>
    %c0_5 = arith.constant 0 : index
    %c0_6 = arith.constant 0 : index
    %6 = vector.load %arg3[%c0_5, %c0_6] : memref<256x512xf32, #tpu.memory_space<vmem>>, vector<256x512xf32>
    %c0_7 = arith.constant 0 : index
    %c0_8 = arith.constant 0 : index
    %7 = vector.load %arg4[%c0_7, %c0_8] : memref<256x512xf32, #tpu.memory_space<vmem>>, vector<256x512xf32>
    %cst = arith.constant 0.000000e+00 : f32
    %8 = vector.broadcast %cst : f32 to vector<1x128xf32>
    %c0_9 = arith.constant 0 : index
    %9 = memref.load %arg0[%c0_9] : memref<8xf32, #tpu.memory_space<smem>>
    %10 = vector.broadcast %9 : f32 to vector<1x512xf32>
    %11 = arith.mulf %10, %4 : vector<1x512xf32>
    %cst_10 = arith.constant dense<0.000000e+00> : vector<1x512xf32>
    %12 = tpu.matmul %8, %5, %cst_10 {dimension_numbers = #tpu.dot_dimension_numbers<[1], [0], [0], [1], [0, 0, 1, 1], [], []>} : vector<1x128xf32>, vector<128x512xf32>, vector<1x512xf32> -> vector<1x512xf32>
    %13 = arith.addf %11, %12 : vector<1x512xf32>
    %14 = arith.addf %13, %1 : vector<1x512xf32>
    %15 = arith.negf %14 : vector<1x512xf32>
    %16 = math.exp %15 : vector<1x512xf32>
    %cst_11 = arith.constant 1.000000e+00 : f32
    %17 = vector.broadcast %cst_11 : f32 to vector<1x512xf32>
    %18 = arith.addf %17, %16 : vector<1x512xf32>
    %19 = arith.divf %17, %18 : vector<1x512xf32>
    %20 = math.tanh %14 : vector<1x512xf32>
    %21 = vector.extract_strided_slice %19 {offsets = [0, 0], sizes = [1, 128], strides = [1, 1]} : vector<1x512xf32> to vector<1x128xf32>
    %22 = vector.extract_strided_slice %19 {offsets = [0, 128], sizes = [1, 128], strides = [1, 1]} : vector<1x512xf32> to vector<1x128xf32>
    %23 = vector.extract_strided_slice %20 {offsets = [0, 256], sizes = [1, 128], strides = [1, 1]} : vector<1x512xf32> to vector<1x128xf32>
    %24 = vector.extract_strided_slice %19 {offsets = [0, 384], sizes = [1, 128], strides = [1, 1]} : vector<1x512xf32> to vector<1x128xf32>
    %25 = arith.mulf %22, %8 : vector<1x128xf32>
    %26 = arith.mulf %21, %23 : vector<1x128xf32>
    %27 = arith.addf %25, %26 : vector<1x128xf32>
    %28 = math.tanh %27 : vector<1x128xf32>
    %29 = arith.mulf %24, %28 : vector<1x128xf32>
    %30 = tpu.concatenate %29, %8 in 1 : vector<1x128xf32>, vector<1x128xf32> -> vector<1x256xf32>
    %cst_12 = arith.constant dense<0.000000e+00> : vector<1x512xf32>
    %31 = tpu.matmul %30, %6, %cst_12 {dimension_numbers = #tpu.dot_dimension_numbers<[1], [0], [0], [1], [0, 0, 1, 1], [], []>} : vector<1x256xf32>, vector<256x512xf32>, vector<1x512xf32> -> vector<1x512xf32>
    %32 = arith.addf %31, %2 : vector<1x512xf32>
    %33 = arith.negf %32 : vector<1x512xf32>
    %34 = math.exp %33 : vector<1x512xf32>
    %cst_13 = arith.constant 1.000000e+00 : f32
    %35 = vector.broadcast %cst_13 : f32 to vector<1x512xf32>
    %36 = arith.addf %35, %34 : vector<1x512xf32>
    %37 = arith.divf %35, %36 : vector<1x512xf32>
    %38 = math.tanh %32 : vector<1x512xf32>
    %39 = vector.extract_strided_slice %37 {offsets = [0, 0], sizes = [1, 128], strides = [1, 1]} : vector<1x512xf32> to vector<1x128xf32>
    %40 = vector.extract_strided_slice %37 {offsets = [0, 128], sizes = [1, 128], strides = [1, 1]} : vector<1x512xf32> to vector<1x128xf32>
    %41 = vector.extract_strided_slice %38 {offsets = [0, 256], sizes = [1, 128], strides = [1, 1]} : vector<1x512xf32> to vector<1x128xf32>
    %42 = vector.extract_strided_slice %37 {offsets = [0, 384], sizes = [1, 128], strides = [1, 1]} : vector<1x512xf32> to vector<1x128xf32>
    %43 = arith.mulf %40, %8 : vector<1x128xf32>
    %44 = arith.mulf %39, %41 : vector<1x128xf32>
    %45 = arith.addf %43, %44 : vector<1x128xf32>
    %46 = math.tanh %45 : vector<1x128xf32>
    %47 = arith.mulf %42, %46 : vector<1x128xf32>
    %48 = tpu.concatenate %47, %8 in 1 : vector<1x128xf32>, vector<1x128xf32> -> vector<1x256xf32>
    %cst_14 = arith.constant dense<0.000000e+00> : vector<1x512xf32>
    %49 = tpu.matmul %48, %7, %cst_14 {dimension_numbers = #tpu.dot_dimension_numbers<[1], [0], [0], [1], [0, 0, 1, 1], [], []>} : vector<1x256xf32>, vector<256x512xf32>, vector<1x512xf32> -> vector<1x512xf32>
    %50 = arith.addf %49, %3 : vector<1x512xf32>
    %51 = arith.negf %50 : vector<1x512xf32>
    %52 = math.exp %51 : vector<1x512xf32>
    %cst_15 = arith.constant 1.000000e+00 : f32
    %53 = vector.broadcast %cst_15 : f32 to vector<1x512xf32>
    %54 = arith.addf %53, %52 : vector<1x512xf32>
    %55 = arith.divf %53, %54 : vector<1x512xf32>
    %56 = math.tanh %50 : vector<1x512xf32>
    %57 = vector.extract_strided_slice %55 {offsets = [0, 0], sizes = [1, 128], strides = [1, 1]} : vector<1x512xf32> to vector<1x128xf32>
    %58 = vector.extract_strided_slice %55 {offsets = [0, 128], sizes = [1, 128], strides = [1, 1]} : vector<1x512xf32> to vector<1x128xf32>
    %59 = vector.extract_strided_slice %56 {offsets = [0, 256], sizes = [1, 128], strides = [1, 1]} : vector<1x512xf32> to vector<1x128xf32>
    %60 = vector.extract_strided_slice %55 {offsets = [0, 384], sizes = [1, 128], strides = [1, 1]} : vector<1x512xf32> to vector<1x128xf32>
    %61 = arith.mulf %58, %8 : vector<1x128xf32>
    %62 = arith.mulf %57, %59 : vector<1x128xf32>
    %63 = arith.addf %61, %62 : vector<1x128xf32>
    %64 = math.tanh %63 : vector<1x128xf32>
    %65 = arith.mulf %60, %64 : vector<1x128xf32>
    %c1 = arith.constant 1 : index
    %66 = memref.load %arg0[%c1] : memref<8xf32, #tpu.memory_space<smem>>
    %67 = vector.broadcast %66 : f32 to vector<1x512xf32>
    %68 = arith.mulf %67, %4 : vector<1x512xf32>
    %cst_16 = arith.constant dense<0.000000e+00> : vector<1x512xf32>
    %69 = tpu.matmul %29, %5, %cst_16 {dimension_numbers = #tpu.dot_dimension_numbers<[1], [0], [0], [1], [0, 0, 1, 1], [], []>} : vector<1x128xf32>, vector<128x512xf32>, vector<1x512xf32> -> vector<1x512xf32>
    %70 = arith.addf %68, %69 : vector<1x512xf32>
    %71 = arith.addf %70, %1 : vector<1x512xf32>
    %72 = arith.negf %71 : vector<1x512xf32>
    %73 = math.exp %72 : vector<1x512xf32>
    %cst_17 = arith.constant 1.000000e+00 : f32
    %74 = vector.broadcast %cst_17 : f32 to vector<1x512xf32>
    %75 = arith.addf %74, %73 : vector<1x512xf32>
    %76 = arith.divf %74, %75 : vector<1x512xf32>
    %77 = math.tanh %71 : vector<1x512xf32>
    %78 = vector.extract_strided_slice %76 {offsets = [0, 0], sizes = [1, 128], strides = [1, 1]} : vector<1x512xf32> to vector<1x128xf32>
    %79 = vector.extract_strided_slice %76 {offsets = [0, 128], sizes = [1, 128], strides = [1, 1]} : vector<1x512xf32> to vector<1x128xf32>
    %80 = vector.extract_strided_slice %77 {offsets = [0, 256], sizes = [1, 128], strides = [1, 1]} : vector<1x512xf32> to vector<1x128xf32>
    %81 = vector.extract_strided_slice %76 {offsets = [0, 384], sizes = [1, 128], strides = [1, 1]} : vector<1x512xf32> to vector<1x128xf32>
    %82 = arith.mulf %79, %27 : vector<1x128xf32>
    %83 = arith.mulf %78, %80 : vector<1x128xf32>
    %84 = arith.addf %82, %83 : vector<1x128xf32>
    %85 = math.tanh %84 : vector<1x128xf32>
    %86 = arith.mulf %81, %85 : vector<1x128xf32>
    %87 = tpu.concatenate %86, %47 in 1 : vector<1x128xf32>, vector<1x128xf32> -> vector<1x256xf32>
    %cst_18 = arith.constant dense<0.000000e+00> : vector<1x512xf32>
    %88 = tpu.matmul %87, %6, %cst_18 {dimension_numbers = #tpu.dot_dimension_numbers<[1], [0], [0], [1], [0, 0, 1, 1], [], []>} : vector<1x256xf32>, vector<256x512xf32>, vector<1x512xf32> -> vector<1x512xf32>
    %89 = arith.addf %88, %2 : vector<1x512xf32>
    %90 = arith.negf %89 : vector<1x512xf32>
    %91 = math.exp %90 : vector<1x512xf32>
    %cst_19 = arith.constant 1.000000e+00 : f32
    %92 = vector.broadcast %cst_19 : f32 to vector<1x512xf32>
    %93 = arith.addf %92, %91 : vector<1x512xf32>
    %94 = arith.divf %92, %93 : vector<1x512xf32>
    %95 = math.tanh %89 : vector<1x512xf32>
    %96 = vector.extract_strided_slice %94 {offsets = [0, 0], sizes = [1, 128], strides = [1, 1]} : vector<1x512xf32> to vector<1x128xf32>
    %97 = vector.extract_strided_slice %94 {offsets = [0, 128], sizes = [1, 128], strides = [1, 1]} : vector<1x512xf32> to vector<1x128xf32>
    %98 = vector.extract_strided_slice %95 {offsets = [0, 256], sizes = [1, 128], strides = [1, 1]} : vector<1x512xf32> to vector<1x128xf32>
    %99 = vector.extract_strided_slice %94 {offsets = [0, 384], sizes = [1, 128], strides = [1, 1]} : vector<1x512xf32> to vector<1x128xf32>
    %100 = arith.mulf %97, %45 : vector<1x128xf32>
    %101 = arith.mulf %96, %98 : vector<1x128xf32>
    %102 = arith.addf %100, %101 : vector<1x128xf32>
    %103 = math.tanh %102 : vector<1x128xf32>
    %104 = arith.mulf %99, %103 : vector<1x128xf32>
    %105 = tpu.concatenate %104, %65 in 1 : vector<1x128xf32>, vector<1x128xf32> -> vector<1x256xf32>
    %cst_20 = arith.constant dense<0.000000e+00> : vector<1x512xf32>
    %106 = tpu.matmul %105, %7, %cst_20 {dimension_numbers = #tpu.dot_dimension_numbers<[1], [0], [0], [1], [0, 0, 1, 1], [], []>} : vector<1x256xf32>, vector<256x512xf32>, vector<1x512xf32> -> vector<1x512xf32>
    %107 = arith.addf %106, %3 : vector<1x512xf32>
    %108 = arith.negf %107 : vector<1x512xf32>
    %109 = math.exp %108 : vector<1x512xf32>
    %cst_21 = arith.constant 1.000000e+00 : f32
    %110 = vector.broadcast %cst_21 : f32 to vector<1x512xf32>
    %111 = arith.addf %110, %109 : vector<1x512xf32>
    %112 = arith.divf %110, %111 : vector<1x512xf32>
    %113 = math.tanh %107 : vector<1x512xf32>
    %114 = vector.extract_strided_slice %112 {offsets = [0, 0], sizes = [1, 128], strides = [1, 1]} : vector<1x512xf32> to vector<1x128xf32>
    %115 = vector.extract_strided_slice %112 {offsets = [0, 128], sizes = [1, 128], strides = [1, 1]} : vector<1x512xf32> to vector<1x128xf32>
    %116 = vector.extract_strided_slice %113 {offsets = [0, 256], sizes = [1, 128], strides = [1, 1]} : vector<1x512xf32> to vector<1x128xf32>
    %117 = vector.extract_strided_slice %112 {offsets = [0, 384], sizes = [1, 128], strides = [1, 1]} : vector<1x512xf32> to vector<1x128xf32>
    %118 = arith.mulf %115, %63 : vector<1x128xf32>
    %119 = arith.mulf %114, %116 : vector<1x128xf32>
    %120 = arith.addf %118, %119 : vector<1x128xf32>
    %121 = math.tanh %120 : vector<1x128xf32>
    %122 = arith.mulf %117, %121 : vector<1x128xf32>
    %c2 = arith.constant 2 : index
    %123 = memref.load %arg0[%c2] : memref<8xf32, #tpu.memory_space<smem>>
    %124 = vector.broadcast %123 : f32 to vector<1x512xf32>
    %125 = arith.mulf %124, %4 : vector<1x512xf32>
    %cst_22 = arith.constant dense<0.000000e+00> : vector<1x512xf32>
    %126 = tpu.matmul %86, %5, %cst_22 {dimension_numbers = #tpu.dot_dimension_numbers<[1], [0], [0], [1], [0, 0, 1, 1], [], []>} : vector<1x128xf32>, vector<128x512xf32>, vector<1x512xf32> -> vector<1x512xf32>
    %127 = arith.addf %125, %126 : vector<1x512xf32>
    %128 = arith.addf %127, %1 : vector<1x512xf32>
    %129 = arith.negf %128 : vector<1x512xf32>
    %130 = math.exp %129 : vector<1x512xf32>
    %cst_23 = arith.constant 1.000000e+00 : f32
    %131 = vector.broadcast %cst_23 : f32 to vector<1x512xf32>
    %132 = arith.addf %131, %130 : vector<1x512xf32>
    %133 = arith.divf %131, %132 : vector<1x512xf32>
    %134 = math.tanh %128 : vector<1x512xf32>
    %135 = vector.extract_strided_slice %133 {offsets = [0, 0], sizes = [1, 128], strides = [1, 1]} : vector<1x512xf32> to vector<1x128xf32>
    %136 = vector.extract_strided_slice %133 {offsets = [0, 128], sizes = [1, 128], strides = [1, 1]} : vector<1x512xf32> to vector<1x128xf32>
    %137 = vector.extract_strided_slice %134 {offsets = [0, 256], sizes = [1, 128], strides = [1, 1]} : vector<1x512xf32> to vector<1x128xf32>
    %138 = vector.extract_strided_slice %133 {offsets = [0, 384], sizes = [1, 128], strides = [1, 1]} : vector<1x512xf32> to vector<1x128xf32>
    %139 = arith.mulf %136, %84 : vector<1x128xf32>
    %140 = arith.mulf %135, %137 : vector<1x128xf32>
    %141 = arith.addf %139, %140 : vector<1x128xf32>
    %142 = math.tanh %141 : vector<1x128xf32>
    %143 = arith.mulf %138, %142 : vector<1x128xf32>
    %144 = tpu.concatenate %143, %104 in 1 : vector<1x128xf32>, vector<1x128xf32> -> vector<1x256xf32>
    %cst_24 = arith.constant dense<0.000000e+00> : vector<1x512xf32>
    %145 = tpu.matmul %144, %6, %cst_24 {dimension_numbers = #tpu.dot_dimension_numbers<[1], [0], [0], [1], [0, 0, 1, 1], [], []>} : vector<1x256xf32>, vector<256x512xf32>, vector<1x512xf32> -> vector<1x512xf32>
    %146 = arith.addf %145, %2 : vector<1x512xf32>
    %147 = arith.negf %146 : vector<1x512xf32>
    %148 = math.exp %147 : vector<1x512xf32>
    %cst_25 = arith.constant 1.000000e+00 : f32
    %149 = vector.broadcast %cst_25 : f32 to vector<1x512xf32>
    %150 = arith.addf %149, %148 : vector<1x512xf32>
    %151 = arith.divf %149, %150 : vector<1x512xf32>
    %152 = math.tanh %146 : vector<1x512xf32>
    %153 = vector.extract_strided_slice %151 {offsets = [0, 0], sizes = [1, 128], strides = [1, 1]} : vector<1x512xf32> to vector<1x128xf32>
    %154 = vector.extract_strided_slice %151 {offsets = [0, 128], sizes = [1, 128], strides = [1, 1]} : vector<1x512xf32> to vector<1x128xf32>
    %155 = vector.extract_strided_slice %152 {offsets = [0, 256], sizes = [1, 128], strides = [1, 1]} : vector<1x512xf32> to vector<1x128xf32>
    %156 = vector.extract_strided_slice %151 {offsets = [0, 384], sizes = [1, 128], strides = [1, 1]} : vector<1x512xf32> to vector<1x128xf32>
    %157 = arith.mulf %154, %102 : vector<1x128xf32>
    %158 = arith.mulf %153, %155 : vector<1x128xf32>
    %159 = arith.addf %157, %158 : vector<1x128xf32>
    %160 = math.tanh %159 : vector<1x128xf32>
    %161 = arith.mulf %156, %160 : vector<1x128xf32>
    %162 = tpu.concatenate %161, %122 in 1 : vector<1x128xf32>, vector<1x128xf32> -> vector<1x256xf32>
    %cst_26 = arith.constant dense<0.000000e+00> : vector<1x512xf32>
    %163 = tpu.matmul %162, %7, %cst_26 {dimension_numbers = #tpu.dot_dimension_numbers<[1], [0], [0], [1], [0, 0, 1, 1], [], []>} : vector<1x256xf32>, vector<256x512xf32>, vector<1x512xf32> -> vector<1x512xf32>
    %164 = arith.addf %163, %3 : vector<1x512xf32>
    %165 = arith.negf %164 : vector<1x512xf32>
    %166 = math.exp %165 : vector<1x512xf32>
    %cst_27 = arith.constant 1.000000e+00 : f32
    %167 = vector.broadcast %cst_27 : f32 to vector<1x512xf32>
    %168 = arith.addf %167, %166 : vector<1x512xf32>
    %169 = arith.divf %167, %168 : vector<1x512xf32>
    %170 = math.tanh %164 : vector<1x512xf32>
    %171 = vector.extract_strided_slice %169 {offsets = [0, 0], sizes = [1, 128], strides = [1, 1]} : vector<1x512xf32> to vector<1x128xf32>
    %172 = vector.extract_strided_slice %169 {offsets = [0, 128], sizes = [1, 128], strides = [1, 1]} : vector<1x512xf32> to vector<1x128xf32>
    %173 = vector.extract_strided_slice %170 {offsets = [0, 256], sizes = [1, 128], strides = [1, 1]} : vector<1x512xf32> to vector<1x128xf32>
    %174 = vector.extract_strided_slice %169 {offsets = [0, 384], sizes = [1, 128], strides = [1, 1]} : vector<1x512xf32> to vector<1x128xf32>
    %175 = arith.mulf %172, %120 : vector<1x128xf32>
    %176 = arith.mulf %171, %173 : vector<1x128xf32>
    %177 = arith.addf %175, %176 : vector<1x128xf32>
    %178 = math.tanh %177 : vector<1x128xf32>
    %179 = arith.mulf %174, %178 : vector<1x128xf32>
    %c3 = arith.constant 3 : index
    %180 = memref.load %arg0[%c3] : memref<8xf32, #tpu.memory_space<smem>>
    %181 = vector.broadcast %180 : f32 to vector<1x512xf32>
    %182 = arith.mulf %181, %4 : vector<1x512xf32>
    %cst_28 = arith.constant dense<0.000000e+00> : vector<1x512xf32>
    %183 = tpu.matmul %143, %5, %cst_28 {dimension_numbers = #tpu.dot_dimension_numbers<[1], [0], [0], [1], [0, 0, 1, 1], [], []>} : vector<1x128xf32>, vector<128x512xf32>, vector<1x512xf32> -> vector<1x512xf32>
    %184 = arith.addf %182, %183 : vector<1x512xf32>
    %185 = arith.addf %184, %1 : vector<1x512xf32>
    %186 = arith.negf %185 : vector<1x512xf32>
    %187 = math.exp %186 : vector<1x512xf32>
    %cst_29 = arith.constant 1.000000e+00 : f32
    %188 = vector.broadcast %cst_29 : f32 to vector<1x512xf32>
    %189 = arith.addf %188, %187 : vector<1x512xf32>
    %190 = arith.divf %188, %189 : vector<1x512xf32>
    %191 = math.tanh %185 : vector<1x512xf32>
    %192 = vector.extract_strided_slice %190 {offsets = [0, 0], sizes = [1, 128], strides = [1, 1]} : vector<1x512xf32> to vector<1x128xf32>
    %193 = vector.extract_strided_slice %190 {offsets = [0, 128], sizes = [1, 128], strides = [1, 1]} : vector<1x512xf32> to vector<1x128xf32>
    %194 = vector.extract_strided_slice %191 {offsets = [0, 256], sizes = [1, 128], strides = [1, 1]} : vector<1x512xf32> to vector<1x128xf32>
    %195 = vector.extract_strided_slice %190 {offsets = [0, 384], sizes = [1, 128], strides = [1, 1]} : vector<1x512xf32> to vector<1x128xf32>
    %196 = arith.mulf %193, %141 : vector<1x128xf32>
    %197 = arith.mulf %192, %194 : vector<1x128xf32>
    %198 = arith.addf %196, %197 : vector<1x128xf32>
    %199 = math.tanh %198 : vector<1x128xf32>
    %200 = arith.mulf %195, %199 : vector<1x128xf32>
    %201 = tpu.concatenate %200, %161 in 1 : vector<1x128xf32>, vector<1x128xf32> -> vector<1x256xf32>
    %cst_30 = arith.constant dense<0.000000e+00> : vector<1x512xf32>
    %202 = tpu.matmul %201, %6, %cst_30 {dimension_numbers = #tpu.dot_dimension_numbers<[1], [0], [0], [1], [0, 0, 1, 1], [], []>} : vector<1x256xf32>, vector<256x512xf32>, vector<1x512xf32> -> vector<1x512xf32>
    %203 = arith.addf %202, %2 : vector<1x512xf32>
    %204 = arith.negf %203 : vector<1x512xf32>
    %205 = math.exp %204 : vector<1x512xf32>
    %cst_31 = arith.constant 1.000000e+00 : f32
    %206 = vector.broadcast %cst_31 : f32 to vector<1x512xf32>
    %207 = arith.addf %206, %205 : vector<1x512xf32>
    %208 = arith.divf %206, %207 : vector<1x512xf32>
    %209 = math.tanh %203 : vector<1x512xf32>
    %210 = vector.extract_strided_slice %208 {offsets = [0, 0], sizes = [1, 128], strides = [1, 1]} : vector<1x512xf32> to vector<1x128xf32>
    %211 = vector.extract_strided_slice %208 {offsets = [0, 128], sizes = [1, 128], strides = [1, 1]} : vector<1x512xf32> to vector<1x128xf32>
    %212 = vector.extract_strided_slice %209 {offsets = [0, 256], sizes = [1, 128], strides = [1, 1]} : vector<1x512xf32> to vector<1x128xf32>
    %213 = vector.extract_strided_slice %208 {offsets = [0, 384], sizes = [1, 128], strides = [1, 1]} : vector<1x512xf32> to vector<1x128xf32>
    %214 = arith.mulf %211, %159 : vector<1x128xf32>
    %215 = arith.mulf %210, %212 : vector<1x128xf32>
    %216 = arith.addf %214, %215 : vector<1x128xf32>
    %217 = math.tanh %216 : vector<1x128xf32>
    %218 = arith.mulf %213, %217 : vector<1x128xf32>
    %219 = tpu.concatenate %218, %179 in 1 : vector<1x128xf32>, vector<1x128xf32> -> vector<1x256xf32>
    %cst_32 = arith.constant dense<0.000000e+00> : vector<1x512xf32>
    %220 = tpu.matmul %219, %7, %cst_32 {dimension_numbers = #tpu.dot_dimension_numbers<[1], [0], [0], [1], [0, 0, 1, 1], [], []>} : vector<1x256xf32>, vector<256x512xf32>, vector<1x512xf32> -> vector<1x512xf32>
    %221 = arith.addf %220, %3 : vector<1x512xf32>
    %222 = arith.negf %221 : vector<1x512xf32>
    %223 = math.exp %222 : vector<1x512xf32>
    %cst_33 = arith.constant 1.000000e+00 : f32
    %224 = vector.broadcast %cst_33 : f32 to vector<1x512xf32>
    %225 = arith.addf %224, %223 : vector<1x512xf32>
    %226 = arith.divf %224, %225 : vector<1x512xf32>
    %227 = math.tanh %221 : vector<1x512xf32>
    %228 = vector.extract_strided_slice %226 {offsets = [0, 0], sizes = [1, 128], strides = [1, 1]} : vector<1x512xf32> to vector<1x128xf32>
    %229 = vector.extract_strided_slice %226 {offsets = [0, 128], sizes = [1, 128], strides = [1, 1]} : vector<1x512xf32> to vector<1x128xf32>
    %230 = vector.extract_strided_slice %227 {offsets = [0, 256], sizes = [1, 128], strides = [1, 1]} : vector<1x512xf32> to vector<1x128xf32>
    %231 = vector.extract_strided_slice %226 {offsets = [0, 384], sizes = [1, 128], strides = [1, 1]} : vector<1x512xf32> to vector<1x128xf32>
    %232 = arith.mulf %229, %177 : vector<1x128xf32>
    %233 = arith.mulf %228, %230 : vector<1x128xf32>
    %234 = arith.addf %232, %233 : vector<1x128xf32>
    %235 = math.tanh %234 : vector<1x128xf32>
    %236 = arith.mulf %231, %235 : vector<1x128xf32>
    %c4 = arith.constant 4 : index
    %237 = memref.load %arg0[%c4] : memref<8xf32, #tpu.memory_space<smem>>
    %238 = vector.broadcast %237 : f32 to vector<1x512xf32>
    %239 = arith.mulf %238, %4 : vector<1x512xf32>
    %cst_34 = arith.constant dense<0.000000e+00> : vector<1x512xf32>
    %240 = tpu.matmul %200, %5, %cst_34 {dimension_numbers = #tpu.dot_dimension_numbers<[1], [0], [0], [1], [0, 0, 1, 1], [], []>} : vector<1x128xf32>, vector<128x512xf32>, vector<1x512xf32> -> vector<1x512xf32>
    %241 = arith.addf %239, %240 : vector<1x512xf32>
    %242 = arith.addf %241, %1 : vector<1x512xf32>
    %243 = arith.negf %242 : vector<1x512xf32>
    %244 = math.exp %243 : vector<1x512xf32>
    %cst_35 = arith.constant 1.000000e+00 : f32
    %245 = vector.broadcast %cst_35 : f32 to vector<1x512xf32>
    %246 = arith.addf %245, %244 : vector<1x512xf32>
    %247 = arith.divf %245, %246 : vector<1x512xf32>
    %248 = math.tanh %242 : vector<1x512xf32>
    %249 = vector.extract_strided_slice %247 {offsets = [0, 0], sizes = [1, 128], strides = [1, 1]} : vector<1x512xf32> to vector<1x128xf32>
    %250 = vector.extract_strided_slice %247 {offsets = [0, 128], sizes = [1, 128], strides = [1, 1]} : vector<1x512xf32> to vector<1x128xf32>
    %251 = vector.extract_strided_slice %248 {offsets = [0, 256], sizes = [1, 128], strides = [1, 1]} : vector<1x512xf32> to vector<1x128xf32>
    %252 = vector.extract_strided_slice %247 {offsets = [0, 384], sizes = [1, 128], strides = [1, 1]} : vector<1x512xf32> to vector<1x128xf32>
    %253 = arith.mulf %250, %198 : vector<1x128xf32>
    %254 = arith.mulf %249, %251 : vector<1x128xf32>
    %255 = arith.addf %253, %254 : vector<1x128xf32>
    %256 = math.tanh %255 : vector<1x128xf32>
    %257 = arith.mulf %252, %256 : vector<1x128xf32>
    %258 = tpu.concatenate %257, %218 in 1 : vector<1x128xf32>, vector<1x128xf32> -> vector<1x256xf32>
    %cst_36 = arith.constant dense<0.000000e+00> : vector<1x512xf32>
    %259 = tpu.matmul %258, %6, %cst_36 {dimension_numbers = #tpu.dot_dimension_numbers<[1], [0], [0], [1], [0, 0, 1, 1], [], []>} : vector<1x256xf32>, vector<256x512xf32>, vector<1x512xf32> -> vector<1x512xf32>
    %260 = arith.addf %259, %2 : vector<1x512xf32>
    %261 = arith.negf %260 : vector<1x512xf32>
    %262 = math.exp %261 : vector<1x512xf32>
    %cst_37 = arith.constant 1.000000e+00 : f32
    %263 = vector.broadcast %cst_37 : f32 to vector<1x512xf32>
    %264 = arith.addf %263, %262 : vector<1x512xf32>
    %265 = arith.divf %263, %264 : vector<1x512xf32>
    %266 = math.tanh %260 : vector<1x512xf32>
    %267 = vector.extract_strided_slice %265 {offsets = [0, 0], sizes = [1, 128], strides = [1, 1]} : vector<1x512xf32> to vector<1x128xf32>
    %268 = vector.extract_strided_slice %265 {offsets = [0, 128], sizes = [1, 128], strides = [1, 1]} : vector<1x512xf32> to vector<1x128xf32>
    %269 = vector.extract_strided_slice %266 {offsets = [0, 256], sizes = [1, 128], strides = [1, 1]} : vector<1x512xf32> to vector<1x128xf32>
    %270 = vector.extract_strided_slice %265 {offsets = [0, 384], sizes = [1, 128], strides = [1, 1]} : vector<1x512xf32> to vector<1x128xf32>
    %271 = arith.mulf %268, %216 : vector<1x128xf32>
    %272 = arith.mulf %267, %269 : vector<1x128xf32>
    %273 = arith.addf %271, %272 : vector<1x128xf32>
    %274 = math.tanh %273 : vector<1x128xf32>
    %275 = arith.mulf %270, %274 : vector<1x128xf32>
    %276 = tpu.concatenate %275, %236 in 1 : vector<1x128xf32>, vector<1x128xf32> -> vector<1x256xf32>
    %cst_38 = arith.constant dense<0.000000e+00> : vector<1x512xf32>
    %277 = tpu.matmul %276, %7, %cst_38 {dimension_numbers = #tpu.dot_dimension_numbers<[1], [0], [0], [1], [0, 0, 1, 1], [], []>} : vector<1x256xf32>, vector<256x512xf32>, vector<1x512xf32> -> vector<1x512xf32>
    %278 = arith.addf %277, %3 : vector<1x512xf32>
    %279 = arith.negf %278 : vector<1x512xf32>
    %280 = math.exp %279 : vector<1x512xf32>
    %cst_39 = arith.constant 1.000000e+00 : f32
    %281 = vector.broadcast %cst_39 : f32 to vector<1x512xf32>
    %282 = arith.addf %281, %280 : vector<1x512xf32>
    %283 = arith.divf %281, %282 : vector<1x512xf32>
    %284 = math.tanh %278 : vector<1x512xf32>
    %285 = vector.extract_strided_slice %283 {offsets = [0, 0], sizes = [1, 128], strides = [1, 1]} : vector<1x512xf32> to vector<1x128xf32>
    %286 = vector.extract_strided_slice %283 {offsets = [0, 128], sizes = [1, 128], strides = [1, 1]} : vector<1x512xf32> to vector<1x128xf32>
    %287 = vector.extract_strided_slice %284 {offsets = [0, 256], sizes = [1, 128], strides = [1, 1]} : vector<1x512xf32> to vector<1x128xf32>
    %288 = vector.extract_strided_slice %283 {offsets = [0, 384], sizes = [1, 128], strides = [1, 1]} : vector<1x512xf32> to vector<1x128xf32>
    %289 = arith.mulf %286, %234 : vector<1x128xf32>
    %290 = arith.mulf %285, %287 : vector<1x128xf32>
    %291 = arith.addf %289, %290 : vector<1x128xf32>
    %292 = math.tanh %291 : vector<1x128xf32>
    %293 = arith.mulf %288, %292 : vector<1x128xf32>
    %c5 = arith.constant 5 : index
    %294 = memref.load %arg0[%c5] : memref<8xf32, #tpu.memory_space<smem>>
    %295 = vector.broadcast %294 : f32 to vector<1x512xf32>
    %296 = arith.mulf %295, %4 : vector<1x512xf32>
    %cst_40 = arith.constant dense<0.000000e+00> : vector<1x512xf32>
    %297 = tpu.matmul %257, %5, %cst_40 {dimension_numbers = #tpu.dot_dimension_numbers<[1], [0], [0], [1], [0, 0, 1, 1], [], []>} : vector<1x128xf32>, vector<128x512xf32>, vector<1x512xf32> -> vector<1x512xf32>
    %298 = arith.addf %296, %297 : vector<1x512xf32>
    %299 = arith.addf %298, %1 : vector<1x512xf32>
    %300 = arith.negf %299 : vector<1x512xf32>
    %301 = math.exp %300 : vector<1x512xf32>
    %cst_41 = arith.constant 1.000000e+00 : f32
    %302 = vector.broadcast %cst_41 : f32 to vector<1x512xf32>
    %303 = arith.addf %302, %301 : vector<1x512xf32>
    %304 = arith.divf %302, %303 : vector<1x512xf32>
    %305 = math.tanh %299 : vector<1x512xf32>
    %306 = vector.extract_strided_slice %304 {offsets = [0, 0], sizes = [1, 128], strides = [1, 1]} : vector<1x512xf32> to vector<1x128xf32>
    %307 = vector.extract_strided_slice %304 {offsets = [0, 128], sizes = [1, 128], strides = [1, 1]} : vector<1x512xf32> to vector<1x128xf32>
    %308 = vector.extract_strided_slice %305 {offsets = [0, 256], sizes = [1, 128], strides = [1, 1]} : vector<1x512xf32> to vector<1x128xf32>
    %309 = vector.extract_strided_slice %304 {offsets = [0, 384], sizes = [1, 128], strides = [1, 1]} : vector<1x512xf32> to vector<1x128xf32>
    %310 = arith.mulf %307, %255 : vector<1x128xf32>
    %311 = arith.mulf %306, %308 : vector<1x128xf32>
    %312 = arith.addf %310, %311 : vector<1x128xf32>
    %313 = math.tanh %312 : vector<1x128xf32>
    %314 = arith.mulf %309, %313 : vector<1x128xf32>
    %315 = tpu.concatenate %314, %275 in 1 : vector<1x128xf32>, vector<1x128xf32> -> vector<1x256xf32>
    %cst_42 = arith.constant dense<0.000000e+00> : vector<1x512xf32>
    %316 = tpu.matmul %315, %6, %cst_42 {dimension_numbers = #tpu.dot_dimension_numbers<[1], [0], [0], [1], [0, 0, 1, 1], [], []>} : vector<1x256xf32>, vector<256x512xf32>, vector<1x512xf32> -> vector<1x512xf32>
    %317 = arith.addf %316, %2 : vector<1x512xf32>
    %318 = arith.negf %317 : vector<1x512xf32>
    %319 = math.exp %318 : vector<1x512xf32>
    %cst_43 = arith.constant 1.000000e+00 : f32
    %320 = vector.broadcast %cst_43 : f32 to vector<1x512xf32>
    %321 = arith.addf %320, %319 : vector<1x512xf32>
    %322 = arith.divf %320, %321 : vector<1x512xf32>
    %323 = math.tanh %317 : vector<1x512xf32>
    %324 = vector.extract_strided_slice %322 {offsets = [0, 0], sizes = [1, 128], strides = [1, 1]} : vector<1x512xf32> to vector<1x128xf32>
    %325 = vector.extract_strided_slice %322 {offsets = [0, 128], sizes = [1, 128], strides = [1, 1]} : vector<1x512xf32> to vector<1x128xf32>
    %326 = vector.extract_strided_slice %323 {offsets = [0, 256], sizes = [1, 128], strides = [1, 1]} : vector<1x512xf32> to vector<1x128xf32>
    %327 = vector.extract_strided_slice %322 {offsets = [0, 384], sizes = [1, 128], strides = [1, 1]} : vector<1x512xf32> to vector<1x128xf32>
    %328 = arith.mulf %325, %273 : vector<1x128xf32>
    %329 = arith.mulf %324, %326 : vector<1x128xf32>
    %330 = arith.addf %328, %329 : vector<1x128xf32>
    %331 = math.tanh %330 : vector<1x128xf32>
    %332 = arith.mulf %327, %331 : vector<1x128xf32>
    %333 = tpu.concatenate %332, %293 in 1 : vector<1x128xf32>, vector<1x128xf32> -> vector<1x256xf32>
    %cst_44 = arith.constant dense<0.000000e+00> : vector<1x512xf32>
    %334 = tpu.matmul %333, %7, %cst_44 {dimension_numbers = #tpu.dot_dimension_numbers<[1], [0], [0], [1], [0, 0, 1, 1], [], []>} : vector<1x256xf32>, vector<256x512xf32>, vector<1x512xf32> -> vector<1x512xf32>
    %335 = arith.addf %334, %3 : vector<1x512xf32>
    %336 = arith.negf %335 : vector<1x512xf32>
    %337 = math.exp %336 : vector<1x512xf32>
    %cst_45 = arith.constant 1.000000e+00 : f32
    %338 = vector.broadcast %cst_45 : f32 to vector<1x512xf32>
    %339 = arith.addf %338, %337 : vector<1x512xf32>
    %340 = arith.divf %338, %339 : vector<1x512xf32>
    %341 = math.tanh %335 : vector<1x512xf32>
    %342 = vector.extract_strided_slice %340 {offsets = [0, 0], sizes = [1, 128], strides = [1, 1]} : vector<1x512xf32> to vector<1x128xf32>
    %343 = vector.extract_strided_slice %340 {offsets = [0, 128], sizes = [1, 128], strides = [1, 1]} : vector<1x512xf32> to vector<1x128xf32>
    %344 = vector.extract_strided_slice %341 {offsets = [0, 256], sizes = [1, 128], strides = [1, 1]} : vector<1x512xf32> to vector<1x128xf32>
    %345 = vector.extract_strided_slice %340 {offsets = [0, 384], sizes = [1, 128], strides = [1, 1]} : vector<1x512xf32> to vector<1x128xf32>
    %346 = arith.mulf %343, %291 : vector<1x128xf32>
    %347 = arith.mulf %342, %344 : vector<1x128xf32>
    %348 = arith.addf %346, %347 : vector<1x128xf32>
    %349 = math.tanh %348 : vector<1x128xf32>
    %350 = arith.mulf %345, %349 : vector<1x128xf32>
    %c6 = arith.constant 6 : index
    %351 = memref.load %arg0[%c6] : memref<8xf32, #tpu.memory_space<smem>>
    %352 = vector.broadcast %351 : f32 to vector<1x512xf32>
    %353 = arith.mulf %352, %4 : vector<1x512xf32>
    %cst_46 = arith.constant dense<0.000000e+00> : vector<1x512xf32>
    %354 = tpu.matmul %314, %5, %cst_46 {dimension_numbers = #tpu.dot_dimension_numbers<[1], [0], [0], [1], [0, 0, 1, 1], [], []>} : vector<1x128xf32>, vector<128x512xf32>, vector<1x512xf32> -> vector<1x512xf32>
    %355 = arith.addf %353, %354 : vector<1x512xf32>
    %356 = arith.addf %355, %1 : vector<1x512xf32>
    %357 = arith.negf %356 : vector<1x512xf32>
    %358 = math.exp %357 : vector<1x512xf32>
    %cst_47 = arith.constant 1.000000e+00 : f32
    %359 = vector.broadcast %cst_47 : f32 to vector<1x512xf32>
    %360 = arith.addf %359, %358 : vector<1x512xf32>
    %361 = arith.divf %359, %360 : vector<1x512xf32>
    %362 = math.tanh %356 : vector<1x512xf32>
    %363 = vector.extract_strided_slice %361 {offsets = [0, 0], sizes = [1, 128], strides = [1, 1]} : vector<1x512xf32> to vector<1x128xf32>
    %364 = vector.extract_strided_slice %361 {offsets = [0, 128], sizes = [1, 128], strides = [1, 1]} : vector<1x512xf32> to vector<1x128xf32>
    %365 = vector.extract_strided_slice %362 {offsets = [0, 256], sizes = [1, 128], strides = [1, 1]} : vector<1x512xf32> to vector<1x128xf32>
    %366 = vector.extract_strided_slice %361 {offsets = [0, 384], sizes = [1, 128], strides = [1, 1]} : vector<1x512xf32> to vector<1x128xf32>
    %367 = arith.mulf %364, %312 : vector<1x128xf32>
    %368 = arith.mulf %363, %365 : vector<1x128xf32>
    %369 = arith.addf %367, %368 : vector<1x128xf32>
    %370 = math.tanh %369 : vector<1x128xf32>
    %371 = arith.mulf %366, %370 : vector<1x128xf32>
    %372 = tpu.concatenate %371, %332 in 1 : vector<1x128xf32>, vector<1x128xf32> -> vector<1x256xf32>
    %cst_48 = arith.constant dense<0.000000e+00> : vector<1x512xf32>
    %373 = tpu.matmul %372, %6, %cst_48 {dimension_numbers = #tpu.dot_dimension_numbers<[1], [0], [0], [1], [0, 0, 1, 1], [], []>} : vector<1x256xf32>, vector<256x512xf32>, vector<1x512xf32> -> vector<1x512xf32>
    %374 = arith.addf %373, %2 : vector<1x512xf32>
    %375 = arith.negf %374 : vector<1x512xf32>
    %376 = math.exp %375 : vector<1x512xf32>
    %cst_49 = arith.constant 1.000000e+00 : f32
    %377 = vector.broadcast %cst_49 : f32 to vector<1x512xf32>
    %378 = arith.addf %377, %376 : vector<1x512xf32>
    %379 = arith.divf %377, %378 : vector<1x512xf32>
    %380 = math.tanh %374 : vector<1x512xf32>
    %381 = vector.extract_strided_slice %379 {offsets = [0, 0], sizes = [1, 128], strides = [1, 1]} : vector<1x512xf32> to vector<1x128xf32>
    %382 = vector.extract_strided_slice %379 {offsets = [0, 128], sizes = [1, 128], strides = [1, 1]} : vector<1x512xf32> to vector<1x128xf32>
    %383 = vector.extract_strided_slice %380 {offsets = [0, 256], sizes = [1, 128], strides = [1, 1]} : vector<1x512xf32> to vector<1x128xf32>
    %384 = vector.extract_strided_slice %379 {offsets = [0, 384], sizes = [1, 128], strides = [1, 1]} : vector<1x512xf32> to vector<1x128xf32>
    %385 = arith.mulf %382, %330 : vector<1x128xf32>
    %386 = arith.mulf %381, %383 : vector<1x128xf32>
    %387 = arith.addf %385, %386 : vector<1x128xf32>
    %388 = math.tanh %387 : vector<1x128xf32>
    %389 = arith.mulf %384, %388 : vector<1x128xf32>
    %390 = tpu.concatenate %389, %350 in 1 : vector<1x128xf32>, vector<1x128xf32> -> vector<1x256xf32>
    %cst_50 = arith.constant dense<0.000000e+00> : vector<1x512xf32>
    %391 = tpu.matmul %390, %7, %cst_50 {dimension_numbers = #tpu.dot_dimension_numbers<[1], [0], [0], [1], [0, 0, 1, 1], [], []>} : vector<1x256xf32>, vector<256x512xf32>, vector<1x512xf32> -> vector<1x512xf32>
    %392 = arith.addf %391, %3 : vector<1x512xf32>
    %393 = arith.negf %392 : vector<1x512xf32>
    %394 = math.exp %393 : vector<1x512xf32>
    %cst_51 = arith.constant 1.000000e+00 : f32
    %395 = vector.broadcast %cst_51 : f32 to vector<1x512xf32>
    %396 = arith.addf %395, %394 : vector<1x512xf32>
    %397 = arith.divf %395, %396 : vector<1x512xf32>
    %398 = math.tanh %392 : vector<1x512xf32>
    %399 = vector.extract_strided_slice %397 {offsets = [0, 0], sizes = [1, 128], strides = [1, 1]} : vector<1x512xf32> to vector<1x128xf32>
    %400 = vector.extract_strided_slice %397 {offsets = [0, 128], sizes = [1, 128], strides = [1, 1]} : vector<1x512xf32> to vector<1x128xf32>
    %401 = vector.extract_strided_slice %398 {offsets = [0, 256], sizes = [1, 128], strides = [1, 1]} : vector<1x512xf32> to vector<1x128xf32>
    %402 = vector.extract_strided_slice %397 {offsets = [0, 384], sizes = [1, 128], strides = [1, 1]} : vector<1x512xf32> to vector<1x128xf32>
    %403 = arith.mulf %400, %348 : vector<1x128xf32>
    %404 = arith.mulf %399, %401 : vector<1x128xf32>
    %405 = arith.addf %403, %404 : vector<1x128xf32>
    %406 = math.tanh %405 : vector<1x128xf32>
    %407 = arith.mulf %402, %406 : vector<1x128xf32>
    %c7 = arith.constant 7 : index
    %408 = memref.load %arg0[%c7] : memref<8xf32, #tpu.memory_space<smem>>
    %409 = vector.broadcast %408 : f32 to vector<1x512xf32>
    %410 = arith.mulf %409, %4 : vector<1x512xf32>
    %cst_52 = arith.constant dense<0.000000e+00> : vector<1x512xf32>
    %411 = tpu.matmul %371, %5, %cst_52 {dimension_numbers = #tpu.dot_dimension_numbers<[1], [0], [0], [1], [0, 0, 1, 1], [], []>} : vector<1x128xf32>, vector<128x512xf32>, vector<1x512xf32> -> vector<1x512xf32>
    %412 = arith.addf %410, %411 : vector<1x512xf32>
    %413 = arith.addf %412, %1 : vector<1x512xf32>
    %414 = arith.negf %413 : vector<1x512xf32>
    %415 = math.exp %414 : vector<1x512xf32>
    %cst_53 = arith.constant 1.000000e+00 : f32
    %416 = vector.broadcast %cst_53 : f32 to vector<1x512xf32>
    %417 = arith.addf %416, %415 : vector<1x512xf32>
    %418 = arith.divf %416, %417 : vector<1x512xf32>
    %419 = math.tanh %413 : vector<1x512xf32>
    %420 = vector.extract_strided_slice %418 {offsets = [0, 0], sizes = [1, 128], strides = [1, 1]} : vector<1x512xf32> to vector<1x128xf32>
    %421 = vector.extract_strided_slice %418 {offsets = [0, 128], sizes = [1, 128], strides = [1, 1]} : vector<1x512xf32> to vector<1x128xf32>
    %422 = vector.extract_strided_slice %419 {offsets = [0, 256], sizes = [1, 128], strides = [1, 1]} : vector<1x512xf32> to vector<1x128xf32>
    %423 = vector.extract_strided_slice %418 {offsets = [0, 384], sizes = [1, 128], strides = [1, 1]} : vector<1x512xf32> to vector<1x128xf32>
    %424 = arith.mulf %421, %369 : vector<1x128xf32>
    %425 = arith.mulf %420, %422 : vector<1x128xf32>
    %426 = arith.addf %424, %425 : vector<1x128xf32>
    %427 = math.tanh %426 : vector<1x128xf32>
    %428 = arith.mulf %423, %427 : vector<1x128xf32>
    %429 = tpu.concatenate %428, %389 in 1 : vector<1x128xf32>, vector<1x128xf32> -> vector<1x256xf32>
    %cst_54 = arith.constant dense<0.000000e+00> : vector<1x512xf32>
    %430 = tpu.matmul %429, %6, %cst_54 {dimension_numbers = #tpu.dot_dimension_numbers<[1], [0], [0], [1], [0, 0, 1, 1], [], []>} : vector<1x256xf32>, vector<256x512xf32>, vector<1x512xf32> -> vector<1x512xf32>
    %431 = arith.addf %430, %2 : vector<1x512xf32>
    %432 = arith.negf %431 : vector<1x512xf32>
    %433 = math.exp %432 : vector<1x512xf32>
    %cst_55 = arith.constant 1.000000e+00 : f32
    %434 = vector.broadcast %cst_55 : f32 to vector<1x512xf32>
    %435 = arith.addf %434, %433 : vector<1x512xf32>
    %436 = arith.divf %434, %435 : vector<1x512xf32>
    %437 = math.tanh %431 : vector<1x512xf32>
    %438 = vector.extract_strided_slice %436 {offsets = [0, 0], sizes = [1, 128], strides = [1, 1]} : vector<1x512xf32> to vector<1x128xf32>
    %439 = vector.extract_strided_slice %436 {offsets = [0, 128], sizes = [1, 128], strides = [1, 1]} : vector<1x512xf32> to vector<1x128xf32>
    %440 = vector.extract_strided_slice %437 {offsets = [0, 256], sizes = [1, 128], strides = [1, 1]} : vector<1x512xf32> to vector<1x128xf32>
    %441 = vector.extract_strided_slice %436 {offsets = [0, 384], sizes = [1, 128], strides = [1, 1]} : vector<1x512xf32> to vector<1x128xf32>
    %442 = arith.mulf %439, %387 : vector<1x128xf32>
    %443 = arith.mulf %438, %440 : vector<1x128xf32>
    %444 = arith.addf %442, %443 : vector<1x128xf32>
    %445 = math.tanh %444 : vector<1x128xf32>
    %446 = arith.mulf %441, %445 : vector<1x128xf32>
    %447 = tpu.concatenate %446, %407 in 1 : vector<1x128xf32>, vector<1x128xf32> -> vector<1x256xf32>
    %cst_56 = arith.constant dense<0.000000e+00> : vector<1x512xf32>
    %448 = tpu.matmul %447, %7, %cst_56 {dimension_numbers = #tpu.dot_dimension_numbers<[1], [0], [0], [1], [0, 0, 1, 1], [], []>} : vector<1x256xf32>, vector<256x512xf32>, vector<1x512xf32> -> vector<1x512xf32>
    %449 = arith.addf %448, %3 : vector<1x512xf32>
    %450 = arith.negf %449 : vector<1x512xf32>
    %451 = math.exp %450 : vector<1x512xf32>
    %cst_57 = arith.constant 1.000000e+00 : f32
    %452 = vector.broadcast %cst_57 : f32 to vector<1x512xf32>
    %453 = arith.addf %452, %451 : vector<1x512xf32>
    %454 = arith.divf %452, %453 : vector<1x512xf32>
    %455 = math.tanh %449 : vector<1x512xf32>
    %456 = vector.extract_strided_slice %454 {offsets = [0, 0], sizes = [1, 128], strides = [1, 1]} : vector<1x512xf32> to vector<1x128xf32>
    %457 = vector.extract_strided_slice %454 {offsets = [0, 128], sizes = [1, 128], strides = [1, 1]} : vector<1x512xf32> to vector<1x128xf32>
    %458 = vector.extract_strided_slice %455 {offsets = [0, 256], sizes = [1, 128], strides = [1, 1]} : vector<1x512xf32> to vector<1x128xf32>
    %459 = vector.extract_strided_slice %454 {offsets = [0, 384], sizes = [1, 128], strides = [1, 1]} : vector<1x512xf32> to vector<1x128xf32>
    %460 = arith.mulf %457, %405 : vector<1x128xf32>
    %461 = arith.mulf %456, %458 : vector<1x128xf32>
    %462 = arith.addf %460, %461 : vector<1x128xf32>
    %463 = math.tanh %462 : vector<1x128xf32>
    %464 = arith.mulf %459, %463 : vector<1x128xf32>
    %465 = tpu.concatenate %65, %122, %179, %236, %293, %350, %407, %464 in 0 : vector<1x128xf32>, vector<1x128xf32>, vector<1x128xf32>, vector<1x128xf32>, vector<1x128xf32>, vector<1x128xf32>, vector<1x128xf32>, vector<1x128xf32> -> vector<8x128xf32>
    %c0_58 = arith.constant 0 : index
    %c0_59 = arith.constant 0 : index
    %466 = vector.load %arg6[%c0_58, %c0_59] : memref<128x128xf32, #tpu.memory_space<vmem>>, vector<128x128xf32>
    %cst_60 = arith.constant dense<0.000000e+00> : vector<8x128xf32>
    %467 = tpu.matmul %465, %466, %cst_60 {dimension_numbers = #tpu.dot_dimension_numbers<[1], [0], [0], [1], [0, 0, 1, 1], [], []>} : vector<8x128xf32>, vector<128x128xf32>, vector<8x128xf32> -> vector<8x128xf32>
    %c0_61 = arith.constant 0 : index
    %c0_62 = arith.constant 0 : index
    %468 = vector.load %arg7[%c0_61, %c0_62] : memref<1x128xf32, #tpu.memory_space<vmem>>, vector<1x128xf32>
    %469 = vector.broadcast %468 : vector<1x128xf32> to vector<8x128xf32>
    %470 = arith.addf %467, %469 : vector<8x128xf32>
    %c0_63 = arith.constant 0 : index
    %c0_64 = arith.constant 0 : index
    %471 = vector.load %arg8[%c0_63, %c0_64] : memref<8x128xf32, #tpu.memory_space<vmem>>, vector<8x128xf32>
    tpu.vector_store %arg8[%c0_63, %c0_64], %470 {strides = array<i32>} : memref<8x128xf32, #tpu.memory_space<vmem>>, vector<8x128xf32>,
    return
  }
}

</mosaic_0001>

<bundles_post_ra>
// kernel: tpu_custom_call.1
= control target key start
LH: loop header
LB: loop body
LE: loop exit
PB: predicated region body
PF: predicated region fallthrough
CT: control target
= control target key end

     0   :  { %13 = vsyncpa [#allocation5], 0  ;;  %s11290_s0 = inlined_call_operand.hbm [shape: f32[8], index: 0, kind: input, shape index: {}]   ;;  %s11291_s1 = inlined_call_operand.hbm [shape: f32[1,512], index: 1, kind: input, shape index: {}]   ;;  %s11292_s2 = inlined_call_operand.hbm [shape: f32[128,512], index: 2, kind: input, shape index: {}]   ;;  %s11293_s3 = inlined_call_operand.hbm [shape: f32[256,512], index: 3, kind: input, shape index: {}]   ;;  %s11294_s4 = inlined_call_operand.hbm [shape: f32[256,512], index: 4, kind: input, shape index: {}]   ;;  %s11295_s5 = inlined_call_operand.hbm [shape: f32[3,512], index: 5, kind: input, shape index: {}]   ;;  %s11296_s6 = inlined_call_operand.hbm [shape: f32[128,128], index: 6, kind: input, shape index: {}]   ;;  %s11297_s7 = inlined_call_operand.vmem [shape: f32[1,128], index: 7, kind: input, shape index: {}]   ;;  %s11298_s8 = inlined_call_operand.hbm [shape: f32[8,128], index: 8, kind: output, shape index: {}]  }
   0x1   :  { %14 = vsyncpa [#allocation3], 0 }
   0x2   :  { %15 = vsyncpa [#allocation8], 0 }
   0x3   :  { %16 = vsyncpa [#allocation11], 0 }
   0x4   :  { %17 = vsyncpa [#allocation14], 0 }
   0x5   :  { %18 = vsyncpa [#allocation4], 0  ;;  %s6710_s27 = smov [#allocation7]  }
   0x6   :  { %s42_s28 = sshll.u32 %s6710_s27, 4  ;;  %s43_s28 = int_to_ptr.vmem [resolvable:$true] %s42_s28 }
   0x7   :  { %s6558_s29 = scalar_lea.vmem %s43_s28, 8192  ;;  %p6563_p1 = scmp.lt.s32.totalorder %s43_s28, %s43_s28 }
   0x8   :  { %p6559_p0 = scmp.ne.s32.totalorder %s43_s28, %s6558_s29  ;;  %p6564_p2 = scmp.lt.s32.totalorder %s6558_s29, %s6558_s29 }
   0xa   :  { %p6565_p3 = por %p6564_p2, %p6563_p1 }
   0xc   :  { %p6566_p4 = pnand %p6565_p3, %p6559_p0 }
   0xe   :  { %6569 = shalt.err (!%p6566_p4)
}
   0xf   :  { %s6711_s30 = smov 512   ;;  %s6712_s9 = smov 32  }
  0x10   :  { %48 = dma.hbm_to_vmem [thread:$0]  %s11292_s2, 8192, %s43_s28, [#allocation8], %s6711_s30, %s6711_s30, %s6712_s9  }
  0x11   :  { %s6713_s12 = smov [#allocation10]  }
  0x12   :  { %s66_s13 = sshll.u32 %s6713_s12, 4  ;;  %s67_s13 = int_to_ptr.vmem [resolvable:$true] %s66_s13 }
  0x13   :  { %s6578_s14 = scalar_lea.vmem %s67_s13, 16384  ;;  %p6583_p6 = scmp.lt.s32.totalorder %s67_s13, %s67_s13 }
  0x14   :  { %p6579_p5 = scmp.ne.s32.totalorder %s67_s13, %s6578_s14  ;;  %p6584_p7 = scmp.lt.s32.totalorder %s6578_s14, %s6578_s14 }
  0x16   :  { %p6585_p8 = por %p6584_p7, %p6583_p6 }
  0x18   :  { %p6586_p9 = pnand %p6585_p8, %p6579_p5 }
  0x1a   :  { %6589 = shalt.err (!%p6586_p9)
}
  0x1b   :  { %72 = dma.hbm_to_vmem [thread:$0]  %s11294_s4, 16384, %s67_s13, [#allocation11], %s6711_s30, %s6711_s30, %s6712_s9  }
  0x1c   :  { %s6714_s17 = smov [#allocation2]   ;;  %s6715_s19 = smov [#allocation6]  }
  0x1d   :  { %26 = dma.hbm_to_smem %s11290_s0, 16, %s6714_s17, [#allocation5]  }
  0x1e   :  { %s33_s20 = sshll.u32 %s6715_s19, 4  ;;  %s6716_s21 = smov [#allocation9]   ;;  %s34_s20 = int_to_ptr.vmem [resolvable:$true] %s33_s20 }
  0x1f   :  { %s54_s22 = sshll.u32 %s6716_s21, 4  ;;  %s6606_s23 = scalar_lea.vmem %s34_s20, 64  ;;  %s55_s22 = int_to_ptr.vmem [resolvable:$true] %s54_s22 }
  0x20   :  { %p6607_p10 = scmp.ne.s32.totalorder %s34_s20, %s6606_s23  ;;  %p6611_p11 = scmp.lt.s32.totalorder %s34_s20, %s34_s20 }
  0x21   :  { %p6612_p12 = scmp.lt.s32.totalorder %s6606_s23, %s6606_s23 }
  0x23   :  { %p6613_p13 = por %p6612_p12, %p6611_p11 }
  0x25   :  { %p6614_p0 = pnand %p6613_p13, %p6607_p10 }
  0x27   :  { %6617 = shalt.err (!%p6614_p0)
}
  0x28   :  { %36 = dma.hbm_to_vmem [thread:$0]  %s11291_s1, 64, %s34_s20, [#allocation3]  }
  0x29   :  { %s6626_s4 = scalar_lea.vmem %s55_s22, 16384  ;;  %p6631_p2 = scmp.lt.s32.totalorder %s55_s22, %s55_s22 }
  0x2a   :  { %p6627_p1 = scmp.ne.s32.totalorder %s55_s22, %s6626_s4  ;;  %p6632_p3 = scmp.lt.s32.totalorder %s6626_s4, %s6626_s4 }
  0x2c   :  { %p6633_p4 = por %p6632_p3, %p6631_p2 }
  0x2e   :  { %p6634_p5 = pnand %p6633_p4, %p6627_p1 }
  0x30   :  { %6637 = shalt.err (!%p6634_p5)
}
  0x31   :  { %60 = dma.hbm_to_vmem [thread:$0]  %s11293_s3, 16384, %s55_s22, [#allocation8], %s6711_s30, %s6711_s30, %s6712_s9  }
  0x32   :  { %s6717_s27 = smov [#allocation12]   ;;  %s6718_s29 = smov [#allocation13]  }
  0x33   :  { %s79_s28 = sshll.u32 %s6717_s27, 4  ;;  %s88_s1 = sshll.u32 %s6718_s29, 4  ;;  %s80_s28 = int_to_ptr.vmem [resolvable:$true] %s79_s28  ;;  %s89_s1 = int_to_ptr.vmem [resolvable:$true] %s88_s1 }
  0x34   :  { %s6646_s10 = scalar_lea.vmem %s80_s28, 256  ;;  %p6651_p7 = scmp.lt.s32.totalorder %s80_s28, %s80_s28 }
  0x35   :  { %p6647_p6 = scmp.ne.s32.totalorder %s80_s28, %s6646_s10  ;;  %p6652_p8 = scmp.lt.s32.totalorder %s6646_s10, %s6646_s10 }
  0x37   :  { %p6653_p9 = por %p6652_p8, %p6651_p7 }
  0x39   :  { %p6654_p10 = pnand %p6653_p9, %p6647_p6 }
  0x3b   :  { %6657 = shalt.err (!%p6654_p10)
}
  0x3c   :  { %82 = dma.hbm_to_vmem [thread:$0]  %s11295_s5, 256, %s80_s28, [#allocation11]  }
  0x3d   :  { %s6666_s13 = scalar_lea.vmem %s89_s1, 2048  ;;  %p6671_p12 = scmp.lt.s32.totalorder %s89_s1, %s89_s1 }
  0x3e   :  { %p6667_p11 = scmp.ne.s32.totalorder %s89_s1, %s6666_s13  ;;  %p6672_p13 = scmp.lt.s32.totalorder %s6666_s13, %s6666_s13 }
  0x40   :  { %p6673_p0 = por %p6672_p13, %p6671_p12 }
  0x42   :  { %p6674_p1 = pnand %p6673_p0, %p6667_p11 }
  0x44   :  { %6677 = shalt.err (!%p6674_p1)
}
  0x45   :  { %s6719_s3 = smov 128   ;;  %s6720_s30 = smov 8  }
  0x46   :  { %94 = dma.hbm_to_vmem [thread:$0]  %s11296_s6, 2048, %s89_s1, [#allocation14], %s6719_s3, %s6719_s3, %s6720_s30  }
  0x47   :  { %6698 = dma.done.wait [#allocation5], 16  }
  0x48   :  { %6699 = vsyncadd [#allocation5], 4294967280 }
  0x49   :  { %6700 = dma.done.wait [#allocation3], 64  }
  0x4a   :  { %6701 = vsyncadd [#allocation3], 4294967232 }
  0x4b   :  { %6702 = dma.done.wait [#allocation8], 24576  }
  0x4c   :  { %6703 = vsyncadd [#allocation8], 4294942720 }
  0x4d   :  { %6704 = dma.done.wait [#allocation11], 16640  }
  0x4e   :  { %6705 = vsyncadd [#allocation11], 4294950656 }
  0x4f   :  { %6706 = dma.done.wait [#allocation14], 2048  }
  0x50   :  { %6707 = vsyncadd [#allocation14], 4294965248 }
  0x51   :  { %118 = sfence }
  0x52   :  { %v183_v0 = vld [vmem:[#allocation7 + $0x1e8] sm:$0xff]  ;;  %v185_v1 = vld [vmem:[#allocation7 + $0x1f8] sm:$0xff]  ;;  %v182_v2 = vld [vmem:[#allocation7 + $0x1e0] sm:$0xff]  ;;  %s442_s5 = sld [smem:[#allocation2]]  ;;  %vm4752_vm0 = vcmask 1040384   ;;  %vm4754_vm1 = vcmask 1041408  }
  0x53   :  { %445 = vmatprep.subr.mxu0 %v183_v0  ;;  %516 = vmatprep.subr.mxu1 %v185_v1  ;;  %v184_v3 = vld [vmem:[#allocation7 + $0x1f0] sm:$0xff]  ;;  %v179_v4 = vld [vmem:[#allocation7 + $0x1c8] sm:$0xff]  ;;  %v181_v5 = vld [vmem:[#allocation7 + $0x1d8] sm:$0xff]  ;;  %v11299_v0 = vmov 0.0   ;;  %s4886_s6 = sld [smem:[#allocation2 + $0x1]]  ;;  %vm4756_vm2 = vcmask 1042432  }
  0x54   :  { %446 = vmatpush1.msra.mxu0 %v182_v2  ;;  %517 = vmatpush1.msra.mxu1 %v184_v3  ;;  %v178_v6 = vld [vmem:[#allocation7 + $0x1c0] sm:$0xff]  ;;  %v180_v7 = vld [vmem:[#allocation7 + $0x1d0] sm:$0xff]  ;;  %v175_v8 = vld [vmem:[#allocation7 + $0x1a8] sm:$0xff]  ;;  %s4894_s15 = sld [smem:[#allocation2 + $0x2]]  ;;  %vm4758_vm3 = vcmask 1043456   ;;  %vm4760_vm4 = vcmask 1044480  }
  0x55   :  { %447 = vmatprep.subr.mxu0 %v179_v4  ;;  %518 = vmatprep.subr.mxu1 %v181_v5  ;;  %v177_v9 = vld [vmem:[#allocation7 + $0x1b8] sm:$0xff]  ;;  %v174_v10 = vld [vmem:[#allocation7 + $0x1a0] sm:$0xff]  ;;  %v176_v11 = vld [vmem:[#allocation7 + $0x1b0] sm:$0xff]  ;;  %s4902_s16 = sld [smem:[#allocation2 + $0x3]]  ;;  %vm4762_vm5 = vcmask 1045504   ;;  %vm6723_vm6 = vmmov 0  }
  0x56   :  { %448 = vmatpush1.msra.mxu0 %v178_v6  ;;  %519 = vmatpush1.msra.mxu1 %v180_v7  ;;  %v171_v12 = vld [vmem:[#allocation7 + $0x188] sm:$0xff]  ;;  %v173_v13 = vld [vmem:[#allocation7 + $0x198] sm:$0xff]  ;;  %v170_v14 = vld [vmem:[#allocation7 + $0x180] sm:$0xff]  ;;  %s4910_s17 = sld [smem:[#allocation2 + $0x4]]  ;;  %vm4764_vm7 = vcmask 1046528   ;;  %s6724_s22 = smov [#allocation15]  }
  0x57   :  { %449 = vmatprep.subr.mxu0 %v175_v8  ;;  %520 = vmatprep.subr.mxu1 %v177_v9  ;;  %v172_v15 = vld [vmem:[#allocation7 + $0x190] sm:$0xff]  ;;  %v167_v16 = vld [vmem:[#allocation7 + $0x168] sm:$0xff]  ;;  %v169_v17 = vld [vmem:[#allocation7 + $0x178] sm:$0xff]  ;;  %s4918_s18 = sld [smem:[#allocation2 + $0x5]]  ;;  %s4866_s23 = sshll.u32 %s6724_s22, 4  ;;  %s4867_s23 = int_to_ptr.vmem [resolvable:$true] %s4866_s23 }
  0x58   :  { %450 = vmatpush1.msra.mxu0 %v174_v10  ;;  %521 = vmatpush1.msra.mxu1 %v176_v11  ;;  %v166_v18 = vld [vmem:[#allocation7 + $0x160] sm:$0xff]  ;;  %v168_v19 = vld [vmem:[#allocation7 + $0x170] sm:$0xff]  ;;  %v163_v20 = vld [vmem:[#allocation7 + $0x148] sm:$0xff]  ;;  %s4926_s2 = sld [smem:[#allocation2 + $0x6]]  ;;  %s6678_s24 = scalar_lea.vmem %s4867_s23, 128 }
  0x59   :  { %451 = vmatprep.subr.mxu0 %v171_v12  ;;  %522 = vmatprep.subr.mxu1 %v173_v13  ;;  %v165_v21 = vld [vmem:[#allocation7 + $0x158] sm:$0xff]  ;;  %v162_v22 = vld [vmem:[#allocation7 + $0x140] sm:$0xff]  ;;  %v164_v23 = vld [vmem:[#allocation7 + $0x150] sm:$0xff]  ;;  %s4934_s19 = sld [smem:[#allocation2 + $0x7]]  ;;  %p6679_p2 = scmp.ne.s32.totalorder %s4867_s23, %s6678_s24 }
  0x5a   :  { %452 = vmatpush1.msra.mxu0 %v170_v14  ;;  %523 = vmatpush1.msra.mxu1 %v172_v15  ;;  %v159_v24 = vld [vmem:[#allocation7 + $0x128] sm:$0xff]  ;;  %v161_v25 = vld [vmem:[#allocation7 + $0x138] sm:$0xff]  ;;  %v158_v26 = vld [vmem:[#allocation7 + $0x120] sm:$0xff]  ;;  %p6683_p3 = scmp.lt.s32.totalorder %s4867_s23, %s4867_s23  ;;  %p6684_p4 = scmp.lt.s32.totalorder %s6678_s24, %s6678_s24 }
  0x5b   :  { %453 = vmatprep.subr.mxu0 %v167_v16  ;;  %524 = vmatprep.subr.mxu1 %v169_v17  ;;  %v160_v27 = vld [vmem:[#allocation7 + $0x130] sm:$0xff]  ;;  %v155_v28 = vld [vmem:[#allocation7 + $0x108] sm:$0xff]  ;;  %v157_v29 = vld [vmem:[#allocation7 + $0x118] sm:$0xff] }
  0x5c   :  { %454 = vmatpush1.msra.mxu0 %v166_v18  ;;  %525 = vmatpush1.msra.mxu1 %v168_v19  ;;  %v154_v30 = vld [vmem:[#allocation7 + $0x100] sm:$0xff]  ;;  %v156_v31 = vld [vmem:[#allocation7 + $0x110] sm:$0xff]  ;;  %v151_v32 = vld [vmem:[#allocation7 + $0xe8] sm:$0xff]  ;;  %p6685_p5 = por %p6684_p4, %p6683_p3 }
  0x5d   :  { %455 = vmatprep.subr.mxu0 %v163_v20  ;;  %526 = vmatprep.subr.mxu1 %v165_v21  ;;  %v153_v33 = vld [vmem:[#allocation7 + $0xf8] sm:$0xff]  ;;  %v150_v34 = vld [vmem:[#allocation7 + $0xe0] sm:$0xff]  ;;  %v152_v35 = vld [vmem:[#allocation7 + $0xf0] sm:$0xff] }
  0x5e   :  { %456 = vmatpush1.msra.mxu0 %v162_v22  ;;  %527 = vmatpush1.msra.mxu1 %v164_v23  ;;  %v147_v36 = vld [vmem:[#allocation7 + $0xc8] sm:$0xff]  ;;  %v149_v37 = vld [vmem:[#allocation7 + $0xd8] sm:$0xff]  ;;  %v146_v38 = vld [vmem:[#allocation7 + $0xc0] sm:$0xff]  ;;  %p6686_p6 = pnand %p6685_p5, %p6679_p2 }
  0x5f   :  { %457 = vmatprep.subr.mxu0 %v159_v24  ;;  %528 = vmatprep.subr.mxu1 %v161_v25  ;;  %v148_v39 = vld [vmem:[#allocation7 + $0xd0] sm:$0xff]  ;;  %v143_v40 = vld [vmem:[#allocation7 + $0xa8] sm:$0xff]  ;;  %v145_v41 = vld [vmem:[#allocation7 + $0xb8] sm:$0xff] }
  0x60   :  { %458 = vmatpush1.msra.mxu0 %v158_v26  ;;  %529 = vmatpush1.msra.mxu1 %v160_v27  ;;  %v142_v42 = vld [vmem:[#allocation7 + $0xa0] sm:$0xff]  ;;  %v144_v43 = vld [vmem:[#allocation7 + $0xb0] sm:$0xff]  ;;  %v139_v44 = vld [vmem:[#allocation7 + $0x88] sm:$0xff] }
  0x61   :  { %459 = vmatprep.subr.mxu0 %v155_v28  ;;  %530 = vmatprep.subr.mxu1 %v157_v29  ;;  %v141_v45 = vld [vmem:[#allocation7 + $0x98] sm:$0xff]  ;;  %v138_v46 = vld [vmem:[#allocation7 + $0x80] sm:$0xff]  ;;  %v140_v47 = vld [vmem:[#allocation7 + $0x90] sm:$0xff] }
  0x62   :  { %460 = vmatpush1.msra.mxu0 %v154_v30  ;;  %531 = vmatpush1.msra.mxu1 %v156_v31  ;;  %v135_v48 = vld [vmem:[#allocation7 + $0x68] sm:$0xff]  ;;  %v137_v49 = vld [vmem:[#allocation7 + $0x78] sm:$0xff]  ;;  %v134_v50 = vld [vmem:[#allocation7 + $0x60] sm:$0xff] }
  0x63   :  { %461 = vmatprep.subr.mxu0 %v151_v32  ;;  %532 = vmatprep.subr.mxu1 %v153_v33  ;;  %v136_v51 = vld [vmem:[#allocation7 + $0x70] sm:$0xff]  ;;  %v131_v52 = vld [vmem:[#allocation7 + $0x48] sm:$0xff]  ;;  %v133_v53 = vld [vmem:[#allocation7 + $0x58] sm:$0xff] }
  0x64   :  { %462 = vmatpush1.msra.mxu0 %v150_v34  ;;  %533 = vmatpush1.msra.mxu1 %v152_v35  ;;  %v130_v54 = vld [vmem:[#allocation7 + $0x40] sm:$0xff]  ;;  %v132_v55 = vld [vmem:[#allocation7 + $0x50] sm:$0xff]  ;;  %v127_v56 = vld [vmem:[#allocation7 + $0x28] sm:$0xff] }
  0x65   :  { %463 = vmatprep.subr.mxu0 %v147_v36  ;;  %534 = vmatprep.subr.mxu1 %v149_v37  ;;  %v129_v57 = vld [vmem:[#allocation7 + $0x38] sm:$0xff]  ;;  %v126_v58 = vld [vmem:[#allocation7 + $0x20] sm:$0xff]  ;;  %v128_v59 = vld [vmem:[#allocation7 + $0x30] sm:$0xff] }
  0x66   :  { %464 = vmatpush1.msra.mxu0 %v146_v38  ;;  %535 = vmatpush1.msra.mxu1 %v148_v39  ;;  %v123_v60 = vld [vmem:[#allocation7 + $0x8] sm:$0xff]  ;;  %v125_v61 = vld [vmem:[#allocation7 + $0x18] sm:$0xff]  ;;  %v122_v62 = vld [vmem:[#allocation7] sm:$0xff] }
  0x67   :  { %465 = vmatprep.subr.mxu0 %v143_v40  ;;  %536 = vmatprep.subr.mxu1 %v145_v41  ;;  %v124_v63 = vld [vmem:[#allocation7 + $0x10] sm:$0xff]  ;;  %v247_v1 = vld [vmem:[#allocation9 + $0x1e8] sm:$0xff]  ;;  %v249_v2 = vld [vmem:[#allocation9 + $0x1f8] sm:$0xff] }
  0x68   :  { %466 = vmatpush1.msra.mxu0 %v142_v42  ;;  %537 = vmatpush1.msra.mxu1 %v144_v43  ;;  %v246_v3 = vld [vmem:[#allocation9 + $0x1e0] sm:$0xff]  ;;  %v248_v4 = vld [vmem:[#allocation9 + $0x1f0] sm:$0xff]  ;;  %v243_v5 = vld [vmem:[#allocation9 + $0x1c8] sm:$0xff] }
  0x69   :  { %467 = vmatprep.subr.mxu0 %v139_v44  ;;  %538 = vmatprep.subr.mxu1 %v141_v45  ;;  %v245_v6 = vld [vmem:[#allocation9 + $0x1d8] sm:$0xff]  ;;  %v242_v7 = vld [vmem:[#allocation9 + $0x1c0] sm:$0xff]  ;;  %v244_v8 = vld [vmem:[#allocation9 + $0x1d0] sm:$0xff] }
  0x6a   :  { %468 = vmatpush1.msra.mxu0 %v138_v46  ;;  %539 = vmatpush1.msra.mxu1 %v140_v47  ;;  %v239_v9 = vld [vmem:[#allocation9 + $0x1a8] sm:$0xff]  ;;  %v241_v10 = vld [vmem:[#allocation9 + $0x1b8] sm:$0xff]  ;;  %v238_v11 = vld [vmem:[#allocation9 + $0x1a0] sm:$0xff] }
  0x6b   :  { %469 = vmatprep.subr.mxu0 %v135_v48  ;;  %540 = vmatprep.subr.mxu1 %v137_v49  ;;  %v240_v12 = vld [vmem:[#allocation9 + $0x1b0] sm:$0xff]  ;;  %v235_v13 = vld [vmem:[#allocation9 + $0x188] sm:$0xff]  ;;  %v237_v14 = vld [vmem:[#allocation9 + $0x198] sm:$0xff] }
  0x6c   :  { %470 = vmatpush1.msra.mxu0 %v134_v50  ;;  %541 = vmatpush1.msra.mxu1 %v136_v51  ;;  %v234_v15 = vld [vmem:[#allocation9 + $0x180] sm:$0xff]  ;;  %v236_v16 = vld [vmem:[#allocation9 + $0x190] sm:$0xff]  ;;  %v231_v17 = vld [vmem:[#allocation9 + $0x168] sm:$0xff] }
  0x6d   :  { %471 = vmatprep.subr.mxu0 %v131_v52  ;;  %542 = vmatprep.subr.mxu1 %v133_v53  ;;  %v233_v18 = vld [vmem:[#allocation9 + $0x178] sm:$0xff]  ;;  %v230_v19 = vld [vmem:[#allocation9 + $0x160] sm:$0xff]  ;;  %v232_v20 = vld [vmem:[#allocation9 + $0x170] sm:$0xff] }
  0x6e   :  { %472 = vmatpush1.msra.mxu0 %v130_v54  ;;  %543 = vmatpush1.msra.mxu1 %v132_v55  ;;  %v227_v21 = vld [vmem:[#allocation9 + $0x148] sm:$0xff]  ;;  %v229_v22 = vld [vmem:[#allocation9 + $0x158] sm:$0xff]  ;;  %v226_v23 = vld [vmem:[#allocation9 + $0x140] sm:$0xff] }
  0x6f   :  { %473 = vmatprep.subr.mxu0 %v127_v56  ;;  %544 = vmatprep.subr.mxu1 %v129_v57  ;;  %v228_v24 = vld [vmem:[#allocation9 + $0x150] sm:$0xff]  ;;  %v223_v25 = vld [vmem:[#allocation9 + $0x128] sm:$0xff]  ;;  %v225_v26 = vld [vmem:[#allocation9 + $0x138] sm:$0xff] }
  0x70   :  { %474 = vmatpush1.msra.mxu0 %v126_v58  ;;  %545 = vmatpush1.msra.mxu1 %v128_v59  ;;  %v222_v27 = vld [vmem:[#allocation9 + $0x120] sm:$0xff]  ;;  %v224_v28 = vld [vmem:[#allocation9 + $0x130] sm:$0xff]  ;;  %v219_v29 = vld [vmem:[#allocation9 + $0x108] sm:$0xff] }
  0x71   :  { %475 = vmatprep.subr.mxu0 %v123_v60  ;;  %546 = vmatprep.subr.mxu1 %v125_v61  ;;  %v221_v30 = vld [vmem:[#allocation9 + $0x118] sm:$0xff]  ;;  %v218_v31 = vld [vmem:[#allocation9 + $0x100] sm:$0xff]  ;;  %v220_v32 = vld [vmem:[#allocation9 + $0x110] sm:$0xff] }
  0x72   :  { %476 = vmatpush1.msra.mxu0 %v122_v62  ;;  %509 = vmatprep.mubr.f32.mxu0 %v11299_v0  ;;  %v215_v33 = vld [vmem:[#allocation9 + $0xe8] sm:$0xff]  ;;  %v217_v34 = vld [vmem:[#allocation9 + $0xf8] sm:$0xff]  ;;  %v214_v35 = vld [vmem:[#allocation9 + $0xe0] sm:$0xff] }
  0x73   :  { %547 = vmatpush1.msra.mxu1 %v124_v63  ;;  %580 = vmatprep.mubr.f32.mxu1 %v11299_v0  ;;  %v216_v36 = vld [vmem:[#allocation9 + $0xf0] sm:$0xff]  ;;  %v211_v37 = vld [vmem:[#allocation9 + $0xc8] sm:$0xff]  ;;  %v213_v38 = vld [vmem:[#allocation9 + $0xd8] sm:$0xff] }
  0x74   :  { %510 = vmatmul.mubr.f32.vlgmr.msra.gmra.mxu0 %v11299_v0  ;;  %581 = vmatmul.mubr.f32.vlgmr.msra.gmra.mxu1 %v11299_v0  ;;  %v210_v39 = vld [vmem:[#allocation9 + $0xc0] sm:$0xff]  ;;  %v212_v40 = vld [vmem:[#allocation9 + $0xd0] sm:$0xff]  ;;  %v207_v41 = vld [vmem:[#allocation9 + $0xa8] sm:$0xff] }
  0x75   :  { %747 = vmatprep.mubr.f32.mxu0 %v11299_v0  ;;  %818 = vmatprep.mubr.f32.mxu1 %v11299_v0  ;;  %v209_v42 = vld [vmem:[#allocation9 + $0xb8] sm:$0xff]  ;;  %v206_v43 = vld [vmem:[#allocation9 + $0xa0] sm:$0xff]  ;;  %v208_v44 = vld [vmem:[#allocation9 + $0xb0] sm:$0xff] }
  0x76   :  { %683 = vmatprep.subr.mxu0 %v247_v1  ;;  %754 = vmatprep.subr.mxu1 %v249_v2  ;;  %v203_v45 = vld [vmem:[#allocation9 + $0x88] sm:$0xff]  ;;  %v205_v46 = vld [vmem:[#allocation9 + $0x98] sm:$0xff]  ;;  %v202_v47 = vld [vmem:[#allocation9 + $0x80] sm:$0xff] }
  0x77   :  { %684 = vmatpush1.msra.mxu0 %v246_v3  ;;  %755 = vmatpush1.msra.mxu1 %v248_v4  ;;  %v204_v48 = vld [vmem:[#allocation9 + $0x90] sm:$0xff]  ;;  %v199_v49 = vld [vmem:[#allocation9 + $0x68] sm:$0xff]  ;;  %v201_v50 = vld [vmem:[#allocation9 + $0x78] sm:$0xff] }
  0x78   :  { %685 = vmatprep.subr.mxu0 %v243_v5  ;;  %756 = vmatprep.subr.mxu1 %v245_v6  ;;  %v198_v51 = vld [vmem:[#allocation9 + $0x60] sm:$0xff]  ;;  %v200_v52 = vld [vmem:[#allocation9 + $0x70] sm:$0xff]  ;;  %v195_v53 = vld [vmem:[#allocation9 + $0x48] sm:$0xff] }
  0x79   :  { %686 = vmatpush1.msra.mxu0 %v242_v7  ;;  %757 = vmatpush1.msra.mxu1 %v244_v8  ;;  %v197_v54 = vld [vmem:[#allocation9 + $0x58] sm:$0xff]  ;;  %v194_v55 = vld [vmem:[#allocation9 + $0x40] sm:$0xff]  ;;  %v196_v56 = vld [vmem:[#allocation9 + $0x50] sm:$0xff] }
  0x7a   :  { %687 = vmatprep.subr.mxu0 %v239_v9  ;;  %758 = vmatprep.subr.mxu1 %v241_v10  ;;  %v191_v57 = vld [vmem:[#allocation9 + $0x28] sm:$0xff]  ;;  %v193_v58 = vld [vmem:[#allocation9 + $0x38] sm:$0xff]  ;;  %v190_v59 = vld [vmem:[#allocation9 + $0x20] sm:$0xff] }
  0x7b   :  { %688 = vmatpush1.msra.mxu0 %v238_v11  ;;  %759 = vmatpush1.msra.mxu1 %v240_v12  ;;  %v192_v60 = vld [vmem:[#allocation9 + $0x30] sm:$0xff]  ;;  %v187_v61 = vld [vmem:[#allocation9 + $0x8] sm:$0xff]  ;;  %v189_v62 = vld [vmem:[#allocation9 + $0x18] sm:$0xff] }
  0x7c   :  { %689 = vmatprep.subr.mxu0 %v235_v13  ;;  %760 = vmatprep.subr.mxu1 %v237_v14  ;;  %v186_v63 = vld [vmem:[#allocation9] sm:$0xff]  ;;  %v188_v1 = vld [vmem:[#allocation9 + $0x10] sm:$0xff]  ;;  %v311_v2 = vld [vmem:[#allocation9 + $0x3e8] sm:$0xff] }
  0x7d   :  { %690 = vmatpush1.msra.mxu0 %v234_v15  ;;  %761 = vmatpush1.msra.mxu1 %v236_v16  ;;  %v313_v3 = vld [vmem:[#allocation9 + $0x3f8] sm:$0xff]  ;;  %v310_v4 = vld [vmem:[#allocation9 + $0x3e0] sm:$0xff]  ;;  %v312_v5 = vld [vmem:[#allocation9 + $0x3f0] sm:$0xff] }
  0x7e   :  { %691 = vmatprep.subr.mxu0 %v231_v17  ;;  %762 = vmatprep.subr.mxu1 %v233_v18  ;;  %v307_v6 = vld [vmem:[#allocation9 + $0x3c8] sm:$0xff]  ;;  %v309_v7 = vld [vmem:[#allocation9 + $0x3d8] sm:$0xff]  ;;  %v306_v8 = vld [vmem:[#allocation9 + $0x3c0] sm:$0xff] }
  0x7f   :  { %692 = vmatpush1.msra.mxu0 %v230_v19  ;;  %763 = vmatpush1.msra.mxu1 %v232_v20  ;;  %v308_v9 = vld [vmem:[#allocation9 + $0x3d0] sm:$0xff]  ;;  %v303_v10 = vld [vmem:[#allocation9 + $0x3a8] sm:$0xff]  ;;  %v305_v11 = vld [vmem:[#allocation9 + $0x3b8] sm:$0xff] }
  0x80   :  { %693 = vmatprep.subr.mxu0 %v227_v21  ;;  %764 = vmatprep.subr.mxu1 %v229_v22  ;;  %v302_v12 = vld [vmem:[#allocation9 + $0x3a0] sm:$0xff]  ;;  %v304_v13 = vld [vmem:[#allocation9 + $0x3b0] sm:$0xff]  ;;  %v299_v14 = vld [vmem:[#allocation9 + $0x388] sm:$0xff] }
  0x81   :  { %694 = vmatpush1.msra.mxu0 %v226_v23  ;;  %765 = vmatpush1.msra.mxu1 %v228_v24  ;;  %v301_v15 = vld [vmem:[#allocation9 + $0x398] sm:$0xff]  ;;  %v298_v16 = vld [vmem:[#allocation9 + $0x380] sm:$0xff]  ;;  %v300_v17 = vld [vmem:[#allocation9 + $0x390] sm:$0xff] }
  0x82   :  { %695 = vmatprep.subr.mxu0 %v223_v25  ;;  %766 = vmatprep.subr.mxu1 %v225_v26  ;;  %v295_v18 = vld [vmem:[#allocation9 + $0x368] sm:$0xff]  ;;  %v297_v19 = vld [vmem:[#allocation9 + $0x378] sm:$0xff]  ;;  %v294_v20 = vld [vmem:[#allocation9 + $0x360] sm:$0xff] }
  0x83   :  { %696 = vmatpush1.msra.mxu0 %v222_v27  ;;  %767 = vmatpush1.msra.mxu1 %v224_v28  ;;  %v296_v21 = vld [vmem:[#allocation9 + $0x370] sm:$0xff]  ;;  %v291_v22 = vld [vmem:[#allocation9 + $0x348] sm:$0xff]  ;;  %v293_v23 = vld [vmem:[#allocation9 + $0x358] sm:$0xff] }
  0x84   :  { %697 = vmatprep.subr.mxu0 %v219_v29  ;;  %768 = vmatprep.subr.mxu1 %v221_v30  ;;  %v290_v24 = vld [vmem:[#allocation9 + $0x340] sm:$0xff]  ;;  %v292_v25 = vld [vmem:[#allocation9 + $0x350] sm:$0xff]  ;;  %v287_v26 = vld [vmem:[#allocation9 + $0x328] sm:$0xff] }
  0x85   :  { %698 = vmatpush1.msra.mxu0 %v218_v31  ;;  %769 = vmatpush1.msra.mxu1 %v220_v32  ;;  %v289_v27 = vld [vmem:[#allocation9 + $0x338] sm:$0xff]  ;;  %v286_v28 = vld [vmem:[#allocation9 + $0x320] sm:$0xff]  ;;  %v288_v29 = vld [vmem:[#allocation9 + $0x330] sm:$0xff] }
  0x86   :  { %699 = vmatprep.subr.mxu0 %v215_v33  ;;  %770 = vmatprep.subr.mxu1 %v217_v34  ;;  %v283_v30 = vld [vmem:[#allocation9 + $0x308] sm:$0xff]  ;;  %v285_v31 = vld [vmem:[#allocation9 + $0x318] sm:$0xff]  ;;  %v282_v32 = vld [vmem:[#allocation9 + $0x300] sm:$0xff] }
  0x87   :  { %700 = vmatpush1.msra.mxu0 %v214_v35  ;;  %771 = vmatpush1.msra.mxu1 %v216_v36  ;;  %v284_v33 = vld [vmem:[#allocation9 + $0x310] sm:$0xff]  ;;  %v279_v34 = vld [vmem:[#allocation9 + $0x2e8] sm:$0xff]  ;;  %v281_v35 = vld [vmem:[#allocation9 + $0x2f8] sm:$0xff] }
  0x88   :  { %701 = vmatprep.subr.mxu0 %v211_v37  ;;  %772 = vmatprep.subr.mxu1 %v213_v38  ;;  %v278_v36 = vld [vmem:[#allocation9 + $0x2e0] sm:$0xff]  ;;  %v280_v37 = vld [vmem:[#allocation9 + $0x2f0] sm:$0xff]  ;;  %v275_v38 = vld [vmem:[#allocation9 + $0x2c8] sm:$0xff] }
  0x89   :  { %702 = vmatpush1.msra.mxu0 %v210_v39  ;;  %773 = vmatpush1.msra.mxu1 %v212_v40  ;;  %v277_v39 = vld [vmem:[#allocation9 + $0x2d8] sm:$0xff]  ;;  %v274_v40 = vld [vmem:[#allocation9 + $0x2c0] sm:$0xff] }
  0x8a   :  { %703 = vmatprep.subr.mxu0 %v207_v41  ;;  %774 = vmatprep.subr.mxu1 %v209_v42  ;;  %v276_v41 = vld [vmem:[#allocation9 + $0x2d0] sm:$0xff]  ;;  %v271_v42 = vld [vmem:[#allocation9 + $0x2a8] sm:$0xff] }
  0x8b   :  { %704 = vmatpush1.msra.mxu0 %v206_v43  ;;  %775 = vmatpush1.msra.mxu1 %v208_v44  ;;  %v273_v43 = vld [vmem:[#allocation9 + $0x2b8] sm:$0xff]  ;;  %v270_v44 = vld [vmem:[#allocation9 + $0x2a0] sm:$0xff] }
  0x8c   :  { %705 = vmatprep.subr.mxu0 %v203_v45  ;;  %776 = vmatprep.subr.mxu1 %v205_v46  ;;  %v272_v45 = vld [vmem:[#allocation9 + $0x2b0] sm:$0xff]  ;;  %v267_v46 = vld [vmem:[#allocation9 + $0x288] sm:$0xff] }
  0x8d   :  { %706 = vmatpush1.msra.mxu0 %v202_v47  ;;  %777 = vmatpush1.msra.mxu1 %v204_v48  ;;  %v269_v47 = vld [vmem:[#allocation9 + $0x298] sm:$0xff]  ;;  %v266_v48 = vld [vmem:[#allocation9 + $0x280] sm:$0xff] }
  0x8e   :  { %707 = vmatprep.subr.mxu0 %v199_v49  ;;  %778 = vmatprep.subr.mxu1 %v201_v50  ;;  %v268_v49 = vld [vmem:[#allocation9 + $0x290] sm:$0xff]  ;;  %v263_v50 = vld [vmem:[#allocation9 + $0x268] sm:$0xff] }
  0x8f   :  { %708 = vmatpush1.msra.mxu0 %v198_v51  ;;  %779 = vmatpush1.msra.mxu1 %v200_v52  ;;  %v265_v51 = vld [vmem:[#allocation9 + $0x278] sm:$0xff]  ;;  %v262_v52 = vld [vmem:[#allocation9 + $0x260] sm:$0xff] }
  0x90   :  { %709 = vmatprep.subr.mxu0 %v195_v53  ;;  %780 = vmatprep.subr.mxu1 %v197_v54  ;;  %v264_v53 = vld [vmem:[#allocation9 + $0x270] sm:$0xff]  ;;  %v259_v54 = vld [vmem:[#allocation9 + $0x248] sm:$0xff] }
  0x91   :  { %710 = vmatpush1.msra.mxu0 %v194_v55  ;;  %781 = vmatpush1.msra.mxu1 %v196_v56  ;;  %v261_v55 = vld [vmem:[#allocation9 + $0x258] sm:$0xff]  ;;  %v258_v56 = vld [vmem:[#allocation9 + $0x240] sm:$0xff] }
  0x92   :  { %711 = vmatprep.subr.mxu0 %v191_v57  ;;  %782 = vmatprep.subr.mxu1 %v193_v58  ;;  %v260_v57 = vld [vmem:[#allocation9 + $0x250] sm:$0xff]  ;;  %v255_v58 = vld [vmem:[#allocation9 + $0x228] sm:$0xff] }
  0x93   :  { %712 = vmatpush1.msra.mxu0 %v190_v59  ;;  %783 = vmatpush1.msra.mxu1 %v192_v60  ;;  %v257_v59 = vld [vmem:[#allocation9 + $0x238] sm:$0xff]  ;;  %v254_v60 = vld [vmem:[#allocation9 + $0x220] sm:$0xff] }
  0x94   :  { %713 = vmatprep.subr.mxu0 %v187_v61  ;;  %784 = vmatprep.subr.mxu1 %v189_v62  ;;  %v256_v61 = vld [vmem:[#allocation9 + $0x230] sm:$0xff]  ;;  %v251_v62 = vld [vmem:[#allocation9 + $0x208] sm:$0xff] }
  0x95   :  { %714 = vmatpush1.msra.mxu0 %v186_v63  ;;  %785 = vmatpush1.msra.mxu1 %v188_v1  ;;  %v253_v63 = vld [vmem:[#allocation9 + $0x218] sm:$0xff]  ;;  %v250_v1 = vld [vmem:[#allocation9 + $0x200] sm:$0xff] }
  0x96   :  { %715 = vmatprep.subr.mxu0 %v311_v2  ;;  %786 = vmatprep.subr.mxu1 %v313_v3  ;;  %v252_v2 = vld [vmem:[#allocation9 + $0x210] sm:$0xff]  ;;  %v375_v3 = vld [vmem:[#allocation10 + $0x1e8] sm:$0xff] }
  0x97   :  { %716 = vmatpush2.msra.mxu0 %v310_v4  ;;  %787 = vmatpush2.msra.mxu1 %v312_v5  ;;  %v377_v4 = vld [vmem:[#allocation10 + $0x1f8] sm:$0xff]  ;;  %v6722_v5 = vmov 1966171168  }
  0x98   :  { %717 = vmatprep.subr.mxu0 %v307_v6  ;;  %788 = vmatprep.subr.mxu1 %v309_v7  ;;  %v594_v6 = vunpack.c.l.s4 %v6722_v5  ;;  %v596_v7 = vlaneseq  ;;  %v353_v5 = vld [vmem:[#allocation10 + $0x138] sm:$0xff] }
  0x99   :  { %718 = vmatpush2.msra.mxu0 %v306_v8  ;;  %789 = vmatpush2.msra.mxu1 %v308_v9 }
  0x9a   :  { %719 = vmatprep.subr.mxu0 %v303_v10  ;;  %790 = vmatprep.subr.mxu1 %v305_v11  ;;  %v595_v8 = vunpack.c.0.s8 %v594_v6  ;;  %v6806_v9 = vshrl.u32 %v596_v7, 7  ;;  %v6808_v10 = vld [vmem:[#allocation12] sm:$0x77]  ;;  %v6810_v11 = vld [vmem:[#allocation12 + $0x8] sm:$0x77]  ;;  %v352_v7 = vld [vmem:[#allocation10 + $0x130] sm:$0xff] }
  0x9b   :  { %720 = vmatpush2.msra.mxu0 %v302_v12  ;;  %791 = vmatpush2.msra.mxu1 %v304_v13  ;;  %v350_v6 = vld [vmem:[#allocation10 + $0x120] sm:$0xff] }
  0x9c   :  { %721 = vmatprep.subr.mxu0 %v299_v14  ;;  %792 = vmatprep.subr.mxu1 %v301_v15  ;;  %v6813_v12 = vsub.s32 %v595_v8, %v6806_v9  ;;  %v347_v8 = vld [vmem:[#allocation10 + $0x108] sm:$0xff] }
  0x9d   :  { %722 = vmatpush2.msra.mxu0 %v298_v16  ;;  %793 = vmatpush2.msra.mxu1 %v300_v17 }
  0x9e   :  { %723 = vmatprep.subr.mxu0 %v295_v18  ;;  %794 = vmatprep.subr.mxu1 %v297_v19  ;;  %v625_v15 = vrot.slane %v6808_v10, %v6813_v12  ;;  %v632_v16 = vrot.slane %v6810_v11, %v6813_v12 }
  0x9f   :  { %724 = vmatpush2.msra.mxu0 %v294_v20  ;;  %795 = vmatpush2.msra.mxu1 %v296_v21  ;;  %v121_v21 = vld [vmem:[#allocation6] sm:$0xf] }
  0xa0   :  { %725 = vmatprep.subr.mxu0 %v291_v22  ;;  %796 = vmatprep.subr.mxu1 %v293_v23  ;;  %v443_v22 = vstv %s442_s5 }
  0xa1   :  { %726 = vmatpush2.msra.mxu0 %v290_v24  ;;  %797 = vmatpush2.msra.mxu1 %v292_v25  ;;  %v633_v25 = vcombine.low %v625_v15, %v632_v16  ;;  %v348_v15 = vld [vmem:[#allocation10 + $0x110] sm:$0xff]  ;;  %v343_v16 = vld [vmem:[#allocation10 + $0xe8] sm:$0xff] }
  0xa2   :  { %727 = vmatprep.subr.mxu0 %v287_v26  ;;  %798 = vmatprep.subr.mxu1 %v289_v27  ;;  %v444_v26 = vmul.f32 %v443_v22, %v121_v21  ;;  %v341_v21 = vld [vmem:[#allocation10 + $0xd8] sm:$0xff]  ;;  %v338_v22 = vld [vmem:[#allocation10 + $0xc0] sm:$0xff] }
  0xa3   :  { %728 = vmatpush2.msra.mxu0 %v286_v28  ;;  %799 = vmatpush2.msra.mxu1 %v288_v29  ;;  %v6823_v29 = vrot.slane %v633_v25, %v6813_v12  ;;  %v337_v25 = vld [vmem:[#allocation10 + $0xb8] sm:$0xff] }
  0xa4   :  { %729 = vmatprep.subr.mxu0 %v283_v30  ;;  %800 = vmatprep.subr.mxu1 %v285_v31 }
  0xa5   :  { %730 = vmatpush2.msra.mxu0 %v282_v32  ;;  %801 = vmatpush2.msra.mxu1 %v284_v33 }
  0xa6   :  { %731 = vmatprep.subr.mxu0 %v279_v34  ;;  %802 = vmatprep.subr.mxu1 %v281_v35 }
  0xa7   :  { %732 = vmatpush2.msra.mxu0 %v278_v36  ;;  %803 = vmatpush2.msra.mxu1 %v280_v37 }
  0xa8   :  { %733 = vmatprep.subr.mxu0 %v275_v38  ;;  %804 = vmatprep.subr.mxu1 %v277_v39 }
  0xa9   :  { %734 = vmatpush2.msra.mxu0 %v274_v40  ;;  %805 = vmatpush2.msra.mxu1 %v276_v41 }
  0xaa   :  { %735 = vmatprep.subr.mxu0 %v271_v42  ;;  %806 = vmatprep.subr.mxu1 %v273_v43 }
  0xab   :  { %736 = vmatpush2.msra.mxu0 %v270_v44  ;;  %807 = vmatpush2.msra.mxu1 %v272_v45  ;;  %v374_v45 = vld [vmem:[#allocation10 + $0x1e0] sm:$0xff] }
  0xac   :  { %737 = vmatprep.subr.mxu0 %v267_v46  ;;  %808 = vmatprep.subr.mxu1 %v269_v47  ;;  %v376_v46 = vld [vmem:[#allocation10 + $0x1f0] sm:$0xff]  ;;  %v371_v47 = vld [vmem:[#allocation10 + $0x1c8] sm:$0xff] }
  0xad   :  { %738 = vmatpush2.msra.mxu0 %v266_v48  ;;  %809 = vmatpush2.msra.mxu1 %v268_v49  ;;  %v373_v48 = vld [vmem:[#allocation10 + $0x1d8] sm:$0xff]  ;;  %v370_v49 = vld [vmem:[#allocation10 + $0x1c0] sm:$0xff] }
  0xae   :  { %739 = vmatprep.subr.mxu0 %v263_v50  ;;  %810 = vmatprep.subr.mxu1 %v265_v51  ;;  %v372_v50 = vld [vmem:[#allocation10 + $0x1d0] sm:$0xff]  ;;  %v367_v51 = vld [vmem:[#allocation10 + $0x1a8] sm:$0xff] }
  0xaf   :  { %740 = vmatpush2.msra.mxu0 %v262_v52  ;;  %811 = vmatpush2.msra.mxu1 %v264_v53  ;;  %v369_v52 = vld [vmem:[#allocation10 + $0x1b8] sm:$0xff]  ;;  %v366_v53 = vld [vmem:[#allocation10 + $0x1a0] sm:$0xff] }
  0xb0   :  { %741 = vmatprep.subr.mxu0 %v259_v54  ;;  %812 = vmatprep.subr.mxu1 %v261_v55  ;;  %v368_v54 = vld [vmem:[#allocation10 + $0x1b0] sm:$0xff]  ;;  %v363_v55 = vld [vmem:[#allocation10 + $0x188] sm:$0xff] }
  0xb1   :  { %742 = vmatpush2.msra.mxu0 %v258_v56  ;;  %813 = vmatpush2.msra.mxu1 %v260_v57  ;;  %v365_v56 = vld [vmem:[#allocation10 + $0x198] sm:$0xff]  ;;  %v362_v57 = vld [vmem:[#allocation10 + $0x180] sm:$0xff] }
  0xb2   :  { %743 = vmatprep.subr.mxu0 %v255_v58  ;;  %814 = vmatprep.subr.mxu1 %v257_v59  ;;  %v364_v58 = vld [vmem:[#allocation10 + $0x190] sm:$0xff]  ;;  %v359_v59 = vld [vmem:[#allocation10 + $0x168] sm:$0xff] }
  0xb3   :  { %744 = vmatpush2.msra.mxu0 %v254_v60  ;;  %815 = vmatpush2.msra.mxu1 %v256_v61  ;;  %v361_v60 = vld [vmem:[#allocation10 + $0x178] sm:$0xff]  ;;  %v358_v61 = vld [vmem:[#allocation10 + $0x160] sm:$0xff] }
  0xb4   :  { %745 = vmatprep.subr.mxu0 %v251_v62  ;;  %816 = vmatprep.subr.mxu1 %v253_v63  ;;  %v360_v62 = vld [vmem:[#allocation10 + $0x170] sm:$0xff]  ;;  %v355_v63 = vld [vmem:[#allocation10 + $0x148] sm:$0xff] }
  0xb5   :  { %746 = vmatpush2.msra.mxu0 %v250_v1  ;;  %817 = vmatpush2.msra.mxu1 %v252_v2  ;;  %v357_v1 = vld [vmem:[#allocation10 + $0x158] sm:$0xff]  ;;  %v354_v2 = vld [vmem:[#allocation10 + $0x140] sm:$0xff] }
  0xb6   :  { %869 = vmatprep.subr.mxu0 %v375_v3  ;;  %940 = vmatprep.subr.mxu1 %v377_v4  ;;  %v356_v3 = vld [vmem:[#allocation10 + $0x150] sm:$0xff]  ;;  %v351_v4 = vld [vmem:[#allocation10 + $0x128] sm:$0xff] }
 0x134   :  { %v511_v13 = vpop.f32.mrf.mxu0  ;;  %v582_v14 = vpop.f32.mrf.mxu1 }
 0x136   :  { %v513_v17 = vpop.f32.mrf.mxu0  ;;  %v584_v18 = vpop.f32.mrf.mxu1 }
 0x137   :  { %v591_v19 = vcombine.low %v511_v13, %v513_v17  ;;  %v592_v20 = vcombine.low %v582_v14, %v584_v18  ;;  %v349_v13 = vld [vmem:[#allocation10 + $0x118] sm:$0xff]  ;;  %v346_v14 = vld [vmem:[#allocation10 + $0x100] sm:$0xff] }
 0x138   :  { %v345_v17 = vld [vmem:[#allocation10 + $0xf8] sm:$0xff]  ;;  %v342_v18 = vld [vmem:[#allocation10 + $0xe0] sm:$0xff] }
 0x139   :  { %v599_v23 = vrot.slane %v591_v19, %v6813_v12  ;;  %v606_v24 = vrot.slane %v592_v20, %v6813_v12  ;;  %v344_v19 = vld [vmem:[#allocation10 + $0xf0] sm:$0xff]  ;;  %v339_v20 = vld [vmem:[#allocation10 + $0xc8] sm:$0xff] }
 0x13b   :  { %v607_v27 = vcombine.low %v599_v23, %v606_v24  ;;  %v340_v23 = vld [vmem:[#allocation10 + $0xd0] sm:$0xff]  ;;  %v335_v24 = vld [vmem:[#allocation10 + $0xa8] sm:$0xff] }
 0x13d   :  { %v614_v28 = vrot.slane %v607_v27, %v6813_v12  ;;  %v336_v27 = vld [vmem:[#allocation10 + $0xb0] sm:$0xff] }
 0x13f   :  { %v616_v30 = vadd.f32 %v614_v28, %v444_v26  ;;  %v334_v26 = vld [vmem:[#allocation10 + $0xa0] sm:$0xff]  ;;  %v331_v28 = vld [vmem:[#allocation10 + $0x88] sm:$0xff] }
 0x141   :  { %v642_v31 = vadd.f32 %v6823_v29, %v616_v30  ;;  %v333_v30 = vld [vmem:[#allocation10 + $0x98] sm:$0xff] }
 0x143   :  { %v4879_v32 = vmul.f32 -1.442695, %v642_v31 }
 0x145   :  { %5010 = vpow2.f32 %v4879_v32  ;;  %v332_v32 = vld [vmem:[#allocation10 + $0x90] sm:$0xff] }
 0x146   :  { %5012 = vtanh.f32 %v642_v31  ;;  %v330_v31 = vld [vmem:[#allocation10 + $0x80] sm:$0xff] }
 0x152   :  { %v5011_v33 = vpop.eup %5010 }
 0x153   :  { %v646_v34 = vadd.f32 1.0, %v5011_v33  ;;  %v5013_v35 = vpop.eup %5012  ;;  %v327_v33 = vld [vmem:[#allocation10 + $0x68] sm:$0xff] }
 0x154   :  { %v655_v38 = vrot.slane %v5013_v35, 2  ;;  %v326_v35 = vld [vmem:[#allocation10 + $0x60] sm:$0xff] }
 0x155   :  { %5014 = vrcp.f32 %v646_v34  ;;  %v329_v34 = vld [vmem:[#allocation10 + $0x78] sm:$0xff] }
 0x162   :  { %v5015_v36 = vpop.eup %5014 }
 0x163   :  { %v651_v37 = vrot.slane %v5015_v36, 1  ;;  %v657_v40 = vmul.f32 %v5015_v36, %v655_v38  ;;  %v660_v42 = vrot.slane %v5015_v36, 3  ;;  %v328_v36 = vld [vmem:[#allocation10 + $0x70] sm:$0xff]  ;;  %v325_v38 = vld [vmem:[#allocation10 + $0x58] sm:$0xff] }
 0x165   :  { %v653_v39 = vmul.f32 0.0, %v651_v37  ;;  %v323_v37 = vld [vmem:[#allocation10 + $0x48] sm:$0xff] }
 0x167   :  { %v6826_v41 = vadd.f32 %v657_v40, %v653_v39  ;;  %v322_v39 = vld [vmem:[#allocation10 + $0x40] sm:$0xff]  ;;  %v324_v40 = vld [vmem:[#allocation10 + $0x50] sm:$0xff] }
 0x169   :  { %5016 = vtanh.f32 %v6826_v41 }
 0x176   :  { %v5017_v43 = vpop.eup %5016 }
 0x177   :  { %v6829_v44 = vmul.f32 %v5017_v43, %v660_v42  ;;  %v319_v42 = vld [vmem:[#allocation10 + $0x28] sm:$0xff]  ;;  %v321_v43 = vld [vmem:[#allocation10 + $0x38] sm:$0xff] }
 0x179   :  { %748 = vmatmul.mubr.f32.vlgmr.msra.gmra.mxu0 %v6829_v44  ;;  %819 = vmatmul.mubr.f32.vlgmr.msra.gmra.mxu1 %v6829_v44 }
 0x17a   :  { %870 = vmatpush1.msra.mxu0 %v374_v45  ;;  %941 = vmatpush1.msra.mxu1 %v376_v46  ;;  %v318_v45 = vld [vmem:[#allocation10 + $0x20] sm:$0xff]  ;;  %v320_v46 = vld [vmem:[#allocation10 + $0x30] sm:$0xff] }
 0x17b   :  { %871 = vmatprep.subr.mxu0 %v371_v47  ;;  %942 = vmatprep.subr.mxu1 %v373_v48  ;;  %v315_v47 = vld [vmem:[#allocation10 + $0x8] sm:$0xff]  ;;  %v317_v48 = vld [vmem:[#allocation10 + $0x18] sm:$0xff] }
 0x17c   :  { %872 = vmatpush1.msra.mxu0 %v370_v49  ;;  %943 = vmatpush1.msra.mxu1 %v372_v50  ;;  %v6835_v49 = vld [vmem:[#allocation10] sm:$0xff]  ;;  %v6837_v50 = vld [vmem:[#allocation10 + $0x10] sm:$0xff] }
 0x17d   :  { %873 = vmatprep.subr.mxu0 %v367_v51  ;;  %944 = vmatprep.subr.mxu1 %v369_v52  ;;  %v6841_v51 = vld [vmem:[#allocation10 + $0x3e8] sm:$0xff]  ;;  %v6843_v52 = vld [vmem:[#allocation10 + $0x3f8] sm:$0xff] }
 0x17e   :  { %874 = vmatpush1.msra.mxu0 %v366_v53  ;;  %945 = vmatpush1.msra.mxu1 %v368_v54  ;;  %v6847_v53 = vld [vmem:[#allocation10 + $0x3e0] sm:$0xff]  ;;  %v6849_v54 = vld [vmem:[#allocation10 + $0x3f0] sm:$0xff] }
 0x17f   :  { %875 = vmatprep.subr.mxu0 %v363_v55  ;;  %946 = vmatprep.subr.mxu1 %v365_v56  ;;  %v6853_v55 = vld [vmem:[#allocation10 + $0x3c8] sm:$0xff]  ;;  %v6855_v56 = vld [vmem:[#allocation10 + $0x3d8] sm:$0xff] }
 0x180   :  { %876 = vmatpush1.msra.mxu0 %v362_v57  ;;  %947 = vmatpush1.msra.mxu1 %v364_v58  ;;  %v6859_v57 = vld [vmem:[#allocation10 + $0x3c0] sm:$0xff]  ;;  %v6861_v58 = vld [vmem:[#allocation10 + $0x3d0] sm:$0xff] }
 0x181   :  { %933 = vmatprep.mubr.f32.mxu0 %v11299_v0  ;;  %1004 = vmatprep.mubr.f32.mxu1 %v11299_v0  ;;  %v6999_v0 = vld [vmem:[#allocation10 + $0x240] sm:$0xff] }
 0x182   :  { %877 = vmatprep.subr.mxu0 %v359_v59  ;;  %948 = vmatprep.subr.mxu1 %v361_v60  ;;  %v6865_v59 = vld [vmem:[#allocation10 + $0x3a8] sm:$0xff]  ;;  %v6867_v60 = vld [vmem:[#allocation10 + $0x3b8] sm:$0xff]  ;;  %12183 = vst [vmem:[#allocation40_spill] sm:$0xff] %v6999_v0 }
 0x183   :  { %878 = vmatpush1.msra.mxu0 %v358_v61  ;;  %949 = vmatpush1.msra.mxu1 %v360_v62  ;;  %v6871_v61 = vld [vmem:[#allocation10 + $0x3a0] sm:$0xff]  ;;  %v6873_v62 = vld [vmem:[#allocation10 + $0x3b0] sm:$0xff] }
 0x184   :  { %879 = vmatprep.subr.mxu0 %v355_v63  ;;  %950 = vmatprep.subr.mxu1 %v357_v1  ;;  %v6877_v63 = vld [vmem:[#allocation10 + $0x388] sm:$0xff]  ;;  %v6879_v1 = vld [vmem:[#allocation10 + $0x398] sm:$0xff] }
 0x185   :  { %880 = vmatpush1.msra.mxu0 %v354_v2  ;;  %951 = vmatpush1.msra.mxu1 %v356_v3  ;;  %v6883_v2 = vld [vmem:[#allocation10 + $0x380] sm:$0xff]  ;;  %v6885_v3 = vld [vmem:[#allocation10 + $0x390] sm:$0xff] }
 0x186   :  { %881 = vmatprep.subr.mxu0 %v351_v4  ;;  %952 = vmatprep.subr.mxu1 %v353_v5  ;;  %v6889_v4 = vld [vmem:[#allocation10 + $0x368] sm:$0xff]  ;;  %v6891_v5 = vld [vmem:[#allocation10 + $0x378] sm:$0xff] }
 0x187   :  { %882 = vmatpush1.msra.mxu0 %v350_v6  ;;  %953 = vmatpush1.msra.mxu1 %v352_v7  ;;  %v6895_v6 = vld [vmem:[#allocation10 + $0x360] sm:$0xff]  ;;  %v6897_v7 = vld [vmem:[#allocation10 + $0x370] sm:$0xff] }
 0x188   :  { %883 = vmatprep.subr.mxu0 %v347_v8  ;;  %954 = vmatprep.subr.mxu1 %v349_v13  ;;  %v6901_v8 = vld [vmem:[#allocation10 + $0x348] sm:$0xff]  ;;  %v6903_v13 = vld [vmem:[#allocation10 + $0x358] sm:$0xff] }
 0x189   :  { %884 = vmatpush1.msra.mxu0 %v346_v14  ;;  %955 = vmatpush1.msra.mxu1 %v348_v15  ;;  %v6907_v14 = vld [vmem:[#allocation10 + $0x340] sm:$0xff]  ;;  %v6909_v15 = vld [vmem:[#allocation10 + $0x350] sm:$0xff] }
 0x18a   :  { %885 = vmatprep.subr.mxu0 %v343_v16  ;;  %956 = vmatprep.subr.mxu1 %v345_v17  ;;  %v6913_v16 = vld [vmem:[#allocation10 + $0x328] sm:$0xff]  ;;  %v6915_v17 = vld [vmem:[#allocation10 + $0x338] sm:$0xff] }
 0x18b   :  { %886 = vmatpush1.msra.mxu0 %v342_v18  ;;  %957 = vmatpush1.msra.mxu1 %v344_v19  ;;  %v6919_v18 = vld [vmem:[#allocation10 + $0x320] sm:$0xff]  ;;  %v6921_v19 = vld [vmem:[#allocation10 + $0x330] sm:$0xff] }
 0x18c   :  { %887 = vmatprep.subr.mxu0 %v339_v20  ;;  %958 = vmatprep.subr.mxu1 %v341_v21  ;;  %v6925_v20 = vld [vmem:[#allocation10 + $0x308] sm:$0xff]  ;;  %v6927_v21 = vld [vmem:[#allocation10 + $0x318] sm:$0xff] }
 0x18d   :  { %888 = vmatpush1.msra.mxu0 %v338_v22  ;;  %959 = vmatpush1.msra.mxu1 %v340_v23  ;;  %v6931_v22 = vld [vmem:[#allocation10 + $0x300] sm:$0xff]  ;;  %v6933_v23 = vld [vmem:[#allocation10 + $0x310] sm:$0xff] }
 0x18e   :  { %889 = vmatprep.subr.mxu0 %v335_v24  ;;  %960 = vmatprep.subr.mxu1 %v337_v25  ;;  %v6937_v24 = vld [vmem:[#allocation10 + $0x2e8] sm:$0xff]  ;;  %v6939_v25 = vld [vmem:[#allocation10 + $0x2f8] sm:$0xff] }
 0x18f   :  { %890 = vmatpush1.msra.mxu0 %v334_v26  ;;  %961 = vmatpush1.msra.mxu1 %v336_v27  ;;  %v6943_v26 = vld [vmem:[#allocation10 + $0x2e0] sm:$0xff]  ;;  %v6945_v27 = vld [vmem:[#allocation10 + $0x2f0] sm:$0xff] }
 0x190   :  { %891 = vmatprep.subr.mxu0 %v331_v28  ;;  %962 = vmatprep.subr.mxu1 %v333_v30  ;;  %v6947_v28 = vld [vmem:[#allocation10 + $0x2c8] sm:$0xff]  ;;  %v6951_v30 = vld [vmem:[#allocation10 + $0x2d8] sm:$0xff] }
 0x191   :  { %892 = vmatpush1.msra.mxu0 %v330_v31  ;;  %963 = vmatpush1.msra.mxu1 %v332_v32  ;;  %12165 = vst [vmem:[#allocation22_spill] sm:$0xff] %v6947_v28  ;;  %12166 = vst [vmem:[#allocation23_spill] sm:$0xff] %v6951_v30  ;;  %v6953_v31 = vld [vmem:[#allocation10 + $0x2c0] sm:$0xff]  ;;  %v6955_v32 = vld [vmem:[#allocation10 + $0x2d0] sm:$0xff] }
 0x192   :  { %893 = vmatprep.subr.mxu0 %v327_v33  ;;  %964 = vmatprep.subr.mxu1 %v329_v34  ;;  %12167 = vst [vmem:[#allocation24_spill] sm:$0xff] %v6953_v31  ;;  %12168 = vst [vmem:[#allocation25_spill] sm:$0xff] %v6955_v32  ;;  %v6959_v33 = vld [vmem:[#allocation10 + $0x2a8] sm:$0xff]  ;;  %v6961_v34 = vld [vmem:[#allocation10 + $0x2b8] sm:$0xff] }
 0x193   :  { %894 = vmatpush1.msra.mxu0 %v326_v35  ;;  %965 = vmatpush1.msra.mxu1 %v328_v36  ;;  %12169 = vst [vmem:[#allocation26_spill] sm:$0xff] %v6959_v33  ;;  %12170 = vst [vmem:[#allocation27_spill] sm:$0xff] %v6961_v34  ;;  %v6963_v35 = vld [vmem:[#allocation10 + $0x2a0] sm:$0xff]  ;;  %v6967_v36 = vld [vmem:[#allocation10 + $0x2b0] sm:$0xff] }
 0x194   :  { %895 = vmatprep.subr.mxu0 %v323_v37  ;;  %966 = vmatprep.subr.mxu1 %v325_v38  ;;  %12171 = vst [vmem:[#allocation28_spill] sm:$0xff] %v6963_v35  ;;  %12172 = vst [vmem:[#allocation29_spill] sm:$0xff] %v6967_v36  ;;  %v6969_v37 = vld [vmem:[#allocation10 + $0x288] sm:$0xff]  ;;  %v6971_v38 = vld [vmem:[#allocation10 + $0x298] sm:$0xff] }
 0x195   :  { %896 = vmatpush1.msra.mxu0 %v322_v39  ;;  %967 = vmatpush1.msra.mxu1 %v324_v40  ;;  %12173 = vst [vmem:[#allocation30_spill] sm:$0xff] %v6969_v37  ;;  %12174 = vst [vmem:[#allocation31_spill] sm:$0xff] %v6971_v38  ;;  %v6975_v39 = vld [vmem:[#allocation10 + $0x280] sm:$0xff]  ;;  %v6977_v40 = vld [vmem:[#allocation10 + $0x290] sm:$0xff] }
 0x196   :  { %897 = vmatprep.subr.mxu0 %v319_v42  ;;  %968 = vmatprep.subr.mxu1 %v321_v43  ;;  %12175 = vst [vmem:[#allocation32_spill] sm:$0xff] %v6975_v39  ;;  %12176 = vst [vmem:[#allocation33_spill] sm:$0xff] %v6977_v40  ;;  %v6981_v42 = vld [vmem:[#allocation10 + $0x268] sm:$0xff]  ;;  %v6983_v43 = vld [vmem:[#allocation10 + $0x278] sm:$0xff] }
 0x197   :  { %898 = vmatpush1.msra.mxu0 %v318_v45  ;;  %969 = vmatpush1.msra.mxu1 %v320_v46  ;;  %12177 = vst [vmem:[#allocation34_spill] sm:$0xff] %v6981_v42  ;;  %12178 = vst [vmem:[#allocation35_spill] sm:$0xff] %v6983_v43  ;;  %v6987_v45 = vld [vmem:[#allocation10 + $0x260] sm:$0xff]  ;;  %v6989_v46 = vld [vmem:[#allocation10 + $0x270] sm:$0xff] }
 0x198   :  { %899 = vmatprep.subr.mxu0 %v315_v47  ;;  %970 = vmatprep.subr.mxu1 %v317_v48  ;;  %12179 = vst [vmem:[#allocation36_spill] sm:$0xff] %v6987_v45  ;;  %12180 = vst [vmem:[#allocation37_spill] sm:$0xff] %v6989_v46  ;;  %v6993_v47 = vld [vmem:[#allocation10 + $0x248] sm:$0xff]  ;;  %v6995_v48 = vld [vmem:[#allocation10 + $0x258] sm:$0xff] }
 0x199   :  { %900 = vmatpush1.msra.mxu0 %v6835_v49  ;;  %971 = vmatpush1.msra.mxu1 %v6837_v50  ;;  %12181 = vst [vmem:[#allocation38_spill] sm:$0xff] %v6993_v47  ;;  %12182 = vst [vmem:[#allocation39_spill] sm:$0xff] %v6995_v48 }
 0x19a   :  { %901 = vmatprep.subr.mxu0 %v6841_v51  ;;  %972 = vmatprep.subr.mxu1 %v6843_v52 }
 0x19b   :  { %902 = vmatpush2.msra.mxu0 %v6847_v53  ;;  %973 = vmatpush2.msra.mxu1 %v6849_v54 }
 0x19c   :  { %903 = vmatprep.subr.mxu0 %v6853_v55  ;;  %974 = vmatprep.subr.mxu1 %v6855_v56 }
 0x19d   :  { %904 = vmatpush2.msra.mxu0 %v6859_v57  ;;  %975 = vmatpush2.msra.mxu1 %v6861_v58 }
 0x19e   :  { %905 = vmatprep.subr.mxu0 %v6865_v59  ;;  %976 = vmatprep.subr.mxu1 %v6867_v60 }
 0x19f   :  { %906 = vmatpush2.msra.mxu0 %v6871_v61  ;;  %977 = vmatpush2.msra.mxu1 %v6873_v62 }
 0x1a0   :  { %907 = vmatprep.subr.mxu0 %v6877_v63  ;;  %978 = vmatprep.subr.mxu1 %v6879_v1 }
 0x1a1   :  { %908 = vmatpush2.msra.mxu0 %v6883_v2  ;;  %979 = vmatpush2.msra.mxu1 %v6885_v3 }
 0x1a2   :  { %909 = vmatprep.subr.mxu0 %v6889_v4  ;;  %980 = vmatprep.subr.mxu1 %v6891_v5 }
 0x1a3   :  { %910 = vmatpush2.msra.mxu0 %v6895_v6  ;;  %981 = vmatpush2.msra.mxu1 %v6897_v7 }
 0x1a4   :  { %911 = vmatprep.subr.mxu0 %v6901_v8  ;;  %982 = vmatprep.subr.mxu1 %v6903_v13 }
 0x1a5   :  { %912 = vmatpush2.msra.mxu0 %v6907_v14  ;;  %983 = vmatpush2.msra.mxu1 %v6909_v15 }
 0x1a6   :  { %913 = vmatprep.subr.mxu0 %v6913_v16  ;;  %984 = vmatprep.subr.mxu1 %v6915_v17 }
 0x1a7   :  { %914 = vmatpush2.msra.mxu0 %v6919_v18  ;;  %985 = vmatpush2.msra.mxu1 %v6921_v19 }
 0x1a8   :  { %915 = vmatprep.subr.mxu0 %v6925_v20  ;;  %986 = vmatprep.subr.mxu1 %v6927_v21 }
 0x1a9   :  { %916 = vmatpush2.msra.mxu0 %v6931_v22  ;;  %987 = vmatpush2.msra.mxu1 %v6933_v23 }
 0x1aa   :  { %917 = vmatprep.subr.mxu0 %v6937_v24  ;;  %988 = vmatprep.subr.mxu1 %v6939_v25 }
 0x1ab   :  { %918 = vmatpush2.msra.mxu0 %v6943_v26  ;;  %989 = vmatpush2.msra.mxu1 %v6945_v27 }
 0x1ac   :  { %919 = vmatprep.subr.mxu0 %v6947_v28  ;;  %990 = vmatprep.subr.mxu1 %v6951_v30 }
 0x1ad   :  { %920 = vmatpush2.msra.mxu0 %v6953_v31  ;;  %991 = vmatpush2.msra.mxu1 %v6955_v32 }
 0x1ae   :  { %921 = vmatprep.subr.mxu0 %v6959_v33  ;;  %992 = vmatprep.subr.mxu1 %v6961_v34 }
 0x1af   :  { %922 = vmatpush2.msra.mxu0 %v6963_v35  ;;  %993 = vmatpush2.msra.mxu1 %v6967_v36 }
 0x1b0   :  { %923 = vmatprep.subr.mxu0 %v6969_v37  ;;  %994 = vmatprep.subr.mxu1 %v6971_v38  ;;  %v7001_v37 = vld [vmem:[#allocation10 + $0x250] sm:$0xff]  ;;  %v7005_v38 = vld [vmem:[#allocation10 + $0x228] sm:$0xff] }
 0x1b1   :  { %924 = vmatpush2.msra.mxu0 %v6975_v39  ;;  %995 = vmatpush2.msra.mxu1 %v6977_v40  ;;  %12184 = vst [vmem:[#allocation41_spill] sm:$0xff] %v7001_v37  ;;  %12185 = vst [vmem:[#allocation42_spill] sm:$0xff] %v7005_v38  ;;  %v7007_v39 = vld [vmem:[#allocation10 + $0x238] sm:$0xff]  ;;  %v7011_v40 = vld [vmem:[#allocation10 + $0x220] sm:$0xff] }
 0x1b2   :  { %925 = vmatprep.subr.mxu0 %v6981_v42  ;;  %996 = vmatprep.subr.mxu1 %v6983_v43  ;;  %12186 = vst [vmem:[#allocation43_spill] sm:$0xff] %v7007_v39  ;;  %12187 = vst [vmem:[#allocation44_spill] sm:$0xff] %v7011_v40  ;;  %v7013_v42 = vld [vmem:[#allocation10 + $0x230] sm:$0xff]  ;;  %v7017_v43 = vld [vmem:[#allocation10 + $0x208] sm:$0xff] }
 0x1b3   :  { %926 = vmatpush2.msra.mxu0 %v6987_v45  ;;  %997 = vmatpush2.msra.mxu1 %v6989_v46  ;;  %12188 = vst [vmem:[#allocation45_spill] sm:$0xff] %v7013_v42  ;;  %12189 = vst [vmem:[#allocation46_spill] sm:$0xff] %v7017_v43  ;;  %v7019_v45 = vld [vmem:[#allocation10 + $0x218] sm:$0xff]  ;;  %v7023_v46 = vld [vmem:[#allocation10 + $0x200] sm:$0xff] }
 0x1b4   :  { %927 = vmatprep.subr.mxu0 %v6993_v47  ;;  %998 = vmatprep.subr.mxu1 %v6995_v48  ;;  %12190 = vst [vmem:[#allocation47_spill] sm:$0xff] %v7019_v45  ;;  %12191 = vst [vmem:[#allocation48_spill] sm:$0xff] %v7023_v46  ;;  %v7025_v47 = vld [vmem:[#allocation10 + $0x210] sm:$0xff] }
 0x1b5   :  { %928 = vmatpush2.msra.mxu0 %v6999_v0  ;;  %999 = vmatpush2.msra.mxu1 %v7001_v37  ;;  %12192 = vst [vmem:[#allocation49_spill] sm:$0xff] %v7025_v47  ;;  %v7033_v37 = vld [vmem:[#allocation7 + $0x1e8] sm:$0xff] }
 0x1b6   :  { %929 = vmatprep.subr.mxu0 %v7005_v38  ;;  %1000 = vmatprep.subr.mxu1 %v7007_v39  ;;  %12193 = vst [vmem:[#allocation50_spill] sm:$0xff] %v7033_v37  ;;  %v7036_v39 = vld [vmem:[#allocation7 + $0x1f8] sm:$0xff] }
 0x1b7   :  { %930 = vmatpush2.msra.mxu0 %v7011_v40  ;;  %1001 = vmatpush2.msra.mxu1 %v7013_v42  ;;  %12194 = vst [vmem:[#allocation51_spill] sm:$0xff] %v7036_v39  ;;  %v665_v40 = vsub.s32 1, %v6806_v9  ;;  %v669_v42 = vsub.s32 5, %v6806_v9 }
 0x1b8   :  { %931 = vmatprep.subr.mxu0 %v7017_v43  ;;  %1002 = vmatprep.subr.mxu1 %v7019_v45 }
 0x1b9   :  { %932 = vmatpush2.msra.mxu0 %v7023_v46  ;;  %1003 = vmatpush2.msra.mxu1 %v7025_v47  ;;  %v7042_v43 = vrot.slane %v6808_v10, %v665_v40  ;;  %v7045_v45 = vrot.slane %v6808_v10, %v669_v42  ;;  %v7050_v36 = vrot.slane %v6810_v11, %v669_v42 }
 0x1ba   :  { %1038 = vmatprep.subr.mxu0 %v7033_v37  ;;  %1109 = vmatprep.subr.mxu1 %v7036_v39  ;;  %v7054_v10 = vrot.slane %v6810_v11, %v665_v40 }
 0x1bb   :  { %12195 = vst [vmem:[#allocation52_spill] sm:$0xff] %v7042_v43  ;;  %12196 = vst [vmem:[#allocation53_spill] sm:$0xff] %v7045_v45 }
 0x1bc   :  { %12197 = vst [vmem:[#allocation54_spill] sm:$0xff] %v7050_v36  ;;  %12198 = vst [vmem:[#allocation55_spill] sm:$0xff] %v7054_v10 }
 0x239   :  { %v749_v46 = vpop.f32.mrf.mxu0  ;;  %v820_v48 = vpop.f32.mrf.mxu1 }
 0x23a   :  { %v750_v47 = vadd.f32 %v749_v46, %v7042_v43  ;;  %v821_v46 = vadd.f32 %v820_v48, %v7054_v10  ;;  %v7076_v48 = vld [vmem:[#allocation7 + $0x1c0] sm:$0xff] }
 0x23b   :  { %v751_v38 = vpop.f32.mrf.mxu0  ;;  %v822_v35 = vpop.f32.mrf.mxu1  ;;  %12204 = vst [vmem:[#allocation61_spill] sm:$0xff] %v7076_v48 }
 0x23c   :  { %v4880_v0 = vmul.f32 -1.442695, %v750_v47  ;;  %v752_v37 = vadd.f32 %v751_v38, %v7045_v45  ;;  %v823_v34 = vadd.f32 %v822_v35, %v7050_v36 }
 0x23e   :  { %5018 = vpow2.f32 %v4880_v0  ;;  %v4881_v39 = vmul.f32 -1.442695, %v752_v37  ;;  %v4882_v33 = vmul.f32 -1.442695, %v823_v34 }
 0x240   :  { %5020 = vpow2.f32 %v4881_v39 }
 0x241   :  { %5022 = vpow2.f32 %v4882_v33  ;;  %v7064_v33 = vld [vmem:[#allocation7 + $0x1e0] sm:$0xff] }
 0x242   :  { %12200 = vst [vmem:[#allocation57_spill] sm:$0xff] %v7064_v33 }
 0x24b   :  { %v5019_v32 = vpop.eup %5018 }
 0x24c   :  { %v834_v47 = vadd.f32 1.0, %v5019_v32 }
 0x24d   :  { %v5021_v43 = vpop.eup %5020 }
 0x24e   :  { %5024 = vrcp.f32 %v834_v47  ;;  %v835_v0 = vadd.f32 1.0, %v5021_v43  ;;  %v5023_v37 = vpop.eup %5022  ;;  %v7067_v43 = vld [vmem:[#allocation7 + $0x1f0] sm:$0xff]  ;;  %v7082_v47 = vld [vmem:[#allocation7 + $0x1a8] sm:$0xff] }
 0x24f   :  { %5026 = vtanh.f32 %v821_v46  ;;  %v836_v45 = vadd.f32 1.0, %v5023_v37  ;;  %12201 = vst [vmem:[#allocation58_spill] sm:$0xff] %v7067_v43  ;;  %v7079_v46 = vld [vmem:[#allocation7 + $0x1d0] sm:$0xff]  ;;  %12206 = vst [vmem:[#allocation63_spill] sm:$0xff] %v7082_v47  ;;  %v7088_v37 = vld [vmem:[#allocation7 + $0x1a0] sm:$0xff] }
 0x250   :  { %5028 = vrcp.f32 %v835_v0  ;;  %12205 = vst [vmem:[#allocation62_spill] sm:$0xff] %v7079_v46  ;;  %v7085_v0 = vld [vmem:[#allocation7 + $0x1b8] sm:$0xff]  ;;  %12208 = vst [vmem:[#allocation65_spill] sm:$0xff] %v7088_v37 }
 0x251   :  { %5030 = vrcp.f32 %v836_v45  ;;  %v7073_v45 = vld [vmem:[#allocation7 + $0x1d8] sm:$0xff]  ;;  %12207 = vst [vmem:[#allocation64_spill] sm:$0xff] %v7085_v0 }
 0x252   :  { %12203 = vst [vmem:[#allocation60_spill] sm:$0xff] %v7073_v45 }
 0x25b   :  { %v5025_v38 = vpop.eup %5024 }
 0x25c   :  { %v5027_v39 = vpop.eup %5026 }
 0x25d   :  { %v5029_v42 = vpop.eup %5028  ;;  %v845_v36 = vmul.f32 %v5027_v39, %v5025_v38  ;;  %v7091_v38 = vld [vmem:[#allocation7 + $0x1b0] sm:$0xff]  ;;  %v7094_v39 = vld [vmem:[#allocation7 + $0x188] sm:$0xff] }
 0x25e   :  { %v844_v35 = vmul.f32 0.0, %v5029_v42  ;;  %v5031_v34 = vpop.eup %5030  ;;  %12209 = vst [vmem:[#allocation66_spill] sm:$0xff] %v7091_v38  ;;  %12210 = vst [vmem:[#allocation67_spill] sm:$0xff] %v7094_v39  ;;  %v7097_v42 = vld [vmem:[#allocation7 + $0x198] sm:$0xff] }
 0x25f   :  { %12211 = vst [vmem:[#allocation68_spill] sm:$0xff] %v7097_v42 }
 0x260   :  { %v7057_v11 = vadd.f32 %v845_v36, %v844_v35  ;;  %v7070_v36 = vld [vmem:[#allocation7 + $0x1c8] sm:$0xff]  ;;  %v7100_v35 = vld [vmem:[#allocation7 + $0x180] sm:$0xff] }
 0x261   :  { %12202 = vst [vmem:[#allocation59_spill] sm:$0xff] %v7070_v36  ;;  %12212 = vst [vmem:[#allocation69_spill] sm:$0xff] %v7100_v35 }
 0x262   :  { %12199 = vst [vmem:[#allocation56_spill] sm:$0xff] %v7057_v11  ;;  %5032 = vtanh.f32 %v7057_v11  ;;  %v1036_v11 = vstv %s4886_s6 }
 0x26f   :  { %v5033_v32 = vpop.eup %5032 }
 0x270   :  { %v7060_v40 = vmul.f32 %v5033_v32, %v5031_v34  ;;  %v7103_v34 = vld [vmem:[#allocation7 + $0x190] sm:$0xff]  ;;  %v7106_v32 = vld [vmem:[#allocation7 + $0x168] sm:$0xff] }
 0x271   :  { %12213 = vst [vmem:[#allocation70_spill] sm:$0xff] %v7103_v34  ;;  %12214 = vst [vmem:[#allocation71_spill] sm:$0xff] %v7106_v32 }
 0x272   :  { %934 = vmatmul.mubr.f32.vlgmr.msra.gmra.mxu0 %v7060_v40  ;;  %1005 = vmatmul.mubr.f32.vlgmr.msra.gmra.mxu1 %v7060_v40 }
 0x273   :  { %1039 = vmatpush1.msra.mxu0 %v7064_v33  ;;  %1110 = vmatpush1.msra.mxu1 %v7067_v43 }
 0x274   :  { %1040 = vmatprep.subr.mxu0 %v7070_v36  ;;  %1111 = vmatprep.subr.mxu1 %v7073_v45 }
 0x275   :  { %1041 = vmatpush1.msra.mxu0 %v7076_v48  ;;  %1112 = vmatpush1.msra.mxu1 %v7079_v46 }
 0x276   :  { %1042 = vmatprep.subr.mxu0 %v7082_v47  ;;  %1113 = vmatprep.subr.mxu1 %v7085_v0 }
 0x277   :  { %1043 = vmatpush1.msra.mxu0 %v7088_v37  ;;  %1114 = vmatpush1.msra.mxu1 %v7091_v38  ;;  %v7109_v38 = vld [vmem:[#allocation7 + $0x178] sm:$0xff]  ;;  %v7248_v37 = vld [vmem:[#allocation7 + $0x10] sm:$0xff] }
 0x278   :  { %1044 = vmatprep.subr.mxu0 %v7094_v39  ;;  %1115 = vmatprep.subr.mxu1 %v7097_v42  ;;  %12215 = vst [vmem:[#allocation72_spill] sm:$0xff] %v7109_v38  ;;  %v7112_v39 = vld [vmem:[#allocation7 + $0x160] sm:$0xff]  ;;  %v7115_v42 = vld [vmem:[#allocation7 + $0x170] sm:$0xff]  ;;  %12262 = vst [vmem:[#allocation118_spill] sm:$0xff] %v7248_v37 }
 0x279   :  { %1045 = vmatpush1.msra.mxu0 %v7100_v35  ;;  %1116 = vmatpush1.msra.mxu1 %v7103_v34  ;;  %12216 = vst [vmem:[#allocation73_spill] sm:$0xff] %v7112_v39  ;;  %12217 = vst [vmem:[#allocation74_spill] sm:$0xff] %v7115_v42  ;;  %v7118_v35 = vld [vmem:[#allocation7 + $0x148] sm:$0xff]  ;;  %v7121_v34 = vld [vmem:[#allocation7 + $0x158] sm:$0xff] }
 0x27a   :  { %1046 = vmatprep.subr.mxu0 %v7106_v32  ;;  %1117 = vmatprep.subr.mxu1 %v7109_v38  ;;  %12218 = vst [vmem:[#allocation75_spill] sm:$0xff] %v7118_v35  ;;  %12219 = vst [vmem:[#allocation76_spill] sm:$0xff] %v7121_v34  ;;  %v7124_v32 = vld [vmem:[#allocation7 + $0x140] sm:$0xff]  ;;  %v7127_v38 = vld [vmem:[#allocation7 + $0x150] sm:$0xff] }
 0x27b   :  { %1047 = vmatpush1.msra.mxu0 %v7112_v39  ;;  %1118 = vmatpush1.msra.mxu1 %v7115_v42  ;;  %12220 = vst [vmem:[#allocation77_spill] sm:$0xff] %v7124_v32  ;;  %12221 = vst [vmem:[#allocation78_spill] sm:$0xff] %v7127_v38  ;;  %v7130_v39 = vld [vmem:[#allocation7 + $0x128] sm:$0xff]  ;;  %v7133_v42 = vld [vmem:[#allocation7 + $0x138] sm:$0xff] }
 0x27c   :  { %1048 = vmatprep.subr.mxu0 %v7118_v35  ;;  %1119 = vmatprep.subr.mxu1 %v7121_v34  ;;  %12222 = vst [vmem:[#allocation79_spill] sm:$0xff] %v7130_v39  ;;  %12223 = vst [vmem:[#allocation80_spill] sm:$0xff] %v7133_v42  ;;  %v7136_v35 = vld [vmem:[#allocation7 + $0x120] sm:$0xff]  ;;  %v7139_v34 = vld [vmem:[#allocation7 + $0x130] sm:$0xff] }
 0x27d   :  { %1049 = vmatpush1.msra.mxu0 %v7124_v32  ;;  %1120 = vmatpush1.msra.mxu1 %v7127_v38  ;;  %12224 = vst [vmem:[#allocation81_spill] sm:$0xff] %v7136_v35  ;;  %12225 = vst [vmem:[#allocation82_spill] sm:$0xff] %v7139_v34  ;;  %v7142_v32 = vld [vmem:[#allocation7 + $0x108] sm:$0xff]  ;;  %v7145_v38 = vld [vmem:[#allocation7 + $0x118] sm:$0xff] }
 0x27e   :  { %1050 = vmatprep.subr.mxu0 %v7130_v39  ;;  %1121 = vmatprep.subr.mxu1 %v7133_v42  ;;  %12226 = vst [vmem:[#allocation83_spill] sm:$0xff] %v7142_v32  ;;  %12227 = vst [vmem:[#allocation84_spill] sm:$0xff] %v7145_v38  ;;  %v7148_v39 = vld [vmem:[#allocation7 + $0x100] sm:$0xff]  ;;  %v7151_v42 = vld [vmem:[#allocation7 + $0x110] sm:$0xff] }
 0x27f   :  { %1051 = vmatpush1.msra.mxu0 %v7136_v35  ;;  %1122 = vmatpush1.msra.mxu1 %v7139_v34  ;;  %12228 = vst [vmem:[#allocation85_spill] sm:$0xff] %v7148_v39  ;;  %12229 = vst [vmem:[#allocation86_spill] sm:$0xff] %v7151_v42  ;;  %v7154_v35 = vld [vmem:[#allocation7 + $0xe8] sm:$0xff]  ;;  %v7157_v34 = vld [vmem:[#allocation7 + $0xf8] sm:$0xff] }
 0x280   :  { %1052 = vmatprep.subr.mxu0 %v7142_v32  ;;  %1123 = vmatprep.subr.mxu1 %v7145_v38  ;;  %12230 = vst [vmem:[#allocation87_spill] sm:$0xff] %v7154_v35  ;;  %12231 = vst [vmem:[#allocation88_spill] sm:$0xff] %v7157_v34  ;;  %v7160_v32 = vld [vmem:[#allocation7 + $0xe0] sm:$0xff]  ;;  %v7163_v38 = vld [vmem:[#allocation7 + $0xf0] sm:$0xff] }
 0x281   :  { %1053 = vmatpush1.msra.mxu0 %v7148_v39  ;;  %1124 = vmatpush1.msra.mxu1 %v7151_v42  ;;  %12232 = vst [vmem:[#allocation89_spill] sm:$0xff] %v7160_v32  ;;  %12233 = vst [vmem:[#allocation90_spill] sm:$0xff] %v7163_v38  ;;  %v7166_v39 = vld [vmem:[#allocation7 + $0xc8] sm:$0xff]  ;;  %v7169_v42 = vld [vmem:[#allocation7 + $0xd8] sm:$0xff] }
 0x282   :  { %1054 = vmatprep.subr.mxu0 %v7154_v35  ;;  %1125 = vmatprep.subr.mxu1 %v7157_v34  ;;  %12234 = vst [vmem:[#allocation91_spill] sm:$0xff] %v7166_v39  ;;  %12235 = vst [vmem:[#allocation92_spill] sm:$0xff] %v7169_v42  ;;  %v7172_v35 = vld [vmem:[#allocation7 + $0xc0] sm:$0xff]  ;;  %v7175_v34 = vld [vmem:[#allocation7 + $0xd0] sm:$0xff] }
 0x283   :  { %1055 = vmatpush1.msra.mxu0 %v7160_v32  ;;  %1126 = vmatpush1.msra.mxu1 %v7163_v38  ;;  %12236 = vst [vmem:[#allocation93_spill] sm:$0xff] %v7172_v35  ;;  %12237 = vst [vmem:[#allocation94_spill] sm:$0xff] %v7175_v34  ;;  %v7178_v32 = vld [vmem:[#allocation7 + $0xa8] sm:$0xff]  ;;  %v7181_v38 = vld [vmem:[#allocation7 + $0xb8] sm:$0xff] }
 0x284   :  { %1056 = vmatprep.subr.mxu0 %v7166_v39  ;;  %1127 = vmatprep.subr.mxu1 %v7169_v42  ;;  %12238 = vst [vmem:[#allocation95_spill] sm:$0xff] %v7178_v32  ;;  %12239 = vst [vmem:[#allocation96_spill] sm:$0xff] %v7181_v38  ;;  %v7184_v39 = vld [vmem:[#allocation7 + $0xa0] sm:$0xff]  ;;  %v7187_v42 = vld [vmem:[#allocation7 + $0xb0] sm:$0xff] }
 0x285   :  { %1057 = vmatpush1.msra.mxu0 %v7172_v35  ;;  %1128 = vmatpush1.msra.mxu1 %v7175_v34  ;;  %12240 = vst [vmem:[#allocation97_spill] sm:$0xff] %v7184_v39  ;;  %12241 = vst [vmem:[#allocation98_spill] sm:$0xff] %v7187_v42  ;;  %v7190_v35 = vld [vmem:[#allocation7 + $0x88] sm:$0xff]  ;;  %v7193_v34 = vld [vmem:[#allocation7 + $0x98] sm:$0xff] }
 0x286   :  { %1058 = vmatprep.subr.mxu0 %v7178_v32  ;;  %1129 = vmatprep.subr.mxu1 %v7181_v38  ;;  %12242 = vst [vmem:[#allocation99_spill] sm:$0xff] %v7190_v35  ;;  %12243 = vst [vmem:[#allocation100_spill] sm:$0xff] %v7193_v34  ;;  %v7196_v32 = vld [vmem:[#allocation7 + $0x80] sm:$0xff]  ;;  %v7199_v38 = vld [vmem:[#allocation7 + $0x90] sm:$0xff] }
 0x287   :  { %1059 = vmatpush1.msra.mxu0 %v7184_v39  ;;  %1130 = vmatpush1.msra.mxu1 %v7187_v42  ;;  %12244 = vst [vmem:[#allocation101_spill] sm:$0xff] %v7196_v32  ;;  %12245 = vst [vmem:[#allocation102_spill] sm:$0xff] %v7199_v38  ;;  %v7202_v39 = vld [vmem:[#allocation7 + $0x68] sm:$0xff]  ;;  %v7205_v42 = vld [vmem:[#allocation7 + $0x78] sm:$0xff] }
 0x288   :  { %1060 = vmatprep.subr.mxu0 %v7190_v35  ;;  %1131 = vmatprep.subr.mxu1 %v7193_v34  ;;  %12246 = vst [vmem:[#allocation103_spill] sm:$0xff] %v7202_v39  ;;  %12247 = vst [vmem:[#allocation104_spill] sm:$0xff] %v7205_v42  ;;  %v7208_v35 = vld [vmem:[#allocation7 + $0x60] sm:$0xff]  ;;  %v7211_v34 = vld [vmem:[#allocation7 + $0x70] sm:$0xff] }
 0x289   :  { %1061 = vmatpush1.msra.mxu0 %v7196_v32  ;;  %1132 = vmatpush1.msra.mxu1 %v7199_v38  ;;  %12248 = vst [vmem:[#allocation105_spill] sm:$0xff] %v7208_v35  ;;  %12249 = vst [vmem:[#allocation106_spill] sm:$0xff] %v7211_v34  ;;  %v7214_v32 = vld [vmem:[#allocation7 + $0x48] sm:$0xff]  ;;  %v7217_v38 = vld [vmem:[#allocation7 + $0x58] sm:$0xff] }
 0x28a   :  { %1062 = vmatprep.subr.mxu0 %v7202_v39  ;;  %1133 = vmatprep.subr.mxu1 %v7205_v42  ;;  %12250 = vst [vmem:[#allocation107_spill] sm:$0xff] %v7214_v32  ;;  %12251 = vst [vmem:[#allocation108_spill] sm:$0xff] %v7217_v38  ;;  %v7220_v39 = vld [vmem:[#allocation7 + $0x40] sm:$0xff]  ;;  %v7223_v42 = vld [vmem:[#allocation7 + $0x50] sm:$0xff] }
 0x28b   :  { %1063 = vmatpush1.msra.mxu0 %v7208_v35  ;;  %1134 = vmatpush1.msra.mxu1 %v7211_v34  ;;  %12252 = vst [vmem:[#allocation109_spill] sm:$0xff] %v7220_v39  ;;  %12253 = vst [vmem:[#allocation110_spill] sm:$0xff] %v7223_v42  ;;  %v7226_v35 = vld [vmem:[#allocation7 + $0x28] sm:$0xff]  ;;  %v7229_v34 = vld [vmem:[#allocation7 + $0x38] sm:$0xff] }
 0x28c   :  { %1064 = vmatprep.subr.mxu0 %v7214_v32  ;;  %1135 = vmatprep.subr.mxu1 %v7217_v38  ;;  %12254 = vst [vmem:[#allocation111_spill] sm:$0xff] %v7226_v35  ;;  %12255 = vst [vmem:[#allocation112_spill] sm:$0xff] %v7229_v34  ;;  %v7232_v32 = vld [vmem:[#allocation7 + $0x20] sm:$0xff]  ;;  %v7235_v38 = vld [vmem:[#allocation7 + $0x30] sm:$0xff] }
 0x28d   :  { %1065 = vmatpush1.msra.mxu0 %v7220_v39  ;;  %1136 = vmatpush1.msra.mxu1 %v7223_v42  ;;  %12256 = vst [vmem:[#allocation113_spill] sm:$0xff] %v7232_v32  ;;  %12257 = vst [vmem:[#allocation114_spill] sm:$0xff] %v7235_v38  ;;  %v7238_v39 = vld [vmem:[#allocation7 + $0x8] sm:$0xff]  ;;  %v7241_v42 = vld [vmem:[#allocation7 + $0x18] sm:$0xff] }
 0x28e   :  { %1066 = vmatprep.subr.mxu0 %v7226_v35  ;;  %1137 = vmatprep.subr.mxu1 %v7229_v34  ;;  %12258 = vst [vmem:[#allocation115_spill] sm:$0xff] %v7238_v39  ;;  %12259 = vst [vmem:[#allocation116_spill] sm:$0xff] %v7241_v42  ;;  %v7244_v35 = vld [vmem:[#allocation7] sm:$0xff]  ;;  %v12261_v34 = vmov 0.0  }
 0x28f   :  { %1067 = vmatpush1.msra.mxu0 %v7232_v32  ;;  %1138 = vmatpush1.msra.mxu1 %v7235_v38  ;;  %12260 = vst [vmem:[#allocation117_spill] sm:$0xff] %v7244_v35  ;;  %v5524_v32 = vld [vmem:[#allocation12] sm:$0x77] }
 0x290   :  { %1068 = vmatprep.subr.mxu0 %v7238_v39  ;;  %1139 = vmatprep.subr.mxu1 %v7241_v42  ;;  %v7256_v42 = vld [vmem:[#allocation9 + $0x1e8] sm:$0xff]  ;;  %v7262_v39 = vld [vmem:[#allocation9 + $0x1e0] sm:$0xff] }
 0x291   :  { %1069 = vmatpush1.msra.mxu0 %v7244_v35  ;;  %1102 = vmatprep.mubr.f32.mxu0 %v12261_v34  ;;  %12263 = vst [vmem:[#allocation119_spill] sm:$0xff] %v7256_v42  ;;  %v7259_v35 = vld [vmem:[#allocation9 + $0x1f8] sm:$0xff]  ;;  %12265 = vst [vmem:[#allocation121_spill] sm:$0xff] %v7262_v39 }
 0x292   :  { %1140 = vmatpush1.msra.mxu1 %v7248_v37  ;;  %1173 = vmatprep.mubr.f32.mxu1 %v12261_v34  ;;  %12264 = vst [vmem:[#allocation120_spill] sm:$0xff] %v7259_v35  ;;  %v7265_v37 = vld [vmem:[#allocation9 + $0x1f0] sm:$0xff] }
 0x293   :  { %1103 = vmatmul.mubr.f32.vlgmr.msra.gmra.mxu0 %v6829_v44  ;;  %1174 = vmatmul.mubr.f32.vlgmr.msra.gmra.mxu1 %v6829_v44  ;;  %12266 = vst [vmem:[#allocation122_spill] sm:$0xff] %v7265_v37  ;;  %v7268_v44 = vld [vmem:[#allocation9 + $0x1c8] sm:$0xff] }
 0x294   :  { %1295 = vmatprep.mubr.f32.mxu0 %v7060_v40  ;;  %1366 = vmatprep.mubr.f32.mxu1 %v7060_v40  ;;  %12267 = vst [vmem:[#allocation123_spill] sm:$0xff] %v7268_v44  ;;  %v7271_v40 = vld [vmem:[#allocation9 + $0x1d8] sm:$0xff] }
 0x295   :  { %1231 = vmatprep.subr.mxu0 %v7256_v42  ;;  %1302 = vmatprep.subr.mxu1 %v7259_v35  ;;  %12268 = vst [vmem:[#allocation124_spill] sm:$0xff] %v7271_v40  ;;  %v7274_v42 = vld [vmem:[#allocation9 + $0x1c0] sm:$0xff]  ;;  %v7277_v35 = vld [vmem:[#allocation9 + $0x1d0] sm:$0xff] }
 0x296   :  { %1232 = vmatpush1.msra.mxu0 %v7262_v39  ;;  %1303 = vmatpush1.msra.mxu1 %v7265_v37  ;;  %12269 = vst [vmem:[#allocation125_spill] sm:$0xff] %v7274_v42  ;;  %12270 = vst [vmem:[#allocation126_spill] sm:$0xff] %v7277_v35  ;;  %v7280_v39 = vld [vmem:[#allocation9 + $0x1a8] sm:$0xff]  ;;  %v7283_v37 = vld [vmem:[#allocation9 + $0x1b8] sm:$0xff] }
 0x297   :  { %1233 = vmatprep.subr.mxu0 %v7268_v44  ;;  %1304 = vmatprep.subr.mxu1 %v7271_v40  ;;  %12271 = vst [vmem:[#allocation127_spill] sm:$0xff] %v7280_v39  ;;  %12272 = vst [vmem:[#allocation128_spill] sm:$0xff] %v7283_v37  ;;  %v7286_v44 = vld [vmem:[#allocation9 + $0x1a0] sm:$0xff]  ;;  %v7289_v40 = vld [vmem:[#allocation9 + $0x1b0] sm:$0xff] }
 0x298   :  { %1234 = vmatpush1.msra.mxu0 %v7274_v42  ;;  %1305 = vmatpush1.msra.mxu1 %v7277_v35  ;;  %12273 = vst [vmem:[#allocation129_spill] sm:$0xff] %v7286_v44  ;;  %12274 = vst [vmem:[#allocation130_spill] sm:$0xff] %v7289_v40  ;;  %v7292_v42 = vld [vmem:[#allocation9 + $0x188] sm:$0xff]  ;;  %v7295_v35 = vld [vmem:[#allocation9 + $0x198] sm:$0xff] }
 0x299   :  { %1235 = vmatprep.subr.mxu0 %v7280_v39  ;;  %1306 = vmatprep.subr.mxu1 %v7283_v37  ;;  %12275 = vst [vmem:[#allocation131_spill] sm:$0xff] %v7292_v42  ;;  %12276 = vst [vmem:[#allocation132_spill] sm:$0xff] %v7295_v35  ;;  %v7298_v39 = vld [vmem:[#allocation9 + $0x180] sm:$0xff]  ;;  %v7301_v37 = vld [vmem:[#allocation9 + $0x190] sm:$0xff] }
 0x29a   :  { %1236 = vmatpush1.msra.mxu0 %v7286_v44  ;;  %1307 = vmatpush1.msra.mxu1 %v7289_v40  ;;  %12277 = vst [vmem:[#allocation133_spill] sm:$0xff] %v7298_v39  ;;  %12278 = vst [vmem:[#allocation134_spill] sm:$0xff] %v7301_v37  ;;  %v7304_v44 = vld [vmem:[#allocation9 + $0x168] sm:$0xff]  ;;  %v7307_v40 = vld [vmem:[#allocation9 + $0x178] sm:$0xff] }
 0x29b   :  { %1237 = vmatprep.subr.mxu0 %v7292_v42  ;;  %1308 = vmatprep.subr.mxu1 %v7295_v35  ;;  %12279 = vst [vmem:[#allocation135_spill] sm:$0xff] %v7304_v44  ;;  %12280 = vst [vmem:[#allocation136_spill] sm:$0xff] %v7307_v40  ;;  %v7310_v42 = vld [vmem:[#allocation9 + $0x160] sm:$0xff]  ;;  %v7313_v35 = vld [vmem:[#allocation9 + $0x170] sm:$0xff] }
 0x29c   :  { %1238 = vmatpush1.msra.mxu0 %v7298_v39  ;;  %1309 = vmatpush1.msra.mxu1 %v7301_v37  ;;  %12281 = vst [vmem:[#allocation137_spill] sm:$0xff] %v7310_v42  ;;  %12282 = vst [vmem:[#allocation138_spill] sm:$0xff] %v7313_v35  ;;  %v7316_v39 = vld [vmem:[#allocation9 + $0x148] sm:$0xff]  ;;  %v7319_v37 = vld [vmem:[#allocation9 + $0x158] sm:$0xff] }
 0x29d   :  { %1239 = vmatprep.subr.mxu0 %v7304_v44  ;;  %1310 = vmatprep.subr.mxu1 %v7307_v40  ;;  %12283 = vst [vmem:[#allocation139_spill] sm:$0xff] %v7316_v39  ;;  %12284 = vst [vmem:[#allocation140_spill] sm:$0xff] %v7319_v37  ;;  %v7322_v44 = vld [vmem:[#allocation9 + $0x140] sm:$0xff]  ;;  %v7325_v40 = vld [vmem:[#allocation9 + $0x150] sm:$0xff] }
 0x29e   :  { %1240 = vmatpush1.msra.mxu0 %v7310_v42  ;;  %1311 = vmatpush1.msra.mxu1 %v7313_v35  ;;  %12285 = vst [vmem:[#allocation141_spill] sm:$0xff] %v7322_v44  ;;  %12286 = vst [vmem:[#allocation142_spill] sm:$0xff] %v7325_v40  ;;  %v7328_v42 = vld [vmem:[#allocation9 + $0x128] sm:$0xff]  ;;  %v7331_v35 = vld [vmem:[#allocation9 + $0x138] sm:$0xff] }
 0x29f   :  { %1241 = vmatprep.subr.mxu0 %v7316_v39  ;;  %1312 = vmatprep.subr.mxu1 %v7319_v37  ;;  %12287 = vst [vmem:[#allocation143_spill] sm:$0xff] %v7328_v42  ;;  %12288 = vst [vmem:[#allocation144_spill] sm:$0xff] %v7331_v35  ;;  %v7334_v39 = vld [vmem:[#allocation9 + $0x120] sm:$0xff]  ;;  %v7337_v37 = vld [vmem:[#allocation9 + $0x130] sm:$0xff] }
 0x2a0   :  { %1242 = vmatpush1.msra.mxu0 %v7322_v44  ;;  %1313 = vmatpush1.msra.mxu1 %v7325_v40  ;;  %12289 = vst [vmem:[#allocation145_spill] sm:$0xff] %v7334_v39  ;;  %12290 = vst [vmem:[#allocation146_spill] sm:$0xff] %v7337_v37  ;;  %v7340_v44 = vld [vmem:[#allocation9 + $0x108] sm:$0xff]  ;;  %v7343_v40 = vld [vmem:[#allocation9 + $0x118] sm:$0xff] }
 0x2a1   :  { %1243 = vmatprep.subr.mxu0 %v7328_v42  ;;  %1314 = vmatprep.subr.mxu1 %v7331_v35  ;;  %12291 = vst [vmem:[#allocation147_spill] sm:$0xff] %v7340_v44  ;;  %12292 = vst [vmem:[#allocation148_spill] sm:$0xff] %v7343_v40  ;;  %v7346_v42 = vld [vmem:[#allocation9 + $0x100] sm:$0xff]  ;;  %v7349_v35 = vld [vmem:[#allocation9 + $0x110] sm:$0xff] }
 0x2a2   :  { %1244 = vmatpush1.msra.mxu0 %v7334_v39  ;;  %1315 = vmatpush1.msra.mxu1 %v7337_v37  ;;  %12293 = vst [vmem:[#allocation149_spill] sm:$0xff] %v7346_v42  ;;  %12294 = vst [vmem:[#allocation150_spill] sm:$0xff] %v7349_v35  ;;  %v7352_v39 = vld [vmem:[#allocation9 + $0xe8] sm:$0xff]  ;;  %v7355_v37 = vld [vmem:[#allocation9 + $0xf8] sm:$0xff] }
 0x2a3   :  { %1245 = vmatprep.subr.mxu0 %v7340_v44  ;;  %1316 = vmatprep.subr.mxu1 %v7343_v40  ;;  %12295 = vst [vmem:[#allocation151_spill] sm:$0xff] %v7352_v39  ;;  %12296 = vst [vmem:[#allocation152_spill] sm:$0xff] %v7355_v37  ;;  %v7358_v44 = vld [vmem:[#allocation9 + $0xe0] sm:$0xff]  ;;  %v7361_v40 = vld [vmem:[#allocation9 + $0xf0] sm:$0xff] }
 0x2a4   :  { %1246 = vmatpush1.msra.mxu0 %v7346_v42  ;;  %1317 = vmatpush1.msra.mxu1 %v7349_v35  ;;  %12297 = vst [vmem:[#allocation153_spill] sm:$0xff] %v7358_v44  ;;  %12298 = vst [vmem:[#allocation154_spill] sm:$0xff] %v7361_v40  ;;  %v7364_v42 = vld [vmem:[#allocation9 + $0xc8] sm:$0xff]  ;;  %v7367_v35 = vld [vmem:[#allocation9 + $0xd8] sm:$0xff] }
 0x2a5   :  { %1247 = vmatprep.subr.mxu0 %v7352_v39  ;;  %1318 = vmatprep.subr.mxu1 %v7355_v37  ;;  %12299 = vst [vmem:[#allocation155_spill] sm:$0xff] %v7364_v42  ;;  %12300 = vst [vmem:[#allocation156_spill] sm:$0xff] %v7367_v35  ;;  %v7370_v39 = vld [vmem:[#allocation9 + $0xc0] sm:$0xff]  ;;  %v7373_v37 = vld [vmem:[#allocation9 + $0xd0] sm:$0xff] }
 0x2a6   :  { %1248 = vmatpush1.msra.mxu0 %v7358_v44  ;;  %1319 = vmatpush1.msra.mxu1 %v7361_v40  ;;  %12301 = vst [vmem:[#allocation157_spill] sm:$0xff] %v7370_v39  ;;  %12302 = vst [vmem:[#allocation158_spill] sm:$0xff] %v7373_v37  ;;  %v7376_v44 = vld [vmem:[#allocation9 + $0xa8] sm:$0xff]  ;;  %v7379_v40 = vld [vmem:[#allocation9 + $0xb8] sm:$0xff] }
 0x2a7   :  { %1249 = vmatprep.subr.mxu0 %v7364_v42  ;;  %1320 = vmatprep.subr.mxu1 %v7367_v35  ;;  %12303 = vst [vmem:[#allocation159_spill] sm:$0xff] %v7376_v44  ;;  %12304 = vst [vmem:[#allocation160_spill] sm:$0xff] %v7379_v40  ;;  %v7382_v42 = vld [vmem:[#allocation9 + $0xa0] sm:$0xff]  ;;  %v7385_v35 = vld [vmem:[#allocation9 + $0xb0] sm:$0xff] }
 0x2a8   :  { %1250 = vmatpush1.msra.mxu0 %v7370_v39  ;;  %1321 = vmatpush1.msra.mxu1 %v7373_v37  ;;  %12305 = vst [vmem:[#allocation161_spill] sm:$0xff] %v7382_v42  ;;  %12306 = vst [vmem:[#allocation162_spill] sm:$0xff] %v7385_v35  ;;  %v7388_v39 = vld [vmem:[#allocation9 + $0x88] sm:$0xff]  ;;  %v7391_v37 = vld [vmem:[#allocation9 + $0x98] sm:$0xff] }
 0x2a9   :  { %1251 = vmatprep.subr.mxu0 %v7376_v44  ;;  %1322 = vmatprep.subr.mxu1 %v7379_v40  ;;  %12307 = vst [vmem:[#allocation163_spill] sm:$0xff] %v7388_v39  ;;  %12308 = vst [vmem:[#allocation164_spill] sm:$0xff] %v7391_v37  ;;  %v7394_v44 = vld [vmem:[#allocation9 + $0x80] sm:$0xff]  ;;  %v7397_v40 = vld [vmem:[#allocation9 + $0x90] sm:$0xff] }
 0x2aa   :  { %1252 = vmatpush1.msra.mxu0 %v7382_v42  ;;  %1323 = vmatpush1.msra.mxu1 %v7385_v35  ;;  %12309 = vst [vmem:[#allocation165_spill] sm:$0xff] %v7394_v44  ;;  %12310 = vst [vmem:[#allocation166_spill] sm:$0xff] %v7397_v40  ;;  %v7400_v42 = vld [vmem:[#allocation9 + $0x68] sm:$0xff]  ;;  %v7403_v35 = vld [vmem:[#allocation9 + $0x78] sm:$0xff] }
 0x2ab   :  { %1253 = vmatprep.subr.mxu0 %v7388_v39  ;;  %1324 = vmatprep.subr.mxu1 %v7391_v37  ;;  %12311 = vst [vmem:[#allocation167_spill] sm:$0xff] %v7400_v42  ;;  %12312 = vst [vmem:[#allocation168_spill] sm:$0xff] %v7403_v35  ;;  %v7406_v39 = vld [vmem:[#allocation9 + $0x60] sm:$0xff]  ;;  %v7409_v37 = vld [vmem:[#allocation9 + $0x70] sm:$0xff] }
 0x2ac   :  { %1254 = vmatpush1.msra.mxu0 %v7394_v44  ;;  %1325 = vmatpush1.msra.mxu1 %v7397_v40  ;;  %12313 = vst [vmem:[#allocation169_spill] sm:$0xff] %v7406_v39  ;;  %12314 = vst [vmem:[#allocation170_spill] sm:$0xff] %v7409_v37  ;;  %v7412_v44 = vld [vmem:[#allocation9 + $0x48] sm:$0xff]  ;;  %v7415_v40 = vld [vmem:[#allocation9 + $0x58] sm:$0xff] }
 0x2ad   :  { %1255 = vmatprep.subr.mxu0 %v7400_v42  ;;  %1326 = vmatprep.subr.mxu1 %v7403_v35  ;;  %12315 = vst [vmem:[#allocation171_spill] sm:$0xff] %v7412_v44  ;;  %12316 = vst [vmem:[#allocation172_spill] sm:$0xff] %v7415_v40  ;;  %v7418_v42 = vld [vmem:[#allocation9 + $0x40] sm:$0xff]  ;;  %v7421_v35 = vld [vmem:[#allocation9 + $0x50] sm:$0xff] }
 0x2ae   :  { %1256 = vmatpush1.msra.mxu0 %v7406_v39  ;;  %1327 = vmatpush1.msra.mxu1 %v7409_v37  ;;  %12317 = vst [vmem:[#allocation173_spill] sm:$0xff] %v7418_v42  ;;  %12318 = vst [vmem:[#allocation174_spill] sm:$0xff] %v7421_v35  ;;  %v7424_v39 = vld [vmem:[#allocation9 + $0x28] sm:$0xff]  ;;  %v7427_v37 = vld [vmem:[#allocation9 + $0x38] sm:$0xff] }
 0x2af   :  { %1257 = vmatprep.subr.mxu0 %v7412_v44  ;;  %1328 = vmatprep.subr.mxu1 %v7415_v40  ;;  %12319 = vst [vmem:[#allocation175_spill] sm:$0xff] %v7424_v39  ;;  %12320 = vst [vmem:[#allocation176_spill] sm:$0xff] %v7427_v37  ;;  %v7430_v44 = vld [vmem:[#allocation9 + $0x20] sm:$0xff]  ;;  %v7433_v40 = vld [vmem:[#allocation9 + $0x30] sm:$0xff] }
 0x2b0   :  { %1258 = vmatpush1.msra.mxu0 %v7418_v42  ;;  %1329 = vmatpush1.msra.mxu1 %v7421_v35  ;;  %12321 = vst [vmem:[#allocation177_spill] sm:$0xff] %v7430_v44  ;;  %12322 = vst [vmem:[#allocation178_spill] sm:$0xff] %v7433_v40  ;;  %v7436_v42 = vld [vmem:[#allocation9 + $0x8] sm:$0xff]  ;;  %v7439_v35 = vld [vmem:[#allocation9 + $0x18] sm:$0xff] }
 0x2b1   :  { %1259 = vmatprep.subr.mxu0 %v7424_v39  ;;  %1330 = vmatprep.subr.mxu1 %v7427_v37  ;;  %12323 = vst [vmem:[#allocation179_spill] sm:$0xff] %v7436_v42  ;;  %12324 = vst [vmem:[#allocation180_spill] sm:$0xff] %v7439_v35  ;;  %v7442_v39 = vld [vmem:[#allocation9] sm:$0xff]  ;;  %v7445_v37 = vld [vmem:[#allocation9 + $0x10] sm:$0xff] }
 0x2b2   :  { %1260 = vmatpush1.msra.mxu0 %v7430_v44  ;;  %1331 = vmatpush1.msra.mxu1 %v7433_v40  ;;  %12325 = vst [vmem:[#allocation181_spill] sm:$0xff] %v7442_v39  ;;  %12326 = vst [vmem:[#allocation182_spill] sm:$0xff] %v7445_v37  ;;  %v7448_v44 = vld [vmem:[#allocation9 + $0x3e8] sm:$0xff]  ;;  %v7451_v40 = vld [vmem:[#allocation9 + $0x3f8] sm:$0xff] }
 0x2b3   :  { %1261 = vmatprep.subr.mxu0 %v7436_v42  ;;  %1332 = vmatprep.subr.mxu1 %v7439_v35  ;;  %12327 = vst [vmem:[#allocation183_spill] sm:$0xff] %v7448_v44  ;;  %12328 = vst [vmem:[#allocation184_spill] sm:$0xff] %v7451_v40  ;;  %v7454_v42 = vld [vmem:[#allocation9 + $0x3e0] sm:$0xff]  ;;  %v7457_v35 = vld [vmem:[#allocation9 + $0x3f0] sm:$0xff] }
 0x2b4   :  { %1262 = vmatpush1.msra.mxu0 %v7442_v39  ;;  %1333 = vmatpush1.msra.mxu1 %v7445_v37  ;;  %12329 = vst [vmem:[#allocation185_spill] sm:$0xff] %v7454_v42  ;;  %12330 = vst [vmem:[#allocation186_spill] sm:$0xff] %v7457_v35  ;;  %v7460_v39 = vld [vmem:[#allocation9 + $0x3c8] sm:$0xff]  ;;  %v7463_v37 = vld [vmem:[#allocation9 + $0x3d8] sm:$0xff] }
 0x2b5   :  { %1263 = vmatprep.subr.mxu0 %v7448_v44  ;;  %1334 = vmatprep.subr.mxu1 %v7451_v40  ;;  %12331 = vst [vmem:[#allocation187_spill] sm:$0xff] %v7460_v39  ;;  %12332 = vst [vmem:[#allocation188_spill] sm:$0xff] %v7463_v37  ;;  %v7466_v44 = vld [vmem:[#allocation9 + $0x3c0] sm:$0xff]  ;;  %v7469_v40 = vld [vmem:[#allocation9 + $0x3d0] sm:$0xff] }
 0x2b6   :  { %1264 = vmatpush2.msra.mxu0 %v7454_v42  ;;  %1335 = vmatpush2.msra.mxu1 %v7457_v35  ;;  %12333 = vst [vmem:[#allocation189_spill] sm:$0xff] %v7466_v44  ;;  %12334 = vst [vmem:[#allocation190_spill] sm:$0xff] %v7469_v40  ;;  %v7472_v42 = vld [vmem:[#allocation9 + $0x3a8] sm:$0xff]  ;;  %v7475_v35 = vld [vmem:[#allocation9 + $0x3b8] sm:$0xff] }
 0x2b7   :  { %1265 = vmatprep.subr.mxu0 %v7460_v39  ;;  %1336 = vmatprep.subr.mxu1 %v7463_v37  ;;  %12335 = vst [vmem:[#allocation191_spill] sm:$0xff] %v7472_v42  ;;  %12336 = vst [vmem:[#allocation192_spill] sm:$0xff] %v7475_v35  ;;  %v7478_v39 = vld [vmem:[#allocation9 + $0x3a0] sm:$0xff]  ;;  %v7481_v37 = vld [vmem:[#allocation9 + $0x3b0] sm:$0xff] }
 0x2b8   :  { %1266 = vmatpush2.msra.mxu0 %v7466_v44  ;;  %1337 = vmatpush2.msra.mxu1 %v7469_v40  ;;  %12337 = vst [vmem:[#allocation193_spill] sm:$0xff] %v7478_v39  ;;  %12338 = vst [vmem:[#allocation194_spill] sm:$0xff] %v7481_v37  ;;  %v7484_v44 = vld [vmem:[#allocation9 + $0x388] sm:$0xff]  ;;  %v7487_v40 = vld [vmem:[#allocation9 + $0x398] sm:$0xff] }
 0x2b9   :  { %1267 = vmatprep.subr.mxu0 %v7472_v42  ;;  %1338 = vmatprep.subr.mxu1 %v7475_v35  ;;  %12339 = vst [vmem:[#allocation195_spill] sm:$0xff] %v7484_v44  ;;  %12340 = vst [vmem:[#allocation196_spill] sm:$0xff] %v7487_v40  ;;  %v7490_v42 = vld [vmem:[#allocation9 + $0x380] sm:$0xff]  ;;  %v7493_v35 = vld [vmem:[#allocation9 + $0x390] sm:$0xff] }
 0x2ba   :  { %1268 = vmatpush2.msra.mxu0 %v7478_v39  ;;  %1339 = vmatpush2.msra.mxu1 %v7481_v37  ;;  %12341 = vst [vmem:[#allocation197_spill] sm:$0xff] %v7490_v42  ;;  %12342 = vst [vmem:[#allocation198_spill] sm:$0xff] %v7493_v35  ;;  %v7496_v39 = vld [vmem:[#allocation9 + $0x368] sm:$0xff]  ;;  %v7499_v37 = vld [vmem:[#allocation9 + $0x378] sm:$0xff] }
 0x2bb   :  { %1269 = vmatprep.subr.mxu0 %v7484_v44  ;;  %1340 = vmatprep.subr.mxu1 %v7487_v40  ;;  %12343 = vst [vmem:[#allocation199_spill] sm:$0xff] %v7496_v39  ;;  %12344 = vst [vmem:[#allocation200_spill] sm:$0xff] %v7499_v37  ;;  %v7502_v44 = vld [vmem:[#allocation9 + $0x360] sm:$0xff]  ;;  %v7505_v40 = vld [vmem:[#allocation9 + $0x370] sm:$0xff] }
 0x2bc   :  { %1270 = vmatpush2.msra.mxu0 %v7490_v42  ;;  %1341 = vmatpush2.msra.mxu1 %v7493_v35  ;;  %12345 = vst [vmem:[#allocation201_spill] sm:$0xff] %v7502_v44  ;;  %12346 = vst [vmem:[#allocation202_spill] sm:$0xff] %v7505_v40  ;;  %v7508_v42 = vld [vmem:[#allocation9 + $0x348] sm:$0xff]  ;;  %v7511_v35 = vld [vmem:[#allocation9 + $0x358] sm:$0xff] }
 0x2bd   :  { %1271 = vmatprep.subr.mxu0 %v7496_v39  ;;  %1342 = vmatprep.subr.mxu1 %v7499_v37  ;;  %12347 = vst [vmem:[#allocation203_spill] sm:$0xff] %v7508_v42  ;;  %12348 = vst [vmem:[#allocation204_spill] sm:$0xff] %v7511_v35  ;;  %v7514_v39 = vld [vmem:[#allocation9 + $0x340] sm:$0xff]  ;;  %v7517_v37 = vld [vmem:[#allocation9 + $0x350] sm:$0xff] }
 0x2be   :  { %1272 = vmatpush2.msra.mxu0 %v7502_v44  ;;  %1343 = vmatpush2.msra.mxu1 %v7505_v40  ;;  %12349 = vst [vmem:[#allocation205_spill] sm:$0xff] %v7514_v39  ;;  %12350 = vst [vmem:[#allocation206_spill] sm:$0xff] %v7517_v37  ;;  %v7520_v44 = vld [vmem:[#allocation9 + $0x328] sm:$0xff]  ;;  %v7523_v40 = vld [vmem:[#allocation9 + $0x338] sm:$0xff] }
 0x2bf   :  { %1273 = vmatprep.subr.mxu0 %v7508_v42  ;;  %1344 = vmatprep.subr.mxu1 %v7511_v35  ;;  %12351 = vst [vmem:[#allocation207_spill] sm:$0xff] %v7520_v44  ;;  %12352 = vst [vmem:[#allocation208_spill] sm:$0xff] %v7523_v40  ;;  %v7526_v42 = vld [vmem:[#allocation9 + $0x320] sm:$0xff]  ;;  %v7529_v35 = vld [vmem:[#allocation9 + $0x330] sm:$0xff] }
 0x2c0   :  { %1274 = vmatpush2.msra.mxu0 %v7514_v39  ;;  %1345 = vmatpush2.msra.mxu1 %v7517_v37  ;;  %12353 = vst [vmem:[#allocation209_spill] sm:$0xff] %v7526_v42  ;;  %12354 = vst [vmem:[#allocation210_spill] sm:$0xff] %v7529_v35  ;;  %v7532_v39 = vld [vmem:[#allocation9 + $0x308] sm:$0xff]  ;;  %v7535_v37 = vld [vmem:[#allocation9 + $0x318] sm:$0xff] }
 0x2c1   :  { %1275 = vmatprep.subr.mxu0 %v7520_v44  ;;  %1346 = vmatprep.subr.mxu1 %v7523_v40  ;;  %12355 = vst [vmem:[#allocation211_spill] sm:$0xff] %v7532_v39  ;;  %12356 = vst [vmem:[#allocation212_spill] sm:$0xff] %v7535_v37  ;;  %v7538_v44 = vld [vmem:[#allocation9 + $0x300] sm:$0xff]  ;;  %v7541_v40 = vld [vmem:[#allocation9 + $0x310] sm:$0xff] }
 0x2c2   :  { %1276 = vmatpush2.msra.mxu0 %v7526_v42  ;;  %1347 = vmatpush2.msra.mxu1 %v7529_v35  ;;  %12357 = vst [vmem:[#allocation213_spill] sm:$0xff] %v7538_v44  ;;  %12358 = vst [vmem:[#allocation214_spill] sm:$0xff] %v7541_v40  ;;  %v7544_v42 = vld [vmem:[#allocation9 + $0x2e8] sm:$0xff]  ;;  %v7547_v35 = vld [vmem:[#allocation9 + $0x2f8] sm:$0xff] }
 0x2c3   :  { %1277 = vmatprep.subr.mxu0 %v7532_v39  ;;  %1348 = vmatprep.subr.mxu1 %v7535_v37  ;;  %12359 = vst [vmem:[#allocation215_spill] sm:$0xff] %v7544_v42  ;;  %12360 = vst [vmem:[#allocation216_spill] sm:$0xff] %v7547_v35  ;;  %v7550_v39 = vld [vmem:[#allocation9 + $0x2e0] sm:$0xff]  ;;  %v7553_v37 = vld [vmem:[#allocation9 + $0x2f0] sm:$0xff] }
 0x2c4   :  { %1278 = vmatpush2.msra.mxu0 %v7538_v44  ;;  %1349 = vmatpush2.msra.mxu1 %v7541_v40  ;;  %12361 = vst [vmem:[#allocation217_spill] sm:$0xff] %v7550_v39  ;;  %12362 = vst [vmem:[#allocation218_spill] sm:$0xff] %v7553_v37  ;;  %v7556_v44 = vld [vmem:[#allocation9 + $0x2c8] sm:$0xff]  ;;  %v7559_v40 = vld [vmem:[#allocation9 + $0x2d8] sm:$0xff] }
 0x2c5   :  { %1279 = vmatprep.subr.mxu0 %v7544_v42  ;;  %1350 = vmatprep.subr.mxu1 %v7547_v35  ;;  %12363 = vst [vmem:[#allocation219_spill] sm:$0xff] %v7556_v44  ;;  %12364 = vst [vmem:[#allocation220_spill] sm:$0xff] %v7559_v40  ;;  %v7562_v42 = vld [vmem:[#allocation9 + $0x2c0] sm:$0xff]  ;;  %v7565_v35 = vld [vmem:[#allocation9 + $0x2d0] sm:$0xff] }
 0x2c6   :  { %1280 = vmatpush2.msra.mxu0 %v7550_v39  ;;  %1351 = vmatpush2.msra.mxu1 %v7553_v37  ;;  %12365 = vst [vmem:[#allocation221_spill] sm:$0xff] %v7562_v42  ;;  %12366 = vst [vmem:[#allocation222_spill] sm:$0xff] %v7565_v35  ;;  %v7568_v39 = vld [vmem:[#allocation9 + $0x2a8] sm:$0xff]  ;;  %v7571_v37 = vld [vmem:[#allocation9 + $0x2b8] sm:$0xff] }
 0x2c7   :  { %1281 = vmatprep.subr.mxu0 %v7556_v44  ;;  %1352 = vmatprep.subr.mxu1 %v7559_v40  ;;  %12367 = vst [vmem:[#allocation223_spill] sm:$0xff] %v7568_v39  ;;  %12368 = vst [vmem:[#allocation224_spill] sm:$0xff] %v7571_v37  ;;  %v7574_v44 = vld [vmem:[#allocation9 + $0x2a0] sm:$0xff]  ;;  %v7577_v40 = vld [vmem:[#allocation9 + $0x2b0] sm:$0xff] }
 0x2c8   :  { %1282 = vmatpush2.msra.mxu0 %v7562_v42  ;;  %1353 = vmatpush2.msra.mxu1 %v7565_v35  ;;  %12369 = vst [vmem:[#allocation225_spill] sm:$0xff] %v7574_v44  ;;  %12370 = vst [vmem:[#allocation226_spill] sm:$0xff] %v7577_v40  ;;  %v7580_v42 = vld [vmem:[#allocation9 + $0x288] sm:$0xff]  ;;  %v7583_v35 = vld [vmem:[#allocation9 + $0x298] sm:$0xff] }
 0x2c9   :  { %1283 = vmatprep.subr.mxu0 %v7568_v39  ;;  %1354 = vmatprep.subr.mxu1 %v7571_v37  ;;  %12371 = vst [vmem:[#allocation227_spill] sm:$0xff] %v7580_v42  ;;  %12372 = vst [vmem:[#allocation228_spill] sm:$0xff] %v7583_v35  ;;  %v7586_v39 = vld [vmem:[#allocation9 + $0x280] sm:$0xff]  ;;  %v7589_v37 = vld [vmem:[#allocation9 + $0x290] sm:$0xff] }
 0x2ca   :  { %1284 = vmatpush2.msra.mxu0 %v7574_v44  ;;  %1355 = vmatpush2.msra.mxu1 %v7577_v40  ;;  %12373 = vst [vmem:[#allocation229_spill] sm:$0xff] %v7586_v39  ;;  %12374 = vst [vmem:[#allocation230_spill] sm:$0xff] %v7589_v37  ;;  %v7592_v44 = vld [vmem:[#allocation9 + $0x268] sm:$0xff]  ;;  %v7595_v40 = vld [vmem:[#allocation9 + $0x278] sm:$0xff] }
 0x2cb   :  { %1285 = vmatprep.subr.mxu0 %v7580_v42  ;;  %1356 = vmatprep.subr.mxu1 %v7583_v35  ;;  %12375 = vst [vmem:[#allocation231_spill] sm:$0xff] %v7592_v44  ;;  %12376 = vst [vmem:[#allocation232_spill] sm:$0xff] %v7595_v40  ;;  %v7598_v42 = vld [vmem:[#allocation9 + $0x260] sm:$0xff]  ;;  %v7601_v35 = vld [vmem:[#allocation9 + $0x270] sm:$0xff] }
 0x2cc   :  { %1286 = vmatpush2.msra.mxu0 %v7586_v39  ;;  %1357 = vmatpush2.msra.mxu1 %v7589_v37  ;;  %12377 = vst [vmem:[#allocation233_spill] sm:$0xff] %v7598_v42  ;;  %12378 = vst [vmem:[#allocation234_spill] sm:$0xff] %v7601_v35  ;;  %v7604_v39 = vld [vmem:[#allocation9 + $0x248] sm:$0xff]  ;;  %v7607_v37 = vld [vmem:[#allocation9 + $0x258] sm:$0xff] }
 0x2cd   :  { %1287 = vmatprep.subr.mxu0 %v7592_v44  ;;  %1358 = vmatprep.subr.mxu1 %v7595_v40  ;;  %12379 = vst [vmem:[#allocation235_spill] sm:$0xff] %v7604_v39  ;;  %12380 = vst [vmem:[#allocation236_spill] sm:$0xff] %v7607_v37  ;;  %v7610_v44 = vld [vmem:[#allocation9 + $0x240] sm:$0xff]  ;;  %v7613_v40 = vld [vmem:[#allocation9 + $0x250] sm:$0xff] }
 0x2ce   :  { %1288 = vmatpush2.msra.mxu0 %v7598_v42  ;;  %1359 = vmatpush2.msra.mxu1 %v7601_v35  ;;  %12381 = vst [vmem:[#allocation237_spill] sm:$0xff] %v7610_v44  ;;  %12382 = vst [vmem:[#allocation238_spill] sm:$0xff] %v7613_v40  ;;  %v7616_v42 = vld [vmem:[#allocation9 + $0x228] sm:$0xff]  ;;  %v7619_v35 = vld [vmem:[#allocation9 + $0x238] sm:$0xff] }
 0x2cf   :  { %1289 = vmatprep.subr.mxu0 %v7604_v39  ;;  %1360 = vmatprep.subr.mxu1 %v7607_v37  ;;  %12383 = vst [vmem:[#allocation239_spill] sm:$0xff] %v7616_v42  ;;  %12384 = vst [vmem:[#allocation240_spill] sm:$0xff] %v7619_v35  ;;  %v7622_v39 = vld [vmem:[#allocation9 + $0x220] sm:$0xff]  ;;  %v7625_v37 = vld [vmem:[#allocation9 + $0x230] sm:$0xff] }
 0x2d0   :  { %1290 = vmatpush2.msra.mxu0 %v7610_v44  ;;  %1361 = vmatpush2.msra.mxu1 %v7613_v40  ;;  %12385 = vst [vmem:[#allocation241_spill] sm:$0xff] %v7622_v39  ;;  %12386 = vst [vmem:[#allocation242_spill] sm:$0xff] %v7625_v37  ;;  %v7628_v44 = vld [vmem:[#allocation9 + $0x208] sm:$0xff]  ;;  %v7631_v40 = vld [vmem:[#allocation9 + $0x218] sm:$0xff] }
 0x2d1   :  { %1291 = vmatprep.subr.mxu0 %v7616_v42  ;;  %1362 = vmatprep.subr.mxu1 %v7619_v35  ;;  %12387 = vst [vmem:[#allocation243_spill] sm:$0xff] %v7628_v44  ;;  %12388 = vst [vmem:[#allocation244_spill] sm:$0xff] %v7631_v40  ;;  %v7634_v42 = vld [vmem:[#allocation9 + $0x200] sm:$0xff]  ;;  %v7637_v35 = vld [vmem:[#allocation9 + $0x210] sm:$0xff] }
 0x2d2   :  { %1292 = vmatpush2.msra.mxu0 %v7622_v39  ;;  %1363 = vmatpush2.msra.mxu1 %v7625_v37  ;;  %12389 = vst [vmem:[#allocation245_spill] sm:$0xff] %v7634_v42  ;;  %12390 = vst [vmem:[#allocation246_spill] sm:$0xff] %v7637_v35  ;;  %v7640_v39 = vld [vmem:[#allocation10 + $0x1e8] sm:$0xff]  ;;  %v7643_v37 = vld [vmem:[#allocation10 + $0x1f8] sm:$0xff] }
 0x2d3   :  { %1293 = vmatprep.subr.mxu0 %v7628_v44  ;;  %1364 = vmatprep.subr.mxu1 %v7631_v40  ;;  %12391 = vst [vmem:[#allocation247_spill] sm:$0xff] %v7640_v39  ;;  %12392 = vst [vmem:[#allocation248_spill] sm:$0xff] %v7643_v37  ;;  %v855_v44 = vsub.s32 6, %v6806_v9  ;;  %v851_v40 = vsub.s32 2, %v6806_v9 }
 0x2d4   :  { %1294 = vmatpush2.msra.mxu0 %v7634_v42  ;;  %1365 = vmatpush2.msra.mxu1 %v7637_v35 }
 0x2d5   :  { %1397 = vmatprep.subr.mxu0 %v7640_v39  ;;  %1468 = vmatprep.subr.mxu1 %v7643_v37  ;;  %v7648_v42 = vrot.slane %v5524_v32, %v855_v44  ;;  %v7650_v35 = vrot.slane %v5524_v32, %v851_v40  ;;  %v7656_v32 = vld [vmem:[#allocation6] sm:$0xf] }
 0x2d6   :  { %v1037_v28 = vmul.f32 %v7656_v32, %v1036_v11 }
 0x2d7   :  { %12393 = vst [vmem:[#allocation249_spill] sm:$0xff] %v7648_v42  ;;  %12394 = vst [vmem:[#allocation250_spill] sm:$0xff] %v7650_v35 }
 0x332   :  { %v935_v34 = vpop.f32.mrf.mxu0  ;;  %v1006_v38 = vpop.f32.mrf.mxu1 }
 0x333   :  { %v936_v37 = vadd.f32 %v935_v34, %v7650_v35 }
 0x334   :  { %v937_v0 = vpop.f32.mrf.mxu0  ;;  %v1008_v47 = vpop.f32.mrf.mxu1 }
 0x335   :  { %v938_v39 = vadd.f32 %v937_v0, %v7648_v42  ;;  %v4883_v30 = vmul.f32 -1.442695, %v936_v37 }
 0x337   :  { %v4884_v9 = vmul.f32 -1.442695, %v938_v39 }
 0x339   :  { %5034 = vpow2.f32 %v4884_v9 }
 0x33a   :  { %5036 = vpow2.f32 %v4883_v30 }
 0x353   :  { %v1104_v46 = vpop.f32.mrf.mxu0  ;;  %v1175_v48 = vpop.f32.mrf.mxu1 }
 0x355   :  { %v1106_v45 = vpop.f32.mrf.mxu0  ;;  %v1177_v36 = vpop.f32.mrf.mxu1 }
 0x356   :  { %v1184_v43 = vcombine.low %v1104_v46, %v1106_v45  ;;  %v1185_v33 = vcombine.low %v1175_v48, %v1177_v36  ;;  %v5035_v48 = vpop.eup %5034  ;;  %v5526_v46 = vld [vmem:[#allocation12 + $0x8] sm:$0x77] }
 0x357   :  { %v7663_v37 = vrot.slane %v5526_v46, %v851_v40  ;;  %v1021_v39 = vadd.f32 1.0, %v5035_v48 }
 0x358   :  { %v1192_v10 = vrot.slane %v1184_v43, %v6813_v12  ;;  %v1199_v31 = vrot.slane %v1185_v33, %v6813_v12  ;;  %v7661_v43 = vrot.slane %v5526_v46, %v855_v44  ;;  %v5037_v33 = vpop.eup %5036 }
 0x359   :  { %12396 = vst [vmem:[#allocation252_spill] sm:$0xff] %v7663_v37  ;;  %v1020_v35 = vadd.f32 1.0, %v5037_v33 }
 0x35a   :  { %v1200_v0 = vcombine.low %v1192_v10, %v1199_v31  ;;  %12395 = vst [vmem:[#allocation251_spill] sm:$0xff] %v7661_v43  ;;  %v1009_v31 = vadd.f32 %v1008_v47, %v7661_v43  ;;  %v1007_v10 = vadd.f32 %v1006_v38, %v7663_v37 }
 0x35c   :  { %v1207_v42 = vrot.slane %v1200_v0, %v6813_v12 }
 0x35e   :  { %v1209_v34 = vadd.f32 %v1207_v42, %v1037_v28  ;;  %v4885_v28 = vmul.f32 -1.442695, %v1009_v31 }
 0x360   :  { %v1210_v45 = vadd.f32 %v1209_v34, %v6823_v29 }
 0x362   :  { %v4887_v36 = vmul.f32 -1.442695, %v1210_v45 }
 0x364   :  { %5038 = vpow2.f32 %v4887_v36 }
 0x365   :  { %5040 = vrcp.f32 %v1021_v39 }
 0x366   :  { %5042 = vrcp.f32 %v1020_v35 }
 0x367   :  { %5044 = vtanh.f32 %v1210_v45 }
 0x368   :  { %5046 = vtanh.f32 %v1007_v10 }
 0x371   :  { %v5039_v30 = vpop.eup %5038 }
 0x372   :  { %v1214_v11 = vadd.f32 1.0, %v5039_v30  ;;  %v5041_v42 = vpop.eup %5040 }
 0x373   :  { %v5043_v44 = vpop.eup %5042  ;;  %v1030_v40 = vmul.f32 0.0, %v5041_v42 }
 0x374   :  { %5048 = vrcp.f32 %v1214_v11  ;;  %v5045_v9 = vpop.eup %5044 }
 0x375   :  { %5050 = vpow2.f32 %v4885_v28  ;;  %v5047_v0 = vpop.eup %5046  ;;  %v1223_v46 = vrot.slane %v5045_v9, 2  ;;  %v7688_v9 = vld [vmem:[#allocation10 + $0x1c8] sm:$0xff] }
 0x376   :  { %v1031_v36 = vmul.f32 %v5047_v0, %v5043_v44  ;;  %v7685_v44 = vld [vmem:[#allocation10 + $0x1f0] sm:$0xff]  ;;  %v7694_v0 = vld [vmem:[#allocation10 + $0x1c0] sm:$0xff] }
 0x378   :  { %v7667_v38 = vadd.f32 %v1031_v36, %v1030_v40  ;;  %v7691_v40 = vld [vmem:[#allocation10 + $0x1d8] sm:$0xff]  ;;  %v7700_v36 = vld [vmem:[#allocation10 + $0x1a8] sm:$0xff] }
 0x37a   :  { %5052 = vtanh.f32 %v7667_v38 }
 0x381   :  { %v5049_v34 = vpop.eup %5048 }
 0x382   :  { %v5051_v48 = vpop.eup %5050  ;;  %v1219_v47 = vrot.slane %v5049_v34, 1  ;;  %v1225_v33 = vmul.f32 %v5049_v34, %v1223_v46  ;;  %v1228_v10 = vrot.slane %v5049_v34, 3  ;;  %v7697_v34 = vld [vmem:[#allocation10 + $0x1d0] sm:$0xff] }
 0x383   :  { %v1022_v39 = vadd.f32 1.0, %v5051_v48  ;;  %v7703_v48 = vld [vmem:[#allocation10 + $0x1b8] sm:$0xff]  ;;  %v7709_v46 = vld [vmem:[#allocation10 + $0x1b0] sm:$0xff] }
 0x384   :  { %v1221_v35 = vmul.f32 %v1219_v47, %v6826_v41  ;;  %v7682_v41 = vld [vmem:[#allocation10 + $0x1e0] sm:$0xff] }
 0x385   :  { %v7706_v47 = vld [vmem:[#allocation10 + $0x1a0] sm:$0xff] }
 0x386   :  { %v7670_v45 = vadd.f32 %v1225_v33, %v1221_v35  ;;  %v7712_v35 = vld [vmem:[#allocation10 + $0x188] sm:$0xff]  ;;  %v7715_v33 = vld [vmem:[#allocation10 + $0x198] sm:$0xff] }
 0x387   :  { %v5053_v31 = vpop.eup %5052 }
 0x388   :  { %5054 = vtanh.f32 %v7670_v45 }
 0x389   :  { %5056 = vrcp.f32 %v1022_v39  ;;  %v7718_v39 = vld [vmem:[#allocation10 + $0x180] sm:$0xff] }
 0x38a   :  { %12398 = vst [vmem:[#allocation254_spill] sm:$0xff] %v7718_v39 }
 0x395   :  { %v5055_v30 = vpop.eup %5054 }
 0x396   :  { %v5057_v28 = vpop.eup %5056  ;;  %v7674_v11 = vmul.f32 %v5055_v30, %v1228_v10  ;;  %v7724_v10 = vld [vmem:[#allocation10 + $0x168] sm:$0xff]  ;;  %v7727_v30 = vld [vmem:[#allocation10 + $0x178] sm:$0xff] }
 0x397   :  { %v7676_v42 = vmul.f32 %v5057_v28, %v5053_v31  ;;  %v7721_v31 = vld [vmem:[#allocation10 + $0x190] sm:$0xff]  ;;  %12400 = vst [vmem:[#allocation256_spill] sm:$0xff] %v7724_v10  ;;  %12401 = vst [vmem:[#allocation257_spill] sm:$0xff] %v7727_v30  ;;  %v7730_v28 = vld [vmem:[#allocation10 + $0x160] sm:$0xff] }
 0x398   :  { %1296 = vmatmul.mubr.f32.vlgmr.msra.gmra.mxu0 %v7674_v11  ;;  %1367 = vmatmul.mubr.f32.vlgmr.msra.gmra.mxu1 %v7674_v11  ;;  %12399 = vst [vmem:[#allocation255_spill] sm:$0xff] %v7721_v31  ;;  %12402 = vst [vmem:[#allocation258_spill] sm:$0xff] %v7730_v28 }
 0x399   :  { %12397 = vst [vmem:[#allocation253_spill] sm:$0xff] %v7676_v42  ;;  %1461 = vmatprep.mubr.f32.mxu0 %v7676_v42  ;;  %1532 = vmatprep.mubr.f32.mxu1 %v7676_v42  ;;  %v7733_v42 = vld [vmem:[#allocation10 + $0x170] sm:$0xff] }
 0x39a   :  { %1398 = vmatpush1.msra.mxu0 %v7682_v41  ;;  %1469 = vmatpush1.msra.mxu1 %v7685_v44  ;;  %12403 = vst [vmem:[#allocation259_spill] sm:$0xff] %v7733_v42 }
 0x39b   :  { %1399 = vmatprep.subr.mxu0 %v7688_v9  ;;  %1470 = vmatprep.subr.mxu1 %v7691_v40 }
 0x39c   :  { %1400 = vmatpush1.msra.mxu0 %v7694_v0  ;;  %1471 = vmatpush1.msra.mxu1 %v7697_v34 }
 0x39d   :  { %1401 = vmatprep.subr.mxu0 %v7700_v36  ;;  %1472 = vmatprep.subr.mxu1 %v7703_v48 }
 0x39e   :  { %1402 = vmatpush1.msra.mxu0 %v7706_v47  ;;  %1473 = vmatpush1.msra.mxu1 %v7709_v46 }
 0x39f   :  { %1403 = vmatprep.subr.mxu0 %v7712_v35  ;;  %1474 = vmatprep.subr.mxu1 %v7715_v33 }
 0x3a0   :  { %1404 = vmatpush1.msra.mxu0 %v7718_v39  ;;  %1475 = vmatpush1.msra.mxu1 %v7721_v31  ;;  %v7736_v39 = vld [vmem:[#allocation10 + $0x148] sm:$0xff]  ;;  %v7739_v31 = vld [vmem:[#allocation10 + $0x158] sm:$0xff] }
 0x3a1   :  { %1405 = vmatprep.subr.mxu0 %v7724_v10  ;;  %1476 = vmatprep.subr.mxu1 %v7727_v30  ;;  %12404 = vst [vmem:[#allocation260_spill] sm:$0xff] %v7736_v39  ;;  %12405 = vst [vmem:[#allocation261_spill] sm:$0xff] %v7739_v31  ;;  %v7742_v10 = vld [vmem:[#allocation10 + $0x140] sm:$0xff]  ;;  %v7745_v30 = vld [vmem:[#allocation10 + $0x150] sm:$0xff] }
 0x3a2   :  { %1406 = vmatpush1.msra.mxu0 %v7730_v28  ;;  %1477 = vmatpush1.msra.mxu1 %v7733_v42  ;;  %12406 = vst [vmem:[#allocation262_spill] sm:$0xff] %v7742_v10  ;;  %12407 = vst [vmem:[#allocation263_spill] sm:$0xff] %v7745_v30  ;;  %v7748_v28 = vld [vmem:[#allocation10 + $0x128] sm:$0xff]  ;;  %v7751_v42 = vld [vmem:[#allocation10 + $0x138] sm:$0xff] }
 0x3a3   :  { %1407 = vmatprep.subr.mxu0 %v7736_v39  ;;  %1478 = vmatprep.subr.mxu1 %v7739_v31  ;;  %12408 = vst [vmem:[#allocation264_spill] sm:$0xff] %v7748_v28  ;;  %12409 = vst [vmem:[#allocation265_spill] sm:$0xff] %v7751_v42  ;;  %v7754_v39 = vld [vmem:[#allocation10 + $0x120] sm:$0xff]  ;;  %v7757_v31 = vld [vmem:[#allocation10 + $0x130] sm:$0xff] }
 0x3a4   :  { %1408 = vmatpush1.msra.mxu0 %v7742_v10  ;;  %1479 = vmatpush1.msra.mxu1 %v7745_v30  ;;  %12410 = vst [vmem:[#allocation266_spill] sm:$0xff] %v7754_v39  ;;  %12411 = vst [vmem:[#allocation267_spill] sm:$0xff] %v7757_v31  ;;  %v7760_v10 = vld [vmem:[#allocation10 + $0x108] sm:$0xff]  ;;  %v7763_v30 = vld [vmem:[#allocation10 + $0x118] sm:$0xff] }
 0x3a5   :  { %1409 = vmatprep.subr.mxu0 %v7748_v28  ;;  %1480 = vmatprep.subr.mxu1 %v7751_v42  ;;  %12412 = vst [vmem:[#allocation268_spill] sm:$0xff] %v7760_v10  ;;  %12413 = vst [vmem:[#allocation269_spill] sm:$0xff] %v7763_v30  ;;  %v7766_v28 = vld [vmem:[#allocation10 + $0x100] sm:$0xff]  ;;  %v7769_v42 = vld [vmem:[#allocation10 + $0x110] sm:$0xff] }
 0x3a6   :  { %1410 = vmatpush1.msra.mxu0 %v7754_v39  ;;  %1481 = vmatpush1.msra.mxu1 %v7757_v31  ;;  %12414 = vst [vmem:[#allocation270_spill] sm:$0xff] %v7766_v28  ;;  %12415 = vst [vmem:[#allocation271_spill] sm:$0xff] %v7769_v42  ;;  %v7772_v39 = vld [vmem:[#allocation10 + $0xe8] sm:$0xff]  ;;  %v7775_v31 = vld [vmem:[#allocation10 + $0xf8] sm:$0xff] }
 0x3a7   :  { %1411 = vmatprep.subr.mxu0 %v7760_v10  ;;  %1482 = vmatprep.subr.mxu1 %v7763_v30  ;;  %12416 = vst [vmem:[#allocation272_spill] sm:$0xff] %v7772_v39  ;;  %12417 = vst [vmem:[#allocation273_spill] sm:$0xff] %v7775_v31  ;;  %v7778_v10 = vld [vmem:[#allocation10 + $0xe0] sm:$0xff]  ;;  %v7781_v30 = vld [vmem:[#allocation10 + $0xf0] sm:$0xff] }
 0x3a8   :  { %1412 = vmatpush1.msra.mxu0 %v7766_v28  ;;  %1483 = vmatpush1.msra.mxu1 %v7769_v42  ;;  %12418 = vst [vmem:[#allocation274_spill] sm:$0xff] %v7778_v10  ;;  %12419 = vst [vmem:[#allocation275_spill] sm:$0xff] %v7781_v30  ;;  %v7784_v28 = vld [vmem:[#allocation10 + $0xc8] sm:$0xff]  ;;  %v7787_v42 = vld [vmem:[#allocation10 + $0xd8] sm:$0xff] }
 0x3a9   :  { %1413 = vmatprep.subr.mxu0 %v7772_v39  ;;  %1484 = vmatprep.subr.mxu1 %v7775_v31  ;;  %12420 = vst [vmem:[#allocation276_spill] sm:$0xff] %v7784_v28  ;;  %12421 = vst [vmem:[#allocation277_spill] sm:$0xff] %v7787_v42  ;;  %v7790_v39 = vld [vmem:[#allocation10 + $0xc0] sm:$0xff]  ;;  %v7793_v31 = vld [vmem:[#allocation10 + $0xd0] sm:$0xff] }
 0x3aa   :  { %1414 = vmatpush1.msra.mxu0 %v7778_v10  ;;  %1485 = vmatpush1.msra.mxu1 %v7781_v30  ;;  %12422 = vst [vmem:[#allocation278_spill] sm:$0xff] %v7790_v39  ;;  %12423 = vst [vmem:[#allocation279_spill] sm:$0xff] %v7793_v31  ;;  %v7796_v10 = vld [vmem:[#allocation10 + $0xa8] sm:$0xff]  ;;  %v7799_v30 = vld [vmem:[#allocation10 + $0xb8] sm:$0xff] }
 0x3ab   :  { %1415 = vmatprep.subr.mxu0 %v7784_v28  ;;  %1486 = vmatprep.subr.mxu1 %v7787_v42  ;;  %12424 = vst [vmem:[#allocation280_spill] sm:$0xff] %v7796_v10  ;;  %12425 = vst [vmem:[#allocation281_spill] sm:$0xff] %v7799_v30  ;;  %v7802_v28 = vld [vmem:[#allocation10 + $0xa0] sm:$0xff]  ;;  %v7805_v42 = vld [vmem:[#allocation10 + $0xb0] sm:$0xff] }
 0x3ac   :  { %1416 = vmatpush1.msra.mxu0 %v7790_v39  ;;  %1487 = vmatpush1.msra.mxu1 %v7793_v31  ;;  %12426 = vst [vmem:[#allocation282_spill] sm:$0xff] %v7802_v28  ;;  %12427 = vst [vmem:[#allocation283_spill] sm:$0xff] %v7805_v42  ;;  %v7808_v39 = vld [vmem:[#allocation10 + $0x88] sm:$0xff]  ;;  %v7811_v31 = vld [vmem:[#allocation10 + $0x98] sm:$0xff] }
 0x3ad   :  { %1417 = vmatprep.subr.mxu0 %v7796_v10  ;;  %1488 = vmatprep.subr.mxu1 %v7799_v30  ;;  %12428 = vst [vmem:[#allocation284_spill] sm:$0xff] %v7808_v39  ;;  %12429 = vst [vmem:[#allocation285_spill] sm:$0xff] %v7811_v31  ;;  %v7814_v10 = vld [vmem:[#allocation10 + $0x80] sm:$0xff]  ;;  %v7817_v30 = vld [vmem:[#allocation10 + $0x90] sm:$0xff] }
 0x3ae   :  { %1418 = vmatpush1.msra.mxu0 %v7802_v28  ;;  %1489 = vmatpush1.msra.mxu1 %v7805_v42  ;;  %12430 = vst [vmem:[#allocation286_spill] sm:$0xff] %v7814_v10  ;;  %12431 = vst [vmem:[#allocation287_spill] sm:$0xff] %v7817_v30  ;;  %v7820_v28 = vld [vmem:[#allocation10 + $0x68] sm:$0xff]  ;;  %v7823_v42 = vld [vmem:[#allocation10 + $0x78] sm:$0xff] }
 0x3af   :  { %1419 = vmatprep.subr.mxu0 %v7808_v39  ;;  %1490 = vmatprep.subr.mxu1 %v7811_v31  ;;  %12432 = vst [vmem:[#allocation288_spill] sm:$0xff] %v7820_v28  ;;  %12433 = vst [vmem:[#allocation289_spill] sm:$0xff] %v7823_v42  ;;  %v7826_v39 = vld [vmem:[#allocation10 + $0x60] sm:$0xff]  ;;  %v7829_v31 = vld [vmem:[#allocation10 + $0x70] sm:$0xff] }
 0x3b0   :  { %1420 = vmatpush1.msra.mxu0 %v7814_v10  ;;  %1491 = vmatpush1.msra.mxu1 %v7817_v30  ;;  %12434 = vst [vmem:[#allocation290_spill] sm:$0xff] %v7826_v39  ;;  %12435 = vst [vmem:[#allocation291_spill] sm:$0xff] %v7829_v31  ;;  %v7832_v10 = vld [vmem:[#allocation10 + $0x48] sm:$0xff]  ;;  %v7835_v30 = vld [vmem:[#allocation10 + $0x58] sm:$0xff] }
 0x3b1   :  { %1421 = vmatprep.subr.mxu0 %v7820_v28  ;;  %1492 = vmatprep.subr.mxu1 %v7823_v42  ;;  %12436 = vst [vmem:[#allocation292_spill] sm:$0xff] %v7832_v10  ;;  %12437 = vst [vmem:[#allocation293_spill] sm:$0xff] %v7835_v30  ;;  %v7838_v28 = vld [vmem:[#allocation10 + $0x40] sm:$0xff]  ;;  %v7841_v42 = vld [vmem:[#allocation10 + $0x50] sm:$0xff] }
 0x3b2   :  { %1422 = vmatpush1.msra.mxu0 %v7826_v39  ;;  %1493 = vmatpush1.msra.mxu1 %v7829_v31  ;;  %12438 = vst [vmem:[#allocation294_spill] sm:$0xff] %v7838_v28  ;;  %12439 = vst [vmem:[#allocation295_spill] sm:$0xff] %v7841_v42  ;;  %v7844_v39 = vld [vmem:[#allocation10 + $0x28] sm:$0xff]  ;;  %v7847_v31 = vld [vmem:[#allocation10 + $0x38] sm:$0xff] }
 0x3b3   :  { %1423 = vmatprep.subr.mxu0 %v7832_v10  ;;  %1494 = vmatprep.subr.mxu1 %v7835_v30  ;;  %v7850_v10 = vld [vmem:[#allocation10 + $0x20] sm:$0xff]  ;;  %v7853_v30 = vld [vmem:[#allocation10 + $0x30] sm:$0xff] }
 0x3b4   :  { %1424 = vmatpush1.msra.mxu0 %v7838_v28  ;;  %1495 = vmatpush1.msra.mxu1 %v7841_v42  ;;  %v7856_v28 = vld [vmem:[#allocation10 + $0x8] sm:$0xff]  ;;  %v7859_v42 = vld [vmem:[#allocation10 + $0x18] sm:$0xff] }
 0x3b5   :  { %1425 = vmatprep.subr.mxu0 %v7844_v39  ;;  %1496 = vmatprep.subr.mxu1 %v7847_v31 }
 0x3b6   :  { %1426 = vmatpush1.msra.mxu0 %v7850_v10  ;;  %1497 = vmatpush1.msra.mxu1 %v7853_v30 }
 0x3b7   :  { %1427 = vmatprep.subr.mxu0 %v7856_v28  ;;  %1498 = vmatprep.subr.mxu1 %v7859_v42 }
 0x3b8   :  { %1428 = vmatpush1.msra.mxu0 %v6835_v49  ;;  %1499 = vmatpush1.msra.mxu1 %v6837_v50  ;;  %v12440_v49 = vld [vmem:[#allocation22_spill] sm:$0xff]  ;;  %v12441_v50 = vld [vmem:[#allocation23_spill] sm:$0xff] }
 0x3b9   :  { %1429 = vmatprep.subr.mxu0 %v6841_v51  ;;  %1500 = vmatprep.subr.mxu1 %v6843_v52  ;;  %v12442_v51 = vld [vmem:[#allocation24_spill] sm:$0xff]  ;;  %v12443_v52 = vld [vmem:[#allocation25_spill] sm:$0xff] }
 0x3ba   :  { %1430 = vmatpush2.msra.mxu0 %v6847_v53  ;;  %1501 = vmatpush2.msra.mxu1 %v6849_v54  ;;  %v12444_v53 = vld [vmem:[#allocation26_spill] sm:$0xff]  ;;  %v12445_v54 = vld [vmem:[#allocation27_spill] sm:$0xff] }
 0x3bb   :  { %1431 = vmatprep.subr.mxu0 %v6853_v55  ;;  %1502 = vmatprep.subr.mxu1 %v6855_v56  ;;  %v12446_v55 = vld [vmem:[#allocation28_spill] sm:$0xff]  ;;  %v12447_v56 = vld [vmem:[#allocation29_spill] sm:$0xff] }
 0x3bc   :  { %1432 = vmatpush2.msra.mxu0 %v6859_v57  ;;  %1503 = vmatpush2.msra.mxu1 %v6861_v58  ;;  %v12448_v57 = vld [vmem:[#allocation30_spill] sm:$0xff]  ;;  %v12449_v58 = vld [vmem:[#allocation31_spill] sm:$0xff] }
 0x3bd   :  { %1433 = vmatprep.subr.mxu0 %v6865_v59  ;;  %1504 = vmatprep.subr.mxu1 %v6867_v60  ;;  %v12450_v59 = vld [vmem:[#allocation32_spill] sm:$0xff]  ;;  %v12451_v60 = vld [vmem:[#allocation33_spill] sm:$0xff] }
 0x3be   :  { %1434 = vmatpush2.msra.mxu0 %v6871_v61  ;;  %1505 = vmatpush2.msra.mxu1 %v6873_v62  ;;  %v12452_v61 = vld [vmem:[#allocation34_spill] sm:$0xff]  ;;  %v12453_v62 = vld [vmem:[#allocation35_spill] sm:$0xff] }
 0x3bf   :  { %1435 = vmatprep.subr.mxu0 %v6877_v63  ;;  %1506 = vmatprep.subr.mxu1 %v6879_v1  ;;  %v12454_v63 = vld [vmem:[#allocation36_spill] sm:$0xff]  ;;  %v12455_v1 = vld [vmem:[#allocation37_spill] sm:$0xff] }
 0x3c0   :  { %1436 = vmatpush2.msra.mxu0 %v6883_v2  ;;  %1507 = vmatpush2.msra.mxu1 %v6885_v3  ;;  %v12456_v2 = vld [vmem:[#allocation38_spill] sm:$0xff]  ;;  %v12457_v3 = vld [vmem:[#allocation39_spill] sm:$0xff] }
 0x3c1   :  { %1437 = vmatprep.subr.mxu0 %v6889_v4  ;;  %1508 = vmatprep.subr.mxu1 %v6891_v5  ;;  %v12458_v4 = vld [vmem:[#allocation40_spill] sm:$0xff]  ;;  %v12459_v5 = vld [vmem:[#allocation41_spill] sm:$0xff] }
 0x3c2   :  { %1438 = vmatpush2.msra.mxu0 %v6895_v6  ;;  %1509 = vmatpush2.msra.mxu1 %v6897_v7  ;;  %v12460_v6 = vld [vmem:[#allocation42_spill] sm:$0xff]  ;;  %v12461_v7 = vld [vmem:[#allocation43_spill] sm:$0xff] }
 0x3c3   :  { %1439 = vmatprep.subr.mxu0 %v6901_v8  ;;  %1510 = vmatprep.subr.mxu1 %v6903_v13  ;;  %v12462_v8 = vld [vmem:[#allocation44_spill] sm:$0xff]  ;;  %v12463_v13 = vld [vmem:[#allocation45_spill] sm:$0xff] }
 0x3c4   :  { %1440 = vmatpush2.msra.mxu0 %v6907_v14  ;;  %1511 = vmatpush2.msra.mxu1 %v6909_v15  ;;  %v12464_v14 = vld [vmem:[#allocation46_spill] sm:$0xff]  ;;  %v12465_v15 = vld [vmem:[#allocation47_spill] sm:$0xff] }
 0x3c5   :  { %1441 = vmatprep.subr.mxu0 %v6913_v16  ;;  %1512 = vmatprep.subr.mxu1 %v6915_v17  ;;  %v12466_v16 = vld [vmem:[#allocation48_spill] sm:$0xff]  ;;  %v12467_v17 = vld [vmem:[#allocation49_spill] sm:$0xff] }
 0x3c6   :  { %1442 = vmatpush2.msra.mxu0 %v6919_v18  ;;  %1513 = vmatpush2.msra.mxu1 %v6921_v19  ;;  %v12468_v18 = vld [vmem:[#allocation50_spill] sm:$0xff]  ;;  %v12469_v19 = vld [vmem:[#allocation51_spill] sm:$0xff] }
 0x3c7   :  { %1443 = vmatprep.subr.mxu0 %v6925_v20  ;;  %1514 = vmatprep.subr.mxu1 %v6927_v21  ;;  %v12470_v21 = vld [vmem:[#allocation52_spill] sm:$0xff] }
 0x3c8   :  { %1444 = vmatpush2.msra.mxu0 %v6931_v22  ;;  %1515 = vmatpush2.msra.mxu1 %v6933_v23 }
 0x3c9   :  { %1445 = vmatprep.subr.mxu0 %v6937_v24  ;;  %1516 = vmatprep.subr.mxu1 %v6939_v25  ;;  %v12471_v25 = vld [vmem:[#allocation53_spill] sm:$0xff] }
 0x3ca   :  { %1446 = vmatpush2.msra.mxu0 %v6943_v26  ;;  %1517 = vmatpush2.msra.mxu1 %v6945_v27 }
 0x3cb   :  { %1447 = vmatprep.subr.mxu0 %v12440_v49  ;;  %1518 = vmatprep.subr.mxu1 %v12441_v50 }
 0x3cc   :  { %1448 = vmatpush2.msra.mxu0 %v12442_v51  ;;  %1519 = vmatpush2.msra.mxu1 %v12443_v52  ;;  %v12472_v51 = vld [vmem:[#allocation54_spill] sm:$0xff] }
 0x3cd   :  { %1449 = vmatprep.subr.mxu0 %v12444_v53  ;;  %1520 = vmatprep.subr.mxu1 %v12445_v54 }
 0x3ce   :  { %1450 = vmatpush2.msra.mxu0 %v12446_v55  ;;  %1521 = vmatpush2.msra.mxu1 %v12447_v56  ;;  %v12473_v55 = vld [vmem:[#allocation55_spill] sm:$0xff] }
 0x3cf   :  { %1451 = vmatprep.subr.mxu0 %v12448_v57  ;;  %1522 = vmatprep.subr.mxu1 %v12449_v58 }
 0x3d0   :  { %1452 = vmatpush2.msra.mxu0 %v12450_v59  ;;  %1523 = vmatpush2.msra.mxu1 %v12451_v60 }
 0x3d1   :  { %1453 = vmatprep.subr.mxu0 %v12452_v61  ;;  %1524 = vmatprep.subr.mxu1 %v12453_v62 }
 0x3d2   :  { %1454 = vmatpush2.msra.mxu0 %v12454_v63  ;;  %1525 = vmatpush2.msra.mxu1 %v12455_v1 }
 0x3d3   :  { %1455 = vmatprep.subr.mxu0 %v12456_v2  ;;  %1526 = vmatprep.subr.mxu1 %v12457_v3  ;;  %v12474_v3 = vld [vmem:[#allocation56_spill] sm:$0xff] }
 0x3d4   :  { %1456 = vmatpush2.msra.mxu0 %v12458_v4  ;;  %1527 = vmatpush2.msra.mxu1 %v12459_v5 }
 0x3d5   :  { %1457 = vmatprep.subr.mxu0 %v12460_v6  ;;  %1528 = vmatprep.subr.mxu1 %v12461_v7 }
 0x3d6   :  { %1458 = vmatpush2.msra.mxu0 %v12462_v8  ;;  %1529 = vmatpush2.msra.mxu1 %v12463_v13  ;;  %v12475_v13 = vld [vmem:[#allocation57_spill] sm:$0xff] }
 0x3d7   :  { %1459 = vmatprep.subr.mxu0 %v12464_v14  ;;  %1530 = vmatprep.subr.mxu1 %v12465_v15  ;;  %v12476_v14 = vld [vmem:[#allocation58_spill] sm:$0xff]  ;;  %v12477_v15 = vld [vmem:[#allocation59_spill] sm:$0xff] }
 0x3d8   :  { %1460 = vmatpush2.msra.mxu0 %v12466_v16  ;;  %1531 = vmatpush2.msra.mxu1 %v12467_v17  ;;  %v12478_v16 = vld [vmem:[#allocation60_spill] sm:$0xff]  ;;  %v12479_v17 = vld [vmem:[#allocation61_spill] sm:$0xff] }
 0x3d9   :  { %1566 = vmatprep.subr.mxu0 %v12468_v18  ;;  %1637 = vmatprep.subr.mxu1 %v12469_v19  ;;  %v12480_v18 = vld [vmem:[#allocation62_spill] sm:$0xff]  ;;  %v12481_v19 = vld [vmem:[#allocation63_spill] sm:$0xff] }
 0x458   :  { %v1297_v20 = vpop.f32.mrf.mxu0  ;;  %v1368_v27 = vpop.f32.mrf.mxu1 }
 0x459   :  { %v1298_v22 = vadd.f32 %v1297_v20, %v12470_v21  ;;  %v1369_v56 = vadd.f32 %v1368_v27, %v12473_v55  ;;  %v12482_v20 = vld [vmem:[#allocation64_spill] sm:$0xff]  ;;  %v12487_v27 = vld [vmem:[#allocation69_spill] sm:$0xff] }
 0x45a   :  { %v1299_v23 = vpop.f32.mrf.mxu0  ;;  %v1370_v50 = vpop.f32.mrf.mxu1 }
 0x45b   :  { %v4888_v24 = vmul.f32 -1.442695, %v1298_v22  ;;  %v1300_v26 = vadd.f32 %v1299_v23, %v12471_v25  ;;  %v1371_v52 = vadd.f32 %v1370_v50, %v12472_v51  ;;  %v12483_v22 = vld [vmem:[#allocation65_spill] sm:$0xff]  ;;  %v12484_v23 = vld [vmem:[#allocation66_spill] sm:$0xff]  ;;  %v12489_v50 = vld [vmem:[#allocation71_spill] sm:$0xff] }
 0x45d   :  { %5058 = vpow2.f32 %v4888_v24  ;;  %v4889_v49 = vmul.f32 -1.442695, %v1300_v26  ;;  %v4890_v53 = vmul.f32 -1.442695, %v1371_v52  ;;  %v12485_v24 = vld [vmem:[#allocation67_spill] sm:$0xff]  ;;  %v12486_v26 = vld [vmem:[#allocation68_spill] sm:$0xff] }
 0x45e   :  { %v12490_v52 = vld [vmem:[#allocation72_spill] sm:$0xff] }
 0x45f   :  { %5060 = vpow2.f32 %v4889_v49  ;;  %v12488_v49 = vld [vmem:[#allocation70_spill] sm:$0xff] }
 0x460   :  { %5062 = vpow2.f32 %v4890_v53  ;;  %v12491_v53 = vld [vmem:[#allocation73_spill] sm:$0xff] }
 0x46a   :  { %v5059_v54 = vpop.eup %5058 }
 0x46b   :  { %v1382_v57 = vadd.f32 1.0, %v5059_v54  ;;  %v12492_v54 = vld [vmem:[#allocation74_spill] sm:$0xff] }
 0x46c   :  { %v5061_v58 = vpop.eup %5060 }
 0x46d   :  { %5064 = vrcp.f32 %v1382_v57  ;;  %v1383_v59 = vadd.f32 1.0, %v5061_v58  ;;  %v5063_v60 = vpop.eup %5062  ;;  %v12494_v57 = vld [vmem:[#allocation76_spill] sm:$0xff]  ;;  %v12495_v58 = vld [vmem:[#allocation77_spill] sm:$0xff] }
 0x46e   :  { %5066 = vtanh.f32 %v1369_v56  ;;  %v1384_v1 = vadd.f32 1.0, %v5063_v60  ;;  %v12493_v56 = vld [vmem:[#allocation75_spill] sm:$0xff] }
 0x46f   :  { %5068 = vrcp.f32 %v1383_v59  ;;  %v12496_v59 = vld [vmem:[#allocation78_spill] sm:$0xff]  ;;  %v12497_v60 = vld [vmem:[#allocation79_spill] sm:$0xff] }
 0x470   :  { %5070 = vrcp.f32 %v1384_v1  ;;  %v12501_v1 = vld [vmem:[#allocation83_spill] sm:$0xff] }
 0x47a   :  { %v5065_v61 = vpop.eup %5064 }
 0x47b   :  { %v5067_v62 = vpop.eup %5066 }
 0x47c   :  { %v5069_v63 = vpop.eup %5068  ;;  %v1393_v2 = vmul.f32 %v5067_v62, %v5065_v61  ;;  %v12498_v61 = vld [vmem:[#allocation80_spill] sm:$0xff]  ;;  %v12499_v62 = vld [vmem:[#allocation81_spill] sm:$0xff] }
 0x47d   :  { %v1392_v4 = vmul.f32 %v5069_v63, %v12474_v3  ;;  %v5071_v6 = vpop.eup %5070  ;;  %v12500_v63 = vld [vmem:[#allocation82_spill] sm:$0xff]  ;;  %v12503_v3 = vld [vmem:[#allocation85_spill] sm:$0xff] }
 0x47f   :  { %v7935_v5 = vadd.f32 %v1393_v2, %v1392_v4  ;;  %v12502_v2 = vld [vmem:[#allocation84_spill] sm:$0xff]  ;;  %v12504_v4 = vld [vmem:[#allocation86_spill] sm:$0xff] }
 0x481   :  { %5072 = vtanh.f32 %v7935_v5 }
 0x48e   :  { %v5073_v7 = vpop.eup %5072 }
 0x48f   :  { %v7938_v8 = vmul.f32 %v5073_v7, %v5071_v6  ;;  %v12505_v6 = vld [vmem:[#allocation87_spill] sm:$0xff]  ;;  %v12506_v7 = vld [vmem:[#allocation88_spill] sm:$0xff] }
 0x491   :  { %1462 = vmatmul.mubr.f32.vlgmr.msra.gmra.mxu0 %v7938_v8  ;;  %1533 = vmatmul.mubr.f32.vlgmr.msra.gmra.mxu1 %v7938_v8 }
 0x492   :  { %1567 = vmatpush1.msra.mxu0 %v12475_v13  ;;  %1638 = vmatpush1.msra.mxu1 %v12476_v14  ;;  %v12507_v13 = vld [vmem:[#allocation89_spill] sm:$0xff]  ;;  %v12508_v14 = vld [vmem:[#allocation90_spill] sm:$0xff] }
 0x493   :  { %1568 = vmatprep.subr.mxu0 %v12477_v15  ;;  %1639 = vmatprep.subr.mxu1 %v12478_v16  ;;  %v12509_v15 = vld [vmem:[#allocation91_spill] sm:$0xff]  ;;  %v12510_v16 = vld [vmem:[#allocation92_spill] sm:$0xff] }
 0x494   :  { %1569 = vmatpush1.msra.mxu0 %v12479_v17  ;;  %1640 = vmatpush1.msra.mxu1 %v12480_v18  ;;  %v12511_v17 = vld [vmem:[#allocation93_spill] sm:$0xff]  ;;  %v12512_v18 = vld [vmem:[#allocation94_spill] sm:$0xff] }
 0x495   :  { %1570 = vmatprep.subr.mxu0 %v12481_v19  ;;  %1641 = vmatprep.subr.mxu1 %v12482_v20  ;;  %v12513_v19 = vld [vmem:[#allocation95_spill] sm:$0xff]  ;;  %v12514_v20 = vld [vmem:[#allocation96_spill] sm:$0xff] }
 0x496   :  { %1571 = vmatpush1.msra.mxu0 %v12483_v22  ;;  %1642 = vmatpush1.msra.mxu1 %v12484_v23  ;;  %v12515_v22 = vld [vmem:[#allocation97_spill] sm:$0xff]  ;;  %v12516_v23 = vld [vmem:[#allocation98_spill] sm:$0xff] }
 0x497   :  { %1572 = vmatprep.subr.mxu0 %v12485_v24  ;;  %1643 = vmatprep.subr.mxu1 %v12486_v26  ;;  %v12517_v24 = vld [vmem:[#allocation99_spill] sm:$0xff]  ;;  %v12518_v26 = vld [vmem:[#allocation100_spill] sm:$0xff] }
 0x498   :  { %1573 = vmatpush1.msra.mxu0 %v12487_v27  ;;  %1644 = vmatpush1.msra.mxu1 %v12488_v49  ;;  %v12519_v27 = vld [vmem:[#allocation101_spill] sm:$0xff]  ;;  %v12520_v49 = vld [vmem:[#allocation102_spill] sm:$0xff] }
 0x499   :  { %1574 = vmatprep.subr.mxu0 %v12489_v50  ;;  %1645 = vmatprep.subr.mxu1 %v12490_v52  ;;  %v12521_v50 = vld [vmem:[#allocation103_spill] sm:$0xff]  ;;  %v12522_v52 = vld [vmem:[#allocation104_spill] sm:$0xff] }
 0x49a   :  { %1575 = vmatpush1.msra.mxu0 %v12491_v53  ;;  %1646 = vmatpush1.msra.mxu1 %v12492_v54  ;;  %v12523_v53 = vld [vmem:[#allocation105_spill] sm:$0xff]  ;;  %v12524_v54 = vld [vmem:[#allocation106_spill] sm:$0xff] }
 0x49b   :  { %1576 = vmatprep.subr.mxu0 %v12493_v56  ;;  %1647 = vmatprep.subr.mxu1 %v12494_v57  ;;  %v12525_v56 = vld [vmem:[#allocation107_spill] sm:$0xff]  ;;  %v12526_v57 = vld [vmem:[#allocation108_spill] sm:$0xff] }
 0x49c   :  { %1577 = vmatpush1.msra.mxu0 %v12495_v58  ;;  %1648 = vmatpush1.msra.mxu1 %v12496_v59  ;;  %v12527_v58 = vld [vmem:[#allocation109_spill] sm:$0xff]  ;;  %v12528_v59 = vld [vmem:[#allocation110_spill] sm:$0xff] }
 0x49d   :  { %1578 = vmatprep.subr.mxu0 %v12497_v60  ;;  %1649 = vmatprep.subr.mxu1 %v12498_v61  ;;  %v12529_v60 = vld [vmem:[#allocation111_spill] sm:$0xff]  ;;  %v12530_v61 = vld [vmem:[#allocation112_spill] sm:$0xff] }
 0x49e   :  { %1579 = vmatpush1.msra.mxu0 %v12499_v62  ;;  %1650 = vmatpush1.msra.mxu1 %v12500_v63  ;;  %v12531_v62 = vld [vmem:[#allocation113_spill] sm:$0xff]  ;;  %v12532_v63 = vld [vmem:[#allocation114_spill] sm:$0xff] }
 0x49f   :  { %1580 = vmatprep.subr.mxu0 %v12501_v1  ;;  %1651 = vmatprep.subr.mxu1 %v12502_v2  ;;  %v12533_v1 = vld [vmem:[#allocation115_spill] sm:$0xff]  ;;  %v12534_v2 = vld [vmem:[#allocation116_spill] sm:$0xff] }
 0x4a0   :  { %1581 = vmatpush1.msra.mxu0 %v12503_v3  ;;  %1652 = vmatpush1.msra.mxu1 %v12504_v4  ;;  %v12535_v3 = vld [vmem:[#allocation117_spill] sm:$0xff]  ;;  %v12536_v4 = vmov 0.0  }
 0x4a1   :  { %1582 = vmatprep.subr.mxu0 %v12505_v6  ;;  %1653 = vmatprep.subr.mxu1 %v12506_v7  ;;  %v12537_v6 = vld [vmem:[#allocation118_spill] sm:$0xff]  ;;  %v12538_v7 = vld [vmem:[#allocation119_spill] sm:$0xff] }
 0x4a2   :  { %1583 = vmatpush1.msra.mxu0 %v12507_v13  ;;  %1654 = vmatpush1.msra.mxu1 %v12508_v14  ;;  %v12539_v13 = vld [vmem:[#allocation120_spill] sm:$0xff]  ;;  %v12540_v14 = vld [vmem:[#allocation121_spill] sm:$0xff] }
 0x4a3   :  { %1584 = vmatprep.subr.mxu0 %v12509_v15  ;;  %1655 = vmatprep.subr.mxu1 %v12510_v16  ;;  %v12541_v15 = vld [vmem:[#allocation122_spill] sm:$0xff]  ;;  %v12542_v16 = vld [vmem:[#allocation123_spill] sm:$0xff] }
 0x4a4   :  { %1585 = vmatpush1.msra.mxu0 %v12511_v17  ;;  %1656 = vmatpush1.msra.mxu1 %v12512_v18  ;;  %v12543_v17 = vld [vmem:[#allocation124_spill] sm:$0xff]  ;;  %v12544_v18 = vld [vmem:[#allocation125_spill] sm:$0xff] }
 0x4a5   :  { %1586 = vmatprep.subr.mxu0 %v12513_v19  ;;  %1657 = vmatprep.subr.mxu1 %v12514_v20  ;;  %v12545_v19 = vld [vmem:[#allocation126_spill] sm:$0xff]  ;;  %v12547_v20 = vld [vmem:[#allocation128_spill] sm:$0xff] }
 0x4a6   :  { %1587 = vmatpush1.msra.mxu0 %v12515_v22  ;;  %1658 = vmatpush1.msra.mxu1 %v12516_v23  ;;  %v12549_v22 = vld [vmem:[#allocation130_spill] sm:$0xff]  ;;  %v12550_v23 = vld [vmem:[#allocation131_spill] sm:$0xff] }
 0x4a7   :  { %1588 = vmatprep.subr.mxu0 %v12517_v24  ;;  %1659 = vmatprep.subr.mxu1 %v12518_v26  ;;  %v12551_v24 = vld [vmem:[#allocation132_spill] sm:$0xff]  ;;  %v12552_v26 = vld [vmem:[#allocation133_spill] sm:$0xff] }
 0x4a8   :  { %1589 = vmatpush1.msra.mxu0 %v12519_v27  ;;  %1660 = vmatpush1.msra.mxu1 %v12520_v49  ;;  %v12553_v27 = vld [vmem:[#allocation134_spill] sm:$0xff]  ;;  %v12554_v49 = vld [vmem:[#allocation135_spill] sm:$0xff] }
 0x4a9   :  { %1590 = vmatprep.subr.mxu0 %v12521_v50  ;;  %1661 = vmatprep.subr.mxu1 %v12522_v52  ;;  %v12555_v50 = vld [vmem:[#allocation136_spill] sm:$0xff]  ;;  %v12556_v52 = vld [vmem:[#allocation137_spill] sm:$0xff] }
 0x4aa   :  { %1591 = vmatpush1.msra.mxu0 %v12523_v53  ;;  %1662 = vmatpush1.msra.mxu1 %v12524_v54  ;;  %v12557_v53 = vld [vmem:[#allocation138_spill] sm:$0xff]  ;;  %v12558_v54 = vld [vmem:[#allocation139_spill] sm:$0xff] }
 0x4ab   :  { %1592 = vmatprep.subr.mxu0 %v12525_v56  ;;  %1663 = vmatprep.subr.mxu1 %v12526_v57  ;;  %v12559_v56 = vld [vmem:[#allocation140_spill] sm:$0xff]  ;;  %v12560_v57 = vld [vmem:[#allocation141_spill] sm:$0xff] }
 0x4ac   :  { %1593 = vmatpush1.msra.mxu0 %v12527_v58  ;;  %1664 = vmatpush1.msra.mxu1 %v12528_v59  ;;  %v12561_v58 = vld [vmem:[#allocation142_spill] sm:$0xff]  ;;  %v12562_v59 = vld [vmem:[#allocation143_spill] sm:$0xff] }
 0x4ad   :  { %1594 = vmatprep.subr.mxu0 %v12529_v60  ;;  %1665 = vmatprep.subr.mxu1 %v12530_v61  ;;  %v12563_v60 = vld [vmem:[#allocation144_spill] sm:$0xff]  ;;  %v12564_v61 = vld [vmem:[#allocation145_spill] sm:$0xff] }
 0x4ae   :  { %1595 = vmatpush1.msra.mxu0 %v12531_v62  ;;  %1666 = vmatpush1.msra.mxu1 %v12532_v63  ;;  %v12565_v62 = vld [vmem:[#allocation146_spill] sm:$0xff]  ;;  %v12566_v63 = vld [vmem:[#allocation147_spill] sm:$0xff] }
 0x4af   :  { %1596 = vmatprep.subr.mxu0 %v12533_v1  ;;  %1667 = vmatprep.subr.mxu1 %v12534_v2  ;;  %v12567_v1 = vld [vmem:[#allocation148_spill] sm:$0xff]  ;;  %v12568_v2 = vld [vmem:[#allocation149_spill] sm:$0xff] }
 0x4b0   :  { %1597 = vmatpush1.msra.mxu0 %v12535_v3  ;;  %1630 = vmatprep.mubr.f32.mxu0 %v12536_v4  ;;  %v12569_v3 = vld [vmem:[#allocation150_spill] sm:$0xff] }
 0x4b1   :  { %1668 = vmatpush1.msra.mxu1 %v12537_v6  ;;  %1701 = vmatprep.mubr.f32.mxu1 %v12536_v4  ;;  %v12570_v6 = vld [vmem:[#allocation151_spill] sm:$0xff] }
 0x4b2   :  { %1631 = vmatmul.mubr.f32.vlgmr.msra.gmra.mxu0 %v7674_v11  ;;  %1702 = vmatmul.mubr.f32.vlgmr.msra.gmra.mxu1 %v7674_v11  ;;  %v12546_v11 = vld [vmem:[#allocation127_spill] sm:$0xff] }
 0x4b3   :  { %1823 = vmatprep.mubr.f32.mxu0 %v7938_v8  ;;  %1894 = vmatprep.mubr.f32.mxu1 %v7938_v8  ;;  %v12548_v8 = vld [vmem:[#allocation129_spill] sm:$0xff] }
 0x4b4   :  { %1759 = vmatprep.subr.mxu0 %v12538_v7  ;;  %1830 = vmatprep.subr.mxu1 %v12539_v13  ;;  %v12571_v7 = vld [vmem:[#allocation152_spill] sm:$0xff]  ;;  %v12572_v13 = vld [vmem:[#allocation153_spill] sm:$0xff] }
 0x4b5   :  { %1760 = vmatpush1.msra.mxu0 %v12540_v14  ;;  %1831 = vmatpush1.msra.mxu1 %v12541_v15  ;;  %v12573_v14 = vld [vmem:[#allocation154_spill] sm:$0xff]  ;;  %v12574_v15 = vld [vmem:[#allocation155_spill] sm:$0xff] }
 0x4b6   :  { %1761 = vmatprep.subr.mxu0 %v12542_v16  ;;  %1832 = vmatprep.subr.mxu1 %v12543_v17  ;;  %v12575_v16 = vld [vmem:[#allocation156_spill] sm:$0xff]  ;;  %v12576_v17 = vld [vmem:[#allocation157_spill] sm:$0xff] }
 0x4b7   :  { %1762 = vmatpush1.msra.mxu0 %v12544_v18  ;;  %1833 = vmatpush1.msra.mxu1 %v12545_v19  ;;  %v12577_v18 = vld [vmem:[#allocation158_spill] sm:$0xff]  ;;  %v12578_v19 = vld [vmem:[#allocation159_spill] sm:$0xff] }
 0x4b8   :  { %1763 = vmatprep.subr.mxu0 %v12546_v11  ;;  %1834 = vmatprep.subr.mxu1 %v12547_v20  ;;  %v12579_v11 = vld [vmem:[#allocation160_spill] sm:$0xff]  ;;  %v12580_v20 = vld [vmem:[#allocation161_spill] sm:$0xff] }
 0x4b9   :  { %1764 = vmatpush1.msra.mxu0 %v12548_v8  ;;  %1835 = vmatpush1.msra.mxu1 %v12549_v22  ;;  %v12581_v8 = vld [vmem:[#allocation162_spill] sm:$0xff]  ;;  %v12582_v22 = vld [vmem:[#allocation163_spill] sm:$0xff] }
 0x4ba   :  { %1765 = vmatprep.subr.mxu0 %v12550_v23  ;;  %1836 = vmatprep.subr.mxu1 %v12551_v24  ;;  %v12583_v23 = vld [vmem:[#allocation164_spill] sm:$0xff]  ;;  %v12584_v24 = vld [vmem:[#allocation165_spill] sm:$0xff] }
 0x4bb   :  { %1766 = vmatpush1.msra.mxu0 %v12552_v26  ;;  %1837 = vmatpush1.msra.mxu1 %v12553_v27  ;;  %v12585_v26 = vld [vmem:[#allocation166_spill] sm:$0xff]  ;;  %v12586_v27 = vld [vmem:[#allocation167_spill] sm:$0xff] }
 0x4bc   :  { %1767 = vmatprep.subr.mxu0 %v12554_v49  ;;  %1838 = vmatprep.subr.mxu1 %v12555_v50  ;;  %v12587_v49 = vld [vmem:[#allocation168_spill] sm:$0xff]  ;;  %v12588_v50 = vld [vmem:[#allocation169_spill] sm:$0xff] }
 0x4bd   :  { %1768 = vmatpush1.msra.mxu0 %v12556_v52  ;;  %1839 = vmatpush1.msra.mxu1 %v12557_v53  ;;  %v12589_v52 = vld [vmem:[#allocation170_spill] sm:$0xff]  ;;  %v12590_v53 = vld [vmem:[#allocation171_spill] sm:$0xff] }
 0x4be   :  { %1769 = vmatprep.subr.mxu0 %v12558_v54  ;;  %1840 = vmatprep.subr.mxu1 %v12559_v56  ;;  %v12591_v54 = vld [vmem:[#allocation172_spill] sm:$0xff]  ;;  %v12592_v56 = vld [vmem:[#allocation173_spill] sm:$0xff] }
 0x4bf   :  { %1770 = vmatpush1.msra.mxu0 %v12560_v57  ;;  %1841 = vmatpush1.msra.mxu1 %v12561_v58  ;;  %v12593_v57 = vld [vmem:[#allocation174_spill] sm:$0xff]  ;;  %v12594_v58 = vld [vmem:[#allocation175_spill] sm:$0xff] }
 0x4c0   :  { %1771 = vmatprep.subr.mxu0 %v12562_v59  ;;  %1842 = vmatprep.subr.mxu1 %v12563_v60  ;;  %v12595_v59 = vld [vmem:[#allocation176_spill] sm:$0xff]  ;;  %v12596_v60 = vld [vmem:[#allocation177_spill] sm:$0xff] }
 0x4c1   :  { %1772 = vmatpush1.msra.mxu0 %v12564_v61  ;;  %1843 = vmatpush1.msra.mxu1 %v12565_v62  ;;  %v12597_v61 = vld [vmem:[#allocation178_spill] sm:$0xff]  ;;  %v12598_v62 = vld [vmem:[#allocation179_spill] sm:$0xff] }
 0x4c2   :  { %1773 = vmatprep.subr.mxu0 %v12566_v63  ;;  %1844 = vmatprep.subr.mxu1 %v12567_v1  ;;  %v12599_v63 = vld [vmem:[#allocation180_spill] sm:$0xff]  ;;  %v12600_v1 = vld [vmem:[#allocation181_spill] sm:$0xff] }
 0x4c3   :  { %1774 = vmatpush1.msra.mxu0 %v12568_v2  ;;  %1845 = vmatpush1.msra.mxu1 %v12569_v3  ;;  %v12601_v2 = vld [vmem:[#allocation182_spill] sm:$0xff]  ;;  %v12602_v3 = vld [vmem:[#allocation183_spill] sm:$0xff] }
 0x4c4   :  { %1775 = vmatprep.subr.mxu0 %v12570_v6  ;;  %1846 = vmatprep.subr.mxu1 %v12571_v7  ;;  %v12603_v6 = vld [vmem:[#allocation184_spill] sm:$0xff]  ;;  %v12604_v7 = vld [vmem:[#allocation185_spill] sm:$0xff] }
 0x4c5   :  { %1776 = vmatpush1.msra.mxu0 %v12572_v13  ;;  %1847 = vmatpush1.msra.mxu1 %v12573_v14  ;;  %v12605_v13 = vld [vmem:[#allocation186_spill] sm:$0xff]  ;;  %v12606_v14 = vld [vmem:[#allocation187_spill] sm:$0xff] }
 0x4c6   :  { %1777 = vmatprep.subr.mxu0 %v12574_v15  ;;  %1848 = vmatprep.subr.mxu1 %v12575_v16  ;;  %v12607_v15 = vld [vmem:[#allocation188_spill] sm:$0xff]  ;;  %v12608_v16 = vld [vmem:[#allocation189_spill] sm:$0xff] }
 0x4c7   :  { %1778 = vmatpush1.msra.mxu0 %v12576_v17  ;;  %1849 = vmatpush1.msra.mxu1 %v12577_v18  ;;  %v12609_v17 = vld [vmem:[#allocation190_spill] sm:$0xff]  ;;  %v12610_v18 = vld [vmem:[#allocation191_spill] sm:$0xff] }
 0x4c8   :  { %1779 = vmatprep.subr.mxu0 %v12578_v19  ;;  %1850 = vmatprep.subr.mxu1 %v12579_v11  ;;  %v12611_v19 = vld [vmem:[#allocation192_spill] sm:$0xff]  ;;  %v12612_v11 = vld [vmem:[#allocation193_spill] sm:$0xff] }
 0x4c9   :  { %1780 = vmatpush1.msra.mxu0 %v12580_v20  ;;  %1851 = vmatpush1.msra.mxu1 %v12581_v8  ;;  %v12613_v20 = vld [vmem:[#allocation194_spill] sm:$0xff]  ;;  %v12614_v8 = vld [vmem:[#allocation195_spill] sm:$0xff] }
 0x4ca   :  { %1781 = vmatprep.subr.mxu0 %v12582_v22  ;;  %1852 = vmatprep.subr.mxu1 %v12583_v23  ;;  %v12615_v22 = vld [vmem:[#allocation196_spill] sm:$0xff]  ;;  %v12616_v23 = vld [vmem:[#allocation197_spill] sm:$0xff] }
 0x4cb   :  { %1782 = vmatpush1.msra.mxu0 %v12584_v24  ;;  %1853 = vmatpush1.msra.mxu1 %v12585_v26  ;;  %v12617_v24 = vld [vmem:[#allocation198_spill] sm:$0xff]  ;;  %v12618_v26 = vld [vmem:[#allocation199_spill] sm:$0xff] }
 0x4cc   :  { %1783 = vmatprep.subr.mxu0 %v12586_v27  ;;  %1854 = vmatprep.subr.mxu1 %v12587_v49  ;;  %v12619_v27 = vld [vmem:[#allocation200_spill] sm:$0xff]  ;;  %v12620_v49 = vld [vmem:[#allocation201_spill] sm:$0xff] }
 0x4cd   :  { %1784 = vmatpush1.msra.mxu0 %v12588_v50  ;;  %1855 = vmatpush1.msra.mxu1 %v12589_v52  ;;  %v12621_v50 = vld [vmem:[#allocation202_spill] sm:$0xff]  ;;  %v12622_v52 = vld [vmem:[#allocation203_spill] sm:$0xff] }
 0x4ce   :  { %1785 = vmatprep.subr.mxu0 %v12590_v53  ;;  %1856 = vmatprep.subr.mxu1 %v12591_v54  ;;  %v12623_v53 = vld [vmem:[#allocation204_spill] sm:$0xff]  ;;  %v12624_v54 = vld [vmem:[#allocation205_spill] sm:$0xff] }
 0x4cf   :  { %1786 = vmatpush1.msra.mxu0 %v12592_v56  ;;  %1857 = vmatpush1.msra.mxu1 %v12593_v57  ;;  %v12625_v56 = vld [vmem:[#allocation206_spill] sm:$0xff]  ;;  %v12626_v57 = vld [vmem:[#allocation207_spill] sm:$0xff] }
 0x4d0   :  { %1787 = vmatprep.subr.mxu0 %v12594_v58  ;;  %1858 = vmatprep.subr.mxu1 %v12595_v59  ;;  %v12627_v58 = vld [vmem:[#allocation208_spill] sm:$0xff]  ;;  %v12628_v59 = vld [vmem:[#allocation209_spill] sm:$0xff] }
 0x4d1   :  { %1788 = vmatpush1.msra.mxu0 %v12596_v60  ;;  %1859 = vmatpush1.msra.mxu1 %v12597_v61  ;;  %v12629_v60 = vld [vmem:[#allocation210_spill] sm:$0xff]  ;;  %v12630_v61 = vld [vmem:[#allocation211_spill] sm:$0xff] }
 0x4d2   :  { %1789 = vmatprep.subr.mxu0 %v12598_v62  ;;  %1860 = vmatprep.subr.mxu1 %v12599_v63  ;;  %v12631_v62 = vld [vmem:[#allocation212_spill] sm:$0xff]  ;;  %v12632_v63 = vld [vmem:[#allocation213_spill] sm:$0xff] }
 0x4d3   :  { %1790 = vmatpush1.msra.mxu0 %v12600_v1  ;;  %1861 = vmatpush1.msra.mxu1 %v12601_v2  ;;  %v12633_v1 = vld [vmem:[#allocation214_spill] sm:$0xff]  ;;  %v12634_v2 = vld [vmem:[#allocation215_spill] sm:$0xff] }
 0x4d4   :  { %1791 = vmatprep.subr.mxu0 %v12602_v3  ;;  %1862 = vmatprep.subr.mxu1 %v12603_v6  ;;  %v12635_v3 = vld [vmem:[#allocation216_spill] sm:$0xff]  ;;  %v12636_v6 = vld [vmem:[#allocation217_spill] sm:$0xff] }
 0x4d5   :  { %1792 = vmatpush2.msra.mxu0 %v12604_v7  ;;  %1863 = vmatpush2.msra.mxu1 %v12605_v13  ;;  %v12637_v7 = vld [vmem:[#allocation218_spill] sm:$0xff]  ;;  %v12638_v13 = vld [vmem:[#allocation219_spill] sm:$0xff] }
 0x4d6   :  { %1793 = vmatprep.subr.mxu0 %v12606_v14  ;;  %1864 = vmatprep.subr.mxu1 %v12607_v15  ;;  %v12639_v14 = vld [vmem:[#allocation220_spill] sm:$0xff]  ;;  %v12640_v15 = vld [vmem:[#allocation221_spill] sm:$0xff] }
 0x4d7   :  { %1794 = vmatpush2.msra.mxu0 %v12608_v16  ;;  %1865 = vmatpush2.msra.mxu1 %v12609_v17  ;;  %v12641_v16 = vld [vmem:[#allocation222_spill] sm:$0xff]  ;;  %v12642_v17 = vld [vmem:[#allocation223_spill] sm:$0xff] }
 0x4d8   :  { %1795 = vmatprep.subr.mxu0 %v12610_v18  ;;  %1866 = vmatprep.subr.mxu1 %v12611_v19  ;;  %v12643_v18 = vld [vmem:[#allocation224_spill] sm:$0xff]  ;;  %v12644_v19 = vld [vmem:[#allocation225_spill] sm:$0xff] }
 0x4d9   :  { %1796 = vmatpush2.msra.mxu0 %v12612_v11  ;;  %1867 = vmatpush2.msra.mxu1 %v12613_v20  ;;  %v12645_v11 = vld [vmem:[#allocation226_spill] sm:$0xff]  ;;  %v12646_v20 = vld [vmem:[#allocation227_spill] sm:$0xff] }
 0x4da   :  { %1797 = vmatprep.subr.mxu0 %v12614_v8  ;;  %1868 = vmatprep.subr.mxu1 %v12615_v22  ;;  %v12647_v8 = vld [vmem:[#allocation228_spill] sm:$0xff]  ;;  %v12648_v22 = vld [vmem:[#allocation229_spill] sm:$0xff] }
 0x4db   :  { %1798 = vmatpush2.msra.mxu0 %v12616_v23  ;;  %1869 = vmatpush2.msra.mxu1 %v12617_v24  ;;  %v12649_v23 = vld [vmem:[#allocation230_spill] sm:$0xff]  ;;  %v12650_v24 = vld [vmem:[#allocation231_spill] sm:$0xff] }
 0x4dc   :  { %1799 = vmatprep.subr.mxu0 %v12618_v26  ;;  %1870 = vmatprep.subr.mxu1 %v12619_v27  ;;  %v12651_v26 = vld [vmem:[#allocation232_spill] sm:$0xff]  ;;  %v12652_v27 = vld [vmem:[#allocation233_spill] sm:$0xff] }
 0x4dd   :  { %1800 = vmatpush2.msra.mxu0 %v12620_v49  ;;  %1871 = vmatpush2.msra.mxu1 %v12621_v50  ;;  %v12653_v49 = vld [vmem:[#allocation234_spill] sm:$0xff]  ;;  %v12654_v50 = vld [vmem:[#allocation235_spill] sm:$0xff] }
 0x4de   :  { %1801 = vmatprep.subr.mxu0 %v12622_v52  ;;  %1872 = vmatprep.subr.mxu1 %v12623_v53  ;;  %v12655_v52 = vld [vmem:[#allocation236_spill] sm:$0xff]  ;;  %v12656_v53 = vld [vmem:[#allocation237_spill] sm:$0xff] }
 0x4df   :  { %1802 = vmatpush2.msra.mxu0 %v12624_v54  ;;  %1873 = vmatpush2.msra.mxu1 %v12625_v56  ;;  %v12657_v54 = vld [vmem:[#allocation238_spill] sm:$0xff]  ;;  %v12658_v56 = vld [vmem:[#allocation239_spill] sm:$0xff] }
 0x4e0   :  { %1803 = vmatprep.subr.mxu0 %v12626_v57  ;;  %1874 = vmatprep.subr.mxu1 %v12627_v58  ;;  %v12659_v57 = vld [vmem:[#allocation240_spill] sm:$0xff]  ;;  %v12660_v58 = vld [vmem:[#allocation241_spill] sm:$0xff] }
 0x4e1   :  { %1804 = vmatpush2.msra.mxu0 %v12628_v59  ;;  %1875 = vmatpush2.msra.mxu1 %v12629_v60  ;;  %v12661_v59 = vld [vmem:[#allocation242_spill] sm:$0xff]  ;;  %v12662_v60 = vld [vmem:[#allocation243_spill] sm:$0xff] }
 0x4e2   :  { %1805 = vmatprep.subr.mxu0 %v12630_v61  ;;  %1876 = vmatprep.subr.mxu1 %v12631_v62  ;;  %v12663_v61 = vld [vmem:[#allocation244_spill] sm:$0xff]  ;;  %v12664_v62 = vld [vmem:[#allocation245_spill] sm:$0xff] }
 0x4e3   :  { %1806 = vmatpush2.msra.mxu0 %v12632_v63  ;;  %1877 = vmatpush2.msra.mxu1 %v12633_v1  ;;  %v12665_v63 = vld [vmem:[#allocation246_spill] sm:$0xff]  ;;  %v12666_v1 = vld [vmem:[#allocation247_spill] sm:$0xff] }
 0x4e4   :  { %1807 = vmatprep.subr.mxu0 %v12634_v2  ;;  %1878 = vmatprep.subr.mxu1 %v12635_v3  ;;  %v12667_v2 = vld [vmem:[#allocation248_spill] sm:$0xff] }
 0x4e5   :  { %1808 = vmatpush2.msra.mxu0 %v12636_v6  ;;  %1879 = vmatpush2.msra.mxu1 %v12637_v7 }
 0x4e6   :  { %1809 = vmatprep.subr.mxu0 %v12638_v13  ;;  %1880 = vmatprep.subr.mxu1 %v12639_v14  ;;  %v12668_v14 = vld [vmem:[#allocation249_spill] sm:$0xff] }
 0x4e7   :  { %1810 = vmatpush2.msra.mxu0 %v12640_v15  ;;  %1881 = vmatpush2.msra.mxu1 %v12641_v16 }
 0x4e8   :  { %1811 = vmatprep.subr.mxu0 %v12642_v17  ;;  %1882 = vmatprep.subr.mxu1 %v12643_v18  ;;  %v12669_v18 = vld [vmem:[#allocation250_spill] sm:$0xff] }
 0x4e9   :  { %1812 = vmatpush2.msra.mxu0 %v12644_v19  ;;  %1883 = vmatpush2.msra.mxu1 %v12645_v11 }
 0x4ea   :  { %1813 = vmatprep.subr.mxu0 %v12646_v20  ;;  %1884 = vmatprep.subr.mxu1 %v12647_v8 }
 0x4eb   :  { %1814 = vmatpush2.msra.mxu0 %v12648_v22  ;;  %1885 = vmatpush2.msra.mxu1 %v12649_v23 }
 0x4ec   :  { %1815 = vmatprep.subr.mxu0 %v12650_v24  ;;  %1886 = vmatprep.subr.mxu1 %v12651_v26  ;;  %v1564_v24 = vstv %s4894_s15 }
 0x4ed   :  { %1816 = vmatpush2.msra.mxu0 %v12652_v27  ;;  %1887 = vmatpush2.msra.mxu1 %v12653_v49 }
 0x4ee   :  { %1817 = vmatprep.subr.mxu0 %v12654_v50  ;;  %1888 = vmatprep.subr.mxu1 %v12655_v52  ;;  %v1565_v50 = vmul.f32 %v7656_v32, %v1564_v24 }
 0x4ef   :  { %1818 = vmatpush2.msra.mxu0 %v12656_v53  ;;  %1889 = vmatpush2.msra.mxu1 %v12657_v54 }
 0x4f0   :  { %1819 = vmatprep.subr.mxu0 %v12658_v56  ;;  %1890 = vmatprep.subr.mxu1 %v12659_v57 }
 0x4f1   :  { %1820 = vmatpush2.msra.mxu0 %v12660_v58  ;;  %1891 = vmatpush2.msra.mxu1 %v12661_v59 }
 0x4f2   :  { %1821 = vmatprep.subr.mxu0 %v12662_v60  ;;  %1892 = vmatprep.subr.mxu1 %v12663_v61 }
 0x4f3   :  { %1822 = vmatpush2.msra.mxu0 %v12664_v62  ;;  %1893 = vmatpush2.msra.mxu1 %v12665_v63 }
 0x4f4   :  { %1925 = vmatprep.subr.mxu0 %v12666_v1  ;;  %1996 = vmatprep.subr.mxu1 %v12667_v2 }
 0x551   :  { %v1463_v3 = vpop.f32.mrf.mxu0  ;;  %v1534_v6 = vpop.f32.mrf.mxu1 }
 0x552   :  { %v1464_v19 = vadd.f32 %v1463_v3, %v12669_v18  ;;  %v1535_v63 = vadd.f32 %v1534_v6, %v7663_v37 }
 0x553   :  { %v1465_v7 = vpop.f32.mrf.mxu0  ;;  %v1536_v13 = vpop.f32.mrf.mxu1 }
 0x554   :  { %v1466_v15 = vadd.f32 %v1465_v7, %v12668_v14  ;;  %v4891_v49 = vmul.f32 -1.442695, %v1464_v19  ;;  %v1537_v62 = vadd.f32 %v1536_v13, %v7661_v43 }
 0x556   :  { %v4892_v23 = vmul.f32 -1.442695, %v1466_v15  ;;  %v4893_v1 = vmul.f32 -1.442695, %v1537_v62  ;;  %v12690_v62 = vld [vmem:[#allocation274_spill] sm:$0xff] }
 0x558   :  { %5074 = vpow2.f32 %v4892_v23 }
 0x559   :  { %5076 = vpow2.f32 %v4891_v49 }
 0x565   :  { %v5075_v58 = vpop.eup %5074 }
 0x566   :  { %v5077_v59 = vpop.eup %5076  ;;  %v1549_v60 = vadd.f32 1.0, %v5075_v58  ;;  %v12686_v58 = vld [vmem:[#allocation270_spill] sm:$0xff] }
 0x567   :  { %v1548_v61 = vadd.f32 1.0, %v5077_v59  ;;  %v12687_v59 = vld [vmem:[#allocation271_spill] sm:$0xff] }
 0x572   :  { %v1632_v16 = vpop.f32.mrf.mxu0  ;;  %v1703_v17 = vpop.f32.mrf.mxu1 }
 0x574   :  { %v1634_v11 = vpop.f32.mrf.mxu0  ;;  %v1705_v20 = vpop.f32.mrf.mxu1 }
 0x575   :  { %v1712_v8 = vcombine.low %v1632_v16, %v1634_v11  ;;  %v1713_v22 = vcombine.low %v1703_v17, %v1705_v20 }
 0x577   :  { %v1720_v26 = vrot.slane %v1712_v8, %v6813_v12  ;;  %v1727_v27 = vrot.slane %v1713_v22, %v6813_v12 }
 0x579   :  { %v1728_v52 = vcombine.low %v1720_v26, %v1727_v27 }
 0x57b   :  { %v1735_v53 = vrot.slane %v1728_v52, %v6813_v12 }
 0x57d   :  { %v1737_v54 = vadd.f32 %v1735_v53, %v1565_v50 }
 0x57f   :  { %v1738_v56 = vadd.f32 %v1737_v54, %v6823_v29  ;;  %v12683_v54 = vld [vmem:[#allocation267_spill] sm:$0xff] }
 0x581   :  { %v4895_v57 = vmul.f32 -1.442695, %v1738_v56 }
 0x583   :  { %5078 = vpow2.f32 %v4895_v57  ;;  %v12685_v57 = vld [vmem:[#allocation269_spill] sm:$0xff] }
 0x584   :  { %5080 = vrcp.f32 %v1549_v60  ;;  %v12688_v60 = vld [vmem:[#allocation272_spill] sm:$0xff] }
 0x585   :  { %5082 = vrcp.f32 %v1548_v61  ;;  %v12689_v61 = vld [vmem:[#allocation273_spill] sm:$0xff] }
 0x586   :  { %5084 = vtanh.f32 %v1738_v56  ;;  %v12684_v56 = vld [vmem:[#allocation268_spill] sm:$0xff] }
 0x587   :  { %5086 = vtanh.f32 %v1535_v63  ;;  %v12691_v63 = vld [vmem:[#allocation275_spill] sm:$0xff] }
 0x590   :  { %v5079_v32 = vpop.eup %5078 }
 0x591   :  { %v1742_v2 = vadd.f32 1.0, %v5079_v32  ;;  %v5081_v3 = vpop.eup %5080  ;;  %v12692_v32 = vld [vmem:[#allocation276_spill] sm:$0xff] }
 0x592   :  { %v5083_v7 = vpop.eup %5082  ;;  %v1558_v16 = vmul.f32 %v5081_v3, %v7667_v38  ;;  %v12695_v3 = vld [vmem:[#allocation279_spill] sm:$0xff] }
 0x593   :  { %5088 = vrcp.f32 %v1742_v2  ;;  %v5085_v15 = vpop.eup %5084  ;;  %v12694_v2 = vld [vmem:[#allocation278_spill] sm:$0xff] }
 0x594   :  { %5090 = vpow2.f32 %v4893_v1  ;;  %v5087_v17 = vpop.eup %5086  ;;  %v1751_v6 = vrot.slane %v5085_v15, 2  ;;  %v12693_v1 = vld [vmem:[#allocation277_spill] sm:$0xff] }
 0x595   :  { %v1559_v11 = vmul.f32 %v5087_v17, %v5083_v7  ;;  %v12696_v7 = vld [vmem:[#allocation280_spill] sm:$0xff]  ;;  %v12697_v15 = vld [vmem:[#allocation281_spill] sm:$0xff]  ;;  %v12699_v17 = vld [vmem:[#allocation283_spill] sm:$0xff] }
 0x597   :  { %v8150_v8 = vadd.f32 %v1559_v11, %v1558_v16  ;;  %v12698_v16 = vld [vmem:[#allocation282_spill] sm:$0xff]  ;;  %v12701_v11 = vld [vmem:[#allocation285_spill] sm:$0xff] }
 0x599   :  { %5092 = vtanh.f32 %v8150_v8 }
 0x5a0   :  { %v5089_v19 = vpop.eup %5088 }
 0x5a1   :  { %v5091_v13 = vpop.eup %5090  ;;  %v1747_v20 = vrot.slane %v5089_v19, 1  ;;  %v1753_v23 = vmul.f32 %v5089_v19, %v1751_v6  ;;  %v1756_v27 = vrot.slane %v5089_v19, 3  ;;  %v12700_v19 = vld [vmem:[#allocation284_spill] sm:$0xff] }
 0x5a2   :  { %v1550_v24 = vadd.f32 1.0, %v5091_v13  ;;  %v12702_v13 = vld [vmem:[#allocation286_spill] sm:$0xff]  ;;  %v12704_v6 = vld [vmem:[#allocation288_spill] sm:$0xff] }
 0x5a3   :  { %v1749_v22 = vmul.f32 %v1747_v20, %v7670_v45  ;;  %v12670_v45 = vld [vmem:[#allocation254_spill] sm:$0xff]  ;;  %v12703_v20 = vld [vmem:[#allocation287_spill] sm:$0xff] }
 0x5a5   :  { %v8153_v26 = vadd.f32 %v1753_v23, %v1749_v22  ;;  %v12705_v22 = vld [vmem:[#allocation289_spill] sm:$0xff]  ;;  %v12706_v23 = vld [vmem:[#allocation290_spill] sm:$0xff] }
 0x5a6   :  { %v5093_v38 = vpop.eup %5092 }
 0x5a7   :  { %5094 = vtanh.f32 %v8153_v26 }
 0x5a8   :  { %5096 = vrcp.f32 %v1550_v24  ;;  %v12707_v24 = vld [vmem:[#allocation291_spill] sm:$0xff] }
 0x5b4   :  { %v5095_v49 = vpop.eup %5094 }
 0x5b5   :  { %v5097_v50 = vpop.eup %5096  ;;  %v8157_v52 = vmul.f32 %v5095_v49, %v1756_v27  ;;  %v12709_v27 = vld [vmem:[#allocation293_spill] sm:$0xff]  ;;  %v12710_v49 = vld [vmem:[#allocation294_spill] sm:$0xff] }
 0x5b6   :  { %v8159_v53 = vmul.f32 %v5097_v50, %v5093_v38  ;;  %v12708_v38 = vld [vmem:[#allocation292_spill] sm:$0xff]  ;;  %v12711_v50 = vld [vmem:[#allocation295_spill] sm:$0xff] }
 0x5b7   :  { %1824 = vmatmul.mubr.f32.vlgmr.msra.gmra.mxu0 %v8157_v52  ;;  %1895 = vmatmul.mubr.f32.vlgmr.msra.gmra.mxu1 %v8157_v52 }
 0x5b8   :  { %1989 = vmatprep.mubr.f32.mxu0 %v8159_v53  ;;  %2060 = vmatprep.mubr.f32.mxu1 %v8159_v53 }
 0x5b9   :  { %1926 = vmatpush1.msra.mxu0 %v7682_v41  ;;  %1997 = vmatpush1.msra.mxu1 %v7685_v44  ;;  %v12671_v41 = vld [vmem:[#allocation255_spill] sm:$0xff]  ;;  %v12672_v44 = vld [vmem:[#allocation256_spill] sm:$0xff] }
 0x5ba   :  { %1927 = vmatprep.subr.mxu0 %v7688_v9  ;;  %1998 = vmatprep.subr.mxu1 %v7691_v40  ;;  %v12673_v9 = vld [vmem:[#allocation257_spill] sm:$0xff]  ;;  %v12674_v40 = vld [vmem:[#allocation258_spill] sm:$0xff] }
 0x5bb   :  { %1928 = vmatpush1.msra.mxu0 %v7694_v0  ;;  %1999 = vmatpush1.msra.mxu1 %v7697_v34  ;;  %v12675_v0 = vld [vmem:[#allocation259_spill] sm:$0xff]  ;;  %v12676_v34 = vld [vmem:[#allocation260_spill] sm:$0xff] }
 0x5bc   :  { %1929 = vmatprep.subr.mxu0 %v7700_v36  ;;  %2000 = vmatprep.subr.mxu1 %v7703_v48  ;;  %v12677_v36 = vld [vmem:[#allocation261_spill] sm:$0xff]  ;;  %v12678_v48 = vld [vmem:[#allocation262_spill] sm:$0xff] }
 0x5bd   :  { %1930 = vmatpush1.msra.mxu0 %v7706_v47  ;;  %2001 = vmatpush1.msra.mxu1 %v7709_v46  ;;  %v12679_v47 = vld [vmem:[#allocation263_spill] sm:$0xff]  ;;  %v12680_v46 = vld [vmem:[#allocation264_spill] sm:$0xff] }
 0x5be   :  { %1931 = vmatprep.subr.mxu0 %v7712_v35  ;;  %2002 = vmatprep.subr.mxu1 %v7715_v33  ;;  %v12681_v35 = vld [vmem:[#allocation265_spill] sm:$0xff]  ;;  %v12682_v33 = vld [vmem:[#allocation266_spill] sm:$0xff] }
 0x5bf   :  { %1932 = vmatpush1.msra.mxu0 %v12670_v45  ;;  %2003 = vmatpush1.msra.mxu1 %v12671_v41  ;;  %v8225_v45 = vld [vmem:[#allocation10] sm:$0xff]  ;;  %v8228_v41 = vld [vmem:[#allocation10 + $0x10] sm:$0xff] }
 0x5c0   :  { %1933 = vmatprep.subr.mxu0 %v12672_v44  ;;  %2004 = vmatprep.subr.mxu1 %v12673_v9  ;;  %v8231_v44 = vld [vmem:[#allocation10 + $0x3e8] sm:$0xff]  ;;  %v8252_v9 = vld [vmem:[#allocation10 + $0x3d0] sm:$0xff] }
 0x5c1   :  { %1934 = vmatpush1.msra.mxu0 %v12674_v40  ;;  %2005 = vmatpush1.msra.mxu1 %v12675_v0  ;;  %v8255_v40 = vld [vmem:[#allocation10 + $0x3a8] sm:$0xff]  ;;  %v8258_v0 = vld [vmem:[#allocation10 + $0x3b8] sm:$0xff] }
 0x5c2   :  { %1935 = vmatprep.subr.mxu0 %v12676_v34  ;;  %2006 = vmatprep.subr.mxu1 %v12677_v36  ;;  %v8261_v34 = vld [vmem:[#allocation10 + $0x3a0] sm:$0xff]  ;;  %v8264_v36 = vld [vmem:[#allocation10 + $0x3b0] sm:$0xff] }
 0x5c3   :  { %1936 = vmatpush1.msra.mxu0 %v12678_v48  ;;  %2007 = vmatpush1.msra.mxu1 %v12679_v47  ;;  %v8267_v48 = vld [vmem:[#allocation10 + $0x388] sm:$0xff]  ;;  %v8270_v47 = vld [vmem:[#allocation10 + $0x398] sm:$0xff] }
 0x5c4   :  { %1937 = vmatprep.subr.mxu0 %v12680_v46  ;;  %2008 = vmatprep.subr.mxu1 %v12681_v35  ;;  %v8273_v46 = vld [vmem:[#allocation10 + $0x380] sm:$0xff]  ;;  %v8276_v35 = vld [vmem:[#allocation10 + $0x390] sm:$0xff] }
 0x5c5   :  { %1938 = vmatpush1.msra.mxu0 %v12682_v33  ;;  %2009 = vmatpush1.msra.mxu1 %v12683_v54  ;;  %v8279_v33 = vld [vmem:[#allocation10 + $0x368] sm:$0xff]  ;;  %v8282_v54 = vld [vmem:[#allocation10 + $0x378] sm:$0xff] }
 0x5c6   :  { %1939 = vmatprep.subr.mxu0 %v12684_v56  ;;  %2010 = vmatprep.subr.mxu1 %v12685_v57  ;;  %v8285_v56 = vld [vmem:[#allocation10 + $0x360] sm:$0xff]  ;;  %v8288_v57 = vld [vmem:[#allocation10 + $0x370] sm:$0xff] }
 0x5c7   :  { %1940 = vmatpush1.msra.mxu0 %v12686_v58  ;;  %2011 = vmatpush1.msra.mxu1 %v12687_v59  ;;  %v8291_v58 = vld [vmem:[#allocation10 + $0x348] sm:$0xff]  ;;  %v8294_v59 = vld [vmem:[#allocation10 + $0x358] sm:$0xff] }
 0x5c8   :  { %1941 = vmatprep.subr.mxu0 %v12688_v60  ;;  %2012 = vmatprep.subr.mxu1 %v12689_v61  ;;  %v8297_v60 = vld [vmem:[#allocation10 + $0x340] sm:$0xff]  ;;  %v8300_v61 = vld [vmem:[#allocation10 + $0x350] sm:$0xff] }
 0x5c9   :  { %1942 = vmatpush1.msra.mxu0 %v12690_v62  ;;  %2013 = vmatpush1.msra.mxu1 %v12691_v63  ;;  %v8303_v62 = vld [vmem:[#allocation10 + $0x328] sm:$0xff]  ;;  %v8306_v63 = vld [vmem:[#allocation10 + $0x338] sm:$0xff] }
 0x5ca   :  { %1943 = vmatprep.subr.mxu0 %v12692_v32  ;;  %2014 = vmatprep.subr.mxu1 %v12693_v1  ;;  %v8309_v32 = vld [vmem:[#allocation10 + $0x320] sm:$0xff]  ;;  %v8312_v1 = vld [vmem:[#allocation10 + $0x330] sm:$0xff] }
 0x5cb   :  { %1944 = vmatpush1.msra.mxu0 %v12694_v2  ;;  %2015 = vmatpush1.msra.mxu1 %v12695_v3  ;;  %v8315_v2 = vld [vmem:[#allocation10 + $0x308] sm:$0xff]  ;;  %v8318_v3 = vld [vmem:[#allocation10 + $0x318] sm:$0xff] }
 0x5cc   :  { %1945 = vmatprep.subr.mxu0 %v12696_v7  ;;  %2016 = vmatprep.subr.mxu1 %v12697_v15  ;;  %v8321_v7 = vld [vmem:[#allocation10 + $0x300] sm:$0xff]  ;;  %v8324_v15 = vld [vmem:[#allocation10 + $0x310] sm:$0xff] }
 0x5cd   :  { %1946 = vmatpush1.msra.mxu0 %v12698_v16  ;;  %2017 = vmatpush1.msra.mxu1 %v12699_v17  ;;  %v8327_v16 = vld [vmem:[#allocation10 + $0x2e8] sm:$0xff]  ;;  %v8330_v17 = vld [vmem:[#allocation10 + $0x2f8] sm:$0xff] }
 0x5ce   :  { %1947 = vmatprep.subr.mxu0 %v12700_v19  ;;  %2018 = vmatprep.subr.mxu1 %v12701_v11  ;;  %12712 = vst [vmem:[#allocation22_spill] sm:$0xff] %v8327_v16  ;;  %12713 = vst [vmem:[#allocation23_spill] sm:$0xff] %v8330_v17  ;;  %v8333_v19 = vld [vmem:[#allocation10 + $0x2e0] sm:$0xff]  ;;  %v8336_v11 = vld [vmem:[#allocation10 + $0x2f0] sm:$0xff] }
 0x5cf   :  { %1948 = vmatpush1.msra.mxu0 %v12702_v13  ;;  %2019 = vmatpush1.msra.mxu1 %v12703_v20  ;;  %12714 = vst [vmem:[#allocation24_spill] sm:$0xff] %v8333_v19  ;;  %12715 = vst [vmem:[#allocation25_spill] sm:$0xff] %v8336_v11  ;;  %v8339_v13 = vld [vmem:[#allocation10 + $0x2c8] sm:$0xff]  ;;  %v8342_v20 = vld [vmem:[#allocation10 + $0x2d8] sm:$0xff] }
 0x5d0   :  { %1949 = vmatprep.subr.mxu0 %v12704_v6  ;;  %2020 = vmatprep.subr.mxu1 %v12705_v22  ;;  %12716 = vst [vmem:[#allocation26_spill] sm:$0xff] %v8339_v13  ;;  %12717 = vst [vmem:[#allocation27_spill] sm:$0xff] %v8342_v20  ;;  %v8345_v6 = vld [vmem:[#allocation10 + $0x2c0] sm:$0xff]  ;;  %v8348_v22 = vld [vmem:[#allocation10 + $0x2d0] sm:$0xff] }
 0x5d1   :  { %1950 = vmatpush1.msra.mxu0 %v12706_v23  ;;  %2021 = vmatpush1.msra.mxu1 %v12707_v24  ;;  %12718 = vst [vmem:[#allocation28_spill] sm:$0xff] %v8345_v6  ;;  %12719 = vst [vmem:[#allocation29_spill] sm:$0xff] %v8348_v22  ;;  %v8351_v23 = vld [vmem:[#allocation10 + $0x2a8] sm:$0xff]  ;;  %v8354_v24 = vld [vmem:[#allocation10 + $0x2b8] sm:$0xff] }
 0x5d2   :  { %1951 = vmatprep.subr.mxu0 %v12708_v38  ;;  %2022 = vmatprep.subr.mxu1 %v12709_v27  ;;  %12720 = vst [vmem:[#allocation30_spill] sm:$0xff] %v8351_v23  ;;  %12721 = vst [vmem:[#allocation31_spill] sm:$0xff] %v8354_v24  ;;  %v8357_v38 = vld [vmem:[#allocation10 + $0x2a0] sm:$0xff]  ;;  %v8360_v27 = vld [vmem:[#allocation10 + $0x2b0] sm:$0xff] }
 0x5d3   :  { %1952 = vmatpush1.msra.mxu0 %v12710_v49  ;;  %2023 = vmatpush1.msra.mxu1 %v12711_v50  ;;  %12722 = vst [vmem:[#allocation32_spill] sm:$0xff] %v8357_v38  ;;  %12723 = vst [vmem:[#allocation33_spill] sm:$0xff] %v8360_v27  ;;  %v8363_v49 = vld [vmem:[#allocation10 + $0x288] sm:$0xff]  ;;  %v8366_v50 = vld [vmem:[#allocation10 + $0x298] sm:$0xff] }
 0x5d4   :  { %1953 = vmatprep.subr.mxu0 %v7844_v39  ;;  %2024 = vmatprep.subr.mxu1 %v7847_v31  ;;  %v8234_v39 = vld [vmem:[#allocation10 + $0x3f8] sm:$0xff]  ;;  %v8237_v31 = vld [vmem:[#allocation10 + $0x3e0] sm:$0xff]  ;;  %12724 = vst [vmem:[#allocation34_spill] sm:$0xff] %v8363_v49  ;;  %12725 = vst [vmem:[#allocation35_spill] sm:$0xff] %v8366_v50 }
 0x5d5   :  { %1954 = vmatpush1.msra.mxu0 %v7850_v10  ;;  %2025 = vmatpush1.msra.mxu1 %v7853_v30  ;;  %v8243_v10 = vld [vmem:[#allocation10 + $0x3c8] sm:$0xff]  ;;  %v8246_v30 = vld [vmem:[#allocation10 + $0x3d8] sm:$0xff] }
 0x5d6   :  { %1955 = vmatprep.subr.mxu0 %v7856_v28  ;;  %2026 = vmatprep.subr.mxu1 %v7859_v42  ;;  %v8240_v42 = vld [vmem:[#allocation10 + $0x3f0] sm:$0xff]  ;;  %v8249_v28 = vld [vmem:[#allocation10 + $0x3c0] sm:$0xff] }
 0x5d7   :  { %1956 = vmatpush1.msra.mxu0 %v8225_v45  ;;  %2027 = vmatpush1.msra.mxu1 %v8228_v41 }
 0x5d8   :  { %1957 = vmatprep.subr.mxu0 %v8231_v44  ;;  %2028 = vmatprep.subr.mxu1 %v8234_v39 }
 0x5d9   :  { %1958 = vmatpush2.msra.mxu0 %v8237_v31  ;;  %2029 = vmatpush2.msra.mxu1 %v8240_v42 }
 0x5da   :  { %1959 = vmatprep.subr.mxu0 %v8243_v10  ;;  %2030 = vmatprep.subr.mxu1 %v8246_v30 }
 0x5db   :  { %1960 = vmatpush2.msra.mxu0 %v8249_v28  ;;  %2031 = vmatpush2.msra.mxu1 %v8252_v9 }
 0x5dc   :  { %1961 = vmatprep.subr.mxu0 %v8255_v40  ;;  %2032 = vmatprep.subr.mxu1 %v8258_v0 }
 0x5dd   :  { %1962 = vmatpush2.msra.mxu0 %v8261_v34  ;;  %2033 = vmatpush2.msra.mxu1 %v8264_v36 }
 0x5de   :  { %1963 = vmatprep.subr.mxu0 %v8267_v48  ;;  %2034 = vmatprep.subr.mxu1 %v8270_v47 }
 0x5df   :  { %1964 = vmatpush2.msra.mxu0 %v8273_v46  ;;  %2035 = vmatpush2.msra.mxu1 %v8276_v35 }
 0x5e0   :  { %1965 = vmatprep.subr.mxu0 %v8279_v33  ;;  %2036 = vmatprep.subr.mxu1 %v8282_v54 }
 0x5e1   :  { %1966 = vmatpush2.msra.mxu0 %v8285_v56  ;;  %2037 = vmatpush2.msra.mxu1 %v8288_v57 }
 0x5e2   :  { %1967 = vmatprep.subr.mxu0 %v8291_v58  ;;  %2038 = vmatprep.subr.mxu1 %v8294_v59 }
 0x5e3   :  { %1968 = vmatpush2.msra.mxu0 %v8297_v60  ;;  %2039 = vmatpush2.msra.mxu1 %v8300_v61 }
 0x5e4   :  { %1969 = vmatprep.subr.mxu0 %v8303_v62  ;;  %2040 = vmatprep.subr.mxu1 %v8306_v63 }
 0x5e5   :  { %1970 = vmatpush2.msra.mxu0 %v8309_v32  ;;  %2041 = vmatpush2.msra.mxu1 %v8312_v1 }
 0x5e6   :  { %1971 = vmatprep.subr.mxu0 %v8315_v2  ;;  %2042 = vmatprep.subr.mxu1 %v8318_v3 }
 0x5e7   :  { %1972 = vmatpush2.msra.mxu0 %v8321_v7  ;;  %2043 = vmatpush2.msra.mxu1 %v8324_v15 }
 0x5e8   :  { %1973 = vmatprep.subr.mxu0 %v8327_v16  ;;  %2044 = vmatprep.subr.mxu1 %v8330_v17 }
 0x5e9   :  { %1974 = vmatpush2.msra.mxu0 %v8333_v19  ;;  %2045 = vmatpush2.msra.mxu1 %v8336_v11 }
 0x5ea   :  { %1975 = vmatprep.subr.mxu0 %v8339_v13  ;;  %2046 = vmatprep.subr.mxu1 %v8342_v20 }
 0x5eb   :  { %1976 = vmatpush2.msra.mxu0 %v8345_v6  ;;  %2047 = vmatpush2.msra.mxu1 %v8348_v22 }
 0x5ec   :  { %1977 = vmatprep.subr.mxu0 %v8351_v23  ;;  %2048 = vmatprep.subr.mxu1 %v8354_v24  ;;  %v8369_v23 = vld [vmem:[#allocation10 + $0x280] sm:$0xff]  ;;  %v8372_v24 = vld [vmem:[#allocation10 + $0x290] sm:$0xff] }
 0x5ed   :  { %1978 = vmatpush2.msra.mxu0 %v8357_v38  ;;  %2049 = vmatpush2.msra.mxu1 %v8360_v27  ;;  %12726 = vst [vmem:[#allocation36_spill] sm:$0xff] %v8369_v23  ;;  %12727 = vst [vmem:[#allocation37_spill] sm:$0xff] %v8372_v24  ;;  %v8375_v38 = vld [vmem:[#allocation10 + $0x268] sm:$0xff]  ;;  %v8378_v27 = vld [vmem:[#allocation10 + $0x278] sm:$0xff] }
 0x5ee   :  { %1979 = vmatprep.subr.mxu0 %v8363_v49  ;;  %2050 = vmatprep.subr.mxu1 %v8366_v50  ;;  %12728 = vst [vmem:[#allocation38_spill] sm:$0xff] %v8375_v38  ;;  %12729 = vst [vmem:[#allocation39_spill] sm:$0xff] %v8378_v27  ;;  %v8381_v49 = vld [vmem:[#allocation10 + $0x260] sm:$0xff]  ;;  %v8384_v50 = vld [vmem:[#allocation10 + $0x270] sm:$0xff] }
 0x5ef   :  { %1980 = vmatpush2.msra.mxu0 %v8369_v23  ;;  %2051 = vmatpush2.msra.mxu1 %v8372_v24  ;;  %12730 = vst [vmem:[#allocation40_spill] sm:$0xff] %v8381_v49  ;;  %12731 = vst [vmem:[#allocation41_spill] sm:$0xff] %v8384_v50  ;;  %v8387_v23 = vld [vmem:[#allocation10 + $0x248] sm:$0xff]  ;;  %v8390_v24 = vld [vmem:[#allocation10 + $0x258] sm:$0xff] }
 0x5f0   :  { %1981 = vmatprep.subr.mxu0 %v8375_v38  ;;  %2052 = vmatprep.subr.mxu1 %v8378_v27  ;;  %12732 = vst [vmem:[#allocation42_spill] sm:$0xff] %v8387_v23  ;;  %12733 = vst [vmem:[#allocation43_spill] sm:$0xff] %v8390_v24  ;;  %v8393_v38 = vld [vmem:[#allocation10 + $0x240] sm:$0xff]  ;;  %v8396_v27 = vld [vmem:[#allocation10 + $0x250] sm:$0xff] }
 0x5f1   :  { %1982 = vmatpush2.msra.mxu0 %v8381_v49  ;;  %2053 = vmatpush2.msra.mxu1 %v8384_v50  ;;  %12734 = vst [vmem:[#allocation44_spill] sm:$0xff] %v8393_v38  ;;  %12735 = vst [vmem:[#allocation45_spill] sm:$0xff] %v8396_v27  ;;  %v8399_v49 = vld [vmem:[#allocation10 + $0x228] sm:$0xff]  ;;  %v8402_v50 = vld [vmem:[#allocation10 + $0x238] sm:$0xff] }
 0x5f2   :  { %1983 = vmatprep.subr.mxu0 %v8387_v23  ;;  %2054 = vmatprep.subr.mxu1 %v8390_v24  ;;  %12736 = vst [vmem:[#allocation46_spill] sm:$0xff] %v8399_v49  ;;  %12737 = vst [vmem:[#allocation47_spill] sm:$0xff] %v8402_v50  ;;  %v8405_v23 = vld [vmem:[#allocation10 + $0x220] sm:$0xff]  ;;  %v8408_v24 = vld [vmem:[#allocation10 + $0x230] sm:$0xff] }
 0x5f3   :  { %1984 = vmatpush2.msra.mxu0 %v8393_v38  ;;  %2055 = vmatpush2.msra.mxu1 %v8396_v27  ;;  %12738 = vst [vmem:[#allocation48_spill] sm:$0xff] %v8405_v23  ;;  %12739 = vst [vmem:[#allocation49_spill] sm:$0xff] %v8408_v24  ;;  %v8411_v38 = vld [vmem:[#allocation10 + $0x208] sm:$0xff]  ;;  %v8414_v27 = vld [vmem:[#allocation10 + $0x218] sm:$0xff] }
 0x5f4   :  { %1985 = vmatprep.subr.mxu0 %v8399_v49  ;;  %2056 = vmatprep.subr.mxu1 %v8402_v50  ;;  %12740 = vst [vmem:[#allocation50_spill] sm:$0xff] %v8411_v38  ;;  %12741 = vst [vmem:[#allocation51_spill] sm:$0xff] %v8414_v27  ;;  %v8417_v49 = vld [vmem:[#allocation10 + $0x200] sm:$0xff]  ;;  %v8420_v50 = vld [vmem:[#allocation10 + $0x210] sm:$0xff] }
 0x5f5   :  { %1986 = vmatpush2.msra.mxu0 %v8405_v23  ;;  %2057 = vmatpush2.msra.mxu1 %v8408_v24  ;;  %12742 = vst [vmem:[#allocation54_spill] sm:$0xff] %v8417_v49  ;;  %12743 = vst [vmem:[#allocation55_spill] sm:$0xff] %v8420_v50  ;;  %v8423_v23 = vld [vmem:[#allocation7 + $0x1e8] sm:$0xff]  ;;  %v8426_v24 = vld [vmem:[#allocation7 + $0x1f8] sm:$0xff] }
 0x5f6   :  { %1987 = vmatprep.subr.mxu0 %v8411_v38  ;;  %2058 = vmatprep.subr.mxu1 %v8414_v27  ;;  %12744 = vst [vmem:[#allocation56_spill] sm:$0xff] %v8423_v23  ;;  %12745 = vst [vmem:[#allocation57_spill] sm:$0xff] %v8426_v24 }
 0x5f7   :  { %1988 = vmatpush2.msra.mxu0 %v8417_v49  ;;  %2059 = vmatpush2.msra.mxu1 %v8420_v50 }
 0x5f8   :  { %2094 = vmatprep.subr.mxu0 %v8423_v23  ;;  %2165 = vmatprep.subr.mxu1 %v8426_v24 }
 0x677   :  { %v1825_v38 = vpop.f32.mrf.mxu0  ;;  %v1896_v49 = vpop.f32.mrf.mxu1 }
 0x678   :  { %v1826_v22 = vadd.f32 %v1825_v38, %v12470_v21  ;;  %v1897_v17 = vadd.f32 %v1896_v49, %v12473_v55  ;;  %v8459_v49 = vld [vmem:[#allocation7 + $0x1a8] sm:$0xff] }
 0x679   :  { %v1827_v27 = vpop.f32.mrf.mxu0  ;;  %v1898_v50 = vpop.f32.mrf.mxu1  ;;  %12750 = vst [vmem:[#allocation62_spill] sm:$0xff] %v8459_v49 }
 0x67a   :  { %v4896_v6 = vmul.f32 -1.442695, %v1826_v22  ;;  %v1828_v20 = vadd.f32 %v1827_v27, %v12471_v25  ;;  %v1899_v11 = vadd.f32 %v1898_v50, %v12472_v51 }
 0x67c   :  { %5098 = vpow2.f32 %v4896_v6  ;;  %v4897_v13 = vmul.f32 -1.442695, %v1828_v20  ;;  %v4898_v19 = vmul.f32 -1.442695, %v1899_v11 }
 0x67e   :  { %5100 = vpow2.f32 %v4897_v13 }
 0x67f   :  { %5102 = vpow2.f32 %v4898_v19 }
 0x689   :  { %v5099_v23 = vpop.eup %5098 }
 0x68a   :  { %v1910_v16 = vadd.f32 1.0, %v5099_v23 }
 0x68b   :  { %v5101_v24 = vpop.eup %5100 }
 0x68c   :  { %5104 = vrcp.f32 %v1910_v16  ;;  %v1911_v38 = vadd.f32 1.0, %v5101_v24  ;;  %v5103_v22 = vpop.eup %5102  ;;  %v8441_v16 = vld [vmem:[#allocation7 + $0x1e0] sm:$0xff]  ;;  %v8456_v24 = vld [vmem:[#allocation7 + $0x1d0] sm:$0xff] }
 0x68d   :  { %5106 = vtanh.f32 %v1897_v17  ;;  %v1912_v20 = vadd.f32 1.0, %v5103_v22  ;;  %v8444_v17 = vld [vmem:[#allocation7 + $0x1f0] sm:$0xff]  ;;  %12749 = vst [vmem:[#allocation61_spill] sm:$0xff] %v8456_v24  ;;  %v8465_v22 = vld [vmem:[#allocation7 + $0x1a0] sm:$0xff] }
 0x68e   :  { %5108 = vrcp.f32 %v1911_v38  ;;  %v8462_v38 = vld [vmem:[#allocation7 + $0x1b8] sm:$0xff]  ;;  %12752 = vst [vmem:[#allocation64_spill] sm:$0xff] %v8465_v22 }
 0x68f   :  { %5110 = vrcp.f32 %v1912_v20  ;;  %12751 = vst [vmem:[#allocation63_spill] sm:$0xff] %v8462_v38  ;;  %v8474_v20 = vld [vmem:[#allocation7 + $0x198] sm:$0xff] }
 0x690   :  { %12755 = vst [vmem:[#allocation67_spill] sm:$0xff] %v8474_v20 }
 0x699   :  { %v5105_v27 = vpop.eup %5104 }
 0x69a   :  { %v5107_v6 = vpop.eup %5106 }
 0x69b   :  { %v5109_v25 = vpop.eup %5108  ;;  %v1921_v13 = vmul.f32 %v5107_v6, %v5105_v27  ;;  %v8468_v27 = vld [vmem:[#allocation7 + $0x1b0] sm:$0xff]  ;;  %v8471_v6 = vld [vmem:[#allocation7 + $0x188] sm:$0xff] }
 0x69c   :  { %v1920_v21 = vmul.f32 %v5109_v25, %v7935_v5  ;;  %v5111_v11 = vpop.eup %5110  ;;  %v8450_v25 = vld [vmem:[#allocation7 + $0x1d8] sm:$0xff]  ;;  %v8453_v5 = vld [vmem:[#allocation7 + $0x1c0] sm:$0xff]  ;;  %12753 = vst [vmem:[#allocation65_spill] sm:$0xff] %v8468_v27  ;;  %12754 = vst [vmem:[#allocation66_spill] sm:$0xff] %v8471_v6 }
 0x69d   :  { %12747 = vst [vmem:[#allocation59_spill] sm:$0xff] %v8450_v25  ;;  %12748 = vst [vmem:[#allocation60_spill] sm:$0xff] %v8453_v5 }
 0x69e   :  { %v8434_v50 = vadd.f32 %v1921_v13, %v1920_v21  ;;  %v8447_v21 = vld [vmem:[#allocation7 + $0x1c8] sm:$0xff]  ;;  %v8477_v13 = vld [vmem:[#allocation7 + $0x180] sm:$0xff] }
 0x69f   :  { %12746 = vst [vmem:[#allocation58_spill] sm:$0xff] %v8447_v21  ;;  %12756 = vst [vmem:[#allocation68_spill] sm:$0xff] %v8477_v13 }
 0x6a0   :  { %5112 = vtanh.f32 %v8434_v50 }
 0x6ad   :  { %v5113_v23 = vpop.eup %5112 }
 0x6ae   :  { %v8437_v19 = vmul.f32 %v5113_v23, %v5111_v11  ;;  %v8480_v11 = vld [vmem:[#allocation7 + $0x190] sm:$0xff]  ;;  %v8483_v23 = vld [vmem:[#allocation7 + $0x168] sm:$0xff] }
 0x6af   :  { %12757 = vst [vmem:[#allocation69_spill] sm:$0xff] %v8480_v11  ;;  %12758 = vst [vmem:[#allocation70_spill] sm:$0xff] %v8483_v23 }
 0x6b0   :  { %1990 = vmatmul.mubr.f32.vlgmr.msra.gmra.mxu0 %v8437_v19  ;;  %2061 = vmatmul.mubr.f32.vlgmr.msra.gmra.mxu1 %v8437_v19 }
 0x6b1   :  { %2095 = vmatpush1.msra.mxu0 %v8441_v16  ;;  %2166 = vmatpush1.msra.mxu1 %v8444_v17 }
 0x6b2   :  { %2096 = vmatprep.subr.mxu0 %v8447_v21  ;;  %2167 = vmatprep.subr.mxu1 %v8450_v25 }
 0x6b3   :  { %2097 = vmatpush1.msra.mxu0 %v8453_v5  ;;  %2168 = vmatpush1.msra.mxu1 %v8456_v24 }
 0x6b4   :  { %2098 = vmatprep.subr.mxu0 %v8459_v49  ;;  %2169 = vmatprep.subr.mxu1 %v8462_v38 }
 0x6b5   :  { %2099 = vmatpush1.msra.mxu0 %v8465_v22  ;;  %2170 = vmatpush1.msra.mxu1 %v8468_v27  ;;  %v8486_v27 = vld [vmem:[#allocation7 + $0x178] sm:$0xff] }
 0x6b6   :  { %2100 = vmatprep.subr.mxu0 %v8471_v6  ;;  %2171 = vmatprep.subr.mxu1 %v8474_v20  ;;  %12759 = vst [vmem:[#allocation71_spill] sm:$0xff] %v8486_v27  ;;  %v8489_v6 = vld [vmem:[#allocation7 + $0x160] sm:$0xff]  ;;  %v8492_v20 = vld [vmem:[#allocation7 + $0x170] sm:$0xff] }
 0x6b7   :  { %2101 = vmatpush1.msra.mxu0 %v8477_v13  ;;  %2172 = vmatpush1.msra.mxu1 %v8480_v11  ;;  %12760 = vst [vmem:[#allocation72_spill] sm:$0xff] %v8489_v6  ;;  %12761 = vst [vmem:[#allocation73_spill] sm:$0xff] %v8492_v20  ;;  %v8495_v13 = vld [vmem:[#allocation7 + $0x148] sm:$0xff]  ;;  %v8498_v11 = vld [vmem:[#allocation7 + $0x158] sm:$0xff] }
 0x6b8   :  { %2102 = vmatprep.subr.mxu0 %v8483_v23  ;;  %2173 = vmatprep.subr.mxu1 %v8486_v27  ;;  %12762 = vst [vmem:[#allocation74_spill] sm:$0xff] %v8495_v13  ;;  %12763 = vst [vmem:[#allocation75_spill] sm:$0xff] %v8498_v11  ;;  %v8501_v23 = vld [vmem:[#allocation7 + $0x140] sm:$0xff]  ;;  %v8504_v27 = vld [vmem:[#allocation7 + $0x150] sm:$0xff] }
 0x6b9   :  { %2103 = vmatpush1.msra.mxu0 %v8489_v6  ;;  %2174 = vmatpush1.msra.mxu1 %v8492_v20  ;;  %12764 = vst [vmem:[#allocation76_spill] sm:$0xff] %v8501_v23  ;;  %12765 = vst [vmem:[#allocation77_spill] sm:$0xff] %v8504_v27  ;;  %v8507_v6 = vld [vmem:[#allocation7 + $0x128] sm:$0xff]  ;;  %v8510_v20 = vld [vmem:[#allocation7 + $0x138] sm:$0xff] }
 0x6ba   :  { %2104 = vmatprep.subr.mxu0 %v8495_v13  ;;  %2175 = vmatprep.subr.mxu1 %v8498_v11  ;;  %12766 = vst [vmem:[#allocation78_spill] sm:$0xff] %v8507_v6  ;;  %12767 = vst [vmem:[#allocation79_spill] sm:$0xff] %v8510_v20  ;;  %v8513_v13 = vld [vmem:[#allocation7 + $0x120] sm:$0xff]  ;;  %v8516_v11 = vld [vmem:[#allocation7 + $0x130] sm:$0xff] }
 0x6bb   :  { %2105 = vmatpush1.msra.mxu0 %v8501_v23  ;;  %2176 = vmatpush1.msra.mxu1 %v8504_v27  ;;  %12768 = vst [vmem:[#allocation80_spill] sm:$0xff] %v8513_v13  ;;  %12769 = vst [vmem:[#allocation81_spill] sm:$0xff] %v8516_v11  ;;  %v8519_v23 = vld [vmem:[#allocation7 + $0x108] sm:$0xff]  ;;  %v8522_v27 = vld [vmem:[#allocation7 + $0x118] sm:$0xff] }
 0x6bc   :  { %2106 = vmatprep.subr.mxu0 %v8507_v6  ;;  %2177 = vmatprep.subr.mxu1 %v8510_v20  ;;  %12770 = vst [vmem:[#allocation82_spill] sm:$0xff] %v8519_v23  ;;  %12771 = vst [vmem:[#allocation83_spill] sm:$0xff] %v8522_v27  ;;  %v8525_v6 = vld [vmem:[#allocation7 + $0x100] sm:$0xff]  ;;  %v8528_v20 = vld [vmem:[#allocation7 + $0x110] sm:$0xff] }
 0x6bd   :  { %2107 = vmatpush1.msra.mxu0 %v8513_v13  ;;  %2178 = vmatpush1.msra.mxu1 %v8516_v11  ;;  %12772 = vst [vmem:[#allocation84_spill] sm:$0xff] %v8525_v6  ;;  %12773 = vst [vmem:[#allocation85_spill] sm:$0xff] %v8528_v20  ;;  %v8531_v13 = vld [vmem:[#allocation7 + $0xe8] sm:$0xff]  ;;  %v8534_v11 = vld [vmem:[#allocation7 + $0xf8] sm:$0xff] }
 0x6be   :  { %2108 = vmatprep.subr.mxu0 %v8519_v23  ;;  %2179 = vmatprep.subr.mxu1 %v8522_v27  ;;  %12774 = vst [vmem:[#allocation86_spill] sm:$0xff] %v8531_v13  ;;  %12775 = vst [vmem:[#allocation87_spill] sm:$0xff] %v8534_v11  ;;  %v8537_v23 = vld [vmem:[#allocation7 + $0xe0] sm:$0xff]  ;;  %v8540_v27 = vld [vmem:[#allocation7 + $0xf0] sm:$0xff] }
 0x6bf   :  { %2109 = vmatpush1.msra.mxu0 %v8525_v6  ;;  %2180 = vmatpush1.msra.mxu1 %v8528_v20  ;;  %12776 = vst [vmem:[#allocation88_spill] sm:$0xff] %v8537_v23  ;;  %12777 = vst [vmem:[#allocation89_spill] sm:$0xff] %v8540_v27  ;;  %v8543_v6 = vld [vmem:[#allocation7 + $0xc8] sm:$0xff]  ;;  %v8546_v20 = vld [vmem:[#allocation7 + $0xd8] sm:$0xff] }
 0x6c0   :  { %2110 = vmatprep.subr.mxu0 %v8531_v13  ;;  %2181 = vmatprep.subr.mxu1 %v8534_v11  ;;  %12778 = vst [vmem:[#allocation90_spill] sm:$0xff] %v8543_v6  ;;  %12779 = vst [vmem:[#allocation91_spill] sm:$0xff] %v8546_v20  ;;  %v8549_v13 = vld [vmem:[#allocation7 + $0xc0] sm:$0xff]  ;;  %v8552_v11 = vld [vmem:[#allocation7 + $0xd0] sm:$0xff] }
 0x6c1   :  { %2111 = vmatpush1.msra.mxu0 %v8537_v23  ;;  %2182 = vmatpush1.msra.mxu1 %v8540_v27  ;;  %12780 = vst [vmem:[#allocation92_spill] sm:$0xff] %v8549_v13  ;;  %12781 = vst [vmem:[#allocation93_spill] sm:$0xff] %v8552_v11  ;;  %v8555_v23 = vld [vmem:[#allocation7 + $0xa8] sm:$0xff]  ;;  %v8558_v27 = vld [vmem:[#allocation7 + $0xb8] sm:$0xff] }
 0x6c2   :  { %2112 = vmatprep.subr.mxu0 %v8543_v6  ;;  %2183 = vmatprep.subr.mxu1 %v8546_v20  ;;  %12782 = vst [vmem:[#allocation94_spill] sm:$0xff] %v8555_v23  ;;  %12783 = vst [vmem:[#allocation95_spill] sm:$0xff] %v8558_v27  ;;  %v8561_v6 = vld [vmem:[#allocation7 + $0xa0] sm:$0xff]  ;;  %v8564_v20 = vld [vmem:[#allocation7 + $0xb0] sm:$0xff] }
 0x6c3   :  { %2113 = vmatpush1.msra.mxu0 %v8549_v13  ;;  %2184 = vmatpush1.msra.mxu1 %v8552_v11  ;;  %12784 = vst [vmem:[#allocation96_spill] sm:$0xff] %v8561_v6  ;;  %12785 = vst [vmem:[#allocation97_spill] sm:$0xff] %v8564_v20  ;;  %v8567_v13 = vld [vmem:[#allocation7 + $0x88] sm:$0xff]  ;;  %v8570_v11 = vld [vmem:[#allocation7 + $0x98] sm:$0xff] }
 0x6c4   :  { %2114 = vmatprep.subr.mxu0 %v8555_v23  ;;  %2185 = vmatprep.subr.mxu1 %v8558_v27  ;;  %12786 = vst [vmem:[#allocation98_spill] sm:$0xff] %v8567_v13  ;;  %12787 = vst [vmem:[#allocation99_spill] sm:$0xff] %v8570_v11  ;;  %v8573_v23 = vld [vmem:[#allocation7 + $0x80] sm:$0xff]  ;;  %v8576_v27 = vld [vmem:[#allocation7 + $0x90] sm:$0xff] }
 0x6c5   :  { %2115 = vmatpush1.msra.mxu0 %v8561_v6  ;;  %2186 = vmatpush1.msra.mxu1 %v8564_v20  ;;  %12788 = vst [vmem:[#allocation100_spill] sm:$0xff] %v8573_v23  ;;  %12789 = vst [vmem:[#allocation101_spill] sm:$0xff] %v8576_v27  ;;  %v8579_v6 = vld [vmem:[#allocation7 + $0x68] sm:$0xff]  ;;  %v8582_v20 = vld [vmem:[#allocation7 + $0x78] sm:$0xff] }
 0x6c6   :  { %2116 = vmatprep.subr.mxu0 %v8567_v13  ;;  %2187 = vmatprep.subr.mxu1 %v8570_v11  ;;  %12790 = vst [vmem:[#allocation102_spill] sm:$0xff] %v8579_v6  ;;  %12791 = vst [vmem:[#allocation103_spill] sm:$0xff] %v8582_v20  ;;  %v8585_v13 = vld [vmem:[#allocation7 + $0x60] sm:$0xff]  ;;  %v8588_v11 = vld [vmem:[#allocation7 + $0x70] sm:$0xff] }
 0x6c7   :  { %2117 = vmatpush1.msra.mxu0 %v8573_v23  ;;  %2188 = vmatpush1.msra.mxu1 %v8576_v27  ;;  %12792 = vst [vmem:[#allocation104_spill] sm:$0xff] %v8585_v13  ;;  %12793 = vst [vmem:[#allocation105_spill] sm:$0xff] %v8588_v11  ;;  %v8591_v23 = vld [vmem:[#allocation7 + $0x48] sm:$0xff]  ;;  %v8594_v27 = vld [vmem:[#allocation7 + $0x58] sm:$0xff] }
 0x6c8   :  { %2118 = vmatprep.subr.mxu0 %v8579_v6  ;;  %2189 = vmatprep.subr.mxu1 %v8582_v20  ;;  %12794 = vst [vmem:[#allocation106_spill] sm:$0xff] %v8591_v23  ;;  %12795 = vst [vmem:[#allocation107_spill] sm:$0xff] %v8594_v27  ;;  %v8597_v6 = vld [vmem:[#allocation7 + $0x40] sm:$0xff]  ;;  %v8600_v20 = vld [vmem:[#allocation7 + $0x50] sm:$0xff] }
 0x6c9   :  { %2119 = vmatpush1.msra.mxu0 %v8585_v13  ;;  %2190 = vmatpush1.msra.mxu1 %v8588_v11  ;;  %12796 = vst [vmem:[#allocation108_spill] sm:$0xff] %v8597_v6  ;;  %12797 = vst [vmem:[#allocation109_spill] sm:$0xff] %v8600_v20  ;;  %v8603_v13 = vld [vmem:[#allocation7 + $0x28] sm:$0xff]  ;;  %v8606_v11 = vld [vmem:[#allocation7 + $0x38] sm:$0xff] }
 0x6ca   :  { %2120 = vmatprep.subr.mxu0 %v8591_v23  ;;  %2191 = vmatprep.subr.mxu1 %v8594_v27  ;;  %12798 = vst [vmem:[#allocation110_spill] sm:$0xff] %v8603_v13  ;;  %12799 = vst [vmem:[#allocation111_spill] sm:$0xff] %v8606_v11  ;;  %v8609_v23 = vld [vmem:[#allocation7 + $0x20] sm:$0xff]  ;;  %v8612_v27 = vld [vmem:[#allocation7 + $0x30] sm:$0xff] }
 0x6cb   :  { %2121 = vmatpush1.msra.mxu0 %v8597_v6  ;;  %2192 = vmatpush1.msra.mxu1 %v8600_v20  ;;  %12800 = vst [vmem:[#allocation112_spill] sm:$0xff] %v8609_v23  ;;  %12801 = vst [vmem:[#allocation113_spill] sm:$0xff] %v8612_v27  ;;  %v8615_v6 = vld [vmem:[#allocation7 + $0x8] sm:$0xff]  ;;  %v8618_v20 = vld [vmem:[#allocation7 + $0x18] sm:$0xff] }
 0x6cc   :  { %2122 = vmatprep.subr.mxu0 %v8603_v13  ;;  %2193 = vmatprep.subr.mxu1 %v8606_v11  ;;  %12802 = vst [vmem:[#allocation114_spill] sm:$0xff] %v8615_v6  ;;  %12803 = vst [vmem:[#allocation115_spill] sm:$0xff] %v8618_v20  ;;  %v8621_v13 = vld [vmem:[#allocation7] sm:$0xff]  ;;  %v8625_v11 = vld [vmem:[#allocation7 + $0x10] sm:$0xff] }
 0x6cd   :  { %2123 = vmatpush1.msra.mxu0 %v8609_v23  ;;  %2194 = vmatpush1.msra.mxu1 %v8612_v27  ;;  %12804 = vst [vmem:[#allocation116_spill] sm:$0xff] %v8621_v13  ;;  %12805 = vst [vmem:[#allocation117_spill] sm:$0xff] %v8625_v11 }
 0x6ce   :  { %2124 = vmatprep.subr.mxu0 %v8615_v6  ;;  %2195 = vmatprep.subr.mxu1 %v8618_v20  ;;  %v8633_v20 = vld [vmem:[#allocation9 + $0x1e8] sm:$0xff]  ;;  %v8639_v6 = vld [vmem:[#allocation9 + $0x1e0] sm:$0xff] }
 0x6cf   :  { %2125 = vmatpush1.msra.mxu0 %v8621_v13  ;;  %2158 = vmatprep.mubr.f32.mxu0 %v12536_v4  ;;  %12806 = vst [vmem:[#allocation118_spill] sm:$0xff] %v8633_v20  ;;  %v8636_v13 = vld [vmem:[#allocation9 + $0x1f8] sm:$0xff]  ;;  %12808 = vst [vmem:[#allocation120_spill] sm:$0xff] %v8639_v6 }
 0x6d0   :  { %2196 = vmatpush1.msra.mxu1 %v8625_v11  ;;  %2229 = vmatprep.mubr.f32.mxu1 %v12536_v4  ;;  %12807 = vst [vmem:[#allocation119_spill] sm:$0xff] %v8636_v13  ;;  %v8642_v11 = vld [vmem:[#allocation9 + $0x1f0] sm:$0xff] }
 0x6d1   :  { %2159 = vmatmul.mubr.f32.vlgmr.msra.gmra.mxu0 %v8157_v52  ;;  %2230 = vmatmul.mubr.f32.vlgmr.msra.gmra.mxu1 %v8157_v52  ;;  %12809 = vst [vmem:[#allocation121_spill] sm:$0xff] %v8642_v11  ;;  %v8645_v52 = vld [vmem:[#allocation9 + $0x1c8] sm:$0xff] }
 0x6d2   :  { %2351 = vmatprep.mubr.f32.mxu0 %v8437_v19  ;;  %2422 = vmatprep.mubr.f32.mxu1 %v8437_v19  ;;  %12810 = vst [vmem:[#allocation122_spill] sm:$0xff] %v8645_v52  ;;  %v8648_v19 = vld [vmem:[#allocation9 + $0x1d8] sm:$0xff] }
 0x6d3   :  { %2287 = vmatprep.subr.mxu0 %v8633_v20  ;;  %2358 = vmatprep.subr.mxu1 %v8636_v13  ;;  %12811 = vst [vmem:[#allocation123_spill] sm:$0xff] %v8648_v19  ;;  %v8651_v20 = vld [vmem:[#allocation9 + $0x1c0] sm:$0xff]  ;;  %v8654_v13 = vld [vmem:[#allocation9 + $0x1d0] sm:$0xff] }
 0x6d4   :  { %2288 = vmatpush1.msra.mxu0 %v8639_v6  ;;  %2359 = vmatpush1.msra.mxu1 %v8642_v11  ;;  %12812 = vst [vmem:[#allocation124_spill] sm:$0xff] %v8651_v20  ;;  %12813 = vst [vmem:[#allocation125_spill] sm:$0xff] %v8654_v13  ;;  %v8657_v6 = vld [vmem:[#allocation9 + $0x1a8] sm:$0xff]  ;;  %v8660_v11 = vld [vmem:[#allocation9 + $0x1b8] sm:$0xff] }
 0x6d5   :  { %2289 = vmatprep.subr.mxu0 %v8645_v52  ;;  %2360 = vmatprep.subr.mxu1 %v8648_v19  ;;  %12814 = vst [vmem:[#allocation126_spill] sm:$0xff] %v8657_v6  ;;  %12815 = vst [vmem:[#allocation127_spill] sm:$0xff] %v8660_v11  ;;  %v8663_v52 = vld [vmem:[#allocation9 + $0x1a0] sm:$0xff]  ;;  %v8666_v19 = vld [vmem:[#allocation9 + $0x1b0] sm:$0xff] }
 0x6d6   :  { %2290 = vmatpush1.msra.mxu0 %v8651_v20  ;;  %2361 = vmatpush1.msra.mxu1 %v8654_v13  ;;  %12816 = vst [vmem:[#allocation128_spill] sm:$0xff] %v8663_v52  ;;  %12817 = vst [vmem:[#allocation129_spill] sm:$0xff] %v8666_v19  ;;  %v8669_v20 = vld [vmem:[#allocation9 + $0x188] sm:$0xff]  ;;  %v8672_v13 = vld [vmem:[#allocation9 + $0x198] sm:$0xff] }
 0x6d7   :  { %2291 = vmatprep.subr.mxu0 %v8657_v6  ;;  %2362 = vmatprep.subr.mxu1 %v8660_v11  ;;  %12818 = vst [vmem:[#allocation130_spill] sm:$0xff] %v8669_v20  ;;  %12819 = vst [vmem:[#allocation131_spill] sm:$0xff] %v8672_v13  ;;  %v8675_v6 = vld [vmem:[#allocation9 + $0x180] sm:$0xff]  ;;  %v8678_v11 = vld [vmem:[#allocation9 + $0x190] sm:$0xff] }
 0x6d8   :  { %2292 = vmatpush1.msra.mxu0 %v8663_v52  ;;  %2363 = vmatpush1.msra.mxu1 %v8666_v19  ;;  %12820 = vst [vmem:[#allocation132_spill] sm:$0xff] %v8675_v6  ;;  %12821 = vst [vmem:[#allocation133_spill] sm:$0xff] %v8678_v11  ;;  %v8681_v52 = vld [vmem:[#allocation9 + $0x168] sm:$0xff]  ;;  %v8684_v19 = vld [vmem:[#allocation9 + $0x178] sm:$0xff] }
 0x6d9   :  { %2293 = vmatprep.subr.mxu0 %v8669_v20  ;;  %2364 = vmatprep.subr.mxu1 %v8672_v13  ;;  %12822 = vst [vmem:[#allocation134_spill] sm:$0xff] %v8681_v52  ;;  %12823 = vst [vmem:[#allocation135_spill] sm:$0xff] %v8684_v19  ;;  %v8687_v20 = vld [vmem:[#allocation9 + $0x160] sm:$0xff]  ;;  %v8690_v13 = vld [vmem:[#allocation9 + $0x170] sm:$0xff] }
 0x6da   :  { %2294 = vmatpush1.msra.mxu0 %v8675_v6  ;;  %2365 = vmatpush1.msra.mxu1 %v8678_v11  ;;  %12824 = vst [vmem:[#allocation136_spill] sm:$0xff] %v8687_v20  ;;  %12825 = vst [vmem:[#allocation137_spill] sm:$0xff] %v8690_v13  ;;  %v8693_v6 = vld [vmem:[#allocation9 + $0x148] sm:$0xff]  ;;  %v8696_v11 = vld [vmem:[#allocation9 + $0x158] sm:$0xff] }
 0x6db   :  { %2295 = vmatprep.subr.mxu0 %v8681_v52  ;;  %2366 = vmatprep.subr.mxu1 %v8684_v19  ;;  %12826 = vst [vmem:[#allocation138_spill] sm:$0xff] %v8693_v6  ;;  %12827 = vst [vmem:[#allocation139_spill] sm:$0xff] %v8696_v11  ;;  %v8699_v52 = vld [vmem:[#allocation9 + $0x140] sm:$0xff]  ;;  %v8702_v19 = vld [vmem:[#allocation9 + $0x150] sm:$0xff] }
 0x6dc   :  { %2296 = vmatpush1.msra.mxu0 %v8687_v20  ;;  %2367 = vmatpush1.msra.mxu1 %v8690_v13  ;;  %12828 = vst [vmem:[#allocation140_spill] sm:$0xff] %v8699_v52  ;;  %12829 = vst [vmem:[#allocation141_spill] sm:$0xff] %v8702_v19  ;;  %v8705_v20 = vld [vmem:[#allocation9 + $0x128] sm:$0xff]  ;;  %v8708_v13 = vld [vmem:[#allocation9 + $0x138] sm:$0xff] }
 0x6dd   :  { %2297 = vmatprep.subr.mxu0 %v8693_v6  ;;  %2368 = vmatprep.subr.mxu1 %v8696_v11  ;;  %12830 = vst [vmem:[#allocation142_spill] sm:$0xff] %v8705_v20  ;;  %12831 = vst [vmem:[#allocation143_spill] sm:$0xff] %v8708_v13  ;;  %v8711_v6 = vld [vmem:[#allocation9 + $0x120] sm:$0xff]  ;;  %v8714_v11 = vld [vmem:[#allocation9 + $0x130] sm:$0xff] }
 0x6de   :  { %2298 = vmatpush1.msra.mxu0 %v8699_v52  ;;  %2369 = vmatpush1.msra.mxu1 %v8702_v19  ;;  %12832 = vst [vmem:[#allocation144_spill] sm:$0xff] %v8711_v6  ;;  %12833 = vst [vmem:[#allocation145_spill] sm:$0xff] %v8714_v11  ;;  %v8717_v52 = vld [vmem:[#allocation9 + $0x108] sm:$0xff]  ;;  %v8720_v19 = vld [vmem:[#allocation9 + $0x118] sm:$0xff] }
 0x6df   :  { %2299 = vmatprep.subr.mxu0 %v8705_v20  ;;  %2370 = vmatprep.subr.mxu1 %v8708_v13  ;;  %12834 = vst [vmem:[#allocation146_spill] sm:$0xff] %v8717_v52  ;;  %12835 = vst [vmem:[#allocation147_spill] sm:$0xff] %v8720_v19  ;;  %v8723_v20 = vld [vmem:[#allocation9 + $0x100] sm:$0xff]  ;;  %v8726_v13 = vld [vmem:[#allocation9 + $0x110] sm:$0xff] }
 0x6e0   :  { %2300 = vmatpush1.msra.mxu0 %v8711_v6  ;;  %2371 = vmatpush1.msra.mxu1 %v8714_v11  ;;  %12836 = vst [vmem:[#allocation148_spill] sm:$0xff] %v8723_v20  ;;  %12837 = vst [vmem:[#allocation149_spill] sm:$0xff] %v8726_v13  ;;  %v8729_v6 = vld [vmem:[#allocation9 + $0xe8] sm:$0xff]  ;;  %v8732_v11 = vld [vmem:[#allocation9 + $0xf8] sm:$0xff] }
 0x6e1   :  { %2301 = vmatprep.subr.mxu0 %v8717_v52  ;;  %2372 = vmatprep.subr.mxu1 %v8720_v19  ;;  %12838 = vst [vmem:[#allocation150_spill] sm:$0xff] %v8729_v6  ;;  %12839 = vst [vmem:[#allocation151_spill] sm:$0xff] %v8732_v11  ;;  %v8735_v52 = vld [vmem:[#allocation9 + $0xe0] sm:$0xff]  ;;  %v8738_v19 = vld [vmem:[#allocation9 + $0xf0] sm:$0xff] }
 0x6e2   :  { %2302 = vmatpush1.msra.mxu0 %v8723_v20  ;;  %2373 = vmatpush1.msra.mxu1 %v8726_v13  ;;  %12840 = vst [vmem:[#allocation152_spill] sm:$0xff] %v8735_v52  ;;  %12841 = vst [vmem:[#allocation153_spill] sm:$0xff] %v8738_v19  ;;  %v8741_v20 = vld [vmem:[#allocation9 + $0xc8] sm:$0xff]  ;;  %v8744_v13 = vld [vmem:[#allocation9 + $0xd8] sm:$0xff] }
 0x6e3   :  { %2303 = vmatprep.subr.mxu0 %v8729_v6  ;;  %2374 = vmatprep.subr.mxu1 %v8732_v11  ;;  %12842 = vst [vmem:[#allocation154_spill] sm:$0xff] %v8741_v20  ;;  %12843 = vst [vmem:[#allocation155_spill] sm:$0xff] %v8744_v13  ;;  %v8747_v6 = vld [vmem:[#allocation9 + $0xc0] sm:$0xff]  ;;  %v8750_v11 = vld [vmem:[#allocation9 + $0xd0] sm:$0xff] }
 0x6e4   :  { %2304 = vmatpush1.msra.mxu0 %v8735_v52  ;;  %2375 = vmatpush1.msra.mxu1 %v8738_v19  ;;  %12844 = vst [vmem:[#allocation156_spill] sm:$0xff] %v8747_v6  ;;  %12845 = vst [vmem:[#allocation157_spill] sm:$0xff] %v8750_v11  ;;  %v8753_v52 = vld [vmem:[#allocation9 + $0xa8] sm:$0xff]  ;;  %v8756_v19 = vld [vmem:[#allocation9 + $0xb8] sm:$0xff] }
 0x6e5   :  { %2305 = vmatprep.subr.mxu0 %v8741_v20  ;;  %2376 = vmatprep.subr.mxu1 %v8744_v13  ;;  %12846 = vst [vmem:[#allocation158_spill] sm:$0xff] %v8753_v52  ;;  %12847 = vst [vmem:[#allocation159_spill] sm:$0xff] %v8756_v19  ;;  %v8759_v20 = vld [vmem:[#allocation9 + $0xa0] sm:$0xff]  ;;  %v8762_v13 = vld [vmem:[#allocation9 + $0xb0] sm:$0xff] }
 0x6e6   :  { %2306 = vmatpush1.msra.mxu0 %v8747_v6  ;;  %2377 = vmatpush1.msra.mxu1 %v8750_v11  ;;  %12848 = vst [vmem:[#allocation160_spill] sm:$0xff] %v8759_v20  ;;  %12849 = vst [vmem:[#allocation161_spill] sm:$0xff] %v8762_v13  ;;  %v8765_v6 = vld [vmem:[#allocation9 + $0x88] sm:$0xff]  ;;  %v8768_v11 = vld [vmem:[#allocation9 + $0x98] sm:$0xff] }
 0x6e7   :  { %2307 = vmatprep.subr.mxu0 %v8753_v52  ;;  %2378 = vmatprep.subr.mxu1 %v8756_v19  ;;  %12850 = vst [vmem:[#allocation162_spill] sm:$0xff] %v8765_v6  ;;  %12851 = vst [vmem:[#allocation163_spill] sm:$0xff] %v8768_v11  ;;  %v8771_v52 = vld [vmem:[#allocation9 + $0x80] sm:$0xff]  ;;  %v8774_v19 = vld [vmem:[#allocation9 + $0x90] sm:$0xff] }
 0x6e8   :  { %2308 = vmatpush1.msra.mxu0 %v8759_v20  ;;  %2379 = vmatpush1.msra.mxu1 %v8762_v13  ;;  %12852 = vst [vmem:[#allocation164_spill] sm:$0xff] %v8771_v52  ;;  %12853 = vst [vmem:[#allocation165_spill] sm:$0xff] %v8774_v19  ;;  %v8777_v20 = vld [vmem:[#allocation9 + $0x68] sm:$0xff]  ;;  %v8780_v13 = vld [vmem:[#allocation9 + $0x78] sm:$0xff] }
 0x6e9   :  { %2309 = vmatprep.subr.mxu0 %v8765_v6  ;;  %2380 = vmatprep.subr.mxu1 %v8768_v11  ;;  %12854 = vst [vmem:[#allocation166_spill] sm:$0xff] %v8777_v20  ;;  %12855 = vst [vmem:[#allocation167_spill] sm:$0xff] %v8780_v13  ;;  %v8783_v6 = vld [vmem:[#allocation9 + $0x60] sm:$0xff]  ;;  %v8786_v11 = vld [vmem:[#allocation9 + $0x70] sm:$0xff] }
 0x6ea   :  { %2310 = vmatpush1.msra.mxu0 %v8771_v52  ;;  %2381 = vmatpush1.msra.mxu1 %v8774_v19  ;;  %12856 = vst [vmem:[#allocation168_spill] sm:$0xff] %v8783_v6  ;;  %12857 = vst [vmem:[#allocation169_spill] sm:$0xff] %v8786_v11  ;;  %v8789_v52 = vld [vmem:[#allocation9 + $0x48] sm:$0xff]  ;;  %v8792_v19 = vld [vmem:[#allocation9 + $0x58] sm:$0xff] }
 0x6eb   :  { %2311 = vmatprep.subr.mxu0 %v8777_v20  ;;  %2382 = vmatprep.subr.mxu1 %v8780_v13  ;;  %12858 = vst [vmem:[#allocation170_spill] sm:$0xff] %v8789_v52  ;;  %12859 = vst [vmem:[#allocation171_spill] sm:$0xff] %v8792_v19  ;;  %v8795_v20 = vld [vmem:[#allocation9 + $0x40] sm:$0xff]  ;;  %v8798_v13 = vld [vmem:[#allocation9 + $0x50] sm:$0xff] }
 0x6ec   :  { %2312 = vmatpush1.msra.mxu0 %v8783_v6  ;;  %2383 = vmatpush1.msra.mxu1 %v8786_v11  ;;  %12860 = vst [vmem:[#allocation172_spill] sm:$0xff] %v8795_v20  ;;  %12861 = vst [vmem:[#allocation173_spill] sm:$0xff] %v8798_v13  ;;  %v8801_v6 = vld [vmem:[#allocation9 + $0x28] sm:$0xff]  ;;  %v8804_v11 = vld [vmem:[#allocation9 + $0x38] sm:$0xff] }
 0x6ed   :  { %2313 = vmatprep.subr.mxu0 %v8789_v52  ;;  %2384 = vmatprep.subr.mxu1 %v8792_v19  ;;  %12862 = vst [vmem:[#allocation174_spill] sm:$0xff] %v8801_v6  ;;  %12863 = vst [vmem:[#allocation175_spill] sm:$0xff] %v8804_v11  ;;  %v8807_v52 = vld [vmem:[#allocation9 + $0x20] sm:$0xff]  ;;  %v8810_v19 = vld [vmem:[#allocation9 + $0x30] sm:$0xff] }
 0x6ee   :  { %2314 = vmatpush1.msra.mxu0 %v8795_v20  ;;  %2385 = vmatpush1.msra.mxu1 %v8798_v13  ;;  %12864 = vst [vmem:[#allocation176_spill] sm:$0xff] %v8807_v52  ;;  %12865 = vst [vmem:[#allocation177_spill] sm:$0xff] %v8810_v19  ;;  %v8813_v20 = vld [vmem:[#allocation9 + $0x8] sm:$0xff]  ;;  %v8816_v13 = vld [vmem:[#allocation9 + $0x18] sm:$0xff] }
 0x6ef   :  { %2315 = vmatprep.subr.mxu0 %v8801_v6  ;;  %2386 = vmatprep.subr.mxu1 %v8804_v11  ;;  %12866 = vst [vmem:[#allocation178_spill] sm:$0xff] %v8813_v20  ;;  %12867 = vst [vmem:[#allocation179_spill] sm:$0xff] %v8816_v13  ;;  %v8819_v6 = vld [vmem:[#allocation9] sm:$0xff]  ;;  %v8822_v11 = vld [vmem:[#allocation9 + $0x10] sm:$0xff] }
 0x6f0   :  { %2316 = vmatpush1.msra.mxu0 %v8807_v52  ;;  %2387 = vmatpush1.msra.mxu1 %v8810_v19  ;;  %12868 = vst [vmem:[#allocation180_spill] sm:$0xff] %v8819_v6  ;;  %12869 = vst [vmem:[#allocation181_spill] sm:$0xff] %v8822_v11  ;;  %v8825_v52 = vld [vmem:[#allocation9 + $0x3e8] sm:$0xff]  ;;  %v8828_v19 = vld [vmem:[#allocation9 + $0x3f8] sm:$0xff] }
 0x6f1   :  { %2317 = vmatprep.subr.mxu0 %v8813_v20  ;;  %2388 = vmatprep.subr.mxu1 %v8816_v13  ;;  %12870 = vst [vmem:[#allocation182_spill] sm:$0xff] %v8825_v52  ;;  %12871 = vst [vmem:[#allocation183_spill] sm:$0xff] %v8828_v19  ;;  %v8831_v20 = vld [vmem:[#allocation9 + $0x3e0] sm:$0xff]  ;;  %v8834_v13 = vld [vmem:[#allocation9 + $0x3f0] sm:$0xff] }
 0x6f2   :  { %2318 = vmatpush1.msra.mxu0 %v8819_v6  ;;  %2389 = vmatpush1.msra.mxu1 %v8822_v11  ;;  %12872 = vst [vmem:[#allocation184_spill] sm:$0xff] %v8831_v20  ;;  %12873 = vst [vmem:[#allocation185_spill] sm:$0xff] %v8834_v13  ;;  %v8837_v6 = vld [vmem:[#allocation9 + $0x3c8] sm:$0xff]  ;;  %v8840_v11 = vld [vmem:[#allocation9 + $0x3d8] sm:$0xff] }
 0x6f3   :  { %2319 = vmatprep.subr.mxu0 %v8825_v52  ;;  %2390 = vmatprep.subr.mxu1 %v8828_v19  ;;  %12874 = vst [vmem:[#allocation186_spill] sm:$0xff] %v8837_v6  ;;  %12875 = vst [vmem:[#allocation187_spill] sm:$0xff] %v8840_v11  ;;  %v8843_v52 = vld [vmem:[#allocation9 + $0x3c0] sm:$0xff]  ;;  %v8846_v19 = vld [vmem:[#allocation9 + $0x3d0] sm:$0xff] }
 0x6f4   :  { %2320 = vmatpush2.msra.mxu0 %v8831_v20  ;;  %2391 = vmatpush2.msra.mxu1 %v8834_v13  ;;  %12876 = vst [vmem:[#allocation188_spill] sm:$0xff] %v8843_v52  ;;  %12877 = vst [vmem:[#allocation189_spill] sm:$0xff] %v8846_v19  ;;  %v8849_v20 = vld [vmem:[#allocation9 + $0x3a8] sm:$0xff]  ;;  %v8852_v13 = vld [vmem:[#allocation9 + $0x3b8] sm:$0xff] }
 0x6f5   :  { %2321 = vmatprep.subr.mxu0 %v8837_v6  ;;  %2392 = vmatprep.subr.mxu1 %v8840_v11  ;;  %12878 = vst [vmem:[#allocation190_spill] sm:$0xff] %v8849_v20  ;;  %12879 = vst [vmem:[#allocation191_spill] sm:$0xff] %v8852_v13  ;;  %v8855_v6 = vld [vmem:[#allocation9 + $0x3a0] sm:$0xff]  ;;  %v8858_v11 = vld [vmem:[#allocation9 + $0x3b0] sm:$0xff] }
 0x6f6   :  { %2322 = vmatpush2.msra.mxu0 %v8843_v52  ;;  %2393 = vmatpush2.msra.mxu1 %v8846_v19  ;;  %12880 = vst [vmem:[#allocation192_spill] sm:$0xff] %v8855_v6  ;;  %12881 = vst [vmem:[#allocation193_spill] sm:$0xff] %v8858_v11  ;;  %v8861_v52 = vld [vmem:[#allocation9 + $0x388] sm:$0xff]  ;;  %v8864_v19 = vld [vmem:[#allocation9 + $0x398] sm:$0xff] }
 0x6f7   :  { %2323 = vmatprep.subr.mxu0 %v8849_v20  ;;  %2394 = vmatprep.subr.mxu1 %v8852_v13  ;;  %12882 = vst [vmem:[#allocation194_spill] sm:$0xff] %v8861_v52  ;;  %12883 = vst [vmem:[#allocation195_spill] sm:$0xff] %v8864_v19  ;;  %v8867_v20 = vld [vmem:[#allocation9 + $0x380] sm:$0xff]  ;;  %v8870_v13 = vld [vmem:[#allocation9 + $0x390] sm:$0xff] }
 0x6f8   :  { %2324 = vmatpush2.msra.mxu0 %v8855_v6  ;;  %2395 = vmatpush2.msra.mxu1 %v8858_v11  ;;  %12884 = vst [vmem:[#allocation196_spill] sm:$0xff] %v8867_v20  ;;  %12885 = vst [vmem:[#allocation197_spill] sm:$0xff] %v8870_v13  ;;  %v8873_v6 = vld [vmem:[#allocation9 + $0x368] sm:$0xff]  ;;  %v8876_v11 = vld [vmem:[#allocation9 + $0x378] sm:$0xff] }
 0x6f9   :  { %2325 = vmatprep.subr.mxu0 %v8861_v52  ;;  %2396 = vmatprep.subr.mxu1 %v8864_v19  ;;  %12886 = vst [vmem:[#allocation198_spill] sm:$0xff] %v8873_v6  ;;  %12887 = vst [vmem:[#allocation199_spill] sm:$0xff] %v8876_v11  ;;  %v8879_v52 = vld [vmem:[#allocation9 + $0x360] sm:$0xff]  ;;  %v8882_v19 = vld [vmem:[#allocation9 + $0x370] sm:$0xff] }
 0x6fa   :  { %2326 = vmatpush2.msra.mxu0 %v8867_v20  ;;  %2397 = vmatpush2.msra.mxu1 %v8870_v13  ;;  %12888 = vst [vmem:[#allocation200_spill] sm:$0xff] %v8879_v52  ;;  %12889 = vst [vmem:[#allocation201_spill] sm:$0xff] %v8882_v19  ;;  %v8885_v20 = vld [vmem:[#allocation9 + $0x348] sm:$0xff]  ;;  %v8888_v13 = vld [vmem:[#allocation9 + $0x358] sm:$0xff] }
 0x6fb   :  { %2327 = vmatprep.subr.mxu0 %v8873_v6  ;;  %2398 = vmatprep.subr.mxu1 %v8876_v11  ;;  %12890 = vst [vmem:[#allocation202_spill] sm:$0xff] %v8885_v20  ;;  %12891 = vst [vmem:[#allocation203_spill] sm:$0xff] %v8888_v13  ;;  %v8891_v6 = vld [vmem:[#allocation9 + $0x340] sm:$0xff]  ;;  %v8894_v11 = vld [vmem:[#allocation9 + $0x350] sm:$0xff] }
 0x6fc   :  { %2328 = vmatpush2.msra.mxu0 %v8879_v52  ;;  %2399 = vmatpush2.msra.mxu1 %v8882_v19  ;;  %12892 = vst [vmem:[#allocation204_spill] sm:$0xff] %v8891_v6  ;;  %12893 = vst [vmem:[#allocation205_spill] sm:$0xff] %v8894_v11  ;;  %v8897_v52 = vld [vmem:[#allocation9 + $0x328] sm:$0xff]  ;;  %v8900_v19 = vld [vmem:[#allocation9 + $0x338] sm:$0xff] }
 0x6fd   :  { %2329 = vmatprep.subr.mxu0 %v8885_v20  ;;  %2400 = vmatprep.subr.mxu1 %v8888_v13  ;;  %12894 = vst [vmem:[#allocation206_spill] sm:$0xff] %v8897_v52  ;;  %12895 = vst [vmem:[#allocation207_spill] sm:$0xff] %v8900_v19  ;;  %v8903_v20 = vld [vmem:[#allocation9 + $0x320] sm:$0xff]  ;;  %v8906_v13 = vld [vmem:[#allocation9 + $0x330] sm:$0xff] }
 0x6fe   :  { %2330 = vmatpush2.msra.mxu0 %v8891_v6  ;;  %2401 = vmatpush2.msra.mxu1 %v8894_v11  ;;  %12896 = vst [vmem:[#allocation208_spill] sm:$0xff] %v8903_v20  ;;  %12897 = vst [vmem:[#allocation209_spill] sm:$0xff] %v8906_v13  ;;  %v8909_v6 = vld [vmem:[#allocation9 + $0x308] sm:$0xff]  ;;  %v8912_v11 = vld [vmem:[#allocation9 + $0x318] sm:$0xff] }
 0x6ff   :  { %2331 = vmatprep.subr.mxu0 %v8897_v52  ;;  %2402 = vmatprep.subr.mxu1 %v8900_v19  ;;  %12898 = vst [vmem:[#allocation210_spill] sm:$0xff] %v8909_v6  ;;  %12899 = vst [vmem:[#allocation211_spill] sm:$0xff] %v8912_v11  ;;  %v8915_v52 = vld [vmem:[#allocation9 + $0x300] sm:$0xff]  ;;  %v8918_v19 = vld [vmem:[#allocation9 + $0x310] sm:$0xff] }
 0x700   :  { %2332 = vmatpush2.msra.mxu0 %v8903_v20  ;;  %2403 = vmatpush2.msra.mxu1 %v8906_v13  ;;  %12900 = vst [vmem:[#allocation212_spill] sm:$0xff] %v8915_v52  ;;  %12901 = vst [vmem:[#allocation213_spill] sm:$0xff] %v8918_v19  ;;  %v8921_v20 = vld [vmem:[#allocation9 + $0x2e8] sm:$0xff]  ;;  %v8924_v13 = vld [vmem:[#allocation9 + $0x2f8] sm:$0xff] }
 0x701   :  { %2333 = vmatprep.subr.mxu0 %v8909_v6  ;;  %2404 = vmatprep.subr.mxu1 %v8912_v11  ;;  %12902 = vst [vmem:[#allocation214_spill] sm:$0xff] %v8921_v20  ;;  %12903 = vst [vmem:[#allocation215_spill] sm:$0xff] %v8924_v13  ;;  %v8927_v6 = vld [vmem:[#allocation9 + $0x2e0] sm:$0xff]  ;;  %v8930_v11 = vld [vmem:[#allocation9 + $0x2f0] sm:$0xff] }
 0x702   :  { %2334 = vmatpush2.msra.mxu0 %v8915_v52  ;;  %2405 = vmatpush2.msra.mxu1 %v8918_v19  ;;  %12904 = vst [vmem:[#allocation216_spill] sm:$0xff] %v8927_v6  ;;  %12905 = vst [vmem:[#allocation217_spill] sm:$0xff] %v8930_v11  ;;  %v8933_v52 = vld [vmem:[#allocation9 + $0x2c8] sm:$0xff]  ;;  %v8936_v19 = vld [vmem:[#allocation9 + $0x2d8] sm:$0xff] }
 0x703   :  { %2335 = vmatprep.subr.mxu0 %v8921_v20  ;;  %2406 = vmatprep.subr.mxu1 %v8924_v13  ;;  %12906 = vst [vmem:[#allocation218_spill] sm:$0xff] %v8933_v52  ;;  %12907 = vst [vmem:[#allocation219_spill] sm:$0xff] %v8936_v19  ;;  %v8939_v20 = vld [vmem:[#allocation9 + $0x2c0] sm:$0xff]  ;;  %v8942_v13 = vld [vmem:[#allocation9 + $0x2d0] sm:$0xff] }
 0x704   :  { %2336 = vmatpush2.msra.mxu0 %v8927_v6  ;;  %2407 = vmatpush2.msra.mxu1 %v8930_v11  ;;  %12908 = vst [vmem:[#allocation220_spill] sm:$0xff] %v8939_v20  ;;  %12909 = vst [vmem:[#allocation221_spill] sm:$0xff] %v8942_v13  ;;  %v8945_v6 = vld [vmem:[#allocation9 + $0x2a8] sm:$0xff]  ;;  %v8948_v11 = vld [vmem:[#allocation9 + $0x2b8] sm:$0xff] }
 0x705   :  { %2337 = vmatprep.subr.mxu0 %v8933_v52  ;;  %2408 = vmatprep.subr.mxu1 %v8936_v19  ;;  %12910 = vst [vmem:[#allocation222_spill] sm:$0xff] %v8945_v6  ;;  %12911 = vst [vmem:[#allocation223_spill] sm:$0xff] %v8948_v11  ;;  %v8951_v52 = vld [vmem:[#allocation9 + $0x2a0] sm:$0xff]  ;;  %v8954_v19 = vld [vmem:[#allocation9 + $0x2b0] sm:$0xff] }
 0x706   :  { %2338 = vmatpush2.msra.mxu0 %v8939_v20  ;;  %2409 = vmatpush2.msra.mxu1 %v8942_v13  ;;  %12912 = vst [vmem:[#allocation224_spill] sm:$0xff] %v8951_v52  ;;  %12913 = vst [vmem:[#allocation225_spill] sm:$0xff] %v8954_v19  ;;  %v8957_v20 = vld [vmem:[#allocation9 + $0x288] sm:$0xff]  ;;  %v8960_v13 = vld [vmem:[#allocation9 + $0x298] sm:$0xff] }
 0x707   :  { %2339 = vmatprep.subr.mxu0 %v8945_v6  ;;  %2410 = vmatprep.subr.mxu1 %v8948_v11  ;;  %12914 = vst [vmem:[#allocation226_spill] sm:$0xff] %v8957_v20  ;;  %12915 = vst [vmem:[#allocation227_spill] sm:$0xff] %v8960_v13  ;;  %v8963_v6 = vld [vmem:[#allocation9 + $0x280] sm:$0xff]  ;;  %v8966_v11 = vld [vmem:[#allocation9 + $0x290] sm:$0xff] }
 0x708   :  { %2340 = vmatpush2.msra.mxu0 %v8951_v52  ;;  %2411 = vmatpush2.msra.mxu1 %v8954_v19  ;;  %12916 = vst [vmem:[#allocation228_spill] sm:$0xff] %v8963_v6  ;;  %12917 = vst [vmem:[#allocation229_spill] sm:$0xff] %v8966_v11  ;;  %v8969_v52 = vld [vmem:[#allocation9 + $0x268] sm:$0xff]  ;;  %v8972_v19 = vld [vmem:[#allocation9 + $0x278] sm:$0xff] }
 0x709   :  { %2341 = vmatprep.subr.mxu0 %v8957_v20  ;;  %2412 = vmatprep.subr.mxu1 %v8960_v13  ;;  %12918 = vst [vmem:[#allocation230_spill] sm:$0xff] %v8969_v52  ;;  %12919 = vst [vmem:[#allocation231_spill] sm:$0xff] %v8972_v19  ;;  %v8975_v20 = vld [vmem:[#allocation9 + $0x260] sm:$0xff]  ;;  %v8978_v13 = vld [vmem:[#allocation9 + $0x270] sm:$0xff] }
 0x70a   :  { %2342 = vmatpush2.msra.mxu0 %v8963_v6  ;;  %2413 = vmatpush2.msra.mxu1 %v8966_v11  ;;  %12920 = vst [vmem:[#allocation232_spill] sm:$0xff] %v8975_v20  ;;  %12921 = vst [vmem:[#allocation233_spill] sm:$0xff] %v8978_v13  ;;  %v8981_v6 = vld [vmem:[#allocation9 + $0x248] sm:$0xff]  ;;  %v8984_v11 = vld [vmem:[#allocation9 + $0x258] sm:$0xff] }
 0x70b   :  { %2343 = vmatprep.subr.mxu0 %v8969_v52  ;;  %2414 = vmatprep.subr.mxu1 %v8972_v19  ;;  %12922 = vst [vmem:[#allocation234_spill] sm:$0xff] %v8981_v6  ;;  %12923 = vst [vmem:[#allocation235_spill] sm:$0xff] %v8984_v11  ;;  %v8987_v52 = vld [vmem:[#allocation9 + $0x240] sm:$0xff]  ;;  %v8990_v19 = vld [vmem:[#allocation9 + $0x250] sm:$0xff] }
 0x70c   :  { %2344 = vmatpush2.msra.mxu0 %v8975_v20  ;;  %2415 = vmatpush2.msra.mxu1 %v8978_v13  ;;  %12924 = vst [vmem:[#allocation236_spill] sm:$0xff] %v8987_v52  ;;  %12925 = vst [vmem:[#allocation237_spill] sm:$0xff] %v8990_v19  ;;  %v8993_v20 = vld [vmem:[#allocation9 + $0x228] sm:$0xff]  ;;  %v8996_v13 = vld [vmem:[#allocation9 + $0x238] sm:$0xff] }
 0x70d   :  { %2345 = vmatprep.subr.mxu0 %v8981_v6  ;;  %2416 = vmatprep.subr.mxu1 %v8984_v11  ;;  %12926 = vst [vmem:[#allocation238_spill] sm:$0xff] %v8993_v20  ;;  %12927 = vst [vmem:[#allocation239_spill] sm:$0xff] %v8996_v13  ;;  %v8999_v6 = vld [vmem:[#allocation9 + $0x220] sm:$0xff]  ;;  %v9002_v11 = vld [vmem:[#allocation9 + $0x230] sm:$0xff] }
 0x70e   :  { %2346 = vmatpush2.msra.mxu0 %v8987_v52  ;;  %2417 = vmatpush2.msra.mxu1 %v8990_v19  ;;  %12928 = vst [vmem:[#allocation240_spill] sm:$0xff] %v8999_v6  ;;  %12929 = vst [vmem:[#allocation241_spill] sm:$0xff] %v9002_v11  ;;  %v9005_v52 = vld [vmem:[#allocation9 + $0x208] sm:$0xff]  ;;  %v9008_v19 = vld [vmem:[#allocation9 + $0x218] sm:$0xff] }
 0x70f   :  { %2347 = vmatprep.subr.mxu0 %v8993_v20  ;;  %2418 = vmatprep.subr.mxu1 %v8996_v13  ;;  %12930 = vst [vmem:[#allocation242_spill] sm:$0xff] %v9005_v52  ;;  %12931 = vst [vmem:[#allocation243_spill] sm:$0xff] %v9008_v19  ;;  %v9011_v20 = vld [vmem:[#allocation9 + $0x200] sm:$0xff]  ;;  %v9014_v13 = vld [vmem:[#allocation9 + $0x210] sm:$0xff] }
 0x710   :  { %2348 = vmatpush2.msra.mxu0 %v8999_v6  ;;  %2419 = vmatpush2.msra.mxu1 %v9002_v11  ;;  %12932 = vst [vmem:[#allocation244_spill] sm:$0xff] %v9011_v20  ;;  %12933 = vst [vmem:[#allocation245_spill] sm:$0xff] %v9014_v13  ;;  %v9017_v6 = vld [vmem:[#allocation10 + $0x1e8] sm:$0xff]  ;;  %v9020_v11 = vld [vmem:[#allocation10 + $0x1f8] sm:$0xff] }
 0x711   :  { %2349 = vmatprep.subr.mxu0 %v9005_v52  ;;  %2420 = vmatprep.subr.mxu1 %v9008_v19  ;;  %12934 = vst [vmem:[#allocation246_spill] sm:$0xff] %v9017_v6  ;;  %12935 = vst [vmem:[#allocation247_spill] sm:$0xff] %v9020_v11 }
 0x712   :  { %2350 = vmatpush2.msra.mxu0 %v9011_v20  ;;  %2421 = vmatpush2.msra.mxu1 %v9014_v13 }
 0x713   :  { %2453 = vmatprep.subr.mxu0 %v9017_v6  ;;  %2524 = vmatprep.subr.mxu1 %v9020_v11 }
 0x770   :  { %v1991_v52 = vpop.f32.mrf.mxu0  ;;  %v2062_v20 = vpop.f32.mrf.mxu1 }
 0x771   :  { %v1992_v4 = vadd.f32 %v1991_v52, %v12669_v18  ;;  %v2063_v24 = vadd.f32 %v2062_v20, %v7663_v37 }
 0x772   :  { %v1993_v19 = vpop.f32.mrf.mxu0  ;;  %v2064_v13 = vpop.f32.mrf.mxu1 }
 0x773   :  { %v4899_v27 = vmul.f32 -1.442695, %v1992_v4  ;;  %v1994_v23 = vadd.f32 %v1993_v19, %v12668_v14  ;;  %v2065_v38 = vadd.f32 %v2064_v13, %v7661_v43 }
 0x775   :  { %5114 = vpow2.f32 %v4899_v27  ;;  %v4900_v22 = vmul.f32 -1.442695, %v1994_v23  ;;  %v4901_v49 = vmul.f32 -1.442695, %v2065_v38 }
 0x777   :  { %5116 = vpow2.f32 %v4900_v22 }
 0x778   :  { %5118 = vpow2.f32 %v4901_v49  ;;  %v2092_v49 = vstv %s4902_s16 }
 0x782   :  { %v5115_v6 = vpop.eup %5114 }
 0x783   :  { %v2076_v5 = vadd.f32 1.0, %v5115_v6 }
 0x784   :  { %v5117_v11 = vpop.eup %5116 }
 0x785   :  { %5120 = vrcp.f32 %v2076_v5  ;;  %v2077_v52 = vadd.f32 1.0, %v5117_v11  ;;  %v5119_v4 = vpop.eup %5118 }
 0x786   :  { %5122 = vtanh.f32 %v2063_v24  ;;  %v2078_v38 = vadd.f32 1.0, %v5119_v4 }
 0x787   :  { %5124 = vrcp.f32 %v2077_v52  ;;  %v9032_v52 = vld [vmem:[#allocation6] sm:$0xf] }
 0x788   :  { %5126 = vrcp.f32 %v2078_v38  ;;  %v2093_v37 = vmul.f32 %v9032_v52, %v2092_v49 }
 0x791   :  { %v2160_v27 = vpop.f32.mrf.mxu0  ;;  %v2231_v19 = vpop.f32.mrf.mxu1 }
 0x792   :  { %v5121_v23 = vpop.eup %5120 }
 0x793   :  { %v5123_v22 = vpop.eup %5122  ;;  %v2162_v14 = vpop.f32.mrf.mxu0 }
 0x794   :  { %v2233_v18 = vpop.f32.mrf.mxu1  ;;  %v5125_v13 = vpop.eup %5124  ;;  %v2240_v43 = vcombine.low %v2160_v27, %v2162_v14  ;;  %v2087_v20 = vmul.f32 %v5123_v22, %v5121_v23  ;;  %v12936_v22 = vld [vmem:[#allocation253_spill] sm:$0xff] }
 0x795   :  { %v2241_v25 = vcombine.low %v2231_v19, %v2233_v18  ;;  %v2086_v6 = vmul.f32 %v5125_v13, %v8150_v8 }
 0x796   :  { %v2248_v5 = vrot.slane %v2240_v43, %v6813_v12  ;;  %v5127_v43 = vpop.eup %5126 }
 0x797   :  { %v2255_v24 = vrot.slane %v2241_v25, %v6813_v12  ;;  %v9030_v11 = vadd.f32 %v2087_v20, %v2086_v6  ;;  %v4732_v25 = vrot.slane %v8159_v53, 7 }
 0x799   :  { %v2256_v21 = vcombine.low %v2248_v5, %v2255_v24  ;;  %5128 = vtanh.f32 %v9030_v11  ;;  %v4753_v13 = vsel %vm4752_vm0, %v12936_v22, %v4732_v25  ;;  %v9059_v25 = vld [vmem:[#allocation10 + $0x1d8] sm:$0xff]  ;;  %v9068_v22 = vld [vmem:[#allocation10 + $0x1a8] sm:$0xff] }
 0x79b   :  { %v2263_v14 = vrot.slane %v2256_v21, %v6813_v12 }
 0x79d   :  { %v2265_v18 = vadd.f32 %v2263_v14, %v2093_v37 }
 0x79f   :  { %v2266_v8 = vadd.f32 %v2265_v18, %v6823_v29 }
 0x7a1   :  { %v4903_v4 = vmul.f32 -1.442695, %v2266_v8 }
 0x7a3   :  { %5130 = vpow2.f32 %v4903_v4 }
 0x7a4   :  { %5132 = vtanh.f32 %v2266_v8  ;;  %v9050_v8 = vld [vmem:[#allocation10 + $0x1e0] sm:$0xff] }
 0x7a6   :  { %v5129_v27 = vpop.eup %5128 }
 0x7a7   :  { %v2090_v19 = vmul.f32 %v5129_v27, %v5127_v43  ;;  %v9056_v27 = vld [vmem:[#allocation10 + $0x1c8] sm:$0xff] }
 0x7a9   :  { %v4735_v23 = vrot.slane %v2090_v19, 6 }
 0x7ab   :  { %v9040_v38 = vsel %vm4754_vm1, %v4753_v13, %v4735_v23  ;;  %v9062_v23 = vld [vmem:[#allocation10 + $0x1c0] sm:$0xff]  ;;  %v9071_v13 = vld [vmem:[#allocation10 + $0x1b8] sm:$0xff] }
 0x7b0   :  { %v5131_v20 = vpop.eup %5130 }
 0x7b1   :  { %v2270_v6 = vadd.f32 1.0, %v5131_v20  ;;  %v5133_v37 = vpop.eup %5132  ;;  %v9074_v20 = vld [vmem:[#allocation10 + $0x1a0] sm:$0xff] }
 0x7b2   :  { %v2279_v5 = vrot.slane %v5133_v37, 2  ;;  %v9080_v37 = vld [vmem:[#allocation10 + $0x188] sm:$0xff] }
 0x7b3   :  { %5134 = vrcp.f32 %v2270_v6  ;;  %v9077_v6 = vld [vmem:[#allocation10 + $0x1b0] sm:$0xff] }
 0x7c0   :  { %v5135_v21 = vpop.eup %5134 }
 0x7c1   :  { %v2275_v49 = vrot.slane %v5135_v21, 1  ;;  %v2281_v14 = vmul.f32 %v5135_v21, %v2279_v5  ;;  %v2284_v18 = vrot.slane %v5135_v21, 3  ;;  %v9083_v21 = vld [vmem:[#allocation10 + $0x198] sm:$0xff]  ;;  %v9089_v5 = vld [vmem:[#allocation10 + $0x190] sm:$0xff] }
 0x7c2   :  { %12938 = vst [vmem:[#allocation254_spill] sm:$0xff] %v9089_v5 }
 0x7c3   :  { %v2277_v24 = vmul.f32 %v2275_v49, %v8153_v26  ;;  %v9053_v26 = vld [vmem:[#allocation10 + $0x1f0] sm:$0xff]  ;;  %v9086_v49 = vld [vmem:[#allocation10 + $0x180] sm:$0xff] }
 0x7c4   :  { %12937 = vst [vmem:[#allocation248_spill] sm:$0xff] %v9086_v49 }
 0x7c5   :  { %v9043_v53 = vadd.f32 %v2281_v14, %v2277_v24  ;;  %v9092_v24 = vld [vmem:[#allocation10 + $0x168] sm:$0xff]  ;;  %v9095_v14 = vld [vmem:[#allocation10 + $0x178] sm:$0xff] }
 0x7c6   :  { %12939 = vst [vmem:[#allocation255_spill] sm:$0xff] %v9092_v24  ;;  %12940 = vst [vmem:[#allocation256_spill] sm:$0xff] %v9095_v14 }
 0x7c7   :  { %5136 = vtanh.f32 %v9043_v53 }
 0x7d4   :  { %v5137_v4 = vpop.eup %5136 }
 0x7d5   :  { %v9046_v43 = vmul.f32 %v5137_v4, %v2284_v18  ;;  %v9098_v18 = vld [vmem:[#allocation10 + $0x160] sm:$0xff]  ;;  %v9101_v4 = vld [vmem:[#allocation10 + $0x170] sm:$0xff] }
 0x7d6   :  { %12941 = vst [vmem:[#allocation257_spill] sm:$0xff] %v9098_v18  ;;  %12942 = vst [vmem:[#allocation258_spill] sm:$0xff] %v9101_v4 }
 0x7d7   :  { %2352 = vmatmul.mubr.f32.vlgmr.msra.gmra.mxu0 %v9046_v43  ;;  %2423 = vmatmul.mubr.f32.vlgmr.msra.gmra.mxu1 %v9046_v43 }
 0x7d8   :  { %2517 = vmatprep.mubr.f32.mxu0 %v2090_v19  ;;  %2588 = vmatprep.mubr.f32.mxu1 %v2090_v19  ;;  %v9065_v19 = vld [vmem:[#allocation10 + $0x1d0] sm:$0xff] }
 0x7d9   :  { %2454 = vmatpush1.msra.mxu0 %v9050_v8  ;;  %2525 = vmatpush1.msra.mxu1 %v9053_v26 }
 0x7da   :  { %2455 = vmatprep.subr.mxu0 %v9056_v27  ;;  %2526 = vmatprep.subr.mxu1 %v9059_v25 }
 0x7db   :  { %2456 = vmatpush1.msra.mxu0 %v9062_v23  ;;  %2527 = vmatpush1.msra.mxu1 %v9065_v19 }
 0x7dc   :  { %2457 = vmatprep.subr.mxu0 %v9068_v22  ;;  %2528 = vmatprep.subr.mxu1 %v9071_v13 }
 0x7dd   :  { %2458 = vmatpush1.msra.mxu0 %v9074_v20  ;;  %2529 = vmatpush1.msra.mxu1 %v9077_v6 }
 0x7de   :  { %2459 = vmatprep.subr.mxu0 %v9080_v37  ;;  %2530 = vmatprep.subr.mxu1 %v9083_v21 }
 0x7df   :  { %2460 = vmatpush1.msra.mxu0 %v9086_v49  ;;  %2531 = vmatpush1.msra.mxu1 %v9089_v5  ;;  %v9104_v49 = vld [vmem:[#allocation10 + $0x148] sm:$0xff]  ;;  %v9107_v5 = vld [vmem:[#allocation10 + $0x158] sm:$0xff] }
 0x7e0   :  { %2461 = vmatprep.subr.mxu0 %v9092_v24  ;;  %2532 = vmatprep.subr.mxu1 %v9095_v14  ;;  %12943 = vst [vmem:[#allocation259_spill] sm:$0xff] %v9104_v49  ;;  %12944 = vst [vmem:[#allocation260_spill] sm:$0xff] %v9107_v5  ;;  %v9110_v24 = vld [vmem:[#allocation10 + $0x140] sm:$0xff]  ;;  %v9113_v14 = vld [vmem:[#allocation10 + $0x150] sm:$0xff] }
 0x7e1   :  { %2462 = vmatpush1.msra.mxu0 %v9098_v18  ;;  %2533 = vmatpush1.msra.mxu1 %v9101_v4  ;;  %12945 = vst [vmem:[#allocation261_spill] sm:$0xff] %v9110_v24  ;;  %12946 = vst [vmem:[#allocation262_spill] sm:$0xff] %v9113_v14  ;;  %v9116_v18 = vld [vmem:[#allocation10 + $0x128] sm:$0xff]  ;;  %v9119_v4 = vld [vmem:[#allocation10 + $0x138] sm:$0xff] }
 0x7e2   :  { %2463 = vmatprep.subr.mxu0 %v9104_v49  ;;  %2534 = vmatprep.subr.mxu1 %v9107_v5  ;;  %12947 = vst [vmem:[#allocation263_spill] sm:$0xff] %v9116_v18  ;;  %12948 = vst [vmem:[#allocation264_spill] sm:$0xff] %v9119_v4  ;;  %v9122_v49 = vld [vmem:[#allocation10 + $0x120] sm:$0xff]  ;;  %v9125_v5 = vld [vmem:[#allocation10 + $0x130] sm:$0xff] }
 0x7e3   :  { %2464 = vmatpush1.msra.mxu0 %v9110_v24  ;;  %2535 = vmatpush1.msra.mxu1 %v9113_v14  ;;  %12949 = vst [vmem:[#allocation265_spill] sm:$0xff] %v9122_v49  ;;  %12950 = vst [vmem:[#allocation266_spill] sm:$0xff] %v9125_v5  ;;  %v9128_v24 = vld [vmem:[#allocation10 + $0x108] sm:$0xff]  ;;  %v9131_v14 = vld [vmem:[#allocation10 + $0x118] sm:$0xff] }
 0x7e4   :  { %2465 = vmatprep.subr.mxu0 %v9116_v18  ;;  %2536 = vmatprep.subr.mxu1 %v9119_v4  ;;  %12951 = vst [vmem:[#allocation267_spill] sm:$0xff] %v9128_v24  ;;  %12952 = vst [vmem:[#allocation268_spill] sm:$0xff] %v9131_v14  ;;  %v9134_v18 = vld [vmem:[#allocation10 + $0x100] sm:$0xff]  ;;  %v9137_v4 = vld [vmem:[#allocation10 + $0x110] sm:$0xff] }
 0x7e5   :  { %2466 = vmatpush1.msra.mxu0 %v9122_v49  ;;  %2537 = vmatpush1.msra.mxu1 %v9125_v5  ;;  %12953 = vst [vmem:[#allocation269_spill] sm:$0xff] %v9134_v18  ;;  %12954 = vst [vmem:[#allocation270_spill] sm:$0xff] %v9137_v4  ;;  %v9140_v49 = vld [vmem:[#allocation10 + $0xe8] sm:$0xff]  ;;  %v9143_v5 = vld [vmem:[#allocation10 + $0xf8] sm:$0xff] }
 0x7e6   :  { %2467 = vmatprep.subr.mxu0 %v9128_v24  ;;  %2538 = vmatprep.subr.mxu1 %v9131_v14  ;;  %12955 = vst [vmem:[#allocation271_spill] sm:$0xff] %v9140_v49  ;;  %12956 = vst [vmem:[#allocation272_spill] sm:$0xff] %v9143_v5  ;;  %v9146_v24 = vld [vmem:[#allocation10 + $0xe0] sm:$0xff]  ;;  %v9149_v14 = vld [vmem:[#allocation10 + $0xf0] sm:$0xff] }
 0x7e7   :  { %2468 = vmatpush1.msra.mxu0 %v9134_v18  ;;  %2539 = vmatpush1.msra.mxu1 %v9137_v4  ;;  %12957 = vst [vmem:[#allocation273_spill] sm:$0xff] %v9146_v24  ;;  %12958 = vst [vmem:[#allocation274_spill] sm:$0xff] %v9149_v14  ;;  %v9152_v18 = vld [vmem:[#allocation10 + $0xc8] sm:$0xff]  ;;  %v9155_v4 = vld [vmem:[#allocation10 + $0xd8] sm:$0xff] }
 0x7e8   :  { %2469 = vmatprep.subr.mxu0 %v9140_v49  ;;  %2540 = vmatprep.subr.mxu1 %v9143_v5  ;;  %12959 = vst [vmem:[#allocation275_spill] sm:$0xff] %v9152_v18  ;;  %12960 = vst [vmem:[#allocation276_spill] sm:$0xff] %v9155_v4  ;;  %v9158_v49 = vld [vmem:[#allocation10 + $0xc0] sm:$0xff]  ;;  %v9161_v5 = vld [vmem:[#allocation10 + $0xd0] sm:$0xff] }
 0x7e9   :  { %2470 = vmatpush1.msra.mxu0 %v9146_v24  ;;  %2541 = vmatpush1.msra.mxu1 %v9149_v14  ;;  %12961 = vst [vmem:[#allocation277_spill] sm:$0xff] %v9158_v49  ;;  %12962 = vst [vmem:[#allocation278_spill] sm:$0xff] %v9161_v5  ;;  %v9164_v24 = vld [vmem:[#allocation10 + $0xa8] sm:$0xff]  ;;  %v9167_v14 = vld [vmem:[#allocation10 + $0xb8] sm:$0xff] }
 0x7ea   :  { %2471 = vmatprep.subr.mxu0 %v9152_v18  ;;  %2542 = vmatprep.subr.mxu1 %v9155_v4  ;;  %12963 = vst [vmem:[#allocation279_spill] sm:$0xff] %v9164_v24  ;;  %12964 = vst [vmem:[#allocation280_spill] sm:$0xff] %v9167_v14  ;;  %v9170_v18 = vld [vmem:[#allocation10 + $0xa0] sm:$0xff]  ;;  %v9173_v4 = vld [vmem:[#allocation10 + $0xb0] sm:$0xff] }
 0x7eb   :  { %2472 = vmatpush1.msra.mxu0 %v9158_v49  ;;  %2543 = vmatpush1.msra.mxu1 %v9161_v5  ;;  %12965 = vst [vmem:[#allocation281_spill] sm:$0xff] %v9170_v18  ;;  %12966 = vst [vmem:[#allocation282_spill] sm:$0xff] %v9173_v4  ;;  %v9176_v49 = vld [vmem:[#allocation10 + $0x88] sm:$0xff]  ;;  %v9179_v5 = vld [vmem:[#allocation10 + $0x98] sm:$0xff] }
 0x7ec   :  { %2473 = vmatprep.subr.mxu0 %v9164_v24  ;;  %2544 = vmatprep.subr.mxu1 %v9167_v14  ;;  %12967 = vst [vmem:[#allocation283_spill] sm:$0xff] %v9176_v49  ;;  %12968 = vst [vmem:[#allocation284_spill] sm:$0xff] %v9179_v5  ;;  %v9182_v24 = vld [vmem:[#allocation10 + $0x80] sm:$0xff]  ;;  %v9185_v14 = vld [vmem:[#allocation10 + $0x90] sm:$0xff] }
 0x7ed   :  { %2474 = vmatpush1.msra.mxu0 %v9170_v18  ;;  %2545 = vmatpush1.msra.mxu1 %v9173_v4  ;;  %12969 = vst [vmem:[#allocation285_spill] sm:$0xff] %v9182_v24  ;;  %12970 = vst [vmem:[#allocation286_spill] sm:$0xff] %v9185_v14  ;;  %v9188_v18 = vld [vmem:[#allocation10 + $0x68] sm:$0xff]  ;;  %v9191_v4 = vld [vmem:[#allocation10 + $0x78] sm:$0xff] }
 0x7ee   :  { %2475 = vmatprep.subr.mxu0 %v9176_v49  ;;  %2546 = vmatprep.subr.mxu1 %v9179_v5  ;;  %12971 = vst [vmem:[#allocation287_spill] sm:$0xff] %v9188_v18  ;;  %12972 = vst [vmem:[#allocation288_spill] sm:$0xff] %v9191_v4  ;;  %v9194_v49 = vld [vmem:[#allocation10 + $0x60] sm:$0xff]  ;;  %v9197_v5 = vld [vmem:[#allocation10 + $0x70] sm:$0xff] }
 0x7ef   :  { %2476 = vmatpush1.msra.mxu0 %v9182_v24  ;;  %2547 = vmatpush1.msra.mxu1 %v9185_v14  ;;  %12973 = vst [vmem:[#allocation289_spill] sm:$0xff] %v9194_v49  ;;  %12974 = vst [vmem:[#allocation290_spill] sm:$0xff] %v9197_v5  ;;  %v9200_v24 = vld [vmem:[#allocation10 + $0x48] sm:$0xff]  ;;  %v9203_v14 = vld [vmem:[#allocation10 + $0x58] sm:$0xff] }
 0x7f0   :  { %2477 = vmatprep.subr.mxu0 %v9188_v18  ;;  %2548 = vmatprep.subr.mxu1 %v9191_v4  ;;  %12975 = vst [vmem:[#allocation291_spill] sm:$0xff] %v9200_v24  ;;  %12976 = vst [vmem:[#allocation292_spill] sm:$0xff] %v9203_v14  ;;  %v9206_v18 = vld [vmem:[#allocation10 + $0x40] sm:$0xff]  ;;  %v9209_v4 = vld [vmem:[#allocation10 + $0x50] sm:$0xff] }
 0x7f1   :  { %2478 = vmatpush1.msra.mxu0 %v9194_v49  ;;  %2549 = vmatpush1.msra.mxu1 %v9197_v5  ;;  %12977 = vst [vmem:[#allocation293_spill] sm:$0xff] %v9206_v18  ;;  %12978 = vst [vmem:[#allocation294_spill] sm:$0xff] %v9209_v4  ;;  %v9212_v49 = vld [vmem:[#allocation10 + $0x28] sm:$0xff]  ;;  %v9215_v5 = vld [vmem:[#allocation10 + $0x38] sm:$0xff] }
 0x7f2   :  { %2479 = vmatprep.subr.mxu0 %v9200_v24  ;;  %2550 = vmatprep.subr.mxu1 %v9203_v14  ;;  %v9218_v24 = vld [vmem:[#allocation10 + $0x20] sm:$0xff]  ;;  %v9221_v14 = vld [vmem:[#allocation10 + $0x30] sm:$0xff] }
 0x7f3   :  { %2480 = vmatpush1.msra.mxu0 %v9206_v18  ;;  %2551 = vmatpush1.msra.mxu1 %v9209_v4  ;;  %v9224_v18 = vld [vmem:[#allocation10 + $0x8] sm:$0xff]  ;;  %v9227_v4 = vld [vmem:[#allocation10 + $0x18] sm:$0xff] }
 0x7f4   :  { %2481 = vmatprep.subr.mxu0 %v9212_v49  ;;  %2552 = vmatprep.subr.mxu1 %v9215_v5 }
 0x7f5   :  { %2482 = vmatpush1.msra.mxu0 %v9218_v24  ;;  %2553 = vmatpush1.msra.mxu1 %v9221_v14 }
 0x7f6   :  { %2483 = vmatprep.subr.mxu0 %v9224_v18  ;;  %2554 = vmatprep.subr.mxu1 %v9227_v4 }
 0x7f7   :  { %2484 = vmatpush1.msra.mxu0 %v8225_v45  ;;  %2555 = vmatpush1.msra.mxu1 %v8228_v41  ;;  %v12979_v45 = vld [vmem:[#allocation22_spill] sm:$0xff]  ;;  %v12980_v41 = vld [vmem:[#allocation23_spill] sm:$0xff] }
 0x7f8   :  { %2485 = vmatprep.subr.mxu0 %v8231_v44  ;;  %2556 = vmatprep.subr.mxu1 %v8234_v39  ;;  %v12981_v44 = vld [vmem:[#allocation24_spill] sm:$0xff]  ;;  %v12982_v39 = vld [vmem:[#allocation25_spill] sm:$0xff] }
 0x7f9   :  { %2486 = vmatpush2.msra.mxu0 %v8237_v31  ;;  %2557 = vmatpush2.msra.mxu1 %v8240_v42  ;;  %v12983_v31 = vld [vmem:[#allocation26_spill] sm:$0xff]  ;;  %v12984_v42 = vld [vmem:[#allocation27_spill] sm:$0xff] }
 0x7fa   :  { %2487 = vmatprep.subr.mxu0 %v8243_v10  ;;  %2558 = vmatprep.subr.mxu1 %v8246_v30  ;;  %v12985_v10 = vld [vmem:[#allocation28_spill] sm:$0xff]  ;;  %v12986_v30 = vld [vmem:[#allocation29_spill] sm:$0xff] }
 0x7fb   :  { %2488 = vmatpush2.msra.mxu0 %v8249_v28  ;;  %2559 = vmatpush2.msra.mxu1 %v8252_v9  ;;  %v12987_v28 = vld [vmem:[#allocation30_spill] sm:$0xff]  ;;  %v12988_v9 = vld [vmem:[#allocation31_spill] sm:$0xff] }
 0x7fc   :  { %2489 = vmatprep.subr.mxu0 %v8255_v40  ;;  %2560 = vmatprep.subr.mxu1 %v8258_v0  ;;  %v12989_v40 = vld [vmem:[#allocation32_spill] sm:$0xff]  ;;  %v12990_v0 = vld [vmem:[#allocation33_spill] sm:$0xff] }
 0x7fd   :  { %2490 = vmatpush2.msra.mxu0 %v8261_v34  ;;  %2561 = vmatpush2.msra.mxu1 %v8264_v36  ;;  %v12991_v34 = vld [vmem:[#allocation34_spill] sm:$0xff]  ;;  %v12992_v36 = vld [vmem:[#allocation35_spill] sm:$0xff] }
 0x7fe   :  { %2491 = vmatprep.subr.mxu0 %v8267_v48  ;;  %2562 = vmatprep.subr.mxu1 %v8270_v47  ;;  %v12993_v48 = vld [vmem:[#allocation36_spill] sm:$0xff]  ;;  %v12994_v47 = vld [vmem:[#allocation37_spill] sm:$0xff] }
 0x7ff   :  { %2492 = vmatpush2.msra.mxu0 %v8273_v46  ;;  %2563 = vmatpush2.msra.mxu1 %v8276_v35  ;;  %v12995_v46 = vld [vmem:[#allocation38_spill] sm:$0xff]  ;;  %v12996_v35 = vld [vmem:[#allocation39_spill] sm:$0xff] }
 0x800   :  { %2493 = vmatprep.subr.mxu0 %v8279_v33  ;;  %2564 = vmatprep.subr.mxu1 %v8282_v54  ;;  %v12997_v33 = vld [vmem:[#allocation40_spill] sm:$0xff]  ;;  %v12998_v54 = vld [vmem:[#allocation41_spill] sm:$0xff] }
 0x801   :  { %2494 = vmatpush2.msra.mxu0 %v8285_v56  ;;  %2565 = vmatpush2.msra.mxu1 %v8288_v57  ;;  %v12999_v56 = vld [vmem:[#allocation42_spill] sm:$0xff]  ;;  %v13000_v57 = vld [vmem:[#allocation43_spill] sm:$0xff] }
 0x802   :  { %2495 = vmatprep.subr.mxu0 %v8291_v58  ;;  %2566 = vmatprep.subr.mxu1 %v8294_v59  ;;  %v13001_v58 = vld [vmem:[#allocation44_spill] sm:$0xff]  ;;  %v13002_v59 = vld [vmem:[#allocation45_spill] sm:$0xff] }
 0x803   :  { %2496 = vmatpush2.msra.mxu0 %v8297_v60  ;;  %2567 = vmatpush2.msra.mxu1 %v8300_v61  ;;  %v13003_v60 = vld [vmem:[#allocation46_spill] sm:$0xff]  ;;  %v13004_v61 = vld [vmem:[#allocation47_spill] sm:$0xff] }
 0x804   :  { %2497 = vmatprep.subr.mxu0 %v8303_v62  ;;  %2568 = vmatprep.subr.mxu1 %v8306_v63  ;;  %v13005_v62 = vld [vmem:[#allocation48_spill] sm:$0xff]  ;;  %v13006_v63 = vld [vmem:[#allocation49_spill] sm:$0xff] }
 0x805   :  { %2498 = vmatpush2.msra.mxu0 %v8309_v32  ;;  %2569 = vmatpush2.msra.mxu1 %v8312_v1  ;;  %v13007_v32 = vld [vmem:[#allocation50_spill] sm:$0xff]  ;;  %v13008_v1 = vld [vmem:[#allocation51_spill] sm:$0xff] }
 0x806   :  { %2499 = vmatprep.subr.mxu0 %v8315_v2  ;;  %2570 = vmatprep.subr.mxu1 %v8318_v3  ;;  %v13009_v2 = vld [vmem:[#allocation54_spill] sm:$0xff]  ;;  %v13010_v3 = vld [vmem:[#allocation55_spill] sm:$0xff] }
 0x807   :  { %2500 = vmatpush2.msra.mxu0 %v8321_v7  ;;  %2571 = vmatpush2.msra.mxu1 %v8324_v15  ;;  %v13011_v7 = vld [vmem:[#allocation56_spill] sm:$0xff]  ;;  %v13012_v15 = vld [vmem:[#allocation57_spill] sm:$0xff] }
 0x808   :  { %2501 = vmatprep.subr.mxu0 %v12979_v45  ;;  %2572 = vmatprep.subr.mxu1 %v12980_v41  ;;  %v13013_v41 = vld [vmem:[#allocation52_spill] sm:$0xff] }
 0x809   :  { %2502 = vmatpush2.msra.mxu0 %v12981_v44  ;;  %2573 = vmatpush2.msra.mxu1 %v12982_v39 }
 0x80a   :  { %2503 = vmatprep.subr.mxu0 %v12983_v31  ;;  %2574 = vmatprep.subr.mxu1 %v12984_v42  ;;  %v13014_v42 = vld [vmem:[#allocation53_spill] sm:$0xff] }
 0x80b   :  { %2504 = vmatpush2.msra.mxu0 %v12985_v10  ;;  %2575 = vmatpush2.msra.mxu1 %v12986_v30 }
 0x80c   :  { %2505 = vmatprep.subr.mxu0 %v12987_v28  ;;  %2576 = vmatprep.subr.mxu1 %v12988_v9 }
 0x80d   :  { %2506 = vmatpush2.msra.mxu0 %v12989_v40  ;;  %2577 = vmatpush2.msra.mxu1 %v12990_v0 }
 0x80e   :  { %2507 = vmatprep.subr.mxu0 %v12991_v34  ;;  %2578 = vmatprep.subr.mxu1 %v12992_v36 }
 0x80f   :  { %2508 = vmatpush2.msra.mxu0 %v12993_v48  ;;  %2579 = vmatpush2.msra.mxu1 %v12994_v47 }
 0x810   :  { %2509 = vmatprep.subr.mxu0 %v12995_v46  ;;  %2580 = vmatprep.subr.mxu1 %v12996_v35 }
 0x811   :  { %2510 = vmatpush2.msra.mxu0 %v12997_v33  ;;  %2581 = vmatpush2.msra.mxu1 %v12998_v54 }
 0x812   :  { %2511 = vmatprep.subr.mxu0 %v12999_v56  ;;  %2582 = vmatprep.subr.mxu1 %v13000_v57 }
 0x813   :  { %2512 = vmatpush2.msra.mxu0 %v13001_v58  ;;  %2583 = vmatpush2.msra.mxu1 %v13002_v59 }
 0x814   :  { %2513 = vmatprep.subr.mxu0 %v13003_v60  ;;  %2584 = vmatprep.subr.mxu1 %v13004_v61 }
 0x815   :  { %2514 = vmatpush2.msra.mxu0 %v13005_v62  ;;  %2585 = vmatpush2.msra.mxu1 %v13006_v63 }
 0x816   :  { %2515 = vmatprep.subr.mxu0 %v13007_v32  ;;  %2586 = vmatprep.subr.mxu1 %v13008_v1  ;;  %v13015_v32 = vld [vmem:[#allocation58_spill] sm:$0xff]  ;;  %v13017_v1 = vld [vmem:[#allocation60_spill] sm:$0xff] }
 0x817   :  { %2516 = vmatpush2.msra.mxu0 %v13009_v2  ;;  %2587 = vmatpush2.msra.mxu1 %v13010_v3  ;;  %v13018_v2 = vld [vmem:[#allocation61_spill] sm:$0xff]  ;;  %v13019_v3 = vld [vmem:[#allocation62_spill] sm:$0xff] }
 0x818   :  { %2622 = vmatprep.subr.mxu0 %v13011_v7  ;;  %2693 = vmatprep.subr.mxu1 %v13012_v15  ;;  %v13020_v7 = vld [vmem:[#allocation63_spill] sm:$0xff]  ;;  %v13021_v15 = vld [vmem:[#allocation64_spill] sm:$0xff] }
 0x897   :  { %v2353_v45 = vpop.f32.mrf.mxu0  ;;  %v2424_v30 = vpop.f32.mrf.mxu1 }
 0x898   :  { %v2354_v44 = vadd.f32 %v2353_v45, %v13013_v41  ;;  %v2425_v36 = vadd.f32 %v2424_v30, %v12473_v55  ;;  %v13022_v45 = vld [vmem:[#allocation65_spill] sm:$0xff]  ;;  %v13029_v30 = vld [vmem:[#allocation72_spill] sm:$0xff] }
 0x899   :  { %v2355_v39 = vpop.f32.mrf.mxu0  ;;  %v2426_v9 = vpop.f32.mrf.mxu1 }
 0x89a   :  { %v4904_v31 = vmul.f32 -1.442695, %v2354_v44  ;;  %v2356_v10 = vadd.f32 %v2355_v39, %v13014_v42  ;;  %v2427_v40 = vadd.f32 %v2426_v9, %v12472_v51  ;;  %v13023_v44 = vld [vmem:[#allocation66_spill] sm:$0xff]  ;;  %v13026_v39 = vld [vmem:[#allocation69_spill] sm:$0xff] }
 0x89b   :  { %v13031_v9 = vld [vmem:[#allocation74_spill] sm:$0xff] }
 0x89c   :  { %5138 = vpow2.f32 %v4904_v31  ;;  %v4905_v28 = vmul.f32 -1.442695, %v2356_v10  ;;  %v4906_v0 = vmul.f32 -1.442695, %v2427_v40  ;;  %v13027_v31 = vld [vmem:[#allocation70_spill] sm:$0xff]  ;;  %v13028_v10 = vld [vmem:[#allocation71_spill] sm:$0xff] }
 0x89d   :  { %v13032_v40 = vld [vmem:[#allocation75_spill] sm:$0xff] }
 0x89e   :  { %5140 = vpow2.f32 %v4905_v28  ;;  %v13030_v28 = vld [vmem:[#allocation73_spill] sm:$0xff] }
 0x89f   :  { %5142 = vpow2.f32 %v4906_v0  ;;  %v13033_v0 = vld [vmem:[#allocation76_spill] sm:$0xff] }
 0x8a9   :  { %v5139_v34 = vpop.eup %5138 }
 0x8aa   :  { %v2438_v48 = vadd.f32 1.0, %v5139_v34  ;;  %v13034_v34 = vld [vmem:[#allocation77_spill] sm:$0xff] }
 0x8ab   :  { %v5141_v47 = vpop.eup %5140 }
 0x8ac   :  { %5144 = vrcp.f32 %v2438_v48  ;;  %v2439_v46 = vadd.f32 1.0, %v5141_v47  ;;  %v5143_v35 = vpop.eup %5142  ;;  %v13036_v48 = vld [vmem:[#allocation79_spill] sm:$0xff]  ;;  %v13037_v47 = vld [vmem:[#allocation80_spill] sm:$0xff] }
 0x8ad   :  { %5146 = vtanh.f32 %v2425_v36  ;;  %v2440_v57 = vadd.f32 1.0, %v5143_v35  ;;  %v13035_v36 = vld [vmem:[#allocation78_spill] sm:$0xff] }
 0x8ae   :  { %5148 = vrcp.f32 %v2439_v46  ;;  %v13038_v46 = vld [vmem:[#allocation81_spill] sm:$0xff]  ;;  %v13039_v35 = vld [vmem:[#allocation82_spill] sm:$0xff] }
 0x8af   :  { %5150 = vrcp.f32 %v2440_v57  ;;  %v13043_v57 = vld [vmem:[#allocation86_spill] sm:$0xff] }
 0x8b9   :  { %v5145_v33 = vpop.eup %5144 }
 0x8ba   :  { %v5147_v54 = vpop.eup %5146 }
 0x8bb   :  { %v5149_v56 = vpop.eup %5148  ;;  %v2449_v58 = vmul.f32 %v5147_v54, %v5145_v33  ;;  %v13040_v33 = vld [vmem:[#allocation83_spill] sm:$0xff]  ;;  %v13041_v54 = vld [vmem:[#allocation84_spill] sm:$0xff] }
 0x8bc   :  { %v2448_v59 = vmul.f32 %v5149_v56, %v8434_v50  ;;  %v5151_v61 = vpop.eup %5150  ;;  %v13016_v50 = vld [vmem:[#allocation59_spill] sm:$0xff]  ;;  %v13042_v56 = vld [vmem:[#allocation85_spill] sm:$0xff] }
 0x8be   :  { %v9303_v60 = vadd.f32 %v2449_v58, %v2448_v59  ;;  %v13044_v58 = vld [vmem:[#allocation87_spill] sm:$0xff]  ;;  %v13045_v59 = vld [vmem:[#allocation88_spill] sm:$0xff] }
 0x8c0   :  { %5152 = vtanh.f32 %v9303_v60 }
 0x8cd   :  { %v5153_v62 = vpop.eup %5152 }
 0x8ce   :  { %v9306_v63 = vmul.f32 %v5153_v62, %v5151_v61  ;;  %v13046_v61 = vld [vmem:[#allocation89_spill] sm:$0xff]  ;;  %v13047_v62 = vld [vmem:[#allocation90_spill] sm:$0xff] }
 0x8d0   :  { %2518 = vmatmul.mubr.f32.vlgmr.msra.gmra.mxu0 %v9306_v63  ;;  %2589 = vmatmul.mubr.f32.vlgmr.msra.gmra.mxu1 %v9306_v63 }
 0x8d1   :  { %2623 = vmatpush1.msra.mxu0 %v8441_v16  ;;  %2694 = vmatpush1.msra.mxu1 %v8444_v17  ;;  %v13024_v16 = vld [vmem:[#allocation67_spill] sm:$0xff]  ;;  %v13025_v17 = vld [vmem:[#allocation68_spill] sm:$0xff] }
 0x8d2   :  { %2624 = vmatprep.subr.mxu0 %v13015_v32  ;;  %2695 = vmatprep.subr.mxu1 %v13016_v50  ;;  %v13048_v32 = vld [vmem:[#allocation91_spill] sm:$0xff]  ;;  %v13049_v50 = vld [vmem:[#allocation92_spill] sm:$0xff] }
 0x8d3   :  { %2625 = vmatpush1.msra.mxu0 %v13017_v1  ;;  %2696 = vmatpush1.msra.mxu1 %v13018_v2  ;;  %v13050_v1 = vld [vmem:[#allocation93_spill] sm:$0xff]  ;;  %v13051_v2 = vld [vmem:[#allocation94_spill] sm:$0xff] }
 0x8d4   :  { %2626 = vmatprep.subr.mxu0 %v13019_v3  ;;  %2697 = vmatprep.subr.mxu1 %v13020_v7  ;;  %v13052_v3 = vld [vmem:[#allocation95_spill] sm:$0xff]  ;;  %v13053_v7 = vld [vmem:[#allocation96_spill] sm:$0xff] }
 0x8d5   :  { %2627 = vmatpush1.msra.mxu0 %v13021_v15  ;;  %2698 = vmatpush1.msra.mxu1 %v13022_v45  ;;  %v13054_v15 = vld [vmem:[#allocation97_spill] sm:$0xff]  ;;  %v13055_v45 = vld [vmem:[#allocation98_spill] sm:$0xff] }
 0x8d6   :  { %2628 = vmatprep.subr.mxu0 %v13023_v44  ;;  %2699 = vmatprep.subr.mxu1 %v13024_v16  ;;  %v13056_v44 = vld [vmem:[#allocation99_spill] sm:$0xff]  ;;  %v13057_v16 = vld [vmem:[#allocation100_spill] sm:$0xff] }
 0x8d7   :  { %2629 = vmatpush1.msra.mxu0 %v13025_v17  ;;  %2700 = vmatpush1.msra.mxu1 %v13026_v39  ;;  %v13058_v17 = vld [vmem:[#allocation101_spill] sm:$0xff]  ;;  %v13059_v39 = vld [vmem:[#allocation102_spill] sm:$0xff] }
 0x8d8   :  { %2630 = vmatprep.subr.mxu0 %v13027_v31  ;;  %2701 = vmatprep.subr.mxu1 %v13028_v10  ;;  %v13060_v31 = vld [vmem:[#allocation103_spill] sm:$0xff]  ;;  %v13061_v10 = vld [vmem:[#allocation104_spill] sm:$0xff] }
 0x8d9   :  { %2631 = vmatpush1.msra.mxu0 %v13029_v30  ;;  %2702 = vmatpush1.msra.mxu1 %v13030_v28  ;;  %v13062_v30 = vld [vmem:[#allocation105_spill] sm:$0xff]  ;;  %v13063_v28 = vld [vmem:[#allocation106_spill] sm:$0xff] }
 0x8da   :  { %2632 = vmatprep.subr.mxu0 %v13031_v9  ;;  %2703 = vmatprep.subr.mxu1 %v13032_v40  ;;  %v13064_v9 = vld [vmem:[#allocation107_spill] sm:$0xff]  ;;  %v13065_v40 = vld [vmem:[#allocation108_spill] sm:$0xff] }
 0x8db   :  { %2633 = vmatpush1.msra.mxu0 %v13033_v0  ;;  %2704 = vmatpush1.msra.mxu1 %v13034_v34  ;;  %v13066_v0 = vld [vmem:[#allocation109_spill] sm:$0xff]  ;;  %v13067_v34 = vld [vmem:[#allocation110_spill] sm:$0xff] }
 0x8dc   :  { %2634 = vmatprep.subr.mxu0 %v13035_v36  ;;  %2705 = vmatprep.subr.mxu1 %v13036_v48  ;;  %v13068_v36 = vld [vmem:[#allocation111_spill] sm:$0xff]  ;;  %v13069_v48 = vld [vmem:[#allocation112_spill] sm:$0xff] }
 0x8dd   :  { %2635 = vmatpush1.msra.mxu0 %v13037_v47  ;;  %2706 = vmatpush1.msra.mxu1 %v13038_v46  ;;  %v13070_v47 = vld [vmem:[#allocation113_spill] sm:$0xff]  ;;  %v13071_v46 = vld [vmem:[#allocation114_spill] sm:$0xff] }
 0x8de   :  { %2636 = vmatprep.subr.mxu0 %v13039_v35  ;;  %2707 = vmatprep.subr.mxu1 %v13040_v33  ;;  %v13072_v35 = vld [vmem:[#allocation115_spill] sm:$0xff]  ;;  %v13073_v33 = vld [vmem:[#allocation116_spill] sm:$0xff] }
 0x8df   :  { %2637 = vmatpush1.msra.mxu0 %v13041_v54  ;;  %2708 = vmatpush1.msra.mxu1 %v13042_v56  ;;  %v13074_v54 = vmov 0.0   ;;  %v13075_v56 = vld [vmem:[#allocation117_spill] sm:$0xff] }
 0x8e0   :  { %2638 = vmatprep.subr.mxu0 %v13043_v57  ;;  %2709 = vmatprep.subr.mxu1 %v13044_v58  ;;  %v13076_v57 = vld [vmem:[#allocation118_spill] sm:$0xff]  ;;  %v13077_v58 = vld [vmem:[#allocation119_spill] sm:$0xff] }
 0x8e1   :  { %2639 = vmatpush1.msra.mxu0 %v13045_v59  ;;  %2710 = vmatpush1.msra.mxu1 %v13046_v61  ;;  %v13078_v59 = vld [vmem:[#allocation120_spill] sm:$0xff]  ;;  %v13079_v61 = vld [vmem:[#allocation121_spill] sm:$0xff] }
 0x8e2   :  { %2640 = vmatprep.subr.mxu0 %v13047_v62  ;;  %2711 = vmatprep.subr.mxu1 %v13048_v32  ;;  %v13080_v62 = vld [vmem:[#allocation122_spill] sm:$0xff]  ;;  %v13081_v32 = vld [vmem:[#allocation123_spill] sm:$0xff] }
 0x8e3   :  { %2641 = vmatpush1.msra.mxu0 %v13049_v50  ;;  %2712 = vmatpush1.msra.mxu1 %v13050_v1  ;;  %v13082_v50 = vld [vmem:[#allocation124_spill] sm:$0xff]  ;;  %v13083_v1 = vld [vmem:[#allocation125_spill] sm:$0xff] }
 0x8e4   :  { %2642 = vmatprep.subr.mxu0 %v13051_v2  ;;  %2713 = vmatprep.subr.mxu1 %v13052_v3  ;;  %v13085_v2 = vld [vmem:[#allocation127_spill] sm:$0xff]  ;;  %v13087_v3 = vld [vmem:[#allocation129_spill] sm:$0xff] }
 0x8e5   :  { %2643 = vmatpush1.msra.mxu0 %v13053_v7  ;;  %2714 = vmatpush1.msra.mxu1 %v13054_v15  ;;  %v13088_v7 = vld [vmem:[#allocation130_spill] sm:$0xff]  ;;  %v13089_v15 = vld [vmem:[#allocation131_spill] sm:$0xff] }
 0x8e6   :  { %2644 = vmatprep.subr.mxu0 %v13055_v45  ;;  %2715 = vmatprep.subr.mxu1 %v13056_v44  ;;  %v13090_v45 = vld [vmem:[#allocation132_spill] sm:$0xff]  ;;  %v13091_v44 = vld [vmem:[#allocation133_spill] sm:$0xff] }
 0x8e7   :  { %2645 = vmatpush1.msra.mxu0 %v13057_v16  ;;  %2716 = vmatpush1.msra.mxu1 %v13058_v17  ;;  %v13092_v16 = vld [vmem:[#allocation134_spill] sm:$0xff]  ;;  %v13093_v17 = vld [vmem:[#allocation135_spill] sm:$0xff] }
 0x8e8   :  { %2646 = vmatprep.subr.mxu0 %v13059_v39  ;;  %2717 = vmatprep.subr.mxu1 %v13060_v31  ;;  %v13094_v39 = vld [vmem:[#allocation136_spill] sm:$0xff]  ;;  %v13095_v31 = vld [vmem:[#allocation137_spill] sm:$0xff] }
 0x8e9   :  { %2647 = vmatpush1.msra.mxu0 %v13061_v10  ;;  %2718 = vmatpush1.msra.mxu1 %v13062_v30  ;;  %v13096_v10 = vld [vmem:[#allocation138_spill] sm:$0xff]  ;;  %v13097_v30 = vld [vmem:[#allocation139_spill] sm:$0xff] }
 0x8ea   :  { %2648 = vmatprep.subr.mxu0 %v13063_v28  ;;  %2719 = vmatprep.subr.mxu1 %v13064_v9  ;;  %v13098_v28 = vld [vmem:[#allocation140_spill] sm:$0xff]  ;;  %v13099_v9 = vld [vmem:[#allocation141_spill] sm:$0xff] }
 0x8eb   :  { %2649 = vmatpush1.msra.mxu0 %v13065_v40  ;;  %2720 = vmatpush1.msra.mxu1 %v13066_v0  ;;  %v13100_v40 = vld [vmem:[#allocation142_spill] sm:$0xff]  ;;  %v13101_v0 = vld [vmem:[#allocation143_spill] sm:$0xff] }
 0x8ec   :  { %2650 = vmatprep.subr.mxu0 %v13067_v34  ;;  %2721 = vmatprep.subr.mxu1 %v13068_v36  ;;  %v13102_v34 = vld [vmem:[#allocation144_spill] sm:$0xff]  ;;  %v13103_v36 = vld [vmem:[#allocation145_spill] sm:$0xff] }
 0x8ed   :  { %2651 = vmatpush1.msra.mxu0 %v13069_v48  ;;  %2722 = vmatpush1.msra.mxu1 %v13070_v47  ;;  %v13104_v48 = vld [vmem:[#allocation146_spill] sm:$0xff]  ;;  %v13105_v47 = vld [vmem:[#allocation147_spill] sm:$0xff] }
 0x8ee   :  { %2652 = vmatprep.subr.mxu0 %v13071_v46  ;;  %2723 = vmatprep.subr.mxu1 %v13072_v35  ;;  %v13106_v46 = vld [vmem:[#allocation148_spill] sm:$0xff]  ;;  %v13107_v35 = vld [vmem:[#allocation149_spill] sm:$0xff] }
 0x8ef   :  { %2653 = vmatpush1.msra.mxu0 %v13073_v33  ;;  %2686 = vmatprep.mubr.f32.mxu0 %v13074_v54  ;;  %v13108_v33 = vld [vmem:[#allocation150_spill] sm:$0xff] }
 0x8f0   :  { %2724 = vmatpush1.msra.mxu1 %v13075_v56  ;;  %2757 = vmatprep.mubr.f32.mxu1 %v13074_v54  ;;  %v13109_v56 = vld [vmem:[#allocation151_spill] sm:$0xff] }
 0x8f1   :  { %2687 = vmatmul.mubr.f32.vlgmr.msra.gmra.mxu0 %v9046_v43  ;;  %2758 = vmatmul.mubr.f32.vlgmr.msra.gmra.mxu1 %v9046_v43  ;;  %v13084_v43 = vld [vmem:[#allocation126_spill] sm:$0xff] }
 0x8f2   :  { %2879 = vmatprep.mubr.f32.mxu0 %v9306_v63  ;;  %2950 = vmatprep.mubr.f32.mxu1 %v9306_v63  ;;  %v13086_v63 = vld [vmem:[#allocation128_spill] sm:$0xff] }
 0x8f3   :  { %2815 = vmatprep.subr.mxu0 %v13076_v57  ;;  %2886 = vmatprep.subr.mxu1 %v13077_v58  ;;  %v13110_v57 = vld [vmem:[#allocation152_spill] sm:$0xff]  ;;  %v13111_v58 = vld [vmem:[#allocation153_spill] sm:$0xff] }
 0x8f4   :  { %2816 = vmatpush1.msra.mxu0 %v13078_v59  ;;  %2887 = vmatpush1.msra.mxu1 %v13079_v61  ;;  %v13112_v59 = vld [vmem:[#allocation154_spill] sm:$0xff]  ;;  %v13113_v61 = vld [vmem:[#allocation155_spill] sm:$0xff] }
 0x8f5   :  { %2817 = vmatprep.subr.mxu0 %v13080_v62  ;;  %2888 = vmatprep.subr.mxu1 %v13081_v32  ;;  %v13114_v62 = vld [vmem:[#allocation156_spill] sm:$0xff]  ;;  %v13115_v32 = vld [vmem:[#allocation157_spill] sm:$0xff] }
 0x8f6   :  { %2818 = vmatpush1.msra.mxu0 %v13082_v50  ;;  %2889 = vmatpush1.msra.mxu1 %v13083_v1  ;;  %v13116_v50 = vld [vmem:[#allocation158_spill] sm:$0xff]  ;;  %v13117_v1 = vld [vmem:[#allocation159_spill] sm:$0xff] }
 0x8f7   :  { %2819 = vmatprep.subr.mxu0 %v13084_v43  ;;  %2890 = vmatprep.subr.mxu1 %v13085_v2  ;;  %v13118_v43 = vld [vmem:[#allocation160_spill] sm:$0xff]  ;;  %v13119_v2 = vld [vmem:[#allocation161_spill] sm:$0xff] }
 0x8f8   :  { %2820 = vmatpush1.msra.mxu0 %v13086_v63  ;;  %2891 = vmatpush1.msra.mxu1 %v13087_v3  ;;  %v13120_v63 = vld [vmem:[#allocation162_spill] sm:$0xff]  ;;  %v13121_v3 = vld [vmem:[#allocation163_spill] sm:$0xff] }
 0x8f9   :  { %2821 = vmatprep.subr.mxu0 %v13088_v7  ;;  %2892 = vmatprep.subr.mxu1 %v13089_v15  ;;  %v13122_v7 = vld [vmem:[#allocation164_spill] sm:$0xff]  ;;  %v13123_v15 = vld [vmem:[#allocation165_spill] sm:$0xff] }
 0x8fa   :  { %2822 = vmatpush1.msra.mxu0 %v13090_v45  ;;  %2893 = vmatpush1.msra.mxu1 %v13091_v44  ;;  %v13124_v45 = vld [vmem:[#allocation166_spill] sm:$0xff]  ;;  %v13125_v44 = vld [vmem:[#allocation167_spill] sm:$0xff] }
 0x8fb   :  { %2823 = vmatprep.subr.mxu0 %v13092_v16  ;;  %2894 = vmatprep.subr.mxu1 %v13093_v17  ;;  %v13126_v16 = vld [vmem:[#allocation168_spill] sm:$0xff]  ;;  %v13127_v17 = vld [vmem:[#allocation169_spill] sm:$0xff] }
 0x8fc   :  { %2824 = vmatpush1.msra.mxu0 %v13094_v39  ;;  %2895 = vmatpush1.msra.mxu1 %v13095_v31  ;;  %v13128_v39 = vld [vmem:[#allocation170_spill] sm:$0xff]  ;;  %v13129_v31 = vld [vmem:[#allocation171_spill] sm:$0xff] }
 0x8fd   :  { %2825 = vmatprep.subr.mxu0 %v13096_v10  ;;  %2896 = vmatprep.subr.mxu1 %v13097_v30  ;;  %v13130_v10 = vld [vmem:[#allocation172_spill] sm:$0xff]  ;;  %v13131_v30 = vld [vmem:[#allocation173_spill] sm:$0xff] }
 0x8fe   :  { %2826 = vmatpush1.msra.mxu0 %v13098_v28  ;;  %2897 = vmatpush1.msra.mxu1 %v13099_v9  ;;  %v13132_v28 = vld [vmem:[#allocation174_spill] sm:$0xff]  ;;  %v13133_v9 = vld [vmem:[#allocation175_spill] sm:$0xff] }
 0x8ff   :  { %2827 = vmatprep.subr.mxu0 %v13100_v40  ;;  %2898 = vmatprep.subr.mxu1 %v13101_v0  ;;  %v13134_v40 = vld [vmem:[#allocation176_spill] sm:$0xff]  ;;  %v13135_v0 = vld [vmem:[#allocation177_spill] sm:$0xff] }
 0x900   :  { %2828 = vmatpush1.msra.mxu0 %v13102_v34  ;;  %2899 = vmatpush1.msra.mxu1 %v13103_v36  ;;  %v13136_v34 = vld [vmem:[#allocation178_spill] sm:$0xff]  ;;  %v13137_v36 = vld [vmem:[#allocation179_spill] sm:$0xff] }
 0x901   :  { %2829 = vmatprep.subr.mxu0 %v13104_v48  ;;  %2900 = vmatprep.subr.mxu1 %v13105_v47  ;;  %v13138_v48 = vld [vmem:[#allocation180_spill] sm:$0xff]  ;;  %v13139_v47 = vld [vmem:[#allocation181_spill] sm:$0xff] }
 0x902   :  { %2830 = vmatpush1.msra.mxu0 %v13106_v46  ;;  %2901 = vmatpush1.msra.mxu1 %v13107_v35  ;;  %v13140_v46 = vld [vmem:[#allocation182_spill] sm:$0xff]  ;;  %v13141_v35 = vld [vmem:[#allocation183_spill] sm:$0xff] }
 0x903   :  { %2831 = vmatprep.subr.mxu0 %v13108_v33  ;;  %2902 = vmatprep.subr.mxu1 %v13109_v56  ;;  %v13142_v33 = vld [vmem:[#allocation184_spill] sm:$0xff]  ;;  %v13143_v56 = vld [vmem:[#allocation185_spill] sm:$0xff] }
 0x904   :  { %2832 = vmatpush1.msra.mxu0 %v13110_v57  ;;  %2903 = vmatpush1.msra.mxu1 %v13111_v58  ;;  %v13144_v57 = vld [vmem:[#allocation186_spill] sm:$0xff]  ;;  %v13145_v58 = vld [vmem:[#allocation187_spill] sm:$0xff] }
 0x905   :  { %2833 = vmatprep.subr.mxu0 %v13112_v59  ;;  %2904 = vmatprep.subr.mxu1 %v13113_v61  ;;  %v13146_v59 = vld [vmem:[#allocation188_spill] sm:$0xff]  ;;  %v13147_v61 = vld [vmem:[#allocation189_spill] sm:$0xff] }
 0x906   :  { %2834 = vmatpush1.msra.mxu0 %v13114_v62  ;;  %2905 = vmatpush1.msra.mxu1 %v13115_v32  ;;  %v13148_v62 = vld [vmem:[#allocation190_spill] sm:$0xff]  ;;  %v13149_v32 = vld [vmem:[#allocation191_spill] sm:$0xff] }
 0x907   :  { %2835 = vmatprep.subr.mxu0 %v13116_v50  ;;  %2906 = vmatprep.subr.mxu1 %v13117_v1  ;;  %v13150_v50 = vld [vmem:[#allocation192_spill] sm:$0xff]  ;;  %v13151_v1 = vld [vmem:[#allocation193_spill] sm:$0xff] }
 0x908   :  { %2836 = vmatpush1.msra.mxu0 %v13118_v43  ;;  %2907 = vmatpush1.msra.mxu1 %v13119_v2  ;;  %v13152_v43 = vld [vmem:[#allocation194_spill] sm:$0xff]  ;;  %v13153_v2 = vld [vmem:[#allocation195_spill] sm:$0xff] }
 0x909   :  { %2837 = vmatprep.subr.mxu0 %v13120_v63  ;;  %2908 = vmatprep.subr.mxu1 %v13121_v3  ;;  %v13154_v63 = vld [vmem:[#allocation196_spill] sm:$0xff]  ;;  %v13155_v3 = vld [vmem:[#allocation197_spill] sm:$0xff] }
 0x90a   :  { %2838 = vmatpush1.msra.mxu0 %v13122_v7  ;;  %2909 = vmatpush1.msra.mxu1 %v13123_v15  ;;  %v13156_v7 = vld [vmem:[#allocation198_spill] sm:$0xff]  ;;  %v13157_v15 = vld [vmem:[#allocation199_spill] sm:$0xff] }
 0x90b   :  { %2839 = vmatprep.subr.mxu0 %v13124_v45  ;;  %2910 = vmatprep.subr.mxu1 %v13125_v44  ;;  %v13158_v45 = vld [vmem:[#allocation200_spill] sm:$0xff]  ;;  %v13159_v44 = vld [vmem:[#allocation201_spill] sm:$0xff] }
 0x90c   :  { %2840 = vmatpush1.msra.mxu0 %v13126_v16  ;;  %2911 = vmatpush1.msra.mxu1 %v13127_v17  ;;  %v13160_v16 = vld [vmem:[#allocation202_spill] sm:$0xff]  ;;  %v13161_v17 = vld [vmem:[#allocation203_spill] sm:$0xff] }
 0x90d   :  { %2841 = vmatprep.subr.mxu0 %v13128_v39  ;;  %2912 = vmatprep.subr.mxu1 %v13129_v31  ;;  %v13162_v39 = vld [vmem:[#allocation204_spill] sm:$0xff]  ;;  %v13163_v31 = vld [vmem:[#allocation205_spill] sm:$0xff] }
 0x90e   :  { %2842 = vmatpush1.msra.mxu0 %v13130_v10  ;;  %2913 = vmatpush1.msra.mxu1 %v13131_v30  ;;  %v13164_v10 = vld [vmem:[#allocation206_spill] sm:$0xff]  ;;  %v13165_v30 = vld [vmem:[#allocation207_spill] sm:$0xff] }
 0x90f   :  { %2843 = vmatprep.subr.mxu0 %v13132_v28  ;;  %2914 = vmatprep.subr.mxu1 %v13133_v9  ;;  %v13166_v28 = vld [vmem:[#allocation208_spill] sm:$0xff]  ;;  %v13167_v9 = vld [vmem:[#allocation209_spill] sm:$0xff] }
 0x910   :  { %2844 = vmatpush1.msra.mxu0 %v13134_v40  ;;  %2915 = vmatpush1.msra.mxu1 %v13135_v0  ;;  %v13168_v40 = vld [vmem:[#allocation210_spill] sm:$0xff]  ;;  %v13169_v0 = vld [vmem:[#allocation211_spill] sm:$0xff] }
 0x911   :  { %2845 = vmatprep.subr.mxu0 %v13136_v34  ;;  %2916 = vmatprep.subr.mxu1 %v13137_v36  ;;  %v13170_v34 = vld [vmem:[#allocation212_spill] sm:$0xff]  ;;  %v13171_v36 = vld [vmem:[#allocation213_spill] sm:$0xff] }
 0x912   :  { %2846 = vmatpush1.msra.mxu0 %v13138_v48  ;;  %2917 = vmatpush1.msra.mxu1 %v13139_v47  ;;  %v13172_v48 = vld [vmem:[#allocation214_spill] sm:$0xff]  ;;  %v13173_v47 = vld [vmem:[#allocation215_spill] sm:$0xff] }
 0x913   :  { %2847 = vmatprep.subr.mxu0 %v13140_v46  ;;  %2918 = vmatprep.subr.mxu1 %v13141_v35  ;;  %v13174_v46 = vld [vmem:[#allocation216_spill] sm:$0xff]  ;;  %v13175_v35 = vld [vmem:[#allocation217_spill] sm:$0xff] }
 0x914   :  { %2848 = vmatpush2.msra.mxu0 %v13142_v33  ;;  %2919 = vmatpush2.msra.mxu1 %v13143_v56  ;;  %v13176_v33 = vld [vmem:[#allocation218_spill] sm:$0xff]  ;;  %v13177_v56 = vld [vmem:[#allocation219_spill] sm:$0xff] }
 0x915   :  { %2849 = vmatprep.subr.mxu0 %v13144_v57  ;;  %2920 = vmatprep.subr.mxu1 %v13145_v58  ;;  %v13178_v57 = vld [vmem:[#allocation220_spill] sm:$0xff]  ;;  %v13179_v58 = vld [vmem:[#allocation221_spill] sm:$0xff] }
 0x916   :  { %2850 = vmatpush2.msra.mxu0 %v13146_v59  ;;  %2921 = vmatpush2.msra.mxu1 %v13147_v61  ;;  %v13180_v59 = vld [vmem:[#allocation222_spill] sm:$0xff]  ;;  %v13181_v61 = vld [vmem:[#allocation223_spill] sm:$0xff] }
 0x917   :  { %2851 = vmatprep.subr.mxu0 %v13148_v62  ;;  %2922 = vmatprep.subr.mxu1 %v13149_v32  ;;  %v13182_v62 = vld [vmem:[#allocation224_spill] sm:$0xff]  ;;  %v13183_v32 = vld [vmem:[#allocation225_spill] sm:$0xff] }
 0x918   :  { %2852 = vmatpush2.msra.mxu0 %v13150_v50  ;;  %2923 = vmatpush2.msra.mxu1 %v13151_v1  ;;  %v13184_v50 = vld [vmem:[#allocation226_spill] sm:$0xff]  ;;  %v13185_v1 = vld [vmem:[#allocation227_spill] sm:$0xff] }
 0x919   :  { %2853 = vmatprep.subr.mxu0 %v13152_v43  ;;  %2924 = vmatprep.subr.mxu1 %v13153_v2  ;;  %v13186_v43 = vld [vmem:[#allocation228_spill] sm:$0xff]  ;;  %v13187_v2 = vld [vmem:[#allocation229_spill] sm:$0xff] }
 0x91a   :  { %2854 = vmatpush2.msra.mxu0 %v13154_v63  ;;  %2925 = vmatpush2.msra.mxu1 %v13155_v3  ;;  %v13188_v63 = vld [vmem:[#allocation230_spill] sm:$0xff]  ;;  %v13189_v3 = vld [vmem:[#allocation231_spill] sm:$0xff] }
 0x91b   :  { %2855 = vmatprep.subr.mxu0 %v13156_v7  ;;  %2926 = vmatprep.subr.mxu1 %v13157_v15  ;;  %v13190_v7 = vld [vmem:[#allocation232_spill] sm:$0xff]  ;;  %v13191_v15 = vld [vmem:[#allocation233_spill] sm:$0xff] }
 0x91c   :  { %2856 = vmatpush2.msra.mxu0 %v13158_v45  ;;  %2927 = vmatpush2.msra.mxu1 %v13159_v44  ;;  %v13192_v45 = vld [vmem:[#allocation234_spill] sm:$0xff]  ;;  %v13193_v44 = vld [vmem:[#allocation235_spill] sm:$0xff] }
 0x91d   :  { %2857 = vmatprep.subr.mxu0 %v13160_v16  ;;  %2928 = vmatprep.subr.mxu1 %v13161_v17  ;;  %v13194_v16 = vld [vmem:[#allocation236_spill] sm:$0xff]  ;;  %v13195_v17 = vld [vmem:[#allocation237_spill] sm:$0xff] }
 0x91e   :  { %2858 = vmatpush2.msra.mxu0 %v13162_v39  ;;  %2929 = vmatpush2.msra.mxu1 %v13163_v31  ;;  %v13196_v39 = vld [vmem:[#allocation238_spill] sm:$0xff]  ;;  %v13197_v31 = vld [vmem:[#allocation239_spill] sm:$0xff] }
 0x91f   :  { %2859 = vmatprep.subr.mxu0 %v13164_v10  ;;  %2930 = vmatprep.subr.mxu1 %v13165_v30  ;;  %v13198_v10 = vld [vmem:[#allocation240_spill] sm:$0xff]  ;;  %v13199_v30 = vld [vmem:[#allocation241_spill] sm:$0xff] }
 0x920   :  { %2860 = vmatpush2.msra.mxu0 %v13166_v28  ;;  %2931 = vmatpush2.msra.mxu1 %v13167_v9  ;;  %v13200_v28 = vld [vmem:[#allocation242_spill] sm:$0xff]  ;;  %v13201_v9 = vld [vmem:[#allocation243_spill] sm:$0xff] }
 0x921   :  { %2861 = vmatprep.subr.mxu0 %v13168_v40  ;;  %2932 = vmatprep.subr.mxu1 %v13169_v0  ;;  %v13202_v40 = vld [vmem:[#allocation244_spill] sm:$0xff]  ;;  %v13203_v0 = vld [vmem:[#allocation245_spill] sm:$0xff] }
 0x922   :  { %2862 = vmatpush2.msra.mxu0 %v13170_v34  ;;  %2933 = vmatpush2.msra.mxu1 %v13171_v36  ;;  %v13204_v34 = vld [vmem:[#allocation246_spill] sm:$0xff]  ;;  %v13205_v36 = vld [vmem:[#allocation247_spill] sm:$0xff] }
 0x923   :  { %2863 = vmatprep.subr.mxu0 %v13172_v48  ;;  %2934 = vmatprep.subr.mxu1 %v13173_v47  ;;  %v13206_v47 = vld [vmem:[#allocation250_spill] sm:$0xff] }
 0x924   :  { %2864 = vmatpush2.msra.mxu0 %v13174_v46  ;;  %2935 = vmatpush2.msra.mxu1 %v13175_v35 }
 0x925   :  { %2865 = vmatprep.subr.mxu0 %v13176_v33  ;;  %2936 = vmatprep.subr.mxu1 %v13177_v56  ;;  %v13207_v56 = vld [vmem:[#allocation249_spill] sm:$0xff] }
 0x926   :  { %2866 = vmatpush2.msra.mxu0 %v13178_v57  ;;  %2937 = vmatpush2.msra.mxu1 %v13179_v58 }
 0x927   :  { %2867 = vmatprep.subr.mxu0 %v13180_v59  ;;  %2938 = vmatprep.subr.mxu1 %v13181_v61 }
 0x928   :  { %2868 = vmatpush2.msra.mxu0 %v13182_v62  ;;  %2939 = vmatpush2.msra.mxu1 %v13183_v32  ;;  %v13208_v62 = vld [vmem:[#allocation251_spill] sm:$0xff] }
 0x929   :  { %2869 = vmatprep.subr.mxu0 %v13184_v50  ;;  %2940 = vmatprep.subr.mxu1 %v13185_v1 }
 0x92a   :  { %2870 = vmatpush2.msra.mxu0 %v13186_v43  ;;  %2941 = vmatpush2.msra.mxu1 %v13187_v2  ;;  %v13209_v43 = vld [vmem:[#allocation252_spill] sm:$0xff] }
 0x92b   :  { %2871 = vmatprep.subr.mxu0 %v13188_v63  ;;  %2942 = vmatprep.subr.mxu1 %v13189_v3 }
 0x92c   :  { %2872 = vmatpush2.msra.mxu0 %v13190_v7  ;;  %2943 = vmatpush2.msra.mxu1 %v13191_v15 }
 0x92d   :  { %2873 = vmatprep.subr.mxu0 %v13192_v45  ;;  %2944 = vmatprep.subr.mxu1 %v13193_v44 }
 0x92e   :  { %2874 = vmatpush2.msra.mxu0 %v13194_v16  ;;  %2945 = vmatpush2.msra.mxu1 %v13195_v17 }
 0x92f   :  { %2875 = vmatprep.subr.mxu0 %v13196_v39  ;;  %2946 = vmatprep.subr.mxu1 %v13197_v31 }
 0x930   :  { %2876 = vmatpush2.msra.mxu0 %v13198_v10  ;;  %2947 = vmatpush2.msra.mxu1 %v13199_v30 }
 0x931   :  { %2877 = vmatprep.subr.mxu0 %v13200_v28  ;;  %2948 = vmatprep.subr.mxu1 %v13201_v9 }
 0x932   :  { %2878 = vmatpush2.msra.mxu0 %v13202_v40  ;;  %2949 = vmatpush2.msra.mxu1 %v13203_v0 }
 0x933   :  { %2981 = vmatprep.subr.mxu0 %v13204_v34  ;;  %3052 = vmatprep.subr.mxu1 %v13205_v36  ;;  %v2620_v34 = vstv %s4910_s17 }
 0x990   :  { %v2519_v48 = vpop.f32.mrf.mxu0  ;;  %v2590_v58 = vpop.f32.mrf.mxu1 }
 0x991   :  { %v2520_v46 = vadd.f32 %v2519_v48, %v13206_v47  ;;  %v2591_v2 = vadd.f32 %v2590_v58, %v13209_v43 }
 0x992   :  { %v2521_v35 = vpop.f32.mrf.mxu0  ;;  %v2592_v61 = vpop.f32.mrf.mxu1 }
 0x993   :  { %v4907_v33 = vmul.f32 -1.442695, %v2520_v46  ;;  %v2522_v57 = vadd.f32 %v2521_v35, %v13207_v56  ;;  %v2593_v32 = vadd.f32 %v2592_v61, %v13208_v62  ;;  %v2621_v35 = vmul.f32 %v9032_v52, %v2620_v34  ;;  %v13229_v34 = vld [vmem:[#allocation272_spill] sm:$0xff] }
 0x995   :  { %5154 = vpow2.f32 %v4907_v33  ;;  %v4908_v59 = vmul.f32 -1.442695, %v2522_v57  ;;  %v4909_v50 = vmul.f32 -1.442695, %v2593_v32 }
 0x997   :  { %5156 = vpow2.f32 %v4908_v59 }
 0x998   :  { %5158 = vpow2.f32 %v4909_v50 }
 0x9a2   :  { %v5155_v1 = vpop.eup %5154 }
 0x9a3   :  { %v2604_v63 = vadd.f32 1.0, %v5155_v1 }
 0x9a4   :  { %v5157_v3 = vpop.eup %5156 }
 0x9a5   :  { %5160 = vrcp.f32 %v2604_v63  ;;  %v2605_v7 = vadd.f32 1.0, %v5157_v3  ;;  %v5159_v15 = vpop.eup %5158 }
 0x9a6   :  { %5162 = vtanh.f32 %v2591_v2  ;;  %v2606_v30 = vadd.f32 1.0, %v5159_v15 }
 0x9a7   :  { %5164 = vrcp.f32 %v2605_v7 }
 0x9a8   :  { %5166 = vrcp.f32 %v2606_v30  ;;  %v13224_v30 = vld [vmem:[#allocation267_spill] sm:$0xff] }
 0x9b1   :  { %v2688_v45 = vpop.f32.mrf.mxu0  ;;  %v2759_v44 = vpop.f32.mrf.mxu1 }
 0x9b2   :  { %v5161_v16 = vpop.eup %5160 }
 0x9b3   :  { %v5163_v17 = vpop.eup %5162  ;;  %v2690_v39 = vpop.f32.mrf.mxu0 }
 0x9b4   :  { %v2761_v31 = vpop.f32.mrf.mxu1  ;;  %v5165_v10 = vpop.eup %5164  ;;  %v2768_v28 = vcombine.low %v2688_v45, %v2690_v39  ;;  %v2615_v40 = vmul.f32 %v5163_v17, %v5161_v16 }
 0x9b5   :  { %v2769_v9 = vcombine.low %v2759_v44, %v2761_v31  ;;  %v2614_v0 = vmul.f32 %v5165_v10, %v9030_v11  ;;  %v5167_v11 = vpop.eup %5166 }
 0x9b6   :  { %v2776_v36 = vrot.slane %v2768_v28, %v6813_v12  ;;  %v13225_v28 = vld [vmem:[#allocation268_spill] sm:$0xff] }
 0x9b7   :  { %v2783_v48 = vrot.slane %v2769_v9, %v6813_v12  ;;  %v9515_v46 = vadd.f32 %v2615_v40, %v2614_v0  ;;  %v13226_v9 = vld [vmem:[#allocation269_spill] sm:$0xff]  ;;  %v13227_v40 = vld [vmem:[#allocation270_spill] sm:$0xff]  ;;  %v13228_v0 = vld [vmem:[#allocation271_spill] sm:$0xff] }
 0x9b9   :  { %v2784_v33 = vcombine.low %v2776_v36, %v2783_v48  ;;  %5168 = vtanh.f32 %v9515_v46  ;;  %v13230_v36 = vld [vmem:[#allocation273_spill] sm:$0xff]  ;;  %v13231_v48 = vld [vmem:[#allocation274_spill] sm:$0xff] }
 0x9bb   :  { %v2791_v57 = vrot.slane %v2784_v33, %v6813_v12  ;;  %v13233_v33 = vld [vmem:[#allocation276_spill] sm:$0xff] }
 0x9bd   :  { %v2793_v58 = vadd.f32 %v2791_v57, %v2621_v35  ;;  %v13232_v35 = vld [vmem:[#allocation275_spill] sm:$0xff]  ;;  %v13234_v57 = vld [vmem:[#allocation277_spill] sm:$0xff] }
 0x9bf   :  { %v2794_v59 = vadd.f32 %v2793_v58, %v6823_v29  ;;  %v13235_v58 = vld [vmem:[#allocation278_spill] sm:$0xff] }
 0x9c1   :  { %v4911_v61 = vmul.f32 -1.442695, %v2794_v59 }
 0x9c3   :  { %5170 = vpow2.f32 %v4911_v61  ;;  %v13237_v61 = vld [vmem:[#allocation280_spill] sm:$0xff] }
 0x9c4   :  { %5172 = vtanh.f32 %v2794_v59  ;;  %v13236_v59 = vld [vmem:[#allocation279_spill] sm:$0xff] }
 0x9c6   :  { %v5169_v32 = vpop.eup %5168 }
 0x9c7   :  { %v2618_v50 = vmul.f32 %v5169_v32, %v5167_v11  ;;  %v13238_v11 = vld [vmem:[#allocation281_spill] sm:$0xff]  ;;  %v13239_v32 = vld [vmem:[#allocation282_spill] sm:$0xff] }
 0x9c9   :  { %v4738_v1 = vrot.slane %v2618_v50, 5 }
 0x9cb   :  { %v9522_v2 = vsel %vm4756_vm2, %v9040_v38, %v4738_v1  ;;  %v13210_v38 = vld [vmem:[#allocation248_spill] sm:$0xff] }
 0x9cc   :  { %v13241_v1 = vld [vmem:[#allocation284_spill] sm:$0xff] }
 0x9d0   :  { %v5171_v63 = vpop.eup %5170 }
 0x9d1   :  { %v2798_v52 = vadd.f32 1.0, %v5171_v63  ;;  %v5173_v3 = vpop.eup %5172  ;;  %v13242_v63 = vld [vmem:[#allocation285_spill] sm:$0xff] }
 0x9d2   :  { %v2807_v45 = vrot.slane %v5173_v3, 2  ;;  %v13244_v3 = vld [vmem:[#allocation287_spill] sm:$0xff] }
 0x9d3   :  { %5174 = vrcp.f32 %v2798_v52  ;;  %v13243_v52 = vld [vmem:[#allocation286_spill] sm:$0xff] }
 0x9e0   :  { %v5175_v7 = vpop.eup %5174 }
 0x9e1   :  { %v2803_v15 = vrot.slane %v5175_v7, 1  ;;  %v2809_v16 = vmul.f32 %v5175_v7, %v2807_v45  ;;  %v2812_v39 = vrot.slane %v5175_v7, 3  ;;  %v13245_v7 = vld [vmem:[#allocation288_spill] sm:$0xff]  ;;  %v13247_v45 = vld [vmem:[#allocation290_spill] sm:$0xff] }
 0x9e3   :  { %v2805_v44 = vmul.f32 %v2803_v15, %v9043_v53  ;;  %v13211_v53 = vld [vmem:[#allocation254_spill] sm:$0xff]  ;;  %v13246_v15 = vld [vmem:[#allocation289_spill] sm:$0xff] }
 0x9e5   :  { %v9525_v17 = vadd.f32 %v2809_v16, %v2805_v44  ;;  %v13248_v44 = vld [vmem:[#allocation291_spill] sm:$0xff]  ;;  %v13249_v16 = vld [vmem:[#allocation292_spill] sm:$0xff] }
 0x9e7   :  { %5176 = vtanh.f32 %v9525_v17 }
 0x9f4   :  { %v5177_v31 = vpop.eup %5176 }
 0x9f5   :  { %v9528_v10 = vmul.f32 %v5177_v31, %v2812_v39  ;;  %v13250_v39 = vld [vmem:[#allocation293_spill] sm:$0xff]  ;;  %v13251_v31 = vld [vmem:[#allocation294_spill] sm:$0xff] }
 0x9f7   :  { %2880 = vmatmul.mubr.f32.vlgmr.msra.gmra.mxu0 %v9528_v10  ;;  %2951 = vmatmul.mubr.f32.vlgmr.msra.gmra.mxu1 %v9528_v10 }
 0x9f8   :  { %3045 = vmatprep.mubr.f32.mxu0 %v2618_v50  ;;  %3116 = vmatprep.mubr.f32.mxu1 %v2618_v50  ;;  %v13240_v50 = vld [vmem:[#allocation283_spill] sm:$0xff] }
 0x9f9   :  { %2982 = vmatpush1.msra.mxu0 %v9050_v8  ;;  %3053 = vmatpush1.msra.mxu1 %v9053_v26  ;;  %v13212_v8 = vld [vmem:[#allocation255_spill] sm:$0xff]  ;;  %v13213_v26 = vld [vmem:[#allocation256_spill] sm:$0xff] }
 0x9fa   :  { %2983 = vmatprep.subr.mxu0 %v9056_v27  ;;  %3054 = vmatprep.subr.mxu1 %v9059_v25  ;;  %v13214_v27 = vld [vmem:[#allocation257_spill] sm:$0xff]  ;;  %v13215_v25 = vld [vmem:[#allocation258_spill] sm:$0xff] }
 0x9fb   :  { %2984 = vmatpush1.msra.mxu0 %v9062_v23  ;;  %3055 = vmatpush1.msra.mxu1 %v9065_v19  ;;  %v13216_v23 = vld [vmem:[#allocation259_spill] sm:$0xff]  ;;  %v13217_v19 = vld [vmem:[#allocation260_spill] sm:$0xff] }
 0x9fc   :  { %2985 = vmatprep.subr.mxu0 %v9068_v22  ;;  %3056 = vmatprep.subr.mxu1 %v9071_v13  ;;  %v13218_v22 = vld [vmem:[#allocation261_spill] sm:$0xff]  ;;  %v13219_v13 = vld [vmem:[#allocation262_spill] sm:$0xff] }
 0x9fd   :  { %2986 = vmatpush1.msra.mxu0 %v9074_v20  ;;  %3057 = vmatpush1.msra.mxu1 %v9077_v6  ;;  %v13220_v20 = vld [vmem:[#allocation263_spill] sm:$0xff]  ;;  %v13221_v6 = vld [vmem:[#allocation264_spill] sm:$0xff] }
 0x9fe   :  { %2987 = vmatprep.subr.mxu0 %v9080_v37  ;;  %3058 = vmatprep.subr.mxu1 %v9083_v21  ;;  %v13222_v37 = vld [vmem:[#allocation265_spill] sm:$0xff]  ;;  %v13223_v21 = vld [vmem:[#allocation266_spill] sm:$0xff] }
 0x9ff   :  { %2988 = vmatpush1.msra.mxu0 %v13210_v38  ;;  %3059 = vmatpush1.msra.mxu1 %v13211_v53  ;;  %v9592_v38 = vld [vmem:[#allocation10] sm:$0xff]  ;;  %v9595_v53 = vld [vmem:[#allocation10 + $0x10] sm:$0xff] }
 0xa00   :  { %2989 = vmatprep.subr.mxu0 %v13212_v8  ;;  %3060 = vmatprep.subr.mxu1 %v13213_v26  ;;  %v9598_v8 = vld [vmem:[#allocation10 + $0x3e8] sm:$0xff]  ;;  %v9619_v26 = vld [vmem:[#allocation10 + $0x3d0] sm:$0xff] }
 0xa01   :  { %2990 = vmatpush1.msra.mxu0 %v13214_v27  ;;  %3061 = vmatpush1.msra.mxu1 %v13215_v25  ;;  %v9622_v27 = vld [vmem:[#allocation10 + $0x3a8] sm:$0xff]  ;;  %v9625_v25 = vld [vmem:[#allocation10 + $0x3b8] sm:$0xff] }
 0xa02   :  { %2991 = vmatprep.subr.mxu0 %v13216_v23  ;;  %3062 = vmatprep.subr.mxu1 %v13217_v19  ;;  %v9628_v23 = vld [vmem:[#allocation10 + $0x3a0] sm:$0xff]  ;;  %v9631_v19 = vld [vmem:[#allocation10 + $0x3b0] sm:$0xff] }
 0xa03   :  { %2992 = vmatpush1.msra.mxu0 %v13218_v22  ;;  %3063 = vmatpush1.msra.mxu1 %v13219_v13  ;;  %v9634_v22 = vld [vmem:[#allocation10 + $0x388] sm:$0xff]  ;;  %v9637_v13 = vld [vmem:[#allocation10 + $0x398] sm:$0xff] }
 0xa04   :  { %2993 = vmatprep.subr.mxu0 %v13220_v20  ;;  %3064 = vmatprep.subr.mxu1 %v13221_v6  ;;  %v9640_v20 = vld [vmem:[#allocation10 + $0x380] sm:$0xff]  ;;  %v9643_v6 = vld [vmem:[#allocation10 + $0x390] sm:$0xff] }
 0xa05   :  { %2994 = vmatpush1.msra.mxu0 %v13222_v37  ;;  %3065 = vmatpush1.msra.mxu1 %v13223_v21  ;;  %v9646_v37 = vld [vmem:[#allocation10 + $0x368] sm:$0xff]  ;;  %v9649_v21 = vld [vmem:[#allocation10 + $0x378] sm:$0xff] }
 0xa06   :  { %2995 = vmatprep.subr.mxu0 %v13224_v30  ;;  %3066 = vmatprep.subr.mxu1 %v13225_v28  ;;  %v9652_v30 = vld [vmem:[#allocation10 + $0x360] sm:$0xff]  ;;  %v9655_v28 = vld [vmem:[#allocation10 + $0x370] sm:$0xff] }
 0xa07   :  { %2996 = vmatpush1.msra.mxu0 %v13226_v9  ;;  %3067 = vmatpush1.msra.mxu1 %v13227_v40  ;;  %v9658_v9 = vld [vmem:[#allocation10 + $0x348] sm:$0xff]  ;;  %v9661_v40 = vld [vmem:[#allocation10 + $0x358] sm:$0xff] }
 0xa08   :  { %2997 = vmatprep.subr.mxu0 %v13228_v0  ;;  %3068 = vmatprep.subr.mxu1 %v13229_v34  ;;  %v9664_v0 = vld [vmem:[#allocation10 + $0x340] sm:$0xff]  ;;  %v9667_v34 = vld [vmem:[#allocation10 + $0x350] sm:$0xff] }
 0xa09   :  { %2998 = vmatpush1.msra.mxu0 %v13230_v36  ;;  %3069 = vmatpush1.msra.mxu1 %v13231_v48  ;;  %v9670_v36 = vld [vmem:[#allocation10 + $0x328] sm:$0xff]  ;;  %v9673_v48 = vld [vmem:[#allocation10 + $0x338] sm:$0xff] }
 0xa0a   :  { %2999 = vmatprep.subr.mxu0 %v13232_v35  ;;  %3070 = vmatprep.subr.mxu1 %v13233_v33  ;;  %v9676_v35 = vld [vmem:[#allocation10 + $0x320] sm:$0xff]  ;;  %v9679_v33 = vld [vmem:[#allocation10 + $0x330] sm:$0xff] }
 0xa0b   :  { %3000 = vmatpush1.msra.mxu0 %v13234_v57  ;;  %3071 = vmatpush1.msra.mxu1 %v13235_v58  ;;  %v9682_v57 = vld [vmem:[#allocation10 + $0x308] sm:$0xff]  ;;  %v9685_v58 = vld [vmem:[#allocation10 + $0x318] sm:$0xff] }
 0xa0c   :  { %3001 = vmatprep.subr.mxu0 %v13236_v59  ;;  %3072 = vmatprep.subr.mxu1 %v13237_v61  ;;  %v9688_v59 = vld [vmem:[#allocation10 + $0x300] sm:$0xff]  ;;  %v9691_v61 = vld [vmem:[#allocation10 + $0x310] sm:$0xff] }
 0xa0d   :  { %3002 = vmatpush1.msra.mxu0 %v13238_v11  ;;  %3073 = vmatpush1.msra.mxu1 %v13239_v32  ;;  %v9694_v11 = vld [vmem:[#allocation10 + $0x2e8] sm:$0xff]  ;;  %v9697_v32 = vld [vmem:[#allocation10 + $0x2f8] sm:$0xff] }
 0xa0e   :  { %3003 = vmatprep.subr.mxu0 %v13240_v50  ;;  %3074 = vmatprep.subr.mxu1 %v13241_v1  ;;  %13252 = vst [vmem:[#allocation295_spill] sm:$0xff] %v9694_v11  ;;  %13253 = vst [vmem:[#allocation253_spill] sm:$0xff] %v9697_v32  ;;  %v9700_v50 = vld [vmem:[#allocation10 + $0x2e0] sm:$0xff]  ;;  %v9703_v1 = vld [vmem:[#allocation10 + $0x2f0] sm:$0xff] }
 0xa0f   :  { %3004 = vmatpush1.msra.mxu0 %v13242_v63  ;;  %3075 = vmatpush1.msra.mxu1 %v13243_v52  ;;  %13254 = vst [vmem:[#allocation22_spill] sm:$0xff] %v9700_v50  ;;  %13255 = vst [vmem:[#allocation23_spill] sm:$0xff] %v9703_v1  ;;  %v9706_v63 = vld [vmem:[#allocation10 + $0x2c8] sm:$0xff]  ;;  %v9709_v52 = vld [vmem:[#allocation10 + $0x2d8] sm:$0xff] }
 0xa10   :  { %3005 = vmatprep.subr.mxu0 %v13244_v3  ;;  %3076 = vmatprep.subr.mxu1 %v13245_v7  ;;  %13256 = vst [vmem:[#allocation24_spill] sm:$0xff] %v9706_v63  ;;  %13257 = vst [vmem:[#allocation25_spill] sm:$0xff] %v9709_v52  ;;  %v9712_v3 = vld [vmem:[#allocation10 + $0x2c0] sm:$0xff]  ;;  %v9715_v7 = vld [vmem:[#allocation10 + $0x2d0] sm:$0xff] }
 0xa11   :  { %3006 = vmatpush1.msra.mxu0 %v13246_v15  ;;  %3077 = vmatpush1.msra.mxu1 %v13247_v45  ;;  %13258 = vst [vmem:[#allocation26_spill] sm:$0xff] %v9712_v3  ;;  %13259 = vst [vmem:[#allocation27_spill] sm:$0xff] %v9715_v7  ;;  %v9718_v15 = vld [vmem:[#allocation10 + $0x2a8] sm:$0xff]  ;;  %v9721_v45 = vld [vmem:[#allocation10 + $0x2b8] sm:$0xff] }
 0xa12   :  { %3007 = vmatprep.subr.mxu0 %v13248_v44  ;;  %3078 = vmatprep.subr.mxu1 %v13249_v16  ;;  %13260 = vst [vmem:[#allocation28_spill] sm:$0xff] %v9718_v15  ;;  %13261 = vst [vmem:[#allocation29_spill] sm:$0xff] %v9721_v45  ;;  %v9724_v44 = vld [vmem:[#allocation10 + $0x2a0] sm:$0xff]  ;;  %v9727_v16 = vld [vmem:[#allocation10 + $0x2b0] sm:$0xff] }
 0xa13   :  { %3008 = vmatpush1.msra.mxu0 %v13250_v39  ;;  %3079 = vmatpush1.msra.mxu1 %v13251_v31  ;;  %13262 = vst [vmem:[#allocation30_spill] sm:$0xff] %v9724_v44  ;;  %13263 = vst [vmem:[#allocation31_spill] sm:$0xff] %v9727_v16  ;;  %v9730_v39 = vld [vmem:[#allocation10 + $0x288] sm:$0xff]  ;;  %v9733_v31 = vld [vmem:[#allocation10 + $0x298] sm:$0xff] }
 0xa14   :  { %3009 = vmatprep.subr.mxu0 %v9212_v49  ;;  %3080 = vmatprep.subr.mxu1 %v9215_v5  ;;  %v9601_v49 = vld [vmem:[#allocation10 + $0x3f8] sm:$0xff]  ;;  %v9604_v5 = vld [vmem:[#allocation10 + $0x3e0] sm:$0xff]  ;;  %13264 = vst [vmem:[#allocation32_spill] sm:$0xff] %v9730_v39  ;;  %13265 = vst [vmem:[#allocation33_spill] sm:$0xff] %v9733_v31 }
 0xa15   :  { %3010 = vmatpush1.msra.mxu0 %v9218_v24  ;;  %3081 = vmatpush1.msra.mxu1 %v9221_v14  ;;  %v9607_v24 = vld [vmem:[#allocation10 + $0x3f0] sm:$0xff]  ;;  %v9610_v14 = vld [vmem:[#allocation10 + $0x3c8] sm:$0xff] }
 0xa16   :  { %3011 = vmatprep.subr.mxu0 %v9224_v18  ;;  %3082 = vmatprep.subr.mxu1 %v9227_v4  ;;  %v9613_v18 = vld [vmem:[#allocation10 + $0x3d8] sm:$0xff]  ;;  %v9616_v4 = vld [vmem:[#allocation10 + $0x3c0] sm:$0xff] }
 0xa17   :  { %3012 = vmatpush1.msra.mxu0 %v9592_v38  ;;  %3083 = vmatpush1.msra.mxu1 %v9595_v53 }
 0xa18   :  { %3013 = vmatprep.subr.mxu0 %v9598_v8  ;;  %3084 = vmatprep.subr.mxu1 %v9601_v49 }
 0xa19   :  { %3014 = vmatpush2.msra.mxu0 %v9604_v5  ;;  %3085 = vmatpush2.msra.mxu1 %v9607_v24 }
 0xa1a   :  { %3015 = vmatprep.subr.mxu0 %v9610_v14  ;;  %3086 = vmatprep.subr.mxu1 %v9613_v18 }
 0xa1b   :  { %3016 = vmatpush2.msra.mxu0 %v9616_v4  ;;  %3087 = vmatpush2.msra.mxu1 %v9619_v26 }
 0xa1c   :  { %3017 = vmatprep.subr.mxu0 %v9622_v27  ;;  %3088 = vmatprep.subr.mxu1 %v9625_v25 }
 0xa1d   :  { %3018 = vmatpush2.msra.mxu0 %v9628_v23  ;;  %3089 = vmatpush2.msra.mxu1 %v9631_v19 }
 0xa1e   :  { %3019 = vmatprep.subr.mxu0 %v9634_v22  ;;  %3090 = vmatprep.subr.mxu1 %v9637_v13 }
 0xa1f   :  { %3020 = vmatpush2.msra.mxu0 %v9640_v20  ;;  %3091 = vmatpush2.msra.mxu1 %v9643_v6 }
 0xa20   :  { %3021 = vmatprep.subr.mxu0 %v9646_v37  ;;  %3092 = vmatprep.subr.mxu1 %v9649_v21 }
 0xa21   :  { %3022 = vmatpush2.msra.mxu0 %v9652_v30  ;;  %3093 = vmatpush2.msra.mxu1 %v9655_v28 }
 0xa22   :  { %3023 = vmatprep.subr.mxu0 %v9658_v9  ;;  %3094 = vmatprep.subr.mxu1 %v9661_v40 }
 0xa23   :  { %3024 = vmatpush2.msra.mxu0 %v9664_v0  ;;  %3095 = vmatpush2.msra.mxu1 %v9667_v34 }
 0xa24   :  { %3025 = vmatprep.subr.mxu0 %v9670_v36  ;;  %3096 = vmatprep.subr.mxu1 %v9673_v48 }
 0xa25   :  { %3026 = vmatpush2.msra.mxu0 %v9676_v35  ;;  %3097 = vmatpush2.msra.mxu1 %v9679_v33 }
 0xa26   :  { %3027 = vmatprep.subr.mxu0 %v9682_v57  ;;  %3098 = vmatprep.subr.mxu1 %v9685_v58 }
 0xa27   :  { %3028 = vmatpush2.msra.mxu0 %v9688_v59  ;;  %3099 = vmatpush2.msra.mxu1 %v9691_v61 }
 0xa28   :  { %3029 = vmatprep.subr.mxu0 %v9694_v11  ;;  %3100 = vmatprep.subr.mxu1 %v9697_v32 }
 0xa29   :  { %3030 = vmatpush2.msra.mxu0 %v9700_v50  ;;  %3101 = vmatpush2.msra.mxu1 %v9703_v1 }
 0xa2a   :  { %3031 = vmatprep.subr.mxu0 %v9706_v63  ;;  %3102 = vmatprep.subr.mxu1 %v9709_v52 }
 0xa2b   :  { %3032 = vmatpush2.msra.mxu0 %v9712_v3  ;;  %3103 = vmatpush2.msra.mxu1 %v9715_v7 }
 0xa2c   :  { %3033 = vmatprep.subr.mxu0 %v9718_v15  ;;  %3104 = vmatprep.subr.mxu1 %v9721_v45  ;;  %v9736_v15 = vld [vmem:[#allocation10 + $0x280] sm:$0xff]  ;;  %v9739_v45 = vld [vmem:[#allocation10 + $0x290] sm:$0xff] }
 0xa2d   :  { %3034 = vmatpush2.msra.mxu0 %v9724_v44  ;;  %3105 = vmatpush2.msra.mxu1 %v9727_v16  ;;  %13266 = vst [vmem:[#allocation34_spill] sm:$0xff] %v9736_v15  ;;  %13267 = vst [vmem:[#allocation35_spill] sm:$0xff] %v9739_v45  ;;  %v9742_v44 = vld [vmem:[#allocation10 + $0x268] sm:$0xff]  ;;  %v9745_v16 = vld [vmem:[#allocation10 + $0x278] sm:$0xff] }
 0xa2e   :  { %3035 = vmatprep.subr.mxu0 %v9730_v39  ;;  %3106 = vmatprep.subr.mxu1 %v9733_v31  ;;  %13268 = vst [vmem:[#allocation36_spill] sm:$0xff] %v9742_v44  ;;  %13269 = vst [vmem:[#allocation37_spill] sm:$0xff] %v9745_v16  ;;  %v9748_v39 = vld [vmem:[#allocation10 + $0x260] sm:$0xff]  ;;  %v9751_v31 = vld [vmem:[#allocation10 + $0x270] sm:$0xff] }
 0xa2f   :  { %3036 = vmatpush2.msra.mxu0 %v9736_v15  ;;  %3107 = vmatpush2.msra.mxu1 %v9739_v45  ;;  %13270 = vst [vmem:[#allocation38_spill] sm:$0xff] %v9748_v39  ;;  %13271 = vst [vmem:[#allocation39_spill] sm:$0xff] %v9751_v31  ;;  %v9754_v15 = vld [vmem:[#allocation10 + $0x248] sm:$0xff]  ;;  %v9757_v45 = vld [vmem:[#allocation10 + $0x258] sm:$0xff] }
 0xa30   :  { %3037 = vmatprep.subr.mxu0 %v9742_v44  ;;  %3108 = vmatprep.subr.mxu1 %v9745_v16  ;;  %13272 = vst [vmem:[#allocation40_spill] sm:$0xff] %v9754_v15  ;;  %13273 = vst [vmem:[#allocation41_spill] sm:$0xff] %v9757_v45  ;;  %v9760_v44 = vld [vmem:[#allocation10 + $0x240] sm:$0xff]  ;;  %v9763_v16 = vld [vmem:[#allocation10 + $0x250] sm:$0xff] }
 0xa31   :  { %3038 = vmatpush2.msra.mxu0 %v9748_v39  ;;  %3109 = vmatpush2.msra.mxu1 %v9751_v31  ;;  %13274 = vst [vmem:[#allocation42_spill] sm:$0xff] %v9760_v44  ;;  %13275 = vst [vmem:[#allocation43_spill] sm:$0xff] %v9763_v16  ;;  %v9766_v39 = vld [vmem:[#allocation10 + $0x228] sm:$0xff]  ;;  %v9769_v31 = vld [vmem:[#allocation10 + $0x238] sm:$0xff] }
 0xa32   :  { %3039 = vmatprep.subr.mxu0 %v9754_v15  ;;  %3110 = vmatprep.subr.mxu1 %v9757_v45  ;;  %13276 = vst [vmem:[#allocation44_spill] sm:$0xff] %v9766_v39  ;;  %13277 = vst [vmem:[#allocation45_spill] sm:$0xff] %v9769_v31  ;;  %v9772_v15 = vld [vmem:[#allocation10 + $0x220] sm:$0xff]  ;;  %v9775_v45 = vld [vmem:[#allocation10 + $0x230] sm:$0xff] }
 0xa33   :  { %3040 = vmatpush2.msra.mxu0 %v9760_v44  ;;  %3111 = vmatpush2.msra.mxu1 %v9763_v16  ;;  %13278 = vst [vmem:[#allocation46_spill] sm:$0xff] %v9772_v15  ;;  %13279 = vst [vmem:[#allocation47_spill] sm:$0xff] %v9775_v45  ;;  %v9778_v44 = vld [vmem:[#allocation10 + $0x208] sm:$0xff]  ;;  %v9781_v16 = vld [vmem:[#allocation10 + $0x218] sm:$0xff] }
 0xa34   :  { %3041 = vmatprep.subr.mxu0 %v9766_v39  ;;  %3112 = vmatprep.subr.mxu1 %v9769_v31  ;;  %13280 = vst [vmem:[#allocation48_spill] sm:$0xff] %v9778_v44  ;;  %13281 = vst [vmem:[#allocation49_spill] sm:$0xff] %v9781_v16  ;;  %v9784_v39 = vld [vmem:[#allocation10 + $0x200] sm:$0xff]  ;;  %v9787_v31 = vld [vmem:[#allocation10 + $0x210] sm:$0xff] }
 0xa35   :  { %3042 = vmatpush2.msra.mxu0 %v9772_v15  ;;  %3113 = vmatpush2.msra.mxu1 %v9775_v45  ;;  %13282 = vst [vmem:[#allocation50_spill] sm:$0xff] %v9784_v39  ;;  %13283 = vst [vmem:[#allocation51_spill] sm:$0xff] %v9787_v31  ;;  %v9790_v15 = vld [vmem:[#allocation7 + $0x1e8] sm:$0xff]  ;;  %v9793_v45 = vld [vmem:[#allocation7 + $0x1f8] sm:$0xff] }
 0xa36   :  { %3043 = vmatprep.subr.mxu0 %v9778_v44  ;;  %3114 = vmatprep.subr.mxu1 %v9781_v16  ;;  %13284 = vst [vmem:[#allocation54_spill] sm:$0xff] %v9790_v15  ;;  %13285 = vst [vmem:[#allocation55_spill] sm:$0xff] %v9793_v45 }
 0xa37   :  { %3044 = vmatpush2.msra.mxu0 %v9784_v39  ;;  %3115 = vmatpush2.msra.mxu1 %v9787_v31 }
 0xa38   :  { %3150 = vmatprep.subr.mxu0 %v9790_v15  ;;  %3221 = vmatprep.subr.mxu1 %v9793_v45 }
 0xab7   :  { %v2881_v44 = vpop.f32.mrf.mxu0  ;;  %v2952_v39 = vpop.f32.mrf.mxu1 }
 0xab8   :  { %v2882_v7 = vadd.f32 %v2881_v44, %v13013_v41  ;;  %v2953_v32 = vadd.f32 %v2952_v39, %v12473_v55  ;;  %v9826_v39 = vld [vmem:[#allocation7 + $0x1a8] sm:$0xff] }
 0xab9   :  { %v2883_v16 = vpop.f32.mrf.mxu0  ;;  %v2954_v31 = vpop.f32.mrf.mxu1  ;;  %13290 = vst [vmem:[#allocation60_spill] sm:$0xff] %v9826_v39 }
 0xaba   :  { %v4912_v3 = vmul.f32 -1.442695, %v2882_v7  ;;  %v2884_v52 = vadd.f32 %v2883_v16, %v13014_v42  ;;  %v2955_v1 = vadd.f32 %v2954_v31, %v12472_v51 }
 0xabc   :  { %5178 = vpow2.f32 %v4912_v3  ;;  %v4913_v63 = vmul.f32 -1.442695, %v2884_v52  ;;  %v4914_v50 = vmul.f32 -1.442695, %v2955_v1 }
 0xabe   :  { %5180 = vpow2.f32 %v4913_v63 }
 0xabf   :  { %5182 = vpow2.f32 %v4914_v50 }
 0xac9   :  { %v5179_v15 = vpop.eup %5178 }
 0xaca   :  { %v2966_v11 = vadd.f32 1.0, %v5179_v15 }
 0xacb   :  { %v5181_v45 = vpop.eup %5180 }
 0xacc   :  { %5184 = vrcp.f32 %v2966_v11  ;;  %v2967_v44 = vadd.f32 1.0, %v5181_v45  ;;  %v5183_v7 = vpop.eup %5182  ;;  %v9808_v11 = vld [vmem:[#allocation7 + $0x1e0] sm:$0xff]  ;;  %v9823_v45 = vld [vmem:[#allocation7 + $0x1d0] sm:$0xff] }
 0xacd   :  { %5186 = vtanh.f32 %v2953_v32  ;;  %v2968_v52 = vadd.f32 1.0, %v5183_v7  ;;  %v9811_v32 = vld [vmem:[#allocation7 + $0x1f0] sm:$0xff]  ;;  %13289 = vst [vmem:[#allocation59_spill] sm:$0xff] %v9823_v45  ;;  %v9832_v7 = vld [vmem:[#allocation7 + $0x1a0] sm:$0xff] }
 0xace   :  { %5188 = vrcp.f32 %v2967_v44  ;;  %v9829_v44 = vld [vmem:[#allocation7 + $0x1b8] sm:$0xff]  ;;  %13292 = vst [vmem:[#allocation62_spill] sm:$0xff] %v9832_v7 }
 0xacf   :  { %5190 = vrcp.f32 %v2968_v52  ;;  %13291 = vst [vmem:[#allocation61_spill] sm:$0xff] %v9829_v44  ;;  %v9841_v52 = vld [vmem:[#allocation7 + $0x198] sm:$0xff] }
 0xad0   :  { %13295 = vst [vmem:[#allocation65_spill] sm:$0xff] %v9841_v52 }
 0xad9   :  { %v5185_v16 = vpop.eup %5184 }
 0xada   :  { %v5187_v3 = vpop.eup %5186 }
 0xadb   :  { %v5189_v42 = vpop.eup %5188  ;;  %v2977_v63 = vmul.f32 %v5187_v3, %v5185_v16  ;;  %v9835_v16 = vld [vmem:[#allocation7 + $0x1b0] sm:$0xff]  ;;  %v9838_v3 = vld [vmem:[#allocation7 + $0x188] sm:$0xff] }
 0xadc   :  { %v2976_v41 = vmul.f32 %v5189_v42, %v9303_v60  ;;  %v5191_v1 = vpop.eup %5190  ;;  %v9817_v42 = vld [vmem:[#allocation7 + $0x1d8] sm:$0xff]  ;;  %v9820_v60 = vld [vmem:[#allocation7 + $0x1c0] sm:$0xff]  ;;  %13293 = vst [vmem:[#allocation63_spill] sm:$0xff] %v9835_v16  ;;  %13294 = vst [vmem:[#allocation64_spill] sm:$0xff] %v9838_v3 }
 0xadd   :  { %13287 = vst [vmem:[#allocation57_spill] sm:$0xff] %v9817_v42  ;;  %13288 = vst [vmem:[#allocation58_spill] sm:$0xff] %v9820_v60 }
 0xade   :  { %v9801_v31 = vadd.f32 %v2977_v63, %v2976_v41  ;;  %v9814_v41 = vld [vmem:[#allocation7 + $0x1c8] sm:$0xff]  ;;  %v9844_v63 = vld [vmem:[#allocation7 + $0x180] sm:$0xff] }
 0xadf   :  { %13286 = vst [vmem:[#allocation56_spill] sm:$0xff] %v9814_v41  ;;  %13296 = vst [vmem:[#allocation66_spill] sm:$0xff] %v9844_v63 }
 0xae0   :  { %5192 = vtanh.f32 %v9801_v31 }
 0xaed   :  { %v5193_v15 = vpop.eup %5192 }
 0xaee   :  { %v9804_v50 = vmul.f32 %v5193_v15, %v5191_v1  ;;  %v9847_v1 = vld [vmem:[#allocation7 + $0x190] sm:$0xff]  ;;  %v9850_v15 = vld [vmem:[#allocation7 + $0x168] sm:$0xff] }
 0xaef   :  { %13297 = vst [vmem:[#allocation67_spill] sm:$0xff] %v9847_v1  ;;  %13298 = vst [vmem:[#allocation68_spill] sm:$0xff] %v9850_v15 }
 0xaf0   :  { %3046 = vmatmul.mubr.f32.vlgmr.msra.gmra.mxu0 %v9804_v50  ;;  %3117 = vmatmul.mubr.f32.vlgmr.msra.gmra.mxu1 %v9804_v50 }
 0xaf1   :  { %3151 = vmatpush1.msra.mxu0 %v9808_v11  ;;  %3222 = vmatpush1.msra.mxu1 %v9811_v32 }
 0xaf2   :  { %3152 = vmatprep.subr.mxu0 %v9814_v41  ;;  %3223 = vmatprep.subr.mxu1 %v9817_v42 }
 0xaf3   :  { %3153 = vmatpush1.msra.mxu0 %v9820_v60  ;;  %3224 = vmatpush1.msra.mxu1 %v9823_v45 }
 0xaf4   :  { %3154 = vmatprep.subr.mxu0 %v9826_v39  ;;  %3225 = vmatprep.subr.mxu1 %v9829_v44 }
 0xaf5   :  { %3155 = vmatpush1.msra.mxu0 %v9832_v7  ;;  %3226 = vmatpush1.msra.mxu1 %v9835_v16  ;;  %v9853_v16 = vld [vmem:[#allocation7 + $0x178] sm:$0xff] }
 0xaf6   :  { %3156 = vmatprep.subr.mxu0 %v9838_v3  ;;  %3227 = vmatprep.subr.mxu1 %v9841_v52  ;;  %13299 = vst [vmem:[#allocation69_spill] sm:$0xff] %v9853_v16  ;;  %v9856_v3 = vld [vmem:[#allocation7 + $0x160] sm:$0xff]  ;;  %v9859_v52 = vld [vmem:[#allocation7 + $0x170] sm:$0xff] }
 0xaf7   :  { %3157 = vmatpush1.msra.mxu0 %v9844_v63  ;;  %3228 = vmatpush1.msra.mxu1 %v9847_v1  ;;  %13300 = vst [vmem:[#allocation70_spill] sm:$0xff] %v9856_v3  ;;  %13301 = vst [vmem:[#allocation71_spill] sm:$0xff] %v9859_v52  ;;  %v9862_v63 = vld [vmem:[#allocation7 + $0x148] sm:$0xff]  ;;  %v9865_v1 = vld [vmem:[#allocation7 + $0x158] sm:$0xff] }
 0xaf8   :  { %3158 = vmatprep.subr.mxu0 %v9850_v15  ;;  %3229 = vmatprep.subr.mxu1 %v9853_v16  ;;  %13302 = vst [vmem:[#allocation72_spill] sm:$0xff] %v9862_v63  ;;  %13303 = vst [vmem:[#allocation73_spill] sm:$0xff] %v9865_v1  ;;  %v9868_v15 = vld [vmem:[#allocation7 + $0x140] sm:$0xff]  ;;  %v9871_v16 = vld [vmem:[#allocation7 + $0x150] sm:$0xff] }
 0xaf9   :  { %3159 = vmatpush1.msra.mxu0 %v9856_v3  ;;  %3230 = vmatpush1.msra.mxu1 %v9859_v52  ;;  %13304 = vst [vmem:[#allocation74_spill] sm:$0xff] %v9868_v15  ;;  %13305 = vst [vmem:[#allocation75_spill] sm:$0xff] %v9871_v16  ;;  %v9874_v3 = vld [vmem:[#allocation7 + $0x128] sm:$0xff]  ;;  %v9877_v52 = vld [vmem:[#allocation7 + $0x138] sm:$0xff] }
 0xafa   :  { %3160 = vmatprep.subr.mxu0 %v9862_v63  ;;  %3231 = vmatprep.subr.mxu1 %v9865_v1  ;;  %13306 = vst [vmem:[#allocation76_spill] sm:$0xff] %v9874_v3  ;;  %13307 = vst [vmem:[#allocation77_spill] sm:$0xff] %v9877_v52  ;;  %v9880_v63 = vld [vmem:[#allocation7 + $0x120] sm:$0xff]  ;;  %v9883_v1 = vld [vmem:[#allocation7 + $0x130] sm:$0xff] }
 0xafb   :  { %3161 = vmatpush1.msra.mxu0 %v9868_v15  ;;  %3232 = vmatpush1.msra.mxu1 %v9871_v16  ;;  %13308 = vst [vmem:[#allocation78_spill] sm:$0xff] %v9880_v63  ;;  %13309 = vst [vmem:[#allocation79_spill] sm:$0xff] %v9883_v1  ;;  %v9886_v15 = vld [vmem:[#allocation7 + $0x108] sm:$0xff]  ;;  %v9889_v16 = vld [vmem:[#allocation7 + $0x118] sm:$0xff] }
 0xafc   :  { %3162 = vmatprep.subr.mxu0 %v9874_v3  ;;  %3233 = vmatprep.subr.mxu1 %v9877_v52  ;;  %13310 = vst [vmem:[#allocation80_spill] sm:$0xff] %v9886_v15  ;;  %13311 = vst [vmem:[#allocation81_spill] sm:$0xff] %v9889_v16  ;;  %v9892_v3 = vld [vmem:[#allocation7 + $0x100] sm:$0xff]  ;;  %v9895_v52 = vld [vmem:[#allocation7 + $0x110] sm:$0xff] }
 0xafd   :  { %3163 = vmatpush1.msra.mxu0 %v9880_v63  ;;  %3234 = vmatpush1.msra.mxu1 %v9883_v1  ;;  %13312 = vst [vmem:[#allocation82_spill] sm:$0xff] %v9892_v3  ;;  %13313 = vst [vmem:[#allocation83_spill] sm:$0xff] %v9895_v52  ;;  %v9898_v63 = vld [vmem:[#allocation7 + $0xe8] sm:$0xff]  ;;  %v9901_v1 = vld [vmem:[#allocation7 + $0xf8] sm:$0xff] }
 0xafe   :  { %3164 = vmatprep.subr.mxu0 %v9886_v15  ;;  %3235 = vmatprep.subr.mxu1 %v9889_v16  ;;  %13314 = vst [vmem:[#allocation84_spill] sm:$0xff] %v9898_v63  ;;  %13315 = vst [vmem:[#allocation85_spill] sm:$0xff] %v9901_v1  ;;  %v9904_v15 = vld [vmem:[#allocation7 + $0xe0] sm:$0xff]  ;;  %v9907_v16 = vld [vmem:[#allocation7 + $0xf0] sm:$0xff] }
 0xaff   :  { %3165 = vmatpush1.msra.mxu0 %v9892_v3  ;;  %3236 = vmatpush1.msra.mxu1 %v9895_v52  ;;  %13316 = vst [vmem:[#allocation86_spill] sm:$0xff] %v9904_v15  ;;  %13317 = vst [vmem:[#allocation87_spill] sm:$0xff] %v9907_v16  ;;  %v9910_v3 = vld [vmem:[#allocation7 + $0xc8] sm:$0xff]  ;;  %v9913_v52 = vld [vmem:[#allocation7 + $0xd8] sm:$0xff] }
 0xb00   :  { %3166 = vmatprep.subr.mxu0 %v9898_v63  ;;  %3237 = vmatprep.subr.mxu1 %v9901_v1  ;;  %13318 = vst [vmem:[#allocation88_spill] sm:$0xff] %v9910_v3  ;;  %13319 = vst [vmem:[#allocation89_spill] sm:$0xff] %v9913_v52  ;;  %v9916_v63 = vld [vmem:[#allocation7 + $0xc0] sm:$0xff]  ;;  %v9919_v1 = vld [vmem:[#allocation7 + $0xd0] sm:$0xff] }
 0xb01   :  { %3167 = vmatpush1.msra.mxu0 %v9904_v15  ;;  %3238 = vmatpush1.msra.mxu1 %v9907_v16  ;;  %13320 = vst [vmem:[#allocation90_spill] sm:$0xff] %v9916_v63  ;;  %13321 = vst [vmem:[#allocation91_spill] sm:$0xff] %v9919_v1  ;;  %v9922_v15 = vld [vmem:[#allocation7 + $0xa8] sm:$0xff]  ;;  %v9925_v16 = vld [vmem:[#allocation7 + $0xb8] sm:$0xff] }
 0xb02   :  { %3168 = vmatprep.subr.mxu0 %v9910_v3  ;;  %3239 = vmatprep.subr.mxu1 %v9913_v52  ;;  %13322 = vst [vmem:[#allocation92_spill] sm:$0xff] %v9922_v15  ;;  %13323 = vst [vmem:[#allocation93_spill] sm:$0xff] %v9925_v16  ;;  %v9928_v3 = vld [vmem:[#allocation7 + $0xa0] sm:$0xff]  ;;  %v9931_v52 = vld [vmem:[#allocation7 + $0xb0] sm:$0xff] }
 0xb03   :  { %3169 = vmatpush1.msra.mxu0 %v9916_v63  ;;  %3240 = vmatpush1.msra.mxu1 %v9919_v1  ;;  %13324 = vst [vmem:[#allocation94_spill] sm:$0xff] %v9928_v3  ;;  %13325 = vst [vmem:[#allocation95_spill] sm:$0xff] %v9931_v52  ;;  %v9934_v63 = vld [vmem:[#allocation7 + $0x88] sm:$0xff]  ;;  %v9937_v1 = vld [vmem:[#allocation7 + $0x98] sm:$0xff] }
 0xb04   :  { %3170 = vmatprep.subr.mxu0 %v9922_v15  ;;  %3241 = vmatprep.subr.mxu1 %v9925_v16  ;;  %13326 = vst [vmem:[#allocation96_spill] sm:$0xff] %v9934_v63  ;;  %13327 = vst [vmem:[#allocation97_spill] sm:$0xff] %v9937_v1  ;;  %v9940_v15 = vld [vmem:[#allocation7 + $0x80] sm:$0xff]  ;;  %v9943_v16 = vld [vmem:[#allocation7 + $0x90] sm:$0xff] }
 0xb05   :  { %3171 = vmatpush1.msra.mxu0 %v9928_v3  ;;  %3242 = vmatpush1.msra.mxu1 %v9931_v52  ;;  %13328 = vst [vmem:[#allocation98_spill] sm:$0xff] %v9940_v15  ;;  %13329 = vst [vmem:[#allocation99_spill] sm:$0xff] %v9943_v16  ;;  %v9946_v3 = vld [vmem:[#allocation7 + $0x68] sm:$0xff]  ;;  %v9949_v52 = vld [vmem:[#allocation7 + $0x78] sm:$0xff] }
 0xb06   :  { %3172 = vmatprep.subr.mxu0 %v9934_v63  ;;  %3243 = vmatprep.subr.mxu1 %v9937_v1  ;;  %13330 = vst [vmem:[#allocation100_spill] sm:$0xff] %v9946_v3  ;;  %13331 = vst [vmem:[#allocation101_spill] sm:$0xff] %v9949_v52  ;;  %v9952_v63 = vld [vmem:[#allocation7 + $0x60] sm:$0xff]  ;;  %v9955_v1 = vld [vmem:[#allocation7 + $0x70] sm:$0xff] }
 0xb07   :  { %3173 = vmatpush1.msra.mxu0 %v9940_v15  ;;  %3244 = vmatpush1.msra.mxu1 %v9943_v16  ;;  %13332 = vst [vmem:[#allocation102_spill] sm:$0xff] %v9952_v63  ;;  %13333 = vst [vmem:[#allocation103_spill] sm:$0xff] %v9955_v1  ;;  %v9958_v15 = vld [vmem:[#allocation7 + $0x48] sm:$0xff]  ;;  %v9961_v16 = vld [vmem:[#allocation7 + $0x58] sm:$0xff] }
 0xb08   :  { %3174 = vmatprep.subr.mxu0 %v9946_v3  ;;  %3245 = vmatprep.subr.mxu1 %v9949_v52  ;;  %13334 = vst [vmem:[#allocation104_spill] sm:$0xff] %v9958_v15  ;;  %13335 = vst [vmem:[#allocation105_spill] sm:$0xff] %v9961_v16  ;;  %v9964_v3 = vld [vmem:[#allocation7 + $0x40] sm:$0xff]  ;;  %v9967_v52 = vld [vmem:[#allocation7 + $0x50] sm:$0xff] }
 0xb09   :  { %3175 = vmatpush1.msra.mxu0 %v9952_v63  ;;  %3246 = vmatpush1.msra.mxu1 %v9955_v1  ;;  %13336 = vst [vmem:[#allocation106_spill] sm:$0xff] %v9964_v3  ;;  %13337 = vst [vmem:[#allocation107_spill] sm:$0xff] %v9967_v52  ;;  %v9970_v63 = vld [vmem:[#allocation7 + $0x28] sm:$0xff]  ;;  %v9973_v1 = vld [vmem:[#allocation7 + $0x38] sm:$0xff] }
 0xb0a   :  { %3176 = vmatprep.subr.mxu0 %v9958_v15  ;;  %3247 = vmatprep.subr.mxu1 %v9961_v16  ;;  %13338 = vst [vmem:[#allocation108_spill] sm:$0xff] %v9970_v63  ;;  %13339 = vst [vmem:[#allocation109_spill] sm:$0xff] %v9973_v1  ;;  %v9976_v15 = vld [vmem:[#allocation7 + $0x20] sm:$0xff]  ;;  %v9979_v16 = vld [vmem:[#allocation7 + $0x30] sm:$0xff] }
 0xb0b   :  { %3177 = vmatpush1.msra.mxu0 %v9964_v3  ;;  %3248 = vmatpush1.msra.mxu1 %v9967_v52  ;;  %13340 = vst [vmem:[#allocation110_spill] sm:$0xff] %v9976_v15  ;;  %13341 = vst [vmem:[#allocation111_spill] sm:$0xff] %v9979_v16  ;;  %v9982_v3 = vld [vmem:[#allocation7 + $0x8] sm:$0xff]  ;;  %v9985_v52 = vld [vmem:[#allocation7 + $0x18] sm:$0xff] }
 0xb0c   :  { %3178 = vmatprep.subr.mxu0 %v9970_v63  ;;  %3249 = vmatprep.subr.mxu1 %v9973_v1  ;;  %13342 = vst [vmem:[#allocation112_spill] sm:$0xff] %v9982_v3  ;;  %13343 = vst [vmem:[#allocation113_spill] sm:$0xff] %v9985_v52  ;;  %v9988_v63 = vld [vmem:[#allocation7] sm:$0xff]  ;;  %v9992_v1 = vld [vmem:[#allocation7 + $0x10] sm:$0xff] }
 0xb0d   :  { %3179 = vmatpush1.msra.mxu0 %v9976_v15  ;;  %3250 = vmatpush1.msra.mxu1 %v9979_v16  ;;  %13344 = vst [vmem:[#allocation114_spill] sm:$0xff] %v9988_v63  ;;  %13345 = vst [vmem:[#allocation115_spill] sm:$0xff] %v9992_v1 }
 0xb0e   :  { %3180 = vmatprep.subr.mxu0 %v9982_v3  ;;  %3251 = vmatprep.subr.mxu1 %v9985_v52  ;;  %v10000_v52 = vld [vmem:[#allocation9 + $0x1e8] sm:$0xff]  ;;  %v10006_v3 = vld [vmem:[#allocation9 + $0x1e0] sm:$0xff] }
 0xb0f   :  { %3181 = vmatpush1.msra.mxu0 %v9988_v63  ;;  %3214 = vmatprep.mubr.f32.mxu0 %v13074_v54  ;;  %13346 = vst [vmem:[#allocation116_spill] sm:$0xff] %v10000_v52  ;;  %v10003_v63 = vld [vmem:[#allocation9 + $0x1f8] sm:$0xff]  ;;  %13348 = vst [vmem:[#allocation118_spill] sm:$0xff] %v10006_v3 }
 0xb10   :  { %3252 = vmatpush1.msra.mxu1 %v9992_v1  ;;  %3285 = vmatprep.mubr.f32.mxu1 %v13074_v54  ;;  %13347 = vst [vmem:[#allocation117_spill] sm:$0xff] %v10003_v63  ;;  %v10009_v1 = vld [vmem:[#allocation9 + $0x1f0] sm:$0xff] }
 0xb11   :  { %3215 = vmatmul.mubr.f32.vlgmr.msra.gmra.mxu0 %v9528_v10  ;;  %3286 = vmatmul.mubr.f32.vlgmr.msra.gmra.mxu1 %v9528_v10  ;;  %13349 = vst [vmem:[#allocation119_spill] sm:$0xff] %v10009_v1  ;;  %v10012_v10 = vld [vmem:[#allocation9 + $0x1c8] sm:$0xff] }
 0xb12   :  { %3407 = vmatprep.mubr.f32.mxu0 %v9804_v50  ;;  %3478 = vmatprep.mubr.f32.mxu1 %v9804_v50  ;;  %13350 = vst [vmem:[#allocation120_spill] sm:$0xff] %v10012_v10  ;;  %v10015_v50 = vld [vmem:[#allocation9 + $0x1d8] sm:$0xff] }
 0xb13   :  { %3343 = vmatprep.subr.mxu0 %v10000_v52  ;;  %3414 = vmatprep.subr.mxu1 %v10003_v63  ;;  %13351 = vst [vmem:[#allocation121_spill] sm:$0xff] %v10015_v50  ;;  %v10018_v52 = vld [vmem:[#allocation9 + $0x1c0] sm:$0xff]  ;;  %v10021_v63 = vld [vmem:[#allocation9 + $0x1d0] sm:$0xff] }
 0xb14   :  { %3344 = vmatpush1.msra.mxu0 %v10006_v3  ;;  %3415 = vmatpush1.msra.mxu1 %v10009_v1  ;;  %13352 = vst [vmem:[#allocation122_spill] sm:$0xff] %v10018_v52  ;;  %13353 = vst [vmem:[#allocation123_spill] sm:$0xff] %v10021_v63  ;;  %v10024_v3 = vld [vmem:[#allocation9 + $0x1a8] sm:$0xff]  ;;  %v10027_v1 = vld [vmem:[#allocation9 + $0x1b8] sm:$0xff] }
 0xb15   :  { %3345 = vmatprep.subr.mxu0 %v10012_v10  ;;  %3416 = vmatprep.subr.mxu1 %v10015_v50  ;;  %13354 = vst [vmem:[#allocation124_spill] sm:$0xff] %v10024_v3  ;;  %13355 = vst [vmem:[#allocation125_spill] sm:$0xff] %v10027_v1  ;;  %v10030_v10 = vld [vmem:[#allocation9 + $0x1a0] sm:$0xff]  ;;  %v10033_v50 = vld [vmem:[#allocation9 + $0x1b0] sm:$0xff] }
 0xb16   :  { %3346 = vmatpush1.msra.mxu0 %v10018_v52  ;;  %3417 = vmatpush1.msra.mxu1 %v10021_v63  ;;  %13356 = vst [vmem:[#allocation126_spill] sm:$0xff] %v10030_v10  ;;  %13357 = vst [vmem:[#allocation127_spill] sm:$0xff] %v10033_v50  ;;  %v10036_v52 = vld [vmem:[#allocation9 + $0x188] sm:$0xff]  ;;  %v10039_v63 = vld [vmem:[#allocation9 + $0x198] sm:$0xff] }
 0xb17   :  { %3347 = vmatprep.subr.mxu0 %v10024_v3  ;;  %3418 = vmatprep.subr.mxu1 %v10027_v1  ;;  %13358 = vst [vmem:[#allocation128_spill] sm:$0xff] %v10036_v52  ;;  %13359 = vst [vmem:[#allocation129_spill] sm:$0xff] %v10039_v63  ;;  %v10042_v3 = vld [vmem:[#allocation9 + $0x180] sm:$0xff]  ;;  %v10045_v1 = vld [vmem:[#allocation9 + $0x190] sm:$0xff] }
 0xb18   :  { %3348 = vmatpush1.msra.mxu0 %v10030_v10  ;;  %3419 = vmatpush1.msra.mxu1 %v10033_v50  ;;  %13360 = vst [vmem:[#allocation130_spill] sm:$0xff] %v10042_v3  ;;  %13361 = vst [vmem:[#allocation131_spill] sm:$0xff] %v10045_v1  ;;  %v10048_v10 = vld [vmem:[#allocation9 + $0x168] sm:$0xff]  ;;  %v10051_v50 = vld [vmem:[#allocation9 + $0x178] sm:$0xff] }
 0xb19   :  { %3349 = vmatprep.subr.mxu0 %v10036_v52  ;;  %3420 = vmatprep.subr.mxu1 %v10039_v63  ;;  %13362 = vst [vmem:[#allocation132_spill] sm:$0xff] %v10048_v10  ;;  %13363 = vst [vmem:[#allocation133_spill] sm:$0xff] %v10051_v50  ;;  %v10054_v52 = vld [vmem:[#allocation9 + $0x160] sm:$0xff]  ;;  %v10057_v63 = vld [vmem:[#allocation9 + $0x170] sm:$0xff] }
 0xb1a   :  { %3350 = vmatpush1.msra.mxu0 %v10042_v3  ;;  %3421 = vmatpush1.msra.mxu1 %v10045_v1  ;;  %13364 = vst [vmem:[#allocation134_spill] sm:$0xff] %v10054_v52  ;;  %13365 = vst [vmem:[#allocation135_spill] sm:$0xff] %v10057_v63  ;;  %v10060_v3 = vld [vmem:[#allocation9 + $0x148] sm:$0xff]  ;;  %v10063_v1 = vld [vmem:[#allocation9 + $0x158] sm:$0xff] }
 0xb1b   :  { %3351 = vmatprep.subr.mxu0 %v10048_v10  ;;  %3422 = vmatprep.subr.mxu1 %v10051_v50  ;;  %13366 = vst [vmem:[#allocation136_spill] sm:$0xff] %v10060_v3  ;;  %13367 = vst [vmem:[#allocation137_spill] sm:$0xff] %v10063_v1  ;;  %v10066_v10 = vld [vmem:[#allocation9 + $0x140] sm:$0xff]  ;;  %v10069_v50 = vld [vmem:[#allocation9 + $0x150] sm:$0xff] }
 0xb1c   :  { %3352 = vmatpush1.msra.mxu0 %v10054_v52  ;;  %3423 = vmatpush1.msra.mxu1 %v10057_v63  ;;  %13368 = vst [vmem:[#allocation138_spill] sm:$0xff] %v10066_v10  ;;  %13369 = vst [vmem:[#allocation139_spill] sm:$0xff] %v10069_v50  ;;  %v10072_v52 = vld [vmem:[#allocation9 + $0x128] sm:$0xff]  ;;  %v10075_v63 = vld [vmem:[#allocation9 + $0x138] sm:$0xff] }
 0xb1d   :  { %3353 = vmatprep.subr.mxu0 %v10060_v3  ;;  %3424 = vmatprep.subr.mxu1 %v10063_v1  ;;  %13370 = vst [vmem:[#allocation140_spill] sm:$0xff] %v10072_v52  ;;  %13371 = vst [vmem:[#allocation141_spill] sm:$0xff] %v10075_v63  ;;  %v10078_v3 = vld [vmem:[#allocation9 + $0x120] sm:$0xff]  ;;  %v10081_v1 = vld [vmem:[#allocation9 + $0x130] sm:$0xff] }
 0xb1e   :  { %3354 = vmatpush1.msra.mxu0 %v10066_v10  ;;  %3425 = vmatpush1.msra.mxu1 %v10069_v50  ;;  %13372 = vst [vmem:[#allocation142_spill] sm:$0xff] %v10078_v3  ;;  %13373 = vst [vmem:[#allocation143_spill] sm:$0xff] %v10081_v1  ;;  %v10084_v10 = vld [vmem:[#allocation9 + $0x108] sm:$0xff]  ;;  %v10087_v50 = vld [vmem:[#allocation9 + $0x118] sm:$0xff] }
 0xb1f   :  { %3355 = vmatprep.subr.mxu0 %v10072_v52  ;;  %3426 = vmatprep.subr.mxu1 %v10075_v63  ;;  %13374 = vst [vmem:[#allocation144_spill] sm:$0xff] %v10084_v10  ;;  %13375 = vst [vmem:[#allocation145_spill] sm:$0xff] %v10087_v50  ;;  %v10090_v52 = vld [vmem:[#allocation9 + $0x100] sm:$0xff]  ;;  %v10093_v63 = vld [vmem:[#allocation9 + $0x110] sm:$0xff] }
 0xb20   :  { %3356 = vmatpush1.msra.mxu0 %v10078_v3  ;;  %3427 = vmatpush1.msra.mxu1 %v10081_v1  ;;  %13376 = vst [vmem:[#allocation146_spill] sm:$0xff] %v10090_v52  ;;  %13377 = vst [vmem:[#allocation147_spill] sm:$0xff] %v10093_v63  ;;  %v10096_v3 = vld [vmem:[#allocation9 + $0xe8] sm:$0xff]  ;;  %v10099_v1 = vld [vmem:[#allocation9 + $0xf8] sm:$0xff] }
 0xb21   :  { %3357 = vmatprep.subr.mxu0 %v10084_v10  ;;  %3428 = vmatprep.subr.mxu1 %v10087_v50  ;;  %13378 = vst [vmem:[#allocation148_spill] sm:$0xff] %v10096_v3  ;;  %13379 = vst [vmem:[#allocation149_spill] sm:$0xff] %v10099_v1  ;;  %v10102_v10 = vld [vmem:[#allocation9 + $0xe0] sm:$0xff]  ;;  %v10105_v50 = vld [vmem:[#allocation9 + $0xf0] sm:$0xff] }
 0xb22   :  { %3358 = vmatpush1.msra.mxu0 %v10090_v52  ;;  %3429 = vmatpush1.msra.mxu1 %v10093_v63  ;;  %13380 = vst [vmem:[#allocation150_spill] sm:$0xff] %v10102_v10  ;;  %13381 = vst [vmem:[#allocation151_spill] sm:$0xff] %v10105_v50  ;;  %v10108_v52 = vld [vmem:[#allocation9 + $0xc8] sm:$0xff]  ;;  %v10111_v63 = vld [vmem:[#allocation9 + $0xd8] sm:$0xff] }
 0xb23   :  { %3359 = vmatprep.subr.mxu0 %v10096_v3  ;;  %3430 = vmatprep.subr.mxu1 %v10099_v1  ;;  %13382 = vst [vmem:[#allocation152_spill] sm:$0xff] %v10108_v52  ;;  %13383 = vst [vmem:[#allocation153_spill] sm:$0xff] %v10111_v63  ;;  %v10114_v3 = vld [vmem:[#allocation9 + $0xc0] sm:$0xff]  ;;  %v10117_v1 = vld [vmem:[#allocation9 + $0xd0] sm:$0xff] }
 0xb24   :  { %3360 = vmatpush1.msra.mxu0 %v10102_v10  ;;  %3431 = vmatpush1.msra.mxu1 %v10105_v50  ;;  %13384 = vst [vmem:[#allocation154_spill] sm:$0xff] %v10114_v3  ;;  %13385 = vst [vmem:[#allocation155_spill] sm:$0xff] %v10117_v1  ;;  %v10120_v10 = vld [vmem:[#allocation9 + $0xa8] sm:$0xff]  ;;  %v10123_v50 = vld [vmem:[#allocation9 + $0xb8] sm:$0xff] }
 0xb25   :  { %3361 = vmatprep.subr.mxu0 %v10108_v52  ;;  %3432 = vmatprep.subr.mxu1 %v10111_v63  ;;  %13386 = vst [vmem:[#allocation156_spill] sm:$0xff] %v10120_v10  ;;  %13387 = vst [vmem:[#allocation157_spill] sm:$0xff] %v10123_v50  ;;  %v10126_v52 = vld [vmem:[#allocation9 + $0xa0] sm:$0xff]  ;;  %v10129_v63 = vld [vmem:[#allocation9 + $0xb0] sm:$0xff] }
 0xb26   :  { %3362 = vmatpush1.msra.mxu0 %v10114_v3  ;;  %3433 = vmatpush1.msra.mxu1 %v10117_v1  ;;  %13388 = vst [vmem:[#allocation158_spill] sm:$0xff] %v10126_v52  ;;  %13389 = vst [vmem:[#allocation159_spill] sm:$0xff] %v10129_v63  ;;  %v10132_v3 = vld [vmem:[#allocation9 + $0x88] sm:$0xff]  ;;  %v10135_v1 = vld [vmem:[#allocation9 + $0x98] sm:$0xff] }
 0xb27   :  { %3363 = vmatprep.subr.mxu0 %v10120_v10  ;;  %3434 = vmatprep.subr.mxu1 %v10123_v50  ;;  %13390 = vst [vmem:[#allocation160_spill] sm:$0xff] %v10132_v3  ;;  %13391 = vst [vmem:[#allocation161_spill] sm:$0xff] %v10135_v1  ;;  %v10138_v10 = vld [vmem:[#allocation9 + $0x80] sm:$0xff]  ;;  %v10141_v50 = vld [vmem:[#allocation9 + $0x90] sm:$0xff] }
 0xb28   :  { %3364 = vmatpush1.msra.mxu0 %v10126_v52  ;;  %3435 = vmatpush1.msra.mxu1 %v10129_v63  ;;  %13392 = vst [vmem:[#allocation162_spill] sm:$0xff] %v10138_v10  ;;  %13393 = vst [vmem:[#allocation163_spill] sm:$0xff] %v10141_v50  ;;  %v10144_v52 = vld [vmem:[#allocation9 + $0x68] sm:$0xff]  ;;  %v10147_v63 = vld [vmem:[#allocation9 + $0x78] sm:$0xff] }
 0xb29   :  { %3365 = vmatprep.subr.mxu0 %v10132_v3  ;;  %3436 = vmatprep.subr.mxu1 %v10135_v1  ;;  %13394 = vst [vmem:[#allocation164_spill] sm:$0xff] %v10144_v52  ;;  %13395 = vst [vmem:[#allocation165_spill] sm:$0xff] %v10147_v63  ;;  %v10150_v3 = vld [vmem:[#allocation9 + $0x60] sm:$0xff]  ;;  %v10153_v1 = vld [vmem:[#allocation9 + $0x70] sm:$0xff] }
 0xb2a   :  { %3366 = vmatpush1.msra.mxu0 %v10138_v10  ;;  %3437 = vmatpush1.msra.mxu1 %v10141_v50  ;;  %13396 = vst [vmem:[#allocation166_spill] sm:$0xff] %v10150_v3  ;;  %13397 = vst [vmem:[#allocation167_spill] sm:$0xff] %v10153_v1  ;;  %v10156_v10 = vld [vmem:[#allocation9 + $0x48] sm:$0xff]  ;;  %v10159_v50 = vld [vmem:[#allocation9 + $0x58] sm:$0xff] }
 0xb2b   :  { %3367 = vmatprep.subr.mxu0 %v10144_v52  ;;  %3438 = vmatprep.subr.mxu1 %v10147_v63  ;;  %13398 = vst [vmem:[#allocation168_spill] sm:$0xff] %v10156_v10  ;;  %13399 = vst [vmem:[#allocation169_spill] sm:$0xff] %v10159_v50  ;;  %v10162_v52 = vld [vmem:[#allocation9 + $0x40] sm:$0xff]  ;;  %v10165_v63 = vld [vmem:[#allocation9 + $0x50] sm:$0xff] }
 0xb2c   :  { %3368 = vmatpush1.msra.mxu0 %v10150_v3  ;;  %3439 = vmatpush1.msra.mxu1 %v10153_v1  ;;  %13400 = vst [vmem:[#allocation170_spill] sm:$0xff] %v10162_v52  ;;  %13401 = vst [vmem:[#allocation171_spill] sm:$0xff] %v10165_v63  ;;  %v10168_v3 = vld [vmem:[#allocation9 + $0x28] sm:$0xff]  ;;  %v10171_v1 = vld [vmem:[#allocation9 + $0x38] sm:$0xff] }
 0xb2d   :  { %3369 = vmatprep.subr.mxu0 %v10156_v10  ;;  %3440 = vmatprep.subr.mxu1 %v10159_v50  ;;  %13402 = vst [vmem:[#allocation172_spill] sm:$0xff] %v10168_v3  ;;  %13403 = vst [vmem:[#allocation173_spill] sm:$0xff] %v10171_v1  ;;  %v10174_v10 = vld [vmem:[#allocation9 + $0x20] sm:$0xff]  ;;  %v10177_v50 = vld [vmem:[#allocation9 + $0x30] sm:$0xff] }
 0xb2e   :  { %3370 = vmatpush1.msra.mxu0 %v10162_v52  ;;  %3441 = vmatpush1.msra.mxu1 %v10165_v63  ;;  %13404 = vst [vmem:[#allocation174_spill] sm:$0xff] %v10174_v10  ;;  %13405 = vst [vmem:[#allocation175_spill] sm:$0xff] %v10177_v50  ;;  %v10180_v52 = vld [vmem:[#allocation9 + $0x8] sm:$0xff]  ;;  %v10183_v63 = vld [vmem:[#allocation9 + $0x18] sm:$0xff] }
 0xb2f   :  { %3371 = vmatprep.subr.mxu0 %v10168_v3  ;;  %3442 = vmatprep.subr.mxu1 %v10171_v1  ;;  %13406 = vst [vmem:[#allocation176_spill] sm:$0xff] %v10180_v52  ;;  %13407 = vst [vmem:[#allocation177_spill] sm:$0xff] %v10183_v63  ;;  %v10186_v3 = vld [vmem:[#allocation9] sm:$0xff]  ;;  %v10189_v1 = vld [vmem:[#allocation9 + $0x10] sm:$0xff] }
 0xb30   :  { %3372 = vmatpush1.msra.mxu0 %v10174_v10  ;;  %3443 = vmatpush1.msra.mxu1 %v10177_v50  ;;  %13408 = vst [vmem:[#allocation178_spill] sm:$0xff] %v10186_v3  ;;  %13409 = vst [vmem:[#allocation179_spill] sm:$0xff] %v10189_v1  ;;  %v10192_v10 = vld [vmem:[#allocation9 + $0x3e8] sm:$0xff]  ;;  %v10195_v50 = vld [vmem:[#allocation9 + $0x3f8] sm:$0xff] }
 0xb31   :  { %3373 = vmatprep.subr.mxu0 %v10180_v52  ;;  %3444 = vmatprep.subr.mxu1 %v10183_v63  ;;  %13410 = vst [vmem:[#allocation180_spill] sm:$0xff] %v10192_v10  ;;  %13411 = vst [vmem:[#allocation181_spill] sm:$0xff] %v10195_v50  ;;  %v10198_v52 = vld [vmem:[#allocation9 + $0x3e0] sm:$0xff]  ;;  %v10201_v63 = vld [vmem:[#allocation9 + $0x3f0] sm:$0xff] }
 0xb32   :  { %3374 = vmatpush1.msra.mxu0 %v10186_v3  ;;  %3445 = vmatpush1.msra.mxu1 %v10189_v1  ;;  %13412 = vst [vmem:[#allocation182_spill] sm:$0xff] %v10198_v52  ;;  %13413 = vst [vmem:[#allocation183_spill] sm:$0xff] %v10201_v63  ;;  %v10204_v3 = vld [vmem:[#allocation9 + $0x3c8] sm:$0xff]  ;;  %v10207_v1 = vld [vmem:[#allocation9 + $0x3d8] sm:$0xff] }
 0xb33   :  { %3375 = vmatprep.subr.mxu0 %v10192_v10  ;;  %3446 = vmatprep.subr.mxu1 %v10195_v50  ;;  %13414 = vst [vmem:[#allocation184_spill] sm:$0xff] %v10204_v3  ;;  %13415 = vst [vmem:[#allocation185_spill] sm:$0xff] %v10207_v1  ;;  %v10210_v10 = vld [vmem:[#allocation9 + $0x3c0] sm:$0xff]  ;;  %v10213_v50 = vld [vmem:[#allocation9 + $0x3d0] sm:$0xff] }
 0xb34   :  { %3376 = vmatpush2.msra.mxu0 %v10198_v52  ;;  %3447 = vmatpush2.msra.mxu1 %v10201_v63  ;;  %13416 = vst [vmem:[#allocation186_spill] sm:$0xff] %v10210_v10  ;;  %13417 = vst [vmem:[#allocation187_spill] sm:$0xff] %v10213_v50  ;;  %v10216_v52 = vld [vmem:[#allocation9 + $0x3a8] sm:$0xff]  ;;  %v10219_v63 = vld [vmem:[#allocation9 + $0x3b8] sm:$0xff] }
 0xb35   :  { %3377 = vmatprep.subr.mxu0 %v10204_v3  ;;  %3448 = vmatprep.subr.mxu1 %v10207_v1  ;;  %13418 = vst [vmem:[#allocation188_spill] sm:$0xff] %v10216_v52  ;;  %13419 = vst [vmem:[#allocation189_spill] sm:$0xff] %v10219_v63  ;;  %v10222_v3 = vld [vmem:[#allocation9 + $0x3a0] sm:$0xff]  ;;  %v10225_v1 = vld [vmem:[#allocation9 + $0x3b0] sm:$0xff] }
 0xb36   :  { %3378 = vmatpush2.msra.mxu0 %v10210_v10  ;;  %3449 = vmatpush2.msra.mxu1 %v10213_v50  ;;  %13420 = vst [vmem:[#allocation190_spill] sm:$0xff] %v10222_v3  ;;  %13421 = vst [vmem:[#allocation191_spill] sm:$0xff] %v10225_v1  ;;  %v10228_v10 = vld [vmem:[#allocation9 + $0x388] sm:$0xff]  ;;  %v10231_v50 = vld [vmem:[#allocation9 + $0x398] sm:$0xff] }
 0xb37   :  { %3379 = vmatprep.subr.mxu0 %v10216_v52  ;;  %3450 = vmatprep.subr.mxu1 %v10219_v63  ;;  %13422 = vst [vmem:[#allocation192_spill] sm:$0xff] %v10228_v10  ;;  %13423 = vst [vmem:[#allocation193_spill] sm:$0xff] %v10231_v50  ;;  %v10234_v52 = vld [vmem:[#allocation9 + $0x380] sm:$0xff]  ;;  %v10237_v63 = vld [vmem:[#allocation9 + $0x390] sm:$0xff] }
 0xb38   :  { %3380 = vmatpush2.msra.mxu0 %v10222_v3  ;;  %3451 = vmatpush2.msra.mxu1 %v10225_v1  ;;  %13424 = vst [vmem:[#allocation194_spill] sm:$0xff] %v10234_v52  ;;  %13425 = vst [vmem:[#allocation195_spill] sm:$0xff] %v10237_v63  ;;  %v10240_v3 = vld [vmem:[#allocation9 + $0x368] sm:$0xff]  ;;  %v10243_v1 = vld [vmem:[#allocation9 + $0x378] sm:$0xff] }
 0xb39   :  { %3381 = vmatprep.subr.mxu0 %v10228_v10  ;;  %3452 = vmatprep.subr.mxu1 %v10231_v50  ;;  %13426 = vst [vmem:[#allocation196_spill] sm:$0xff] %v10240_v3  ;;  %13427 = vst [vmem:[#allocation197_spill] sm:$0xff] %v10243_v1  ;;  %v10246_v10 = vld [vmem:[#allocation9 + $0x360] sm:$0xff]  ;;  %v10249_v50 = vld [vmem:[#allocation9 + $0x370] sm:$0xff] }
 0xb3a   :  { %3382 = vmatpush2.msra.mxu0 %v10234_v52  ;;  %3453 = vmatpush2.msra.mxu1 %v10237_v63  ;;  %13428 = vst [vmem:[#allocation198_spill] sm:$0xff] %v10246_v10  ;;  %13429 = vst [vmem:[#allocation199_spill] sm:$0xff] %v10249_v50  ;;  %v10252_v52 = vld [vmem:[#allocation9 + $0x348] sm:$0xff]  ;;  %v10255_v63 = vld [vmem:[#allocation9 + $0x358] sm:$0xff] }
 0xb3b   :  { %3383 = vmatprep.subr.mxu0 %v10240_v3  ;;  %3454 = vmatprep.subr.mxu1 %v10243_v1  ;;  %13430 = vst [vmem:[#allocation200_spill] sm:$0xff] %v10252_v52  ;;  %13431 = vst [vmem:[#allocation201_spill] sm:$0xff] %v10255_v63  ;;  %v10258_v3 = vld [vmem:[#allocation9 + $0x340] sm:$0xff]  ;;  %v10261_v1 = vld [vmem:[#allocation9 + $0x350] sm:$0xff] }
 0xb3c   :  { %3384 = vmatpush2.msra.mxu0 %v10246_v10  ;;  %3455 = vmatpush2.msra.mxu1 %v10249_v50  ;;  %13432 = vst [vmem:[#allocation202_spill] sm:$0xff] %v10258_v3  ;;  %13433 = vst [vmem:[#allocation203_spill] sm:$0xff] %v10261_v1  ;;  %v10264_v10 = vld [vmem:[#allocation9 + $0x328] sm:$0xff]  ;;  %v10267_v50 = vld [vmem:[#allocation9 + $0x338] sm:$0xff] }
 0xb3d   :  { %3385 = vmatprep.subr.mxu0 %v10252_v52  ;;  %3456 = vmatprep.subr.mxu1 %v10255_v63  ;;  %13434 = vst [vmem:[#allocation204_spill] sm:$0xff] %v10264_v10  ;;  %13435 = vst [vmem:[#allocation205_spill] sm:$0xff] %v10267_v50  ;;  %v10270_v52 = vld [vmem:[#allocation9 + $0x320] sm:$0xff]  ;;  %v10273_v63 = vld [vmem:[#allocation9 + $0x330] sm:$0xff] }
 0xb3e   :  { %3386 = vmatpush2.msra.mxu0 %v10258_v3  ;;  %3457 = vmatpush2.msra.mxu1 %v10261_v1  ;;  %13436 = vst [vmem:[#allocation206_spill] sm:$0xff] %v10270_v52  ;;  %13437 = vst [vmem:[#allocation207_spill] sm:$0xff] %v10273_v63  ;;  %v10276_v3 = vld [vmem:[#allocation9 + $0x308] sm:$0xff]  ;;  %v10279_v1 = vld [vmem:[#allocation9 + $0x318] sm:$0xff] }
 0xb3f   :  { %3387 = vmatprep.subr.mxu0 %v10264_v10  ;;  %3458 = vmatprep.subr.mxu1 %v10267_v50  ;;  %13438 = vst [vmem:[#allocation208_spill] sm:$0xff] %v10276_v3  ;;  %13439 = vst [vmem:[#allocation209_spill] sm:$0xff] %v10279_v1  ;;  %v10282_v10 = vld [vmem:[#allocation9 + $0x300] sm:$0xff]  ;;  %v10285_v50 = vld [vmem:[#allocation9 + $0x310] sm:$0xff] }
 0xb40   :  { %3388 = vmatpush2.msra.mxu0 %v10270_v52  ;;  %3459 = vmatpush2.msra.mxu1 %v10273_v63  ;;  %13440 = vst [vmem:[#allocation210_spill] sm:$0xff] %v10282_v10  ;;  %13441 = vst [vmem:[#allocation211_spill] sm:$0xff] %v10285_v50  ;;  %v10288_v52 = vld [vmem:[#allocation9 + $0x2e8] sm:$0xff]  ;;  %v10291_v63 = vld [vmem:[#allocation9 + $0x2f8] sm:$0xff] }
 0xb41   :  { %3389 = vmatprep.subr.mxu0 %v10276_v3  ;;  %3460 = vmatprep.subr.mxu1 %v10279_v1  ;;  %13442 = vst [vmem:[#allocation212_spill] sm:$0xff] %v10288_v52  ;;  %13443 = vst [vmem:[#allocation213_spill] sm:$0xff] %v10291_v63  ;;  %v10294_v3 = vld [vmem:[#allocation9 + $0x2e0] sm:$0xff]  ;;  %v10297_v1 = vld [vmem:[#allocation9 + $0x2f0] sm:$0xff] }
 0xb42   :  { %3390 = vmatpush2.msra.mxu0 %v10282_v10  ;;  %3461 = vmatpush2.msra.mxu1 %v10285_v50  ;;  %13444 = vst [vmem:[#allocation214_spill] sm:$0xff] %v10294_v3  ;;  %13445 = vst [vmem:[#allocation215_spill] sm:$0xff] %v10297_v1  ;;  %v10300_v10 = vld [vmem:[#allocation9 + $0x2c8] sm:$0xff]  ;;  %v10303_v50 = vld [vmem:[#allocation9 + $0x2d8] sm:$0xff] }
 0xb43   :  { %3391 = vmatprep.subr.mxu0 %v10288_v52  ;;  %3462 = vmatprep.subr.mxu1 %v10291_v63  ;;  %13446 = vst [vmem:[#allocation216_spill] sm:$0xff] %v10300_v10  ;;  %13447 = vst [vmem:[#allocation217_spill] sm:$0xff] %v10303_v50  ;;  %v10306_v52 = vld [vmem:[#allocation9 + $0x2c0] sm:$0xff]  ;;  %v10309_v63 = vld [vmem:[#allocation9 + $0x2d0] sm:$0xff] }
 0xb44   :  { %3392 = vmatpush2.msra.mxu0 %v10294_v3  ;;  %3463 = vmatpush2.msra.mxu1 %v10297_v1  ;;  %13448 = vst [vmem:[#allocation218_spill] sm:$0xff] %v10306_v52  ;;  %13449 = vst [vmem:[#allocation219_spill] sm:$0xff] %v10309_v63  ;;  %v10312_v3 = vld [vmem:[#allocation9 + $0x2a8] sm:$0xff]  ;;  %v10315_v1 = vld [vmem:[#allocation9 + $0x2b8] sm:$0xff] }
 0xb45   :  { %3393 = vmatprep.subr.mxu0 %v10300_v10  ;;  %3464 = vmatprep.subr.mxu1 %v10303_v50  ;;  %13450 = vst [vmem:[#allocation220_spill] sm:$0xff] %v10312_v3  ;;  %13451 = vst [vmem:[#allocation221_spill] sm:$0xff] %v10315_v1  ;;  %v10318_v10 = vld [vmem:[#allocation9 + $0x2a0] sm:$0xff]  ;;  %v10321_v50 = vld [vmem:[#allocation9 + $0x2b0] sm:$0xff] }
 0xb46   :  { %3394 = vmatpush2.msra.mxu0 %v10306_v52  ;;  %3465 = vmatpush2.msra.mxu1 %v10309_v63  ;;  %13452 = vst [vmem:[#allocation222_spill] sm:$0xff] %v10318_v10  ;;  %13453 = vst [vmem:[#allocation223_spill] sm:$0xff] %v10321_v50  ;;  %v10324_v52 = vld [vmem:[#allocation9 + $0x288] sm:$0xff]  ;;  %v10327_v63 = vld [vmem:[#allocation9 + $0x298] sm:$0xff] }
 0xb47   :  { %3395 = vmatprep.subr.mxu0 %v10312_v3  ;;  %3466 = vmatprep.subr.mxu1 %v10315_v1  ;;  %13454 = vst [vmem:[#allocation224_spill] sm:$0xff] %v10324_v52  ;;  %13455 = vst [vmem:[#allocation225_spill] sm:$0xff] %v10327_v63  ;;  %v10330_v3 = vld [vmem:[#allocation9 + $0x280] sm:$0xff]  ;;  %v10333_v1 = vld [vmem:[#allocation9 + $0x290] sm:$0xff] }
 0xb48   :  { %3396 = vmatpush2.msra.mxu0 %v10318_v10  ;;  %3467 = vmatpush2.msra.mxu1 %v10321_v50  ;;  %13456 = vst [vmem:[#allocation226_spill] sm:$0xff] %v10330_v3  ;;  %13457 = vst [vmem:[#allocation227_spill] sm:$0xff] %v10333_v1  ;;  %v10336_v10 = vld [vmem:[#allocation9 + $0x268] sm:$0xff]  ;;  %v10339_v50 = vld [vmem:[#allocation9 + $0x278] sm:$0xff] }
 0xb49   :  { %3397 = vmatprep.subr.mxu0 %v10324_v52  ;;  %3468 = vmatprep.subr.mxu1 %v10327_v63  ;;  %13458 = vst [vmem:[#allocation228_spill] sm:$0xff] %v10336_v10  ;;  %13459 = vst [vmem:[#allocation229_spill] sm:$0xff] %v10339_v50  ;;  %v10342_v52 = vld [vmem:[#allocation9 + $0x260] sm:$0xff]  ;;  %v10345_v63 = vld [vmem:[#allocation9 + $0x270] sm:$0xff] }
 0xb4a   :  { %3398 = vmatpush2.msra.mxu0 %v10330_v3  ;;  %3469 = vmatpush2.msra.mxu1 %v10333_v1  ;;  %13460 = vst [vmem:[#allocation230_spill] sm:$0xff] %v10342_v52  ;;  %13461 = vst [vmem:[#allocation231_spill] sm:$0xff] %v10345_v63  ;;  %v10348_v3 = vld [vmem:[#allocation9 + $0x248] sm:$0xff]  ;;  %v10351_v1 = vld [vmem:[#allocation9 + $0x258] sm:$0xff] }
 0xb4b   :  { %3399 = vmatprep.subr.mxu0 %v10336_v10  ;;  %3470 = vmatprep.subr.mxu1 %v10339_v50  ;;  %13462 = vst [vmem:[#allocation232_spill] sm:$0xff] %v10348_v3  ;;  %13463 = vst [vmem:[#allocation233_spill] sm:$0xff] %v10351_v1  ;;  %v10354_v10 = vld [vmem:[#allocation9 + $0x240] sm:$0xff]  ;;  %v10357_v50 = vld [vmem:[#allocation9 + $0x250] sm:$0xff] }
 0xb4c   :  { %3400 = vmatpush2.msra.mxu0 %v10342_v52  ;;  %3471 = vmatpush2.msra.mxu1 %v10345_v63  ;;  %13464 = vst [vmem:[#allocation234_spill] sm:$0xff] %v10354_v10  ;;  %13465 = vst [vmem:[#allocation235_spill] sm:$0xff] %v10357_v50  ;;  %v10360_v52 = vld [vmem:[#allocation9 + $0x228] sm:$0xff]  ;;  %v10363_v63 = vld [vmem:[#allocation9 + $0x238] sm:$0xff] }
 0xb4d   :  { %3401 = vmatprep.subr.mxu0 %v10348_v3  ;;  %3472 = vmatprep.subr.mxu1 %v10351_v1  ;;  %13466 = vst [vmem:[#allocation236_spill] sm:$0xff] %v10360_v52  ;;  %13467 = vst [vmem:[#allocation237_spill] sm:$0xff] %v10363_v63  ;;  %v10366_v3 = vld [vmem:[#allocation9 + $0x220] sm:$0xff]  ;;  %v10369_v1 = vld [vmem:[#allocation9 + $0x230] sm:$0xff] }
 0xb4e   :  { %3402 = vmatpush2.msra.mxu0 %v10354_v10  ;;  %3473 = vmatpush2.msra.mxu1 %v10357_v50  ;;  %13468 = vst [vmem:[#allocation238_spill] sm:$0xff] %v10366_v3  ;;  %13469 = vst [vmem:[#allocation239_spill] sm:$0xff] %v10369_v1  ;;  %v10372_v10 = vld [vmem:[#allocation9 + $0x208] sm:$0xff]  ;;  %v10375_v50 = vld [vmem:[#allocation9 + $0x218] sm:$0xff] }
 0xb4f   :  { %3403 = vmatprep.subr.mxu0 %v10360_v52  ;;  %3474 = vmatprep.subr.mxu1 %v10363_v63  ;;  %13470 = vst [vmem:[#allocation240_spill] sm:$0xff] %v10372_v10  ;;  %13471 = vst [vmem:[#allocation241_spill] sm:$0xff] %v10375_v50  ;;  %v10378_v52 = vld [vmem:[#allocation9 + $0x200] sm:$0xff]  ;;  %v10381_v63 = vld [vmem:[#allocation9 + $0x210] sm:$0xff] }
 0xb50   :  { %3404 = vmatpush2.msra.mxu0 %v10366_v3  ;;  %3475 = vmatpush2.msra.mxu1 %v10369_v1  ;;  %13472 = vst [vmem:[#allocation242_spill] sm:$0xff] %v10378_v52  ;;  %13473 = vst [vmem:[#allocation243_spill] sm:$0xff] %v10381_v63  ;;  %v10384_v3 = vld [vmem:[#allocation10 + $0x1e8] sm:$0xff]  ;;  %v10387_v1 = vld [vmem:[#allocation10 + $0x1f8] sm:$0xff] }
 0xb51   :  { %3405 = vmatprep.subr.mxu0 %v10372_v10  ;;  %3476 = vmatprep.subr.mxu1 %v10375_v50  ;;  %13474 = vst [vmem:[#allocation244_spill] sm:$0xff] %v10384_v3  ;;  %13475 = vst [vmem:[#allocation245_spill] sm:$0xff] %v10387_v1 }
 0xb52   :  { %3406 = vmatpush2.msra.mxu0 %v10378_v52  ;;  %3477 = vmatpush2.msra.mxu1 %v10381_v63 }
 0xb53   :  { %3509 = vmatprep.subr.mxu0 %v10384_v3  ;;  %3580 = vmatprep.subr.mxu1 %v10387_v1 }
 0xbb0   :  { %v3047_v10 = vpop.f32.mrf.mxu0  ;;  %v3118_v52 = vpop.f32.mrf.mxu1 }
 0xbb1   :  { %v3048_v54 = vadd.f32 %v3047_v10, %v13206_v47  ;;  %v3119_v45 = vadd.f32 %v3118_v52, %v13209_v43 }
 0xbb2   :  { %v3049_v50 = vpop.f32.mrf.mxu0  ;;  %v3120_v63 = vpop.f32.mrf.mxu1 }
 0xbb3   :  { %v4915_v16 = vmul.f32 -1.442695, %v3048_v54  ;;  %v3050_v15 = vadd.f32 %v3049_v50, %v13207_v56  ;;  %v3121_v44 = vadd.f32 %v3120_v63, %v13208_v62 }
 0xbb5   :  { %5194 = vpow2.f32 %v4915_v16  ;;  %v4916_v7 = vmul.f32 -1.442695, %v3050_v15  ;;  %v4917_v39 = vmul.f32 -1.442695, %v3121_v44 }
 0xbb7   :  { %5196 = vpow2.f32 %v4916_v7 }
 0xbb8   :  { %5198 = vpow2.f32 %v4917_v39  ;;  %v3148_v39 = vstv %s4918_s18 }
 0xbc2   :  { %v5195_v3 = vpop.eup %5194 }
 0xbc3   :  { %v3132_v60 = vadd.f32 1.0, %v5195_v3 }
 0xbc4   :  { %v5197_v1 = vpop.eup %5196 }
 0xbc5   :  { %5200 = vrcp.f32 %v3132_v60  ;;  %v3133_v10 = vadd.f32 1.0, %v5197_v1  ;;  %v5199_v54 = vpop.eup %5198 }
 0xbc6   :  { %5202 = vtanh.f32 %v3119_v45  ;;  %v3134_v44 = vadd.f32 1.0, %v5199_v54 }
 0xbc7   :  { %5204 = vrcp.f32 %v3133_v10  ;;  %v10399_v10 = vld [vmem:[#allocation6] sm:$0xf] }
 0xbc8   :  { %5206 = vrcp.f32 %v3134_v44  ;;  %v3149_v43 = vmul.f32 %v10399_v10, %v3148_v39 }
 0xbd1   :  { %v3216_v16 = vpop.f32.mrf.mxu0  ;;  %v3287_v50 = vpop.f32.mrf.mxu1 }
 0xbd2   :  { %v5201_v15 = vpop.eup %5200 }
 0xbd3   :  { %v5203_v7 = vpop.eup %5202  ;;  %v3218_v56 = vpop.f32.mrf.mxu0 }
 0xbd4   :  { %v3289_v47 = vpop.f32.mrf.mxu1  ;;  %v5205_v63 = vpop.eup %5204  ;;  %v3296_v62 = vcombine.low %v3216_v16, %v3218_v56  ;;  %v3143_v52 = vmul.f32 %v5203_v7, %v5201_v15 }
 0xbd5   :  { %v3297_v42 = vcombine.low %v3287_v50, %v3289_v47  ;;  %v3142_v3 = vmul.f32 %v5205_v63, %v9515_v46 }
 0xbd6   :  { %v3304_v60 = vrot.slane %v3296_v62, %v6813_v12  ;;  %v5207_v62 = vpop.eup %5206 }
 0xbd7   :  { %v3311_v45 = vrot.slane %v3297_v42, %v6813_v12  ;;  %v10397_v1 = vadd.f32 %v3143_v52, %v3142_v3 }
 0xbd9   :  { %v3312_v41 = vcombine.low %v3304_v60, %v3311_v45  ;;  %5208 = vtanh.f32 %v10397_v1 }
 0xbdb   :  { %v3319_v47 = vrot.slane %v3312_v41, %v6813_v12 }
 0xbdd   :  { %v3321_v56 = vadd.f32 %v3319_v47, %v3149_v43 }
 0xbdf   :  { %v3322_v46 = vadd.f32 %v3321_v56, %v6823_v29 }
 0xbe1   :  { %v4919_v54 = vmul.f32 -1.442695, %v3322_v46 }
 0xbe3   :  { %5210 = vpow2.f32 %v4919_v54  ;;  %v10425_v54 = vld [vmem:[#allocation10 + $0x1d8] sm:$0xff] }
 0xbe4   :  { %5212 = vtanh.f32 %v3322_v46  ;;  %v10422_v46 = vld [vmem:[#allocation10 + $0x1c8] sm:$0xff] }
 0xbe6   :  { %v5209_v16 = vpop.eup %5208 }
 0xbe7   :  { %v3146_v42 = vmul.f32 %v5209_v16, %v5207_v62  ;;  %v10428_v62 = vld [vmem:[#allocation10 + $0x1c0] sm:$0xff]  ;;  %v10431_v16 = vld [vmem:[#allocation10 + $0x1d0] sm:$0xff] }
 0xbe9   :  { %v4741_v50 = vrot.slane %v3146_v42, 4 }
 0xbeb   :  { %v10406_v15 = vsel %vm4758_vm3, %v9522_v2, %v4741_v50  ;;  %v10416_v2 = vld [vmem:[#allocation10 + $0x1e0] sm:$0xff]  ;;  %v10437_v50 = vld [vmem:[#allocation10 + $0x1b8] sm:$0xff] }
 0xbf0   :  { %v5211_v7 = vpop.eup %5210 }
 0xbf1   :  { %v3326_v63 = vadd.f32 1.0, %v5211_v7  ;;  %v5213_v44 = vpop.eup %5212  ;;  %v10440_v7 = vld [vmem:[#allocation10 + $0x1a0] sm:$0xff] }
 0xbf2   :  { %v3335_v43 = vrot.slane %v5213_v44, 2  ;;  %v10446_v44 = vld [vmem:[#allocation10 + $0x188] sm:$0xff] }
 0xbf3   :  { %5214 = vrcp.f32 %v3326_v63  ;;  %v10443_v63 = vld [vmem:[#allocation10 + $0x1b0] sm:$0xff] }
 0xc00   :  { %v5215_v52 = vpop.eup %5214 }
 0xc01   :  { %v3331_v41 = vrot.slane %v5215_v52, 1  ;;  %v3337_v39 = vmul.f32 %v5215_v52, %v3335_v43  ;;  %v3340_v45 = vrot.slane %v5215_v52, 3  ;;  %v10449_v52 = vld [vmem:[#allocation10 + $0x198] sm:$0xff]  ;;  %v10455_v43 = vld [vmem:[#allocation10 + $0x190] sm:$0xff] }
 0xc02   :  { %13477 = vst [vmem:[#allocation247_spill] sm:$0xff] %v10455_v43 }
 0xc03   :  { %v3333_v3 = vmul.f32 %v3331_v41, %v9525_v17  ;;  %v10419_v17 = vld [vmem:[#allocation10 + $0x1f0] sm:$0xff]  ;;  %v10452_v41 = vld [vmem:[#allocation10 + $0x180] sm:$0xff] }
 0xc04   :  { %13476 = vst [vmem:[#allocation246_spill] sm:$0xff] %v10452_v41 }
 0xc05   :  { %v10409_v60 = vadd.f32 %v3337_v39, %v3333_v3  ;;  %v10458_v3 = vld [vmem:[#allocation10 + $0x168] sm:$0xff]  ;;  %v10461_v39 = vld [vmem:[#allocation10 + $0x178] sm:$0xff] }
 0xc06   :  { %13478 = vst [vmem:[#allocation248_spill] sm:$0xff] %v10458_v3  ;;  %13479 = vst [vmem:[#allocation254_spill] sm:$0xff] %v10461_v39 }
 0xc07   :  { %5216 = vtanh.f32 %v10409_v60 }
 0xc14   :  { %v5217_v47 = vpop.eup %5216 }
 0xc15   :  { %v10412_v56 = vmul.f32 %v5217_v47, %v3340_v45  ;;  %v10464_v45 = vld [vmem:[#allocation10 + $0x160] sm:$0xff]  ;;  %v10467_v47 = vld [vmem:[#allocation10 + $0x170] sm:$0xff] }
 0xc16   :  { %13480 = vst [vmem:[#allocation255_spill] sm:$0xff] %v10464_v45  ;;  %13481 = vst [vmem:[#allocation256_spill] sm:$0xff] %v10467_v47 }
 0xc17   :  { %3408 = vmatmul.mubr.f32.vlgmr.msra.gmra.mxu0 %v10412_v56  ;;  %3479 = vmatmul.mubr.f32.vlgmr.msra.gmra.mxu1 %v10412_v56 }
 0xc18   :  { %3573 = vmatprep.mubr.f32.mxu0 %v3146_v42  ;;  %3644 = vmatprep.mubr.f32.mxu1 %v3146_v42  ;;  %v10434_v42 = vld [vmem:[#allocation10 + $0x1a8] sm:$0xff] }
 0xc19   :  { %3510 = vmatpush1.msra.mxu0 %v10416_v2  ;;  %3581 = vmatpush1.msra.mxu1 %v10419_v17 }
 0xc1a   :  { %3511 = vmatprep.subr.mxu0 %v10422_v46  ;;  %3582 = vmatprep.subr.mxu1 %v10425_v54 }
 0xc1b   :  { %3512 = vmatpush1.msra.mxu0 %v10428_v62  ;;  %3583 = vmatpush1.msra.mxu1 %v10431_v16 }
 0xc1c   :  { %3513 = vmatprep.subr.mxu0 %v10434_v42  ;;  %3584 = vmatprep.subr.mxu1 %v10437_v50 }
 0xc1d   :  { %3514 = vmatpush1.msra.mxu0 %v10440_v7  ;;  %3585 = vmatpush1.msra.mxu1 %v10443_v63 }
 0xc1e   :  { %3515 = vmatprep.subr.mxu0 %v10446_v44  ;;  %3586 = vmatprep.subr.mxu1 %v10449_v52 }
 0xc1f   :  { %3516 = vmatpush1.msra.mxu0 %v10452_v41  ;;  %3587 = vmatpush1.msra.mxu1 %v10455_v43  ;;  %v10470_v41 = vld [vmem:[#allocation10 + $0x148] sm:$0xff]  ;;  %v10473_v43 = vld [vmem:[#allocation10 + $0x158] sm:$0xff] }
 0xc20   :  { %3517 = vmatprep.subr.mxu0 %v10458_v3  ;;  %3588 = vmatprep.subr.mxu1 %v10461_v39  ;;  %13482 = vst [vmem:[#allocation257_spill] sm:$0xff] %v10470_v41  ;;  %13483 = vst [vmem:[#allocation258_spill] sm:$0xff] %v10473_v43  ;;  %v10476_v3 = vld [vmem:[#allocation10 + $0x140] sm:$0xff]  ;;  %v10479_v39 = vld [vmem:[#allocation10 + $0x150] sm:$0xff] }
 0xc21   :  { %3518 = vmatpush1.msra.mxu0 %v10464_v45  ;;  %3589 = vmatpush1.msra.mxu1 %v10467_v47  ;;  %13484 = vst [vmem:[#allocation259_spill] sm:$0xff] %v10476_v3  ;;  %13485 = vst [vmem:[#allocation260_spill] sm:$0xff] %v10479_v39  ;;  %v10482_v45 = vld [vmem:[#allocation10 + $0x128] sm:$0xff]  ;;  %v10485_v47 = vld [vmem:[#allocation10 + $0x138] sm:$0xff] }
 0xc22   :  { %3519 = vmatprep.subr.mxu0 %v10470_v41  ;;  %3590 = vmatprep.subr.mxu1 %v10473_v43  ;;  %13486 = vst [vmem:[#allocation261_spill] sm:$0xff] %v10482_v45  ;;  %13487 = vst [vmem:[#allocation262_spill] sm:$0xff] %v10485_v47  ;;  %v10488_v41 = vld [vmem:[#allocation10 + $0x120] sm:$0xff]  ;;  %v10491_v43 = vld [vmem:[#allocation10 + $0x130] sm:$0xff] }
 0xc23   :  { %3520 = vmatpush1.msra.mxu0 %v10476_v3  ;;  %3591 = vmatpush1.msra.mxu1 %v10479_v39  ;;  %13488 = vst [vmem:[#allocation263_spill] sm:$0xff] %v10488_v41  ;;  %13489 = vst [vmem:[#allocation264_spill] sm:$0xff] %v10491_v43  ;;  %v10494_v3 = vld [vmem:[#allocation10 + $0x108] sm:$0xff]  ;;  %v10497_v39 = vld [vmem:[#allocation10 + $0x118] sm:$0xff] }
 0xc24   :  { %3521 = vmatprep.subr.mxu0 %v10482_v45  ;;  %3592 = vmatprep.subr.mxu1 %v10485_v47  ;;  %13490 = vst [vmem:[#allocation265_spill] sm:$0xff] %v10494_v3  ;;  %13491 = vst [vmem:[#allocation266_spill] sm:$0xff] %v10497_v39  ;;  %v10500_v45 = vld [vmem:[#allocation10 + $0x100] sm:$0xff]  ;;  %v10503_v47 = vld [vmem:[#allocation10 + $0x110] sm:$0xff] }
 0xc25   :  { %3522 = vmatpush1.msra.mxu0 %v10488_v41  ;;  %3593 = vmatpush1.msra.mxu1 %v10491_v43  ;;  %13492 = vst [vmem:[#allocation267_spill] sm:$0xff] %v10500_v45  ;;  %13493 = vst [vmem:[#allocation268_spill] sm:$0xff] %v10503_v47  ;;  %v10506_v41 = vld [vmem:[#allocation10 + $0xe8] sm:$0xff]  ;;  %v10509_v43 = vld [vmem:[#allocation10 + $0xf8] sm:$0xff] }
 0xc26   :  { %3523 = vmatprep.subr.mxu0 %v10494_v3  ;;  %3594 = vmatprep.subr.mxu1 %v10497_v39  ;;  %13494 = vst [vmem:[#allocation269_spill] sm:$0xff] %v10506_v41  ;;  %13495 = vst [vmem:[#allocation270_spill] sm:$0xff] %v10509_v43  ;;  %v10512_v3 = vld [vmem:[#allocation10 + $0xe0] sm:$0xff]  ;;  %v10515_v39 = vld [vmem:[#allocation10 + $0xf0] sm:$0xff] }
 0xc27   :  { %3524 = vmatpush1.msra.mxu0 %v10500_v45  ;;  %3595 = vmatpush1.msra.mxu1 %v10503_v47  ;;  %13496 = vst [vmem:[#allocation271_spill] sm:$0xff] %v10512_v3  ;;  %13497 = vst [vmem:[#allocation272_spill] sm:$0xff] %v10515_v39  ;;  %v10518_v45 = vld [vmem:[#allocation10 + $0xc8] sm:$0xff]  ;;  %v10521_v47 = vld [vmem:[#allocation10 + $0xd8] sm:$0xff] }
 0xc28   :  { %3525 = vmatprep.subr.mxu0 %v10506_v41  ;;  %3596 = vmatprep.subr.mxu1 %v10509_v43  ;;  %13498 = vst [vmem:[#allocation273_spill] sm:$0xff] %v10518_v45  ;;  %13499 = vst [vmem:[#allocation274_spill] sm:$0xff] %v10521_v47  ;;  %v10524_v41 = vld [vmem:[#allocation10 + $0xc0] sm:$0xff]  ;;  %v10527_v43 = vld [vmem:[#allocation10 + $0xd0] sm:$0xff] }
 0xc29   :  { %3526 = vmatpush1.msra.mxu0 %v10512_v3  ;;  %3597 = vmatpush1.msra.mxu1 %v10515_v39  ;;  %13500 = vst [vmem:[#allocation275_spill] sm:$0xff] %v10524_v41  ;;  %13501 = vst [vmem:[#allocation276_spill] sm:$0xff] %v10527_v43  ;;  %v10530_v3 = vld [vmem:[#allocation10 + $0xa8] sm:$0xff]  ;;  %v10533_v39 = vld [vmem:[#allocation10 + $0xb8] sm:$0xff] }
 0xc2a   :  { %3527 = vmatprep.subr.mxu0 %v10518_v45  ;;  %3598 = vmatprep.subr.mxu1 %v10521_v47  ;;  %13502 = vst [vmem:[#allocation277_spill] sm:$0xff] %v10530_v3  ;;  %13503 = vst [vmem:[#allocation278_spill] sm:$0xff] %v10533_v39  ;;  %v10536_v45 = vld [vmem:[#allocation10 + $0xa0] sm:$0xff]  ;;  %v10539_v47 = vld [vmem:[#allocation10 + $0xb0] sm:$0xff] }
 0xc2b   :  { %3528 = vmatpush1.msra.mxu0 %v10524_v41  ;;  %3599 = vmatpush1.msra.mxu1 %v10527_v43  ;;  %13504 = vst [vmem:[#allocation279_spill] sm:$0xff] %v10536_v45  ;;  %13505 = vst [vmem:[#allocation280_spill] sm:$0xff] %v10539_v47  ;;  %v10542_v41 = vld [vmem:[#allocation10 + $0x88] sm:$0xff]  ;;  %v10545_v43 = vld [vmem:[#allocation10 + $0x98] sm:$0xff] }
 0xc2c   :  { %3529 = vmatprep.subr.mxu0 %v10530_v3  ;;  %3600 = vmatprep.subr.mxu1 %v10533_v39  ;;  %13506 = vst [vmem:[#allocation281_spill] sm:$0xff] %v10542_v41  ;;  %13507 = vst [vmem:[#allocation282_spill] sm:$0xff] %v10545_v43  ;;  %v10548_v3 = vld [vmem:[#allocation10 + $0x80] sm:$0xff]  ;;  %v10551_v39 = vld [vmem:[#allocation10 + $0x90] sm:$0xff] }
 0xc2d   :  { %3530 = vmatpush1.msra.mxu0 %v10536_v45  ;;  %3601 = vmatpush1.msra.mxu1 %v10539_v47  ;;  %13508 = vst [vmem:[#allocation283_spill] sm:$0xff] %v10548_v3  ;;  %13509 = vst [vmem:[#allocation284_spill] sm:$0xff] %v10551_v39  ;;  %v10554_v45 = vld [vmem:[#allocation10 + $0x68] sm:$0xff]  ;;  %v10557_v47 = vld [vmem:[#allocation10 + $0x78] sm:$0xff] }
 0xc2e   :  { %3531 = vmatprep.subr.mxu0 %v10542_v41  ;;  %3602 = vmatprep.subr.mxu1 %v10545_v43  ;;  %13510 = vst [vmem:[#allocation285_spill] sm:$0xff] %v10554_v45  ;;  %13511 = vst [vmem:[#allocation286_spill] sm:$0xff] %v10557_v47  ;;  %v10560_v41 = vld [vmem:[#allocation10 + $0x60] sm:$0xff]  ;;  %v10563_v43 = vld [vmem:[#allocation10 + $0x70] sm:$0xff] }
 0xc2f   :  { %3532 = vmatpush1.msra.mxu0 %v10548_v3  ;;  %3603 = vmatpush1.msra.mxu1 %v10551_v39  ;;  %13512 = vst [vmem:[#allocation287_spill] sm:$0xff] %v10560_v41  ;;  %13513 = vst [vmem:[#allocation288_spill] sm:$0xff] %v10563_v43  ;;  %v10566_v3 = vld [vmem:[#allocation10 + $0x48] sm:$0xff]  ;;  %v10569_v39 = vld [vmem:[#allocation10 + $0x58] sm:$0xff] }
 0xc30   :  { %3533 = vmatprep.subr.mxu0 %v10554_v45  ;;  %3604 = vmatprep.subr.mxu1 %v10557_v47  ;;  %13514 = vst [vmem:[#allocation289_spill] sm:$0xff] %v10566_v3  ;;  %13515 = vst [vmem:[#allocation290_spill] sm:$0xff] %v10569_v39  ;;  %v10572_v45 = vld [vmem:[#allocation10 + $0x40] sm:$0xff]  ;;  %v10575_v47 = vld [vmem:[#allocation10 + $0x50] sm:$0xff] }
 0xc31   :  { %3534 = vmatpush1.msra.mxu0 %v10560_v41  ;;  %3605 = vmatpush1.msra.mxu1 %v10563_v43  ;;  %13516 = vst [vmem:[#allocation291_spill] sm:$0xff] %v10572_v45  ;;  %13517 = vst [vmem:[#allocation292_spill] sm:$0xff] %v10575_v47  ;;  %v10578_v41 = vld [vmem:[#allocation10 + $0x28] sm:$0xff]  ;;  %v10581_v43 = vld [vmem:[#allocation10 + $0x38] sm:$0xff] }
 0xc32   :  { %3535 = vmatprep.subr.mxu0 %v10566_v3  ;;  %3606 = vmatprep.subr.mxu1 %v10569_v39  ;;  %v10584_v3 = vld [vmem:[#allocation10 + $0x20] sm:$0xff]  ;;  %v10587_v39 = vld [vmem:[#allocation10 + $0x30] sm:$0xff] }
 0xc33   :  { %3536 = vmatpush1.msra.mxu0 %v10572_v45  ;;  %3607 = vmatpush1.msra.mxu1 %v10575_v47  ;;  %v10590_v45 = vld [vmem:[#allocation10 + $0x8] sm:$0xff]  ;;  %v10593_v47 = vld [vmem:[#allocation10 + $0x18] sm:$0xff] }
 0xc34   :  { %3537 = vmatprep.subr.mxu0 %v10578_v41  ;;  %3608 = vmatprep.subr.mxu1 %v10581_v43 }
 0xc35   :  { %3538 = vmatpush1.msra.mxu0 %v10584_v3  ;;  %3609 = vmatpush1.msra.mxu1 %v10587_v39 }
 0xc36   :  { %3539 = vmatprep.subr.mxu0 %v10590_v45  ;;  %3610 = vmatprep.subr.mxu1 %v10593_v47 }
 0xc37   :  { %3540 = vmatpush1.msra.mxu0 %v9592_v38  ;;  %3611 = vmatpush1.msra.mxu1 %v9595_v53  ;;  %v13518_v38 = vld [vmem:[#allocation295_spill] sm:$0xff]  ;;  %v13519_v53 = vld [vmem:[#allocation253_spill] sm:$0xff] }
 0xc38   :  { %3541 = vmatprep.subr.mxu0 %v9598_v8  ;;  %3612 = vmatprep.subr.mxu1 %v9601_v49  ;;  %v13520_v8 = vld [vmem:[#allocation22_spill] sm:$0xff]  ;;  %v13521_v49 = vld [vmem:[#allocation23_spill] sm:$0xff] }
 0xc39   :  { %3542 = vmatpush2.msra.mxu0 %v9604_v5  ;;  %3613 = vmatpush2.msra.mxu1 %v9607_v24  ;;  %v13522_v5 = vld [vmem:[#allocation24_spill] sm:$0xff]  ;;  %v13523_v24 = vld [vmem:[#allocation25_spill] sm:$0xff] }
 0xc3a   :  { %3543 = vmatprep.subr.mxu0 %v9610_v14  ;;  %3614 = vmatprep.subr.mxu1 %v9613_v18  ;;  %v13524_v14 = vld [vmem:[#allocation26_spill] sm:$0xff]  ;;  %v13525_v18 = vld [vmem:[#allocation27_spill] sm:$0xff] }
 0xc3b   :  { %3544 = vmatpush2.msra.mxu0 %v9616_v4  ;;  %3615 = vmatpush2.msra.mxu1 %v9619_v26  ;;  %v13526_v4 = vld [vmem:[#allocation28_spill] sm:$0xff]  ;;  %v13527_v26 = vld [vmem:[#allocation29_spill] sm:$0xff] }
 0xc3c   :  { %3545 = vmatprep.subr.mxu0 %v9622_v27  ;;  %3616 = vmatprep.subr.mxu1 %v9625_v25  ;;  %v13528_v27 = vld [vmem:[#allocation30_spill] sm:$0xff]  ;;  %v13529_v25 = vld [vmem:[#allocation31_spill] sm:$0xff] }
 0xc3d   :  { %3546 = vmatpush2.msra.mxu0 %v9628_v23  ;;  %3617 = vmatpush2.msra.mxu1 %v9631_v19  ;;  %v13530_v23 = vld [vmem:[#allocation32_spill] sm:$0xff]  ;;  %v13531_v19 = vld [vmem:[#allocation33_spill] sm:$0xff] }
 0xc3e   :  { %3547 = vmatprep.subr.mxu0 %v9634_v22  ;;  %3618 = vmatprep.subr.mxu1 %v9637_v13  ;;  %v13532_v22 = vld [vmem:[#allocation34_spill] sm:$0xff]  ;;  %v13533_v13 = vld [vmem:[#allocation35_spill] sm:$0xff] }
 0xc3f   :  { %3548 = vmatpush2.msra.mxu0 %v9640_v20  ;;  %3619 = vmatpush2.msra.mxu1 %v9643_v6  ;;  %v13534_v20 = vld [vmem:[#allocation36_spill] sm:$0xff]  ;;  %v13535_v6 = vld [vmem:[#allocation37_spill] sm:$0xff] }
 0xc40   :  { %3549 = vmatprep.subr.mxu0 %v9646_v37  ;;  %3620 = vmatprep.subr.mxu1 %v9649_v21  ;;  %v13536_v37 = vld [vmem:[#allocation38_spill] sm:$0xff]  ;;  %v13537_v21 = vld [vmem:[#allocation39_spill] sm:$0xff] }
 0xc41   :  { %3550 = vmatpush2.msra.mxu0 %v9652_v30  ;;  %3621 = vmatpush2.msra.mxu1 %v9655_v28  ;;  %v13538_v30 = vld [vmem:[#allocation40_spill] sm:$0xff]  ;;  %v13539_v28 = vld [vmem:[#allocation41_spill] sm:$0xff] }
 0xc42   :  { %3551 = vmatprep.subr.mxu0 %v9658_v9  ;;  %3622 = vmatprep.subr.mxu1 %v9661_v40  ;;  %v13540_v9 = vld [vmem:[#allocation42_spill] sm:$0xff]  ;;  %v13541_v40 = vld [vmem:[#allocation43_spill] sm:$0xff] }
 0xc43   :  { %3552 = vmatpush2.msra.mxu0 %v9664_v0  ;;  %3623 = vmatpush2.msra.mxu1 %v9667_v34  ;;  %v13542_v0 = vld [vmem:[#allocation44_spill] sm:$0xff]  ;;  %v13543_v34 = vld [vmem:[#allocation45_spill] sm:$0xff] }
 0xc44   :  { %3553 = vmatprep.subr.mxu0 %v9670_v36  ;;  %3624 = vmatprep.subr.mxu1 %v9673_v48  ;;  %v13544_v36 = vld [vmem:[#allocation46_spill] sm:$0xff]  ;;  %v13545_v48 = vld [vmem:[#allocation47_spill] sm:$0xff] }
 0xc45   :  { %3554 = vmatpush2.msra.mxu0 %v9676_v35  ;;  %3625 = vmatpush2.msra.mxu1 %v9679_v33  ;;  %v13546_v35 = vld [vmem:[#allocation48_spill] sm:$0xff]  ;;  %v13547_v33 = vld [vmem:[#allocation49_spill] sm:$0xff] }
 0xc46   :  { %3555 = vmatprep.subr.mxu0 %v9682_v57  ;;  %3626 = vmatprep.subr.mxu1 %v9685_v58  ;;  %v13548_v57 = vld [vmem:[#allocation50_spill] sm:$0xff]  ;;  %v13549_v58 = vld [vmem:[#allocation51_spill] sm:$0xff] }
 0xc47   :  { %3556 = vmatpush2.msra.mxu0 %v9688_v59  ;;  %3627 = vmatpush2.msra.mxu1 %v9691_v61  ;;  %v13550_v59 = vld [vmem:[#allocation54_spill] sm:$0xff]  ;;  %v13551_v61 = vld [vmem:[#allocation55_spill] sm:$0xff] }
 0xc48   :  { %3557 = vmatprep.subr.mxu0 %v13518_v38  ;;  %3628 = vmatprep.subr.mxu1 %v13519_v53  ;;  %v13552_v53 = vld [vmem:[#allocation52_spill] sm:$0xff] }
 0xc49   :  { %3558 = vmatpush2.msra.mxu0 %v13520_v8  ;;  %3629 = vmatpush2.msra.mxu1 %v13521_v49 }
 0xc4a   :  { %3559 = vmatprep.subr.mxu0 %v13522_v5  ;;  %3630 = vmatprep.subr.mxu1 %v13523_v24  ;;  %v13553_v24 = vld [vmem:[#allocation53_spill] sm:$0xff] }
 0xc4b   :  { %3560 = vmatpush2.msra.mxu0 %v13524_v14  ;;  %3631 = vmatpush2.msra.mxu1 %v13525_v18 }
 0xc4c   :  { %3561 = vmatprep.subr.mxu0 %v13526_v4  ;;  %3632 = vmatprep.subr.mxu1 %v13527_v26 }
 0xc4d   :  { %3562 = vmatpush2.msra.mxu0 %v13528_v27  ;;  %3633 = vmatpush2.msra.mxu1 %v13529_v25 }
 0xc4e   :  { %3563 = vmatprep.subr.mxu0 %v13530_v23  ;;  %3634 = vmatprep.subr.mxu1 %v13531_v19 }
 0xc4f   :  { %3564 = vmatpush2.msra.mxu0 %v13532_v22  ;;  %3635 = vmatpush2.msra.mxu1 %v13533_v13 }
 0xc50   :  { %3565 = vmatprep.subr.mxu0 %v13534_v20  ;;  %3636 = vmatprep.subr.mxu1 %v13535_v6 }
 0xc51   :  { %3566 = vmatpush2.msra.mxu0 %v13536_v37  ;;  %3637 = vmatpush2.msra.mxu1 %v13537_v21 }
 0xc52   :  { %3567 = vmatprep.subr.mxu0 %v13538_v30  ;;  %3638 = vmatprep.subr.mxu1 %v13539_v28 }
 0xc53   :  { %3568 = vmatpush2.msra.mxu0 %v13540_v9  ;;  %3639 = vmatpush2.msra.mxu1 %v13541_v40 }
 0xc54   :  { %3569 = vmatprep.subr.mxu0 %v13542_v0  ;;  %3640 = vmatprep.subr.mxu1 %v13543_v34 }
 0xc55   :  { %3570 = vmatpush2.msra.mxu0 %v13544_v36  ;;  %3641 = vmatpush2.msra.mxu1 %v13545_v48 }
 0xc56   :  { %3571 = vmatprep.subr.mxu0 %v13546_v35  ;;  %3642 = vmatprep.subr.mxu1 %v13547_v33  ;;  %v13554_v35 = vld [vmem:[#allocation56_spill] sm:$0xff]  ;;  %v13556_v33 = vld [vmem:[#allocation58_spill] sm:$0xff] }
 0xc57   :  { %3572 = vmatpush2.msra.mxu0 %v13548_v57  ;;  %3643 = vmatpush2.msra.mxu1 %v13549_v58  ;;  %v13557_v57 = vld [vmem:[#allocation59_spill] sm:$0xff]  ;;  %v13558_v58 = vld [vmem:[#allocation60_spill] sm:$0xff] }
 0xc58   :  { %3678 = vmatprep.subr.mxu0 %v13550_v59  ;;  %3749 = vmatprep.subr.mxu1 %v13551_v61  ;;  %v13559_v59 = vld [vmem:[#allocation61_spill] sm:$0xff]  ;;  %v13560_v61 = vld [vmem:[#allocation62_spill] sm:$0xff] }
 0xcd7   :  { %v3409_v38 = vpop.f32.mrf.mxu0  ;;  %v3480_v18 = vpop.f32.mrf.mxu1 }
 0xcd8   :  { %v3410_v8 = vadd.f32 %v3409_v38, %v13552_v53  ;;  %v3481_v19 = vadd.f32 %v3480_v18, %v12473_v55  ;;  %v13561_v38 = vld [vmem:[#allocation63_spill] sm:$0xff]  ;;  %v13568_v18 = vld [vmem:[#allocation70_spill] sm:$0xff] }
 0xcd9   :  { %v3411_v49 = vpop.f32.mrf.mxu0  ;;  %v3482_v26 = vpop.f32.mrf.mxu1 }
 0xcda   :  { %v4920_v5 = vmul.f32 -1.442695, %v3410_v8  ;;  %v3412_v14 = vadd.f32 %v3411_v49, %v13553_v24  ;;  %v3483_v27 = vadd.f32 %v3482_v26, %v12472_v51  ;;  %v13562_v8 = vld [vmem:[#allocation64_spill] sm:$0xff]  ;;  %v13565_v49 = vld [vmem:[#allocation67_spill] sm:$0xff] }
 0xcdb   :  { %v13570_v26 = vld [vmem:[#allocation72_spill] sm:$0xff] }
 0xcdc   :  { %5218 = vpow2.f32 %v4920_v5  ;;  %v4921_v4 = vmul.f32 -1.442695, %v3412_v14  ;;  %v4922_v25 = vmul.f32 -1.442695, %v3483_v27  ;;  %v13566_v5 = vld [vmem:[#allocation68_spill] sm:$0xff]  ;;  %v13567_v14 = vld [vmem:[#allocation69_spill] sm:$0xff] }
 0xcdd   :  { %v13571_v27 = vld [vmem:[#allocation73_spill] sm:$0xff] }
 0xcde   :  { %5220 = vpow2.f32 %v4921_v4  ;;  %v13569_v4 = vld [vmem:[#allocation71_spill] sm:$0xff] }
 0xcdf   :  { %5222 = vpow2.f32 %v4922_v25  ;;  %v13572_v25 = vld [vmem:[#allocation74_spill] sm:$0xff] }
 0xce9   :  { %v5219_v23 = vpop.eup %5218 }
 0xcea   :  { %v3494_v22 = vadd.f32 1.0, %v5219_v23  ;;  %v13573_v23 = vld [vmem:[#allocation75_spill] sm:$0xff] }
 0xceb   :  { %v5221_v13 = vpop.eup %5220 }
 0xcec   :  { %5224 = vrcp.f32 %v3494_v22  ;;  %v3495_v20 = vadd.f32 1.0, %v5221_v13  ;;  %v5223_v6 = vpop.eup %5222  ;;  %v13575_v22 = vld [vmem:[#allocation77_spill] sm:$0xff]  ;;  %v13576_v13 = vld [vmem:[#allocation78_spill] sm:$0xff] }
 0xced   :  { %5226 = vtanh.f32 %v3481_v19  ;;  %v3496_v28 = vadd.f32 1.0, %v5223_v6  ;;  %v13574_v19 = vld [vmem:[#allocation76_spill] sm:$0xff] }
 0xcee   :  { %5228 = vrcp.f32 %v3495_v20  ;;  %v13577_v20 = vld [vmem:[#allocation79_spill] sm:$0xff]  ;;  %v13578_v6 = vld [vmem:[#allocation80_spill] sm:$0xff] }
 0xcef   :  { %5230 = vrcp.f32 %v3496_v28  ;;  %v13582_v28 = vld [vmem:[#allocation84_spill] sm:$0xff] }
 0xcf9   :  { %v5225_v37 = vpop.eup %5224 }
 0xcfa   :  { %v5227_v21 = vpop.eup %5226 }
 0xcfb   :  { %v5229_v30 = vpop.eup %5228  ;;  %v3505_v9 = vmul.f32 %v5227_v21, %v5225_v37  ;;  %v13579_v37 = vld [vmem:[#allocation81_spill] sm:$0xff]  ;;  %v13580_v21 = vld [vmem:[#allocation82_spill] sm:$0xff] }
 0xcfc   :  { %v3504_v40 = vmul.f32 %v5229_v30, %v9801_v31  ;;  %v5231_v34 = vpop.eup %5230  ;;  %v13555_v31 = vld [vmem:[#allocation57_spill] sm:$0xff]  ;;  %v13581_v30 = vld [vmem:[#allocation83_spill] sm:$0xff] }
 0xcfe   :  { %v10669_v0 = vadd.f32 %v3505_v9, %v3504_v40  ;;  %v13583_v9 = vld [vmem:[#allocation85_spill] sm:$0xff]  ;;  %v13584_v40 = vld [vmem:[#allocation86_spill] sm:$0xff] }
 0xd00   :  { %5232 = vtanh.f32 %v10669_v0 }
 0xd0d   :  { %v5233_v36 = vpop.eup %5232 }
 0xd0e   :  { %v10672_v48 = vmul.f32 %v5233_v36, %v5231_v34  ;;  %v13585_v34 = vld [vmem:[#allocation87_spill] sm:$0xff]  ;;  %v13586_v36 = vld [vmem:[#allocation88_spill] sm:$0xff] }
 0xd10   :  { %3574 = vmatmul.mubr.f32.vlgmr.msra.gmra.mxu0 %v10672_v48  ;;  %3645 = vmatmul.mubr.f32.vlgmr.msra.gmra.mxu1 %v10672_v48 }
 0xd11   :  { %3679 = vmatpush1.msra.mxu0 %v9808_v11  ;;  %3750 = vmatpush1.msra.mxu1 %v9811_v32  ;;  %v13563_v11 = vld [vmem:[#allocation65_spill] sm:$0xff]  ;;  %v13564_v32 = vld [vmem:[#allocation66_spill] sm:$0xff] }
 0xd12   :  { %3680 = vmatprep.subr.mxu0 %v13554_v35  ;;  %3751 = vmatprep.subr.mxu1 %v13555_v31  ;;  %v13587_v35 = vld [vmem:[#allocation89_spill] sm:$0xff]  ;;  %v13588_v31 = vld [vmem:[#allocation90_spill] sm:$0xff] }
 0xd13   :  { %3681 = vmatpush1.msra.mxu0 %v13556_v33  ;;  %3752 = vmatpush1.msra.mxu1 %v13557_v57  ;;  %v13589_v33 = vld [vmem:[#allocation91_spill] sm:$0xff]  ;;  %v13590_v57 = vld [vmem:[#allocation92_spill] sm:$0xff] }
 0xd14   :  { %3682 = vmatprep.subr.mxu0 %v13558_v58  ;;  %3753 = vmatprep.subr.mxu1 %v13559_v59  ;;  %v13591_v58 = vld [vmem:[#allocation93_spill] sm:$0xff]  ;;  %v13592_v59 = vld [vmem:[#allocation94_spill] sm:$0xff] }
 0xd15   :  { %3683 = vmatpush1.msra.mxu0 %v13560_v61  ;;  %3754 = vmatpush1.msra.mxu1 %v13561_v38  ;;  %v13593_v61 = vld [vmem:[#allocation95_spill] sm:$0xff]  ;;  %v13594_v38 = vld [vmem:[#allocation96_spill] sm:$0xff] }
 0xd16   :  { %3684 = vmatprep.subr.mxu0 %v13562_v8  ;;  %3755 = vmatprep.subr.mxu1 %v13563_v11  ;;  %v13595_v8 = vld [vmem:[#allocation97_spill] sm:$0xff]  ;;  %v13596_v11 = vld [vmem:[#allocation98_spill] sm:$0xff] }
 0xd17   :  { %3685 = vmatpush1.msra.mxu0 %v13564_v32  ;;  %3756 = vmatpush1.msra.mxu1 %v13565_v49  ;;  %v13597_v32 = vld [vmem:[#allocation99_spill] sm:$0xff]  ;;  %v13598_v49 = vld [vmem:[#allocation100_spill] sm:$0xff] }
 0xd18   :  { %3686 = vmatprep.subr.mxu0 %v13566_v5  ;;  %3757 = vmatprep.subr.mxu1 %v13567_v14  ;;  %v13599_v5 = vld [vmem:[#allocation101_spill] sm:$0xff]  ;;  %v13600_v14 = vld [vmem:[#allocation102_spill] sm:$0xff] }
 0xd19   :  { %3687 = vmatpush1.msra.mxu0 %v13568_v18  ;;  %3758 = vmatpush1.msra.mxu1 %v13569_v4  ;;  %v13601_v18 = vld [vmem:[#allocation103_spill] sm:$0xff]  ;;  %v13602_v4 = vld [vmem:[#allocation104_spill] sm:$0xff] }
 0xd1a   :  { %3688 = vmatprep.subr.mxu0 %v13570_v26  ;;  %3759 = vmatprep.subr.mxu1 %v13571_v27  ;;  %v13603_v26 = vld [vmem:[#allocation105_spill] sm:$0xff]  ;;  %v13604_v27 = vld [vmem:[#allocation106_spill] sm:$0xff] }
 0xd1b   :  { %3689 = vmatpush1.msra.mxu0 %v13572_v25  ;;  %3760 = vmatpush1.msra.mxu1 %v13573_v23  ;;  %v13605_v25 = vld [vmem:[#allocation107_spill] sm:$0xff]  ;;  %v13606_v23 = vld [vmem:[#allocation108_spill] sm:$0xff] }
 0xd1c   :  { %3690 = vmatprep.subr.mxu0 %v13574_v19  ;;  %3761 = vmatprep.subr.mxu1 %v13575_v22  ;;  %v13607_v19 = vld [vmem:[#allocation109_spill] sm:$0xff]  ;;  %v13608_v22 = vld [vmem:[#allocation110_spill] sm:$0xff] }
 0xd1d   :  { %3691 = vmatpush1.msra.mxu0 %v13576_v13  ;;  %3762 = vmatpush1.msra.mxu1 %v13577_v20  ;;  %v13609_v13 = vld [vmem:[#allocation111_spill] sm:$0xff]  ;;  %v13610_v20 = vld [vmem:[#allocation112_spill] sm:$0xff] }
 0xd1e   :  { %3692 = vmatprep.subr.mxu0 %v13578_v6  ;;  %3763 = vmatprep.subr.mxu1 %v13579_v37  ;;  %v13611_v6 = vld [vmem:[#allocation113_spill] sm:$0xff]  ;;  %v13612_v37 = vld [vmem:[#allocation114_spill] sm:$0xff] }
 0xd1f   :  { %3693 = vmatpush1.msra.mxu0 %v13580_v21  ;;  %3764 = vmatpush1.msra.mxu1 %v13581_v30  ;;  %v13613_v21 = vmov 0.0   ;;  %v13614_v30 = vld [vmem:[#allocation115_spill] sm:$0xff] }
 0xd20   :  { %3694 = vmatprep.subr.mxu0 %v13582_v28  ;;  %3765 = vmatprep.subr.mxu1 %v13583_v9  ;;  %v13615_v28 = vld [vmem:[#allocation116_spill] sm:$0xff]  ;;  %v13616_v9 = vld [vmem:[#allocation117_spill] sm:$0xff] }
 0xd21   :  { %3695 = vmatpush1.msra.mxu0 %v13584_v40  ;;  %3766 = vmatpush1.msra.mxu1 %v13585_v34  ;;  %v13617_v40 = vld [vmem:[#allocation118_spill] sm:$0xff]  ;;  %v13618_v34 = vld [vmem:[#allocation119_spill] sm:$0xff] }
 0xd22   :  { %3696 = vmatprep.subr.mxu0 %v13586_v36  ;;  %3767 = vmatprep.subr.mxu1 %v13587_v35  ;;  %v13619_v36 = vld [vmem:[#allocation120_spill] sm:$0xff]  ;;  %v13620_v35 = vld [vmem:[#allocation121_spill] sm:$0xff] }
 0xd23   :  { %3697 = vmatpush1.msra.mxu0 %v13588_v31  ;;  %3768 = vmatpush1.msra.mxu1 %v13589_v33  ;;  %v13621_v31 = vld [vmem:[#allocation122_spill] sm:$0xff]  ;;  %v13622_v33 = vld [vmem:[#allocation123_spill] sm:$0xff] }
 0xd24   :  { %3698 = vmatprep.subr.mxu0 %v13590_v57  ;;  %3769 = vmatprep.subr.mxu1 %v13591_v58  ;;  %v13624_v57 = vld [vmem:[#allocation125_spill] sm:$0xff]  ;;  %v13626_v58 = vld [vmem:[#allocation127_spill] sm:$0xff] }
 0xd25   :  { %3699 = vmatpush1.msra.mxu0 %v13592_v59  ;;  %3770 = vmatpush1.msra.mxu1 %v13593_v61  ;;  %v13627_v59 = vld [vmem:[#allocation128_spill] sm:$0xff]  ;;  %v13628_v61 = vld [vmem:[#allocation129_spill] sm:$0xff] }
 0xd26   :  { %3700 = vmatprep.subr.mxu0 %v13594_v38  ;;  %3771 = vmatprep.subr.mxu1 %v13595_v8  ;;  %v13629_v38 = vld [vmem:[#allocation130_spill] sm:$0xff]  ;;  %v13630_v8 = vld [vmem:[#allocation131_spill] sm:$0xff] }
 0xd27   :  { %3701 = vmatpush1.msra.mxu0 %v13596_v11  ;;  %3772 = vmatpush1.msra.mxu1 %v13597_v32  ;;  %v13631_v11 = vld [vmem:[#allocation132_spill] sm:$0xff]  ;;  %v13632_v32 = vld [vmem:[#allocation133_spill] sm:$0xff] }
 0xd28   :  { %3702 = vmatprep.subr.mxu0 %v13598_v49  ;;  %3773 = vmatprep.subr.mxu1 %v13599_v5  ;;  %v13633_v49 = vld [vmem:[#allocation134_spill] sm:$0xff]  ;;  %v13634_v5 = vld [vmem:[#allocation135_spill] sm:$0xff] }
 0xd29   :  { %3703 = vmatpush1.msra.mxu0 %v13600_v14  ;;  %3774 = vmatpush1.msra.mxu1 %v13601_v18  ;;  %v13635_v14 = vld [vmem:[#allocation136_spill] sm:$0xff]  ;;  %v13636_v18 = vld [vmem:[#allocation137_spill] sm:$0xff] }
 0xd2a   :  { %3704 = vmatprep.subr.mxu0 %v13602_v4  ;;  %3775 = vmatprep.subr.mxu1 %v13603_v26  ;;  %v13637_v4 = vld [vmem:[#allocation138_spill] sm:$0xff]  ;;  %v13638_v26 = vld [vmem:[#allocation139_spill] sm:$0xff] }
 0xd2b   :  { %3705 = vmatpush1.msra.mxu0 %v13604_v27  ;;  %3776 = vmatpush1.msra.mxu1 %v13605_v25  ;;  %v13639_v27 = vld [vmem:[#allocation140_spill] sm:$0xff]  ;;  %v13640_v25 = vld [vmem:[#allocation141_spill] sm:$0xff] }
 0xd2c   :  { %3706 = vmatprep.subr.mxu0 %v13606_v23  ;;  %3777 = vmatprep.subr.mxu1 %v13607_v19  ;;  %v13641_v23 = vld [vmem:[#allocation142_spill] sm:$0xff]  ;;  %v13642_v19 = vld [vmem:[#allocation143_spill] sm:$0xff] }
 0xd2d   :  { %3707 = vmatpush1.msra.mxu0 %v13608_v22  ;;  %3778 = vmatpush1.msra.mxu1 %v13609_v13  ;;  %v13643_v22 = vld [vmem:[#allocation144_spill] sm:$0xff]  ;;  %v13644_v13 = vld [vmem:[#allocation145_spill] sm:$0xff] }
 0xd2e   :  { %3708 = vmatprep.subr.mxu0 %v13610_v20  ;;  %3779 = vmatprep.subr.mxu1 %v13611_v6  ;;  %v13645_v20 = vld [vmem:[#allocation146_spill] sm:$0xff]  ;;  %v13646_v6 = vld [vmem:[#allocation147_spill] sm:$0xff] }
 0xd2f   :  { %3709 = vmatpush1.msra.mxu0 %v13612_v37  ;;  %3742 = vmatprep.mubr.f32.mxu0 %v13613_v21  ;;  %v13647_v37 = vld [vmem:[#allocation148_spill] sm:$0xff] }
 0xd30   :  { %3780 = vmatpush1.msra.mxu1 %v13614_v30  ;;  %3813 = vmatprep.mubr.f32.mxu1 %v13613_v21  ;;  %v13648_v30 = vld [vmem:[#allocation149_spill] sm:$0xff] }
 0xd31   :  { %3743 = vmatmul.mubr.f32.vlgmr.msra.gmra.mxu0 %v10412_v56  ;;  %3814 = vmatmul.mubr.f32.vlgmr.msra.gmra.mxu1 %v10412_v56  ;;  %v13623_v56 = vld [vmem:[#allocation124_spill] sm:$0xff] }
 0xd32   :  { %3935 = vmatprep.mubr.f32.mxu0 %v10672_v48  ;;  %4006 = vmatprep.mubr.f32.mxu1 %v10672_v48  ;;  %v13625_v48 = vld [vmem:[#allocation126_spill] sm:$0xff] }
 0xd33   :  { %3871 = vmatprep.subr.mxu0 %v13615_v28  ;;  %3942 = vmatprep.subr.mxu1 %v13616_v9  ;;  %v13649_v28 = vld [vmem:[#allocation150_spill] sm:$0xff]  ;;  %v13650_v9 = vld [vmem:[#allocation151_spill] sm:$0xff] }
 0xd34   :  { %3872 = vmatpush1.msra.mxu0 %v13617_v40  ;;  %3943 = vmatpush1.msra.mxu1 %v13618_v34  ;;  %v13651_v40 = vld [vmem:[#allocation152_spill] sm:$0xff]  ;;  %v13652_v34 = vld [vmem:[#allocation153_spill] sm:$0xff] }
 0xd35   :  { %3873 = vmatprep.subr.mxu0 %v13619_v36  ;;  %3944 = vmatprep.subr.mxu1 %v13620_v35  ;;  %v13653_v36 = vld [vmem:[#allocation154_spill] sm:$0xff]  ;;  %v13654_v35 = vld [vmem:[#allocation155_spill] sm:$0xff] }
 0xd36   :  { %3874 = vmatpush1.msra.mxu0 %v13621_v31  ;;  %3945 = vmatpush1.msra.mxu1 %v13622_v33  ;;  %v13655_v31 = vld [vmem:[#allocation156_spill] sm:$0xff]  ;;  %v13656_v33 = vld [vmem:[#allocation157_spill] sm:$0xff] }
 0xd37   :  { %3875 = vmatprep.subr.mxu0 %v13623_v56  ;;  %3946 = vmatprep.subr.mxu1 %v13624_v57  ;;  %v13657_v56 = vld [vmem:[#allocation158_spill] sm:$0xff]  ;;  %v13658_v57 = vld [vmem:[#allocation159_spill] sm:$0xff] }
 0xd38   :  { %3876 = vmatpush1.msra.mxu0 %v13625_v48  ;;  %3947 = vmatpush1.msra.mxu1 %v13626_v58  ;;  %v13659_v48 = vld [vmem:[#allocation160_spill] sm:$0xff]  ;;  %v13660_v58 = vld [vmem:[#allocation161_spill] sm:$0xff] }
 0xd39   :  { %3877 = vmatprep.subr.mxu0 %v13627_v59  ;;  %3948 = vmatprep.subr.mxu1 %v13628_v61  ;;  %v13661_v59 = vld [vmem:[#allocation162_spill] sm:$0xff]  ;;  %v13662_v61 = vld [vmem:[#allocation163_spill] sm:$0xff] }
 0xd3a   :  { %3878 = vmatpush1.msra.mxu0 %v13629_v38  ;;  %3949 = vmatpush1.msra.mxu1 %v13630_v8  ;;  %v13663_v38 = vld [vmem:[#allocation164_spill] sm:$0xff]  ;;  %v13664_v8 = vld [vmem:[#allocation165_spill] sm:$0xff] }
 0xd3b   :  { %3879 = vmatprep.subr.mxu0 %v13631_v11  ;;  %3950 = vmatprep.subr.mxu1 %v13632_v32  ;;  %v13665_v11 = vld [vmem:[#allocation166_spill] sm:$0xff]  ;;  %v13666_v32 = vld [vmem:[#allocation167_spill] sm:$0xff] }
 0xd3c   :  { %3880 = vmatpush1.msra.mxu0 %v13633_v49  ;;  %3951 = vmatpush1.msra.mxu1 %v13634_v5  ;;  %v13667_v49 = vld [vmem:[#allocation168_spill] sm:$0xff]  ;;  %v13668_v5 = vld [vmem:[#allocation169_spill] sm:$0xff] }
 0xd3d   :  { %3881 = vmatprep.subr.mxu0 %v13635_v14  ;;  %3952 = vmatprep.subr.mxu1 %v13636_v18  ;;  %v13669_v14 = vld [vmem:[#allocation170_spill] sm:$0xff]  ;;  %v13670_v18 = vld [vmem:[#allocation171_spill] sm:$0xff] }
 0xd3e   :  { %3882 = vmatpush1.msra.mxu0 %v13637_v4  ;;  %3953 = vmatpush1.msra.mxu1 %v13638_v26  ;;  %v13671_v4 = vld [vmem:[#allocation172_spill] sm:$0xff]  ;;  %v13672_v26 = vld [vmem:[#allocation173_spill] sm:$0xff] }
 0xd3f   :  { %3883 = vmatprep.subr.mxu0 %v13639_v27  ;;  %3954 = vmatprep.subr.mxu1 %v13640_v25  ;;  %v13673_v27 = vld [vmem:[#allocation174_spill] sm:$0xff]  ;;  %v13674_v25 = vld [vmem:[#allocation175_spill] sm:$0xff] }
 0xd40   :  { %3884 = vmatpush1.msra.mxu0 %v13641_v23  ;;  %3955 = vmatpush1.msra.mxu1 %v13642_v19  ;;  %v13675_v23 = vld [vmem:[#allocation176_spill] sm:$0xff]  ;;  %v13676_v19 = vld [vmem:[#allocation177_spill] sm:$0xff] }
 0xd41   :  { %3885 = vmatprep.subr.mxu0 %v13643_v22  ;;  %3956 = vmatprep.subr.mxu1 %v13644_v13  ;;  %v13677_v22 = vld [vmem:[#allocation178_spill] sm:$0xff]  ;;  %v13678_v13 = vld [vmem:[#allocation179_spill] sm:$0xff] }
 0xd42   :  { %3886 = vmatpush1.msra.mxu0 %v13645_v20  ;;  %3957 = vmatpush1.msra.mxu1 %v13646_v6  ;;  %v13679_v20 = vld [vmem:[#allocation180_spill] sm:$0xff]  ;;  %v13680_v6 = vld [vmem:[#allocation181_spill] sm:$0xff] }
 0xd43   :  { %3887 = vmatprep.subr.mxu0 %v13647_v37  ;;  %3958 = vmatprep.subr.mxu1 %v13648_v30  ;;  %v13681_v37 = vld [vmem:[#allocation182_spill] sm:$0xff]  ;;  %v13682_v30 = vld [vmem:[#allocation183_spill] sm:$0xff] }
 0xd44   :  { %3888 = vmatpush1.msra.mxu0 %v13649_v28  ;;  %3959 = vmatpush1.msra.mxu1 %v13650_v9  ;;  %v13683_v28 = vld [vmem:[#allocation184_spill] sm:$0xff]  ;;  %v13684_v9 = vld [vmem:[#allocation185_spill] sm:$0xff] }
 0xd45   :  { %3889 = vmatprep.subr.mxu0 %v13651_v40  ;;  %3960 = vmatprep.subr.mxu1 %v13652_v34  ;;  %v13685_v40 = vld [vmem:[#allocation186_spill] sm:$0xff]  ;;  %v13686_v34 = vld [vmem:[#allocation187_spill] sm:$0xff] }
 0xd46   :  { %3890 = vmatpush1.msra.mxu0 %v13653_v36  ;;  %3961 = vmatpush1.msra.mxu1 %v13654_v35  ;;  %v13687_v36 = vld [vmem:[#allocation188_spill] sm:$0xff]  ;;  %v13688_v35 = vld [vmem:[#allocation189_spill] sm:$0xff] }
 0xd47   :  { %3891 = vmatprep.subr.mxu0 %v13655_v31  ;;  %3962 = vmatprep.subr.mxu1 %v13656_v33  ;;  %v13689_v31 = vld [vmem:[#allocation190_spill] sm:$0xff]  ;;  %v13690_v33 = vld [vmem:[#allocation191_spill] sm:$0xff] }
 0xd48   :  { %3892 = vmatpush1.msra.mxu0 %v13657_v56  ;;  %3963 = vmatpush1.msra.mxu1 %v13658_v57  ;;  %v13691_v56 = vld [vmem:[#allocation192_spill] sm:$0xff]  ;;  %v13692_v57 = vld [vmem:[#allocation193_spill] sm:$0xff] }
 0xd49   :  { %3893 = vmatprep.subr.mxu0 %v13659_v48  ;;  %3964 = vmatprep.subr.mxu1 %v13660_v58  ;;  %v13693_v48 = vld [vmem:[#allocation194_spill] sm:$0xff]  ;;  %v13694_v58 = vld [vmem:[#allocation195_spill] sm:$0xff] }
 0xd4a   :  { %3894 = vmatpush1.msra.mxu0 %v13661_v59  ;;  %3965 = vmatpush1.msra.mxu1 %v13662_v61  ;;  %v13695_v59 = vld [vmem:[#allocation196_spill] sm:$0xff]  ;;  %v13696_v61 = vld [vmem:[#allocation197_spill] sm:$0xff] }
 0xd4b   :  { %3895 = vmatprep.subr.mxu0 %v13663_v38  ;;  %3966 = vmatprep.subr.mxu1 %v13664_v8  ;;  %v13697_v38 = vld [vmem:[#allocation198_spill] sm:$0xff]  ;;  %v13698_v8 = vld [vmem:[#allocation199_spill] sm:$0xff] }
 0xd4c   :  { %3896 = vmatpush1.msra.mxu0 %v13665_v11  ;;  %3967 = vmatpush1.msra.mxu1 %v13666_v32  ;;  %v13699_v11 = vld [vmem:[#allocation200_spill] sm:$0xff]  ;;  %v13700_v32 = vld [vmem:[#allocation201_spill] sm:$0xff] }
 0xd4d   :  { %3897 = vmatprep.subr.mxu0 %v13667_v49  ;;  %3968 = vmatprep.subr.mxu1 %v13668_v5  ;;  %v13701_v49 = vld [vmem:[#allocation202_spill] sm:$0xff]  ;;  %v13702_v5 = vld [vmem:[#allocation203_spill] sm:$0xff] }
 0xd4e   :  { %3898 = vmatpush1.msra.mxu0 %v13669_v14  ;;  %3969 = vmatpush1.msra.mxu1 %v13670_v18  ;;  %v13703_v14 = vld [vmem:[#allocation204_spill] sm:$0xff]  ;;  %v13704_v18 = vld [vmem:[#allocation205_spill] sm:$0xff] }
 0xd4f   :  { %3899 = vmatprep.subr.mxu0 %v13671_v4  ;;  %3970 = vmatprep.subr.mxu1 %v13672_v26  ;;  %v13705_v4 = vld [vmem:[#allocation206_spill] sm:$0xff]  ;;  %v13706_v26 = vld [vmem:[#allocation207_spill] sm:$0xff] }
 0xd50   :  { %3900 = vmatpush1.msra.mxu0 %v13673_v27  ;;  %3971 = vmatpush1.msra.mxu1 %v13674_v25  ;;  %v13707_v27 = vld [vmem:[#allocation208_spill] sm:$0xff]  ;;  %v13708_v25 = vld [vmem:[#allocation209_spill] sm:$0xff] }
 0xd51   :  { %3901 = vmatprep.subr.mxu0 %v13675_v23  ;;  %3972 = vmatprep.subr.mxu1 %v13676_v19  ;;  %v13709_v23 = vld [vmem:[#allocation210_spill] sm:$0xff]  ;;  %v13710_v19 = vld [vmem:[#allocation211_spill] sm:$0xff] }
 0xd52   :  { %3902 = vmatpush1.msra.mxu0 %v13677_v22  ;;  %3973 = vmatpush1.msra.mxu1 %v13678_v13  ;;  %v13711_v22 = vld [vmem:[#allocation212_spill] sm:$0xff]  ;;  %v13712_v13 = vld [vmem:[#allocation213_spill] sm:$0xff] }
 0xd53   :  { %3903 = vmatprep.subr.mxu0 %v13679_v20  ;;  %3974 = vmatprep.subr.mxu1 %v13680_v6  ;;  %v13713_v20 = vld [vmem:[#allocation214_spill] sm:$0xff]  ;;  %v13714_v6 = vld [vmem:[#allocation215_spill] sm:$0xff] }
 0xd54   :  { %3904 = vmatpush2.msra.mxu0 %v13681_v37  ;;  %3975 = vmatpush2.msra.mxu1 %v13682_v30  ;;  %v13715_v37 = vld [vmem:[#allocation216_spill] sm:$0xff]  ;;  %v13716_v30 = vld [vmem:[#allocation217_spill] sm:$0xff] }
 0xd55   :  { %3905 = vmatprep.subr.mxu0 %v13683_v28  ;;  %3976 = vmatprep.subr.mxu1 %v13684_v9  ;;  %v13717_v28 = vld [vmem:[#allocation218_spill] sm:$0xff]  ;;  %v13718_v9 = vld [vmem:[#allocation219_spill] sm:$0xff] }
 0xd56   :  { %3906 = vmatpush2.msra.mxu0 %v13685_v40  ;;  %3977 = vmatpush2.msra.mxu1 %v13686_v34  ;;  %v13719_v40 = vld [vmem:[#allocation220_spill] sm:$0xff]  ;;  %v13720_v34 = vld [vmem:[#allocation221_spill] sm:$0xff] }
 0xd57   :  { %3907 = vmatprep.subr.mxu0 %v13687_v36  ;;  %3978 = vmatprep.subr.mxu1 %v13688_v35  ;;  %v13721_v36 = vld [vmem:[#allocation222_spill] sm:$0xff]  ;;  %v13722_v35 = vld [vmem:[#allocation223_spill] sm:$0xff] }
 0xd58   :  { %3908 = vmatpush2.msra.mxu0 %v13689_v31  ;;  %3979 = vmatpush2.msra.mxu1 %v13690_v33  ;;  %v13723_v31 = vld [vmem:[#allocation224_spill] sm:$0xff]  ;;  %v13724_v33 = vld [vmem:[#allocation225_spill] sm:$0xff] }
 0xd59   :  { %3909 = vmatprep.subr.mxu0 %v13691_v56  ;;  %3980 = vmatprep.subr.mxu1 %v13692_v57  ;;  %v13725_v56 = vld [vmem:[#allocation226_spill] sm:$0xff]  ;;  %v13726_v57 = vld [vmem:[#allocation227_spill] sm:$0xff] }
 0xd5a   :  { %3910 = vmatpush2.msra.mxu0 %v13693_v48  ;;  %3981 = vmatpush2.msra.mxu1 %v13694_v58  ;;  %v13727_v48 = vld [vmem:[#allocation228_spill] sm:$0xff]  ;;  %v13728_v58 = vld [vmem:[#allocation229_spill] sm:$0xff] }
 0xd5b   :  { %3911 = vmatprep.subr.mxu0 %v13695_v59  ;;  %3982 = vmatprep.subr.mxu1 %v13696_v61  ;;  %v13729_v59 = vld [vmem:[#allocation230_spill] sm:$0xff]  ;;  %v13730_v61 = vld [vmem:[#allocation231_spill] sm:$0xff] }
 0xd5c   :  { %3912 = vmatpush2.msra.mxu0 %v13697_v38  ;;  %3983 = vmatpush2.msra.mxu1 %v13698_v8  ;;  %v13731_v38 = vld [vmem:[#allocation232_spill] sm:$0xff]  ;;  %v13732_v8 = vld [vmem:[#allocation233_spill] sm:$0xff] }
 0xd5d   :  { %3913 = vmatprep.subr.mxu0 %v13699_v11  ;;  %3984 = vmatprep.subr.mxu1 %v13700_v32  ;;  %v13733_v11 = vld [vmem:[#allocation234_spill] sm:$0xff]  ;;  %v13734_v32 = vld [vmem:[#allocation235_spill] sm:$0xff] }
 0xd5e   :  { %3914 = vmatpush2.msra.mxu0 %v13701_v49  ;;  %3985 = vmatpush2.msra.mxu1 %v13702_v5  ;;  %v13735_v49 = vld [vmem:[#allocation236_spill] sm:$0xff]  ;;  %v13736_v5 = vld [vmem:[#allocation237_spill] sm:$0xff] }
 0xd5f   :  { %3915 = vmatprep.subr.mxu0 %v13703_v14  ;;  %3986 = vmatprep.subr.mxu1 %v13704_v18  ;;  %v13737_v14 = vld [vmem:[#allocation238_spill] sm:$0xff]  ;;  %v13738_v18 = vld [vmem:[#allocation239_spill] sm:$0xff] }
 0xd60   :  { %3916 = vmatpush2.msra.mxu0 %v13705_v4  ;;  %3987 = vmatpush2.msra.mxu1 %v13706_v26  ;;  %v13739_v4 = vld [vmem:[#allocation240_spill] sm:$0xff]  ;;  %v13740_v26 = vld [vmem:[#allocation241_spill] sm:$0xff] }
 0xd61   :  { %3917 = vmatprep.subr.mxu0 %v13707_v27  ;;  %3988 = vmatprep.subr.mxu1 %v13708_v25  ;;  %v13741_v27 = vld [vmem:[#allocation242_spill] sm:$0xff]  ;;  %v13742_v25 = vld [vmem:[#allocation243_spill] sm:$0xff] }
 0xd62   :  { %3918 = vmatpush2.msra.mxu0 %v13709_v23  ;;  %3989 = vmatpush2.msra.mxu1 %v13710_v19  ;;  %v13743_v23 = vld [vmem:[#allocation244_spill] sm:$0xff]  ;;  %v13744_v19 = vld [vmem:[#allocation245_spill] sm:$0xff] }
 0xd63   :  { %3919 = vmatprep.subr.mxu0 %v13711_v22  ;;  %3990 = vmatprep.subr.mxu1 %v13712_v13  ;;  %v13745_v13 = vld [vmem:[#allocation250_spill] sm:$0xff] }
 0xd64   :  { %3920 = vmatpush2.msra.mxu0 %v13713_v20  ;;  %3991 = vmatpush2.msra.mxu1 %v13714_v6 }
 0xd65   :  { %3921 = vmatprep.subr.mxu0 %v13715_v37  ;;  %3992 = vmatprep.subr.mxu1 %v13716_v30  ;;  %v13746_v30 = vld [vmem:[#allocation249_spill] sm:$0xff] }
 0xd66   :  { %3922 = vmatpush2.msra.mxu0 %v13717_v28  ;;  %3993 = vmatpush2.msra.mxu1 %v13718_v9 }
 0xd67   :  { %3923 = vmatprep.subr.mxu0 %v13719_v40  ;;  %3994 = vmatprep.subr.mxu1 %v13720_v34 }
 0xd68   :  { %3924 = vmatpush2.msra.mxu0 %v13721_v36  ;;  %3995 = vmatpush2.msra.mxu1 %v13722_v35  ;;  %v13747_v36 = vld [vmem:[#allocation251_spill] sm:$0xff] }
 0xd69   :  { %3925 = vmatprep.subr.mxu0 %v13723_v31  ;;  %3996 = vmatprep.subr.mxu1 %v13724_v33 }
 0xd6a   :  { %3926 = vmatpush2.msra.mxu0 %v13725_v56  ;;  %3997 = vmatpush2.msra.mxu1 %v13726_v57  ;;  %v13748_v56 = vld [vmem:[#allocation252_spill] sm:$0xff] }
 0xd6b   :  { %3927 = vmatprep.subr.mxu0 %v13727_v48  ;;  %3998 = vmatprep.subr.mxu1 %v13728_v58 }
 0xd6c   :  { %3928 = vmatpush2.msra.mxu0 %v13729_v59  ;;  %3999 = vmatpush2.msra.mxu1 %v13730_v61 }
 0xd6d   :  { %3929 = vmatprep.subr.mxu0 %v13731_v38  ;;  %4000 = vmatprep.subr.mxu1 %v13732_v8 }
 0xd6e   :  { %3930 = vmatpush2.msra.mxu0 %v13733_v11  ;;  %4001 = vmatpush2.msra.mxu1 %v13734_v32 }
 0xd6f   :  { %3931 = vmatprep.subr.mxu0 %v13735_v49  ;;  %4002 = vmatprep.subr.mxu1 %v13736_v5 }
 0xd70   :  { %3932 = vmatpush2.msra.mxu0 %v13737_v14  ;;  %4003 = vmatpush2.msra.mxu1 %v13738_v18 }
 0xd71   :  { %3933 = vmatprep.subr.mxu0 %v13739_v4  ;;  %4004 = vmatprep.subr.mxu1 %v13740_v26 }
 0xd72   :  { %3934 = vmatpush2.msra.mxu0 %v13741_v27  ;;  %4005 = vmatpush2.msra.mxu1 %v13742_v25 }
 0xd73   :  { %4037 = vmatprep.subr.mxu0 %v13743_v23  ;;  %4108 = vmatprep.subr.mxu1 %v13744_v19  ;;  %v3676_v23 = vstv %s4926_s2 }
 0xdd0   :  { %v3575_v22 = vpop.f32.mrf.mxu0  ;;  %v3646_v9 = vpop.f32.mrf.mxu1 }
 0xdd1   :  { %v3576_v20 = vadd.f32 %v3575_v22, %v13745_v13  ;;  %v3647_v57 = vadd.f32 %v3646_v9, %v13748_v56 }
 0xdd2   :  { %v3577_v6 = vpop.f32.mrf.mxu0  ;;  %v3648_v34 = vpop.f32.mrf.mxu1 }
 0xdd3   :  { %v4923_v37 = vmul.f32 -1.442695, %v3576_v20  ;;  %v3578_v28 = vadd.f32 %v3577_v6, %v13746_v30  ;;  %v3649_v35 = vadd.f32 %v3648_v34, %v13747_v36  ;;  %v3677_v6 = vmul.f32 %v10399_v10, %v3676_v23  ;;  %v13768_v23 = vld [vmem:[#allocation270_spill] sm:$0xff] }
 0xdd5   :  { %5234 = vpow2.f32 %v4923_v37  ;;  %v4924_v40 = vmul.f32 -1.442695, %v3578_v28  ;;  %v4925_v31 = vmul.f32 -1.442695, %v3649_v35 }
 0xdd7   :  { %5236 = vpow2.f32 %v4924_v40 }
 0xdd8   :  { %5238 = vpow2.f32 %v4925_v31 }
 0xde2   :  { %v5235_v33 = vpop.eup %5234 }
 0xde3   :  { %v3660_v48 = vadd.f32 1.0, %v5235_v33 }
 0xde4   :  { %v5237_v58 = vpop.eup %5236 }
 0xde5   :  { %5240 = vrcp.f32 %v3660_v48  ;;  %v3661_v59 = vadd.f32 1.0, %v5237_v58  ;;  %v5239_v61 = vpop.eup %5238 }
 0xde6   :  { %5242 = vtanh.f32 %v3647_v57  ;;  %v3662_v18 = vadd.f32 1.0, %v5239_v61 }
 0xde7   :  { %5244 = vrcp.f32 %v3661_v59 }
 0xde8   :  { %5246 = vrcp.f32 %v3662_v18  ;;  %v13763_v18 = vld [vmem:[#allocation265_spill] sm:$0xff] }
 0xdf1   :  { %v3744_v38 = vpop.f32.mrf.mxu0  ;;  %v3815_v8 = vpop.f32.mrf.mxu1 }
 0xdf2   :  { %v5241_v11 = vpop.eup %5240 }
 0xdf3   :  { %v5243_v32 = vpop.eup %5242  ;;  %v3746_v49 = vpop.f32.mrf.mxu0 }
 0xdf4   :  { %v3817_v5 = vpop.f32.mrf.mxu1  ;;  %v5245_v14 = vpop.eup %5244  ;;  %v3824_v4 = vcombine.low %v3744_v38, %v3746_v49  ;;  %v3671_v27 = vmul.f32 %v5243_v32, %v5241_v11 }
 0xdf5   :  { %v3825_v26 = vcombine.low %v3815_v8, %v3817_v5  ;;  %v3670_v25 = vmul.f32 %v5245_v14, %v10397_v1  ;;  %v5247_v1 = vpop.eup %5246 }
 0xdf6   :  { %v3832_v19 = vrot.slane %v3824_v4, %v6813_v12  ;;  %v13764_v4 = vld [vmem:[#allocation266_spill] sm:$0xff] }
 0xdf7   :  { %v3839_v22 = vrot.slane %v3825_v26, %v6813_v12  ;;  %v10881_v20 = vadd.f32 %v3671_v27, %v3670_v25  ;;  %v13765_v26 = vld [vmem:[#allocation267_spill] sm:$0xff]  ;;  %v13766_v27 = vld [vmem:[#allocation268_spill] sm:$0xff]  ;;  %v13767_v25 = vld [vmem:[#allocation269_spill] sm:$0xff] }
 0xdf9   :  { %v3840_v37 = vcombine.low %v3832_v19, %v3839_v22  ;;  %5248 = vtanh.f32 %v10881_v20  ;;  %v13769_v19 = vld [vmem:[#allocation271_spill] sm:$0xff]  ;;  %v13770_v22 = vld [vmem:[#allocation272_spill] sm:$0xff] }
 0xdfb   :  { %v3847_v28 = vrot.slane %v3840_v37, %v6813_v12  ;;  %v13772_v37 = vld [vmem:[#allocation274_spill] sm:$0xff] }
 0xdfd   :  { %v3849_v9 = vadd.f32 %v3847_v28, %v3677_v6  ;;  %v13771_v6 = vld [vmem:[#allocation273_spill] sm:$0xff]  ;;  %v13773_v28 = vld [vmem:[#allocation275_spill] sm:$0xff] }
 0xdff   :  { %v3850_v40 = vadd.f32 %v3849_v9, %v6823_v29  ;;  %v13774_v9 = vld [vmem:[#allocation276_spill] sm:$0xff] }
 0xe01   :  { %v4927_v34 = vmul.f32 -1.442695, %v3850_v40 }
 0xe03   :  { %5250 = vpow2.f32 %v4927_v34  ;;  %v13776_v34 = vld [vmem:[#allocation278_spill] sm:$0xff] }
 0xe04   :  { %5252 = vtanh.f32 %v3850_v40  ;;  %v13775_v40 = vld [vmem:[#allocation277_spill] sm:$0xff] }
 0xe06   :  { %v5249_v35 = vpop.eup %5248 }
 0xe07   :  { %v3674_v31 = vmul.f32 %v5249_v35, %v5247_v1  ;;  %v13777_v1 = vld [vmem:[#allocation279_spill] sm:$0xff]  ;;  %v13778_v35 = vld [vmem:[#allocation280_spill] sm:$0xff] }
 0xe09   :  { %v4744_v33 = vrot.slane %v3674_v31, 3 }
 0xe0b   :  { %v10888_v57 = vsel %vm4760_vm4, %v10406_v15, %v4744_v33  ;;  %v13749_v15 = vld [vmem:[#allocation246_spill] sm:$0xff] }
 0xe0c   :  { %v13780_v33 = vld [vmem:[#allocation282_spill] sm:$0xff] }
 0xe10   :  { %v5251_v48 = vpop.eup %5250 }
 0xe11   :  { %v3854_v10 = vadd.f32 1.0, %v5251_v48  ;;  %v5253_v58 = vpop.eup %5252  ;;  %v13781_v48 = vld [vmem:[#allocation283_spill] sm:$0xff] }
 0xe12   :  { %v3863_v38 = vrot.slane %v5253_v58, 2  ;;  %v13783_v58 = vld [vmem:[#allocation285_spill] sm:$0xff] }
 0xe13   :  { %5254 = vrcp.f32 %v3854_v10  ;;  %v13782_v10 = vld [vmem:[#allocation284_spill] sm:$0xff] }
 0xe20   :  { %v5255_v59 = vpop.eup %5254 }
 0xe21   :  { %v3859_v61 = vrot.slane %v5255_v59, 1  ;;  %v3865_v11 = vmul.f32 %v5255_v59, %v3863_v38  ;;  %v3868_v49 = vrot.slane %v5255_v59, 3  ;;  %v13784_v59 = vld [vmem:[#allocation286_spill] sm:$0xff]  ;;  %v13786_v38 = vld [vmem:[#allocation288_spill] sm:$0xff] }
 0xe23   :  { %v3861_v8 = vmul.f32 %v3859_v61, %v10409_v60  ;;  %v13750_v60 = vld [vmem:[#allocation247_spill] sm:$0xff] }
 0xe24   :  { %v13785_v61 = vld [vmem:[#allocation287_spill] sm:$0xff] }
 0xe25   :  { %v10891_v32 = vadd.f32 %v3865_v11, %v3861_v8  ;;  %v13787_v8 = vld [vmem:[#allocation289_spill] sm:$0xff]  ;;  %v13788_v11 = vld [vmem:[#allocation290_spill] sm:$0xff] }
 0xe27   :  { %5256 = vtanh.f32 %v10891_v32 }
 0xe34   :  { %v5257_v5 = vpop.eup %5256 }
 0xe35   :  { %v10894_v14 = vmul.f32 %v5257_v5, %v3868_v49  ;;  %v13789_v49 = vld [vmem:[#allocation291_spill] sm:$0xff]  ;;  %v13790_v5 = vld [vmem:[#allocation292_spill] sm:$0xff] }
 0xe37   :  { %3936 = vmatmul.mubr.f32.vlgmr.msra.gmra.mxu0 %v10894_v14  ;;  %4007 = vmatmul.mubr.f32.vlgmr.msra.gmra.mxu1 %v10894_v14 }
 0xe38   :  { %4101 = vmatprep.mubr.f32.mxu0 %v3674_v31  ;;  %4172 = vmatprep.mubr.f32.mxu1 %v3674_v31  ;;  %v13779_v31 = vld [vmem:[#allocation281_spill] sm:$0xff] }
 0xe39   :  { %4038 = vmatpush1.msra.mxu0 %v10416_v2  ;;  %4109 = vmatpush1.msra.mxu1 %v10419_v17  ;;  %v13751_v2 = vld [vmem:[#allocation248_spill] sm:$0xff]  ;;  %v13752_v17 = vld [vmem:[#allocation254_spill] sm:$0xff] }
 0xe3a   :  { %4039 = vmatprep.subr.mxu0 %v10422_v46  ;;  %4110 = vmatprep.subr.mxu1 %v10425_v54  ;;  %v13753_v46 = vld [vmem:[#allocation255_spill] sm:$0xff]  ;;  %v13754_v54 = vld [vmem:[#allocation256_spill] sm:$0xff] }
 0xe3b   :  { %4040 = vmatpush1.msra.mxu0 %v10428_v62  ;;  %4111 = vmatpush1.msra.mxu1 %v10431_v16  ;;  %v13755_v62 = vld [vmem:[#allocation257_spill] sm:$0xff]  ;;  %v13756_v16 = vld [vmem:[#allocation258_spill] sm:$0xff] }
 0xe3c   :  { %4041 = vmatprep.subr.mxu0 %v10434_v42  ;;  %4112 = vmatprep.subr.mxu1 %v10437_v50  ;;  %v13757_v42 = vld [vmem:[#allocation259_spill] sm:$0xff]  ;;  %v13758_v50 = vld [vmem:[#allocation260_spill] sm:$0xff] }
 0xe3d   :  { %4042 = vmatpush1.msra.mxu0 %v10440_v7  ;;  %4113 = vmatpush1.msra.mxu1 %v10443_v63  ;;  %v13759_v7 = vld [vmem:[#allocation261_spill] sm:$0xff]  ;;  %v13760_v63 = vld [vmem:[#allocation262_spill] sm:$0xff] }
 0xe3e   :  { %4043 = vmatprep.subr.mxu0 %v10446_v44  ;;  %4114 = vmatprep.subr.mxu1 %v10449_v52  ;;  %v13761_v44 = vld [vmem:[#allocation263_spill] sm:$0xff]  ;;  %v13762_v52 = vld [vmem:[#allocation264_spill] sm:$0xff] }
 0xe3f   :  { %4044 = vmatpush1.msra.mxu0 %v13749_v15  ;;  %4115 = vmatpush1.msra.mxu1 %v13750_v60  ;;  %v10958_v15 = vld [vmem:[#allocation10] sm:$0xff]  ;;  %v10961_v60 = vld [vmem:[#allocation10 + $0x10] sm:$0xff] }
 0xe40   :  { %4045 = vmatprep.subr.mxu0 %v13751_v2  ;;  %4116 = vmatprep.subr.mxu1 %v13752_v17  ;;  %v10964_v2 = vld [vmem:[#allocation10 + $0x3e8] sm:$0xff]  ;;  %v10985_v17 = vld [vmem:[#allocation10 + $0x3d0] sm:$0xff] }
 0xe41   :  { %4046 = vmatpush1.msra.mxu0 %v13753_v46  ;;  %4117 = vmatpush1.msra.mxu1 %v13754_v54  ;;  %v10988_v46 = vld [vmem:[#allocation10 + $0x3a8] sm:$0xff]  ;;  %v10991_v54 = vld [vmem:[#allocation10 + $0x3b8] sm:$0xff] }
 0xe42   :  { %4047 = vmatprep.subr.mxu0 %v13755_v62  ;;  %4118 = vmatprep.subr.mxu1 %v13756_v16  ;;  %v10994_v62 = vld [vmem:[#allocation10 + $0x3a0] sm:$0xff]  ;;  %v10997_v16 = vld [vmem:[#allocation10 + $0x3b0] sm:$0xff] }
 0xe43   :  { %4048 = vmatpush1.msra.mxu0 %v13757_v42  ;;  %4119 = vmatpush1.msra.mxu1 %v13758_v50  ;;  %v11000_v42 = vld [vmem:[#allocation10 + $0x388] sm:$0xff]  ;;  %v11003_v50 = vld [vmem:[#allocation10 + $0x398] sm:$0xff] }
 0xe44   :  { %4049 = vmatprep.subr.mxu0 %v13759_v7  ;;  %4120 = vmatprep.subr.mxu1 %v13760_v63  ;;  %v11006_v7 = vld [vmem:[#allocation10 + $0x380] sm:$0xff]  ;;  %v11009_v63 = vld [vmem:[#allocation10 + $0x390] sm:$0xff] }
 0xe45   :  { %4050 = vmatpush1.msra.mxu0 %v13761_v44  ;;  %4121 = vmatpush1.msra.mxu1 %v13762_v52  ;;  %v11012_v44 = vld [vmem:[#allocation10 + $0x368] sm:$0xff]  ;;  %v11015_v52 = vld [vmem:[#allocation10 + $0x378] sm:$0xff] }
 0xe46   :  { %4051 = vmatprep.subr.mxu0 %v13763_v18  ;;  %4122 = vmatprep.subr.mxu1 %v13764_v4  ;;  %v11018_v18 = vld [vmem:[#allocation10 + $0x360] sm:$0xff]  ;;  %v11021_v4 = vld [vmem:[#allocation10 + $0x370] sm:$0xff] }
 0xe47   :  { %4052 = vmatpush1.msra.mxu0 %v13765_v26  ;;  %4123 = vmatpush1.msra.mxu1 %v13766_v27  ;;  %v11024_v26 = vld [vmem:[#allocation10 + $0x348] sm:$0xff]  ;;  %v11027_v27 = vld [vmem:[#allocation10 + $0x358] sm:$0xff] }
 0xe48   :  { %4053 = vmatprep.subr.mxu0 %v13767_v25  ;;  %4124 = vmatprep.subr.mxu1 %v13768_v23  ;;  %v11030_v25 = vld [vmem:[#allocation10 + $0x340] sm:$0xff]  ;;  %v11033_v23 = vld [vmem:[#allocation10 + $0x350] sm:$0xff] }
 0xe49   :  { %4054 = vmatpush1.msra.mxu0 %v13769_v19  ;;  %4125 = vmatpush1.msra.mxu1 %v13770_v22  ;;  %v11036_v19 = vld [vmem:[#allocation10 + $0x328] sm:$0xff]  ;;  %v11039_v22 = vld [vmem:[#allocation10 + $0x338] sm:$0xff] }
 0xe4a   :  { %4055 = vmatprep.subr.mxu0 %v13771_v6  ;;  %4126 = vmatprep.subr.mxu1 %v13772_v37  ;;  %v11042_v6 = vld [vmem:[#allocation10 + $0x320] sm:$0xff]  ;;  %v11045_v37 = vld [vmem:[#allocation10 + $0x330] sm:$0xff] }
 0xe4b   :  { %4056 = vmatpush1.msra.mxu0 %v13773_v28  ;;  %4127 = vmatpush1.msra.mxu1 %v13774_v9  ;;  %v11048_v28 = vld [vmem:[#allocation10 + $0x308] sm:$0xff]  ;;  %v11051_v9 = vld [vmem:[#allocation10 + $0x318] sm:$0xff] }
 0xe4c   :  { %4057 = vmatprep.subr.mxu0 %v13775_v40  ;;  %4128 = vmatprep.subr.mxu1 %v13776_v34  ;;  %v11054_v40 = vld [vmem:[#allocation10 + $0x300] sm:$0xff]  ;;  %v11057_v34 = vld [vmem:[#allocation10 + $0x310] sm:$0xff] }
 0xe4d   :  { %4058 = vmatpush1.msra.mxu0 %v13777_v1  ;;  %4129 = vmatpush1.msra.mxu1 %v13778_v35  ;;  %v11060_v1 = vld [vmem:[#allocation10 + $0x2e8] sm:$0xff]  ;;  %v11063_v35 = vld [vmem:[#allocation10 + $0x2f8] sm:$0xff] }
 0xe4e   :  { %4059 = vmatprep.subr.mxu0 %v13779_v31  ;;  %4130 = vmatprep.subr.mxu1 %v13780_v33  ;;  %13791 = vst [vmem:[#allocation293_spill] sm:$0xff] %v11060_v1  ;;  %13792 = vst [vmem:[#allocation294_spill] sm:$0xff] %v11063_v35  ;;  %v11066_v31 = vld [vmem:[#allocation10 + $0x2e0] sm:$0xff]  ;;  %v11069_v33 = vld [vmem:[#allocation10 + $0x2f0] sm:$0xff] }
 0xe4f   :  { %4060 = vmatpush1.msra.mxu0 %v13781_v48  ;;  %4131 = vmatpush1.msra.mxu1 %v13782_v10  ;;  %13793 = vst [vmem:[#allocation295_spill] sm:$0xff] %v11066_v31  ;;  %13794 = vst [vmem:[#allocation253_spill] sm:$0xff] %v11069_v33  ;;  %v11072_v48 = vld [vmem:[#allocation10 + $0x2c8] sm:$0xff]  ;;  %v11075_v10 = vld [vmem:[#allocation10 + $0x2d8] sm:$0xff] }
 0xe50   :  { %4061 = vmatprep.subr.mxu0 %v13783_v58  ;;  %4132 = vmatprep.subr.mxu1 %v13784_v59  ;;  %13795 = vst [vmem:[#allocation22_spill] sm:$0xff] %v11072_v48  ;;  %13796 = vst [vmem:[#allocation23_spill] sm:$0xff] %v11075_v10  ;;  %v11078_v58 = vld [vmem:[#allocation10 + $0x2c0] sm:$0xff]  ;;  %v11081_v59 = vld [vmem:[#allocation10 + $0x2d0] sm:$0xff] }
 0xe51   :  { %4062 = vmatpush1.msra.mxu0 %v13785_v61  ;;  %4133 = vmatpush1.msra.mxu1 %v13786_v38  ;;  %13797 = vst [vmem:[#allocation24_spill] sm:$0xff] %v11078_v58  ;;  %13798 = vst [vmem:[#allocation25_spill] sm:$0xff] %v11081_v59  ;;  %v11084_v61 = vld [vmem:[#allocation10 + $0x2a8] sm:$0xff]  ;;  %v11087_v38 = vld [vmem:[#allocation10 + $0x2b8] sm:$0xff] }
 0xe52   :  { %4063 = vmatprep.subr.mxu0 %v13787_v8  ;;  %4134 = vmatprep.subr.mxu1 %v13788_v11  ;;  %13799 = vst [vmem:[#allocation26_spill] sm:$0xff] %v11084_v61  ;;  %13800 = vst [vmem:[#allocation27_spill] sm:$0xff] %v11087_v38  ;;  %v11090_v8 = vld [vmem:[#allocation10 + $0x2a0] sm:$0xff]  ;;  %v11093_v11 = vld [vmem:[#allocation10 + $0x2b0] sm:$0xff] }
 0xe53   :  { %4064 = vmatpush1.msra.mxu0 %v13789_v49  ;;  %4135 = vmatpush1.msra.mxu1 %v13790_v5  ;;  %13801 = vst [vmem:[#allocation28_spill] sm:$0xff] %v11090_v8  ;;  %13802 = vst [vmem:[#allocation29_spill] sm:$0xff] %v11093_v11  ;;  %v11096_v49 = vld [vmem:[#allocation10 + $0x288] sm:$0xff]  ;;  %v11099_v5 = vld [vmem:[#allocation10 + $0x298] sm:$0xff] }
 0xe54   :  { %4065 = vmatprep.subr.mxu0 %v10578_v41  ;;  %4136 = vmatprep.subr.mxu1 %v10581_v43  ;;  %v10967_v41 = vld [vmem:[#allocation10 + $0x3f8] sm:$0xff]  ;;  %v10970_v43 = vld [vmem:[#allocation10 + $0x3e0] sm:$0xff]  ;;  %13803 = vst [vmem:[#allocation30_spill] sm:$0xff] %v11096_v49  ;;  %13804 = vst [vmem:[#allocation31_spill] sm:$0xff] %v11099_v5 }
 0xe55   :  { %4066 = vmatpush1.msra.mxu0 %v10584_v3  ;;  %4137 = vmatpush1.msra.mxu1 %v10587_v39  ;;  %v10973_v3 = vld [vmem:[#allocation10 + $0x3f0] sm:$0xff]  ;;  %v10976_v39 = vld [vmem:[#allocation10 + $0x3c8] sm:$0xff] }
 0xe56   :  { %4067 = vmatprep.subr.mxu0 %v10590_v45  ;;  %4138 = vmatprep.subr.mxu1 %v10593_v47  ;;  %v10979_v45 = vld [vmem:[#allocation10 + $0x3d8] sm:$0xff]  ;;  %v10982_v47 = vld [vmem:[#allocation10 + $0x3c0] sm:$0xff] }
 0xe57   :  { %4068 = vmatpush1.msra.mxu0 %v10958_v15  ;;  %4139 = vmatpush1.msra.mxu1 %v10961_v60 }
 0xe58   :  { %4069 = vmatprep.subr.mxu0 %v10964_v2  ;;  %4140 = vmatprep.subr.mxu1 %v10967_v41 }
 0xe59   :  { %4070 = vmatpush2.msra.mxu0 %v10970_v43  ;;  %4141 = vmatpush2.msra.mxu1 %v10973_v3 }
 0xe5a   :  { %4071 = vmatprep.subr.mxu0 %v10976_v39  ;;  %4142 = vmatprep.subr.mxu1 %v10979_v45 }
 0xe5b   :  { %4072 = vmatpush2.msra.mxu0 %v10982_v47  ;;  %4143 = vmatpush2.msra.mxu1 %v10985_v17 }
 0xe5c   :  { %4073 = vmatprep.subr.mxu0 %v10988_v46  ;;  %4144 = vmatprep.subr.mxu1 %v10991_v54 }
 0xe5d   :  { %4074 = vmatpush2.msra.mxu0 %v10994_v62  ;;  %4145 = vmatpush2.msra.mxu1 %v10997_v16 }
 0xe5e   :  { %4075 = vmatprep.subr.mxu0 %v11000_v42  ;;  %4146 = vmatprep.subr.mxu1 %v11003_v50 }
 0xe5f   :  { %4076 = vmatpush2.msra.mxu0 %v11006_v7  ;;  %4147 = vmatpush2.msra.mxu1 %v11009_v63 }
 0xe60   :  { %4077 = vmatprep.subr.mxu0 %v11012_v44  ;;  %4148 = vmatprep.subr.mxu1 %v11015_v52 }
 0xe61   :  { %4078 = vmatpush2.msra.mxu0 %v11018_v18  ;;  %4149 = vmatpush2.msra.mxu1 %v11021_v4 }
 0xe62   :  { %4079 = vmatprep.subr.mxu0 %v11024_v26  ;;  %4150 = vmatprep.subr.mxu1 %v11027_v27 }
 0xe63   :  { %4080 = vmatpush2.msra.mxu0 %v11030_v25  ;;  %4151 = vmatpush2.msra.mxu1 %v11033_v23 }
 0xe64   :  { %4081 = vmatprep.subr.mxu0 %v11036_v19  ;;  %4152 = vmatprep.subr.mxu1 %v11039_v22 }
 0xe65   :  { %4082 = vmatpush2.msra.mxu0 %v11042_v6  ;;  %4153 = vmatpush2.msra.mxu1 %v11045_v37 }
 0xe66   :  { %4083 = vmatprep.subr.mxu0 %v11048_v28  ;;  %4154 = vmatprep.subr.mxu1 %v11051_v9 }
 0xe67   :  { %4084 = vmatpush2.msra.mxu0 %v11054_v40  ;;  %4155 = vmatpush2.msra.mxu1 %v11057_v34 }
 0xe68   :  { %4085 = vmatprep.subr.mxu0 %v11060_v1  ;;  %4156 = vmatprep.subr.mxu1 %v11063_v35 }
 0xe69   :  { %4086 = vmatpush2.msra.mxu0 %v11066_v31  ;;  %4157 = vmatpush2.msra.mxu1 %v11069_v33 }
 0xe6a   :  { %4087 = vmatprep.subr.mxu0 %v11072_v48  ;;  %4158 = vmatprep.subr.mxu1 %v11075_v10 }
 0xe6b   :  { %4088 = vmatpush2.msra.mxu0 %v11078_v58  ;;  %4159 = vmatpush2.msra.mxu1 %v11081_v59  ;;  %v6296_v59 = vld [vmem:[#allocation7 + $0x1f8] sm:$0xff] }
 0xe6c   :  { %4089 = vmatprep.subr.mxu0 %v11084_v61  ;;  %4160 = vmatprep.subr.mxu1 %v11087_v38  ;;  %v11102_v61 = vld [vmem:[#allocation10 + $0x280] sm:$0xff]  ;;  %v11105_v38 = vld [vmem:[#allocation10 + $0x290] sm:$0xff] }
 0xe6d   :  { %4090 = vmatpush2.msra.mxu0 %v11090_v8  ;;  %4161 = vmatpush2.msra.mxu1 %v11093_v11  ;;  %13805 = vst [vmem:[#allocation32_spill] sm:$0xff] %v11102_v61  ;;  %13806 = vst [vmem:[#allocation33_spill] sm:$0xff] %v11105_v38  ;;  %v11108_v8 = vld [vmem:[#allocation10 + $0x268] sm:$0xff]  ;;  %v11111_v11 = vld [vmem:[#allocation10 + $0x278] sm:$0xff] }
 0xe6e   :  { %4091 = vmatprep.subr.mxu0 %v11096_v49  ;;  %4162 = vmatprep.subr.mxu1 %v11099_v5  ;;  %13807 = vst [vmem:[#allocation34_spill] sm:$0xff] %v11108_v8  ;;  %13808 = vst [vmem:[#allocation35_spill] sm:$0xff] %v11111_v11  ;;  %v11114_v49 = vld [vmem:[#allocation10 + $0x260] sm:$0xff]  ;;  %v11117_v5 = vld [vmem:[#allocation10 + $0x270] sm:$0xff] }
 0xe6f   :  { %4092 = vmatpush2.msra.mxu0 %v11102_v61  ;;  %4163 = vmatpush2.msra.mxu1 %v11105_v38  ;;  %13809 = vst [vmem:[#allocation36_spill] sm:$0xff] %v11114_v49  ;;  %13810 = vst [vmem:[#allocation37_spill] sm:$0xff] %v11117_v5  ;;  %v11120_v61 = vld [vmem:[#allocation10 + $0x248] sm:$0xff]  ;;  %v11123_v38 = vld [vmem:[#allocation10 + $0x258] sm:$0xff] }
 0xe70   :  { %4093 = vmatprep.subr.mxu0 %v11108_v8  ;;  %4164 = vmatprep.subr.mxu1 %v11111_v11  ;;  %13811 = vst [vmem:[#allocation38_spill] sm:$0xff] %v11120_v61  ;;  %13812 = vst [vmem:[#allocation39_spill] sm:$0xff] %v11123_v38  ;;  %v11126_v8 = vld [vmem:[#allocation10 + $0x240] sm:$0xff]  ;;  %v11129_v11 = vld [vmem:[#allocation10 + $0x250] sm:$0xff] }
 0xe71   :  { %4094 = vmatpush2.msra.mxu0 %v11114_v49  ;;  %4165 = vmatpush2.msra.mxu1 %v11117_v5  ;;  %13813 = vst [vmem:[#allocation40_spill] sm:$0xff] %v11126_v8  ;;  %13814 = vst [vmem:[#allocation41_spill] sm:$0xff] %v11129_v11  ;;  %v11132_v49 = vld [vmem:[#allocation10 + $0x228] sm:$0xff]  ;;  %v11135_v5 = vld [vmem:[#allocation10 + $0x238] sm:$0xff] }
 0xe72   :  { %4095 = vmatprep.subr.mxu0 %v11120_v61  ;;  %4166 = vmatprep.subr.mxu1 %v11123_v38  ;;  %13815 = vst [vmem:[#allocation42_spill] sm:$0xff] %v11132_v49  ;;  %13816 = vst [vmem:[#allocation43_spill] sm:$0xff] %v11135_v5  ;;  %v11138_v61 = vld [vmem:[#allocation10 + $0x220] sm:$0xff]  ;;  %v11141_v38 = vld [vmem:[#allocation10 + $0x230] sm:$0xff] }
 0xe73   :  { %4096 = vmatpush2.msra.mxu0 %v11126_v8  ;;  %4167 = vmatpush2.msra.mxu1 %v11129_v11  ;;  %13817 = vst [vmem:[#allocation44_spill] sm:$0xff] %v11138_v61  ;;  %13818 = vst [vmem:[#allocation45_spill] sm:$0xff] %v11141_v38  ;;  %v11144_v8 = vld [vmem:[#allocation10 + $0x208] sm:$0xff]  ;;  %v11147_v11 = vld [vmem:[#allocation10 + $0x218] sm:$0xff] }
 0xe74   :  { %4097 = vmatprep.subr.mxu0 %v11132_v49  ;;  %4168 = vmatprep.subr.mxu1 %v11135_v5  ;;  %13819 = vst [vmem:[#allocation46_spill] sm:$0xff] %v11144_v8  ;;  %13820 = vst [vmem:[#allocation47_spill] sm:$0xff] %v11147_v11  ;;  %v11150_v49 = vld [vmem:[#allocation10 + $0x200] sm:$0xff]  ;;  %v11153_v5 = vld [vmem:[#allocation10 + $0x210] sm:$0xff] }
 0xe75   :  { %4098 = vmatpush2.msra.mxu0 %v11138_v61  ;;  %4169 = vmatpush2.msra.mxu1 %v11141_v38  ;;  %13821 = vst [vmem:[#allocation48_spill] sm:$0xff] %v11150_v49  ;;  %13822 = vst [vmem:[#allocation49_spill] sm:$0xff] %v11153_v5  ;;  %v6295_v61 = vld [vmem:[#allocation7 + $0x1e8] sm:$0xff] }
 0xe76   :  { %4099 = vmatprep.subr.mxu0 %v11144_v8  ;;  %4170 = vmatprep.subr.mxu1 %v11147_v11 }
 0xe77   :  { %4100 = vmatpush2.msra.mxu0 %v11150_v49  ;;  %4171 = vmatpush2.msra.mxu1 %v11153_v5 }
 0xe78   :  { %4206 = vmatprep.subr.mxu0 %v6295_v61  ;;  %4277 = vmatprep.subr.mxu1 %v6296_v59 }
 0xef7   :  { %v3937_v38 = vpop.f32.mrf.mxu0  ;;  %v4008_v11 = vpop.f32.mrf.mxu1 }
 0xef8   :  { %v3938_v58 = vadd.f32 %v3937_v38, %v13552_v53  ;;  %v4009_v61 = vadd.f32 %v4008_v11, %v12473_v55 }
 0xef9   :  { %v3939_v8 = vpop.f32.mrf.mxu0  ;;  %v4010_v49 = vpop.f32.mrf.mxu1 }
 0xefa   :  { %v4928_v10 = vmul.f32 -1.442695, %v3938_v58  ;;  %v3940_v48 = vadd.f32 %v3939_v8, %v13553_v24  ;;  %v4011_v31 = vadd.f32 %v4010_v49, %v12472_v51 }
 0xefc   :  { %5258 = vpow2.f32 %v4928_v10  ;;  %v4929_v33 = vmul.f32 -1.442695, %v3940_v48  ;;  %v4930_v35 = vmul.f32 -1.442695, %v4011_v31 }
 0xefe   :  { %5260 = vpow2.f32 %v4929_v33 }
 0xeff   :  { %5262 = vpow2.f32 %v4930_v35 }
 0xf09   :  { %v5259_v5 = vpop.eup %5258 }
 0xf0a   :  { %v4022_v1 = vadd.f32 1.0, %v5259_v5  ;;  %v6298_v5 = vld [vmem:[#allocation7 + $0x1f0] sm:$0xff] }
 0xf0b   :  { %v5261_v59 = vpop.eup %5260 }
 0xf0c   :  { %5264 = vrcp.f32 %v4022_v1  ;;  %v4023_v38 = vadd.f32 1.0, %v5261_v59  ;;  %v5263_v58 = vpop.eup %5262  ;;  %v6297_v1 = vld [vmem:[#allocation7 + $0x1e0] sm:$0xff]  ;;  %v6303_v59 = vld [vmem:[#allocation7 + $0x1a8] sm:$0xff] }
 0xf0d   :  { %5266 = vtanh.f32 %v4009_v61  ;;  %v4024_v48 = vadd.f32 1.0, %v5263_v58  ;;  %v6299_v61 = vld [vmem:[#allocation7 + $0x1c8] sm:$0xff]  ;;  %v6305_v58 = vld [vmem:[#allocation7 + $0x1a0] sm:$0xff] }
 0xf0e   :  { %5268 = vrcp.f32 %v4023_v38  ;;  %v6304_v38 = vld [vmem:[#allocation7 + $0x1b8] sm:$0xff] }
 0xf0f   :  { %5270 = vrcp.f32 %v4024_v48  ;;  %v6308_v48 = vld [vmem:[#allocation7 + $0x198] sm:$0xff] }
 0xf19   :  { %v5265_v8 = vpop.eup %5264 }
 0xf1a   :  { %v5267_v10 = vpop.eup %5266 }
 0xf1b   :  { %v5269_v24 = vpop.eup %5268  ;;  %v4033_v33 = vmul.f32 %v5267_v10, %v5265_v8  ;;  %v6306_v8 = vld [vmem:[#allocation7 + $0x1b0] sm:$0xff]  ;;  %v6307_v10 = vld [vmem:[#allocation7 + $0x188] sm:$0xff] }
 0xf1c   :  { %v4032_v53 = vmul.f32 %v5269_v24, %v10669_v0  ;;  %v5271_v31 = vpop.eup %5270  ;;  %v6300_v24 = vld [vmem:[#allocation7 + $0x1d8] sm:$0xff]  ;;  %v6302_v0 = vld [vmem:[#allocation7 + $0x1d0] sm:$0xff] }
 0xf1e   :  { %v11161_v49 = vadd.f32 %v4033_v33, %v4032_v53  ;;  %v6301_v53 = vld [vmem:[#allocation7 + $0x1c0] sm:$0xff] }
 0xf1f   :  { %v6309_v33 = vld [vmem:[#allocation7 + $0x180] sm:$0xff] }
 0xf20   :  { %5272 = vtanh.f32 %v11161_v49 }
 0xf2d   :  { %v5273_v11 = vpop.eup %5272 }
 0xf2e   :  { %v11164_v35 = vmul.f32 %v5273_v11, %v5271_v31  ;;  %v6310_v31 = vld [vmem:[#allocation7 + $0x190] sm:$0xff]  ;;  %v6311_v11 = vld [vmem:[#allocation7 + $0x168] sm:$0xff] }
 0xf30   :  { %4102 = vmatmul.mubr.f32.vlgmr.msra.gmra.mxu0 %v11164_v35  ;;  %4173 = vmatmul.mubr.f32.vlgmr.msra.gmra.mxu1 %v11164_v35 }
 0xf31   :  { %4207 = vmatpush1.msra.mxu0 %v6297_v1  ;;  %4278 = vmatpush1.msra.mxu1 %v6298_v5  ;;  %v6312_v1 = vld [vmem:[#allocation7 + $0x178] sm:$0xff]  ;;  %v6313_v5 = vld [vmem:[#allocation7 + $0x160] sm:$0xff] }
 0xf32   :  { %4208 = vmatprep.subr.mxu0 %v6299_v61  ;;  %4279 = vmatprep.subr.mxu1 %v6300_v24  ;;  %v6314_v61 = vld [vmem:[#allocation7 + $0x170] sm:$0xff]  ;;  %v6315_v24 = vld [vmem:[#allocation7 + $0x148] sm:$0xff] }
 0xf33   :  { %4209 = vmatpush1.msra.mxu0 %v6301_v53  ;;  %4280 = vmatpush1.msra.mxu1 %v6302_v0  ;;  %v6316_v53 = vld [vmem:[#allocation7 + $0x158] sm:$0xff]  ;;  %v6317_v0 = vld [vmem:[#allocation7 + $0x140] sm:$0xff] }
 0xf34   :  { %4210 = vmatprep.subr.mxu0 %v6303_v59  ;;  %4281 = vmatprep.subr.mxu1 %v6304_v38  ;;  %v6318_v59 = vld [vmem:[#allocation7 + $0x150] sm:$0xff]  ;;  %v6319_v38 = vld [vmem:[#allocation7 + $0x128] sm:$0xff] }
 0xf35   :  { %4211 = vmatpush1.msra.mxu0 %v6305_v58  ;;  %4282 = vmatpush1.msra.mxu1 %v6306_v8  ;;  %v6320_v58 = vld [vmem:[#allocation7 + $0x138] sm:$0xff]  ;;  %v6321_v8 = vld [vmem:[#allocation7 + $0x120] sm:$0xff] }
 0xf36   :  { %4212 = vmatprep.subr.mxu0 %v6307_v10  ;;  %4283 = vmatprep.subr.mxu1 %v6308_v48  ;;  %v6322_v10 = vld [vmem:[#allocation7 + $0x130] sm:$0xff]  ;;  %v6323_v48 = vld [vmem:[#allocation7 + $0x108] sm:$0xff] }
 0xf37   :  { %4213 = vmatpush1.msra.mxu0 %v6309_v33  ;;  %4284 = vmatpush1.msra.mxu1 %v6310_v31  ;;  %v6324_v33 = vld [vmem:[#allocation7 + $0x118] sm:$0xff]  ;;  %v6325_v31 = vld [vmem:[#allocation7 + $0x100] sm:$0xff] }
 0xf38   :  { %4214 = vmatprep.subr.mxu0 %v6311_v11  ;;  %4285 = vmatprep.subr.mxu1 %v6312_v1  ;;  %v6326_v11 = vld [vmem:[#allocation7 + $0x110] sm:$0xff]  ;;  %v6327_v1 = vld [vmem:[#allocation7 + $0xe8] sm:$0xff] }
 0xf39   :  { %4215 = vmatpush1.msra.mxu0 %v6313_v5  ;;  %4286 = vmatpush1.msra.mxu1 %v6314_v61  ;;  %v6328_v5 = vld [vmem:[#allocation7 + $0xf8] sm:$0xff]  ;;  %v6329_v61 = vld [vmem:[#allocation7 + $0xe0] sm:$0xff] }
 0xf3a   :  { %4216 = vmatprep.subr.mxu0 %v6315_v24  ;;  %4287 = vmatprep.subr.mxu1 %v6316_v53  ;;  %v6330_v24 = vld [vmem:[#allocation7 + $0xf0] sm:$0xff]  ;;  %v6331_v53 = vld [vmem:[#allocation7 + $0xc8] sm:$0xff] }
 0xf3b   :  { %4217 = vmatpush1.msra.mxu0 %v6317_v0  ;;  %4288 = vmatpush1.msra.mxu1 %v6318_v59  ;;  %v6332_v0 = vld [vmem:[#allocation7 + $0xd8] sm:$0xff]  ;;  %v6333_v59 = vld [vmem:[#allocation7 + $0xc0] sm:$0xff] }
 0xf3c   :  { %4218 = vmatprep.subr.mxu0 %v6319_v38  ;;  %4289 = vmatprep.subr.mxu1 %v6320_v58  ;;  %v6334_v38 = vld [vmem:[#allocation7 + $0xd0] sm:$0xff]  ;;  %v6335_v58 = vld [vmem:[#allocation7 + $0xa8] sm:$0xff] }
 0xf3d   :  { %4219 = vmatpush1.msra.mxu0 %v6321_v8  ;;  %4290 = vmatpush1.msra.mxu1 %v6322_v10  ;;  %v6336_v8 = vld [vmem:[#allocation7 + $0xb8] sm:$0xff]  ;;  %v6337_v10 = vld [vmem:[#allocation7 + $0xa0] sm:$0xff] }
 0xf3e   :  { %4220 = vmatprep.subr.mxu0 %v6323_v48  ;;  %4291 = vmatprep.subr.mxu1 %v6324_v33  ;;  %v6338_v48 = vld [vmem:[#allocation7 + $0xb0] sm:$0xff]  ;;  %v6339_v33 = vld [vmem:[#allocation7 + $0x88] sm:$0xff] }
 0xf3f   :  { %4221 = vmatpush1.msra.mxu0 %v6325_v31  ;;  %4292 = vmatpush1.msra.mxu1 %v6326_v11  ;;  %v6340_v31 = vld [vmem:[#allocation7 + $0x98] sm:$0xff]  ;;  %v6341_v11 = vld [vmem:[#allocation7 + $0x80] sm:$0xff] }
 0xf40   :  { %4222 = vmatprep.subr.mxu0 %v6327_v1  ;;  %4293 = vmatprep.subr.mxu1 %v6328_v5  ;;  %v6342_v1 = vld [vmem:[#allocation7 + $0x90] sm:$0xff]  ;;  %v6343_v5 = vld [vmem:[#allocation7 + $0x68] sm:$0xff] }
 0xf41   :  { %4223 = vmatpush1.msra.mxu0 %v6329_v61  ;;  %4294 = vmatpush1.msra.mxu1 %v6330_v24  ;;  %v6344_v61 = vld [vmem:[#allocation7 + $0x78] sm:$0xff]  ;;  %v6345_v24 = vld [vmem:[#allocation7 + $0x60] sm:$0xff] }
 0xf42   :  { %4224 = vmatprep.subr.mxu0 %v6331_v53  ;;  %4295 = vmatprep.subr.mxu1 %v6332_v0  ;;  %v6346_v53 = vld [vmem:[#allocation7 + $0x70] sm:$0xff]  ;;  %v6347_v0 = vld [vmem:[#allocation7 + $0x48] sm:$0xff] }
 0xf43   :  { %4225 = vmatpush1.msra.mxu0 %v6333_v59  ;;  %4296 = vmatpush1.msra.mxu1 %v6334_v38  ;;  %v6348_v59 = vld [vmem:[#allocation7 + $0x58] sm:$0xff]  ;;  %v6349_v38 = vld [vmem:[#allocation7 + $0x40] sm:$0xff] }
 0xf44   :  { %4226 = vmatprep.subr.mxu0 %v6335_v58  ;;  %4297 = vmatprep.subr.mxu1 %v6336_v8  ;;  %v6350_v58 = vld [vmem:[#allocation7 + $0x50] sm:$0xff]  ;;  %v6351_v8 = vld [vmem:[#allocation7 + $0x28] sm:$0xff] }
 0xf45   :  { %4227 = vmatpush1.msra.mxu0 %v6337_v10  ;;  %4298 = vmatpush1.msra.mxu1 %v6338_v48  ;;  %v6352_v10 = vld [vmem:[#allocation7 + $0x38] sm:$0xff]  ;;  %v6353_v48 = vld [vmem:[#allocation7 + $0x20] sm:$0xff] }
 0xf46   :  { %4228 = vmatprep.subr.mxu0 %v6339_v33  ;;  %4299 = vmatprep.subr.mxu1 %v6340_v31  ;;  %v6354_v33 = vld [vmem:[#allocation7 + $0x30] sm:$0xff]  ;;  %v6355_v31 = vld [vmem:[#allocation7 + $0x8] sm:$0xff] }
 0xf47   :  { %4229 = vmatpush1.msra.mxu0 %v6341_v11  ;;  %4300 = vmatpush1.msra.mxu1 %v6342_v1  ;;  %v6356_v11 = vld [vmem:[#allocation7 + $0x18] sm:$0xff]  ;;  %v6357_v1 = vld [vmem:[#allocation7] sm:$0xff] }
 0xf48   :  { %4230 = vmatprep.subr.mxu0 %v6343_v5  ;;  %4301 = vmatprep.subr.mxu1 %v6344_v61  ;;  %v6358_v5 = vld [vmem:[#allocation7 + $0x10] sm:$0xff]  ;;  %v6359_v61 = vld [vmem:[#allocation9 + $0x1e8] sm:$0xff] }
 0xf49   :  { %4231 = vmatpush1.msra.mxu0 %v6345_v24  ;;  %4302 = vmatpush1.msra.mxu1 %v6346_v53  ;;  %v6360_v24 = vld [vmem:[#allocation9 + $0x1f8] sm:$0xff]  ;;  %v6361_v53 = vld [vmem:[#allocation9 + $0x1e0] sm:$0xff] }
 0xf4a   :  { %4232 = vmatprep.subr.mxu0 %v6347_v0  ;;  %4303 = vmatprep.subr.mxu1 %v6348_v59  ;;  %v6362_v0 = vld [vmem:[#allocation9 + $0x1f0] sm:$0xff]  ;;  %v6363_v59 = vld [vmem:[#allocation9 + $0x1c8] sm:$0xff] }
 0xf4b   :  { %4233 = vmatpush1.msra.mxu0 %v6349_v38  ;;  %4304 = vmatpush1.msra.mxu1 %v6350_v58  ;;  %v6364_v38 = vld [vmem:[#allocation9 + $0x1d8] sm:$0xff]  ;;  %v6365_v58 = vld [vmem:[#allocation9 + $0x1c0] sm:$0xff] }
 0xf4c   :  { %4234 = vmatprep.subr.mxu0 %v6351_v8  ;;  %4305 = vmatprep.subr.mxu1 %v6352_v10  ;;  %v6366_v8 = vld [vmem:[#allocation9 + $0x1d0] sm:$0xff]  ;;  %v6368_v10 = vld [vmem:[#allocation9 + $0x1b8] sm:$0xff] }
 0xf4d   :  { %4235 = vmatpush1.msra.mxu0 %v6353_v48  ;;  %4306 = vmatpush1.msra.mxu1 %v6354_v33  ;;  %v6370_v48 = vld [vmem:[#allocation9 + $0x1b0] sm:$0xff]  ;;  %v6371_v33 = vld [vmem:[#allocation9 + $0x188] sm:$0xff] }
 0xf4e   :  { %4236 = vmatprep.subr.mxu0 %v6355_v31  ;;  %4307 = vmatprep.subr.mxu1 %v6356_v11  ;;  %v6372_v31 = vld [vmem:[#allocation9 + $0x198] sm:$0xff]  ;;  %v6373_v11 = vld [vmem:[#allocation9 + $0x180] sm:$0xff] }
 0xf4f   :  { %4237 = vmatpush1.msra.mxu0 %v6357_v1  ;;  %4270 = vmatprep.mubr.f32.mxu0 %v13613_v21  ;;  %v6374_v1 = vld [vmem:[#allocation9 + $0x190] sm:$0xff] }
 0xf50   :  { %4308 = vmatpush1.msra.mxu1 %v6358_v5  ;;  %4341 = vmatprep.mubr.f32.mxu1 %v13613_v21  ;;  %v6375_v5 = vld [vmem:[#allocation9 + $0x168] sm:$0xff] }
 0xf51   :  { %4271 = vmatmul.mubr.f32.vlgmr.msra.gmra.mxu0 %v10894_v14  ;;  %4342 = vmatmul.mubr.f32.vlgmr.msra.gmra.mxu1 %v10894_v14  ;;  %v6367_v14 = vld [vmem:[#allocation9 + $0x1a8] sm:$0xff] }
 0xf52   :  { %4463 = vmatprep.mubr.f32.mxu0 %v11164_v35  ;;  %4534 = vmatprep.mubr.f32.mxu1 %v11164_v35  ;;  %v6369_v35 = vld [vmem:[#allocation9 + $0x1a0] sm:$0xff] }
 0xf53   :  { %4399 = vmatprep.subr.mxu0 %v6359_v61  ;;  %4470 = vmatprep.subr.mxu1 %v6360_v24  ;;  %v6376_v61 = vld [vmem:[#allocation9 + $0x178] sm:$0xff]  ;;  %v6377_v24 = vld [vmem:[#allocation9 + $0x160] sm:$0xff] }
 0xf54   :  { %4400 = vmatpush1.msra.mxu0 %v6361_v53  ;;  %4471 = vmatpush1.msra.mxu1 %v6362_v0  ;;  %v6378_v53 = vld [vmem:[#allocation9 + $0x170] sm:$0xff]  ;;  %v6379_v0 = vld [vmem:[#allocation9 + $0x148] sm:$0xff] }
 0xf55   :  { %4401 = vmatprep.subr.mxu0 %v6363_v59  ;;  %4472 = vmatprep.subr.mxu1 %v6364_v38  ;;  %v6380_v59 = vld [vmem:[#allocation9 + $0x158] sm:$0xff]  ;;  %v6381_v38 = vld [vmem:[#allocation9 + $0x140] sm:$0xff] }
 0xf56   :  { %4402 = vmatpush1.msra.mxu0 %v6365_v58  ;;  %4473 = vmatpush1.msra.mxu1 %v6366_v8  ;;  %v6382_v58 = vld [vmem:[#allocation9 + $0x150] sm:$0xff]  ;;  %v6383_v8 = vld [vmem:[#allocation9 + $0x128] sm:$0xff] }
 0xf57   :  { %4403 = vmatprep.subr.mxu0 %v6367_v14  ;;  %4474 = vmatprep.subr.mxu1 %v6368_v10  ;;  %v6384_v14 = vld [vmem:[#allocation9 + $0x138] sm:$0xff]  ;;  %v6385_v10 = vld [vmem:[#allocation9 + $0x120] sm:$0xff] }
 0xf58   :  { %4404 = vmatpush1.msra.mxu0 %v6369_v35  ;;  %4475 = vmatpush1.msra.mxu1 %v6370_v48  ;;  %v6386_v35 = vld [vmem:[#allocation9 + $0x130] sm:$0xff]  ;;  %v6387_v48 = vld [vmem:[#allocation9 + $0x108] sm:$0xff] }
 0xf59   :  { %4405 = vmatprep.subr.mxu0 %v6371_v33  ;;  %4476 = vmatprep.subr.mxu1 %v6372_v31  ;;  %v6388_v33 = vld [vmem:[#allocation9 + $0x118] sm:$0xff]  ;;  %v6389_v31 = vld [vmem:[#allocation9 + $0x100] sm:$0xff] }
 0xf5a   :  { %4406 = vmatpush1.msra.mxu0 %v6373_v11  ;;  %4477 = vmatpush1.msra.mxu1 %v6374_v1  ;;  %v6390_v11 = vld [vmem:[#allocation9 + $0x110] sm:$0xff]  ;;  %v6391_v1 = vld [vmem:[#allocation9 + $0xe8] sm:$0xff] }
 0xf5b   :  { %4407 = vmatprep.subr.mxu0 %v6375_v5  ;;  %4478 = vmatprep.subr.mxu1 %v6376_v61  ;;  %v6392_v5 = vld [vmem:[#allocation9 + $0xf8] sm:$0xff]  ;;  %v6393_v61 = vld [vmem:[#allocation9 + $0xe0] sm:$0xff] }
 0xf5c   :  { %4408 = vmatpush1.msra.mxu0 %v6377_v24  ;;  %4479 = vmatpush1.msra.mxu1 %v6378_v53  ;;  %v6394_v24 = vld [vmem:[#allocation9 + $0xf0] sm:$0xff]  ;;  %v6395_v53 = vld [vmem:[#allocation9 + $0xc8] sm:$0xff] }
 0xf5d   :  { %4409 = vmatprep.subr.mxu0 %v6379_v0  ;;  %4480 = vmatprep.subr.mxu1 %v6380_v59  ;;  %v6396_v0 = vld [vmem:[#allocation9 + $0xd8] sm:$0xff]  ;;  %v6397_v59 = vld [vmem:[#allocation9 + $0xc0] sm:$0xff] }
 0xf5e   :  { %4410 = vmatpush1.msra.mxu0 %v6381_v38  ;;  %4481 = vmatpush1.msra.mxu1 %v6382_v58  ;;  %v6398_v38 = vld [vmem:[#allocation9 + $0xd0] sm:$0xff]  ;;  %v6399_v58 = vld [vmem:[#allocation9 + $0xa8] sm:$0xff] }
 0xf5f   :  { %4411 = vmatprep.subr.mxu0 %v6383_v8  ;;  %4482 = vmatprep.subr.mxu1 %v6384_v14  ;;  %v6400_v8 = vld [vmem:[#allocation9 + $0xb8] sm:$0xff]  ;;  %v6401_v14 = vld [vmem:[#allocation9 + $0xa0] sm:$0xff] }
 0xf60   :  { %4412 = vmatpush1.msra.mxu0 %v6385_v10  ;;  %4483 = vmatpush1.msra.mxu1 %v6386_v35  ;;  %v6402_v10 = vld [vmem:[#allocation9 + $0xb0] sm:$0xff]  ;;  %v6403_v35 = vld [vmem:[#allocation9 + $0x88] sm:$0xff] }
 0xf61   :  { %4413 = vmatprep.subr.mxu0 %v6387_v48  ;;  %4484 = vmatprep.subr.mxu1 %v6388_v33  ;;  %v6404_v48 = vld [vmem:[#allocation9 + $0x98] sm:$0xff]  ;;  %v6405_v33 = vld [vmem:[#allocation9 + $0x80] sm:$0xff] }
 0xf62   :  { %4414 = vmatpush1.msra.mxu0 %v6389_v31  ;;  %4485 = vmatpush1.msra.mxu1 %v6390_v11  ;;  %v6406_v31 = vld [vmem:[#allocation9 + $0x90] sm:$0xff]  ;;  %v6407_v11 = vld [vmem:[#allocation9 + $0x68] sm:$0xff] }
 0xf63   :  { %4415 = vmatprep.subr.mxu0 %v6391_v1  ;;  %4486 = vmatprep.subr.mxu1 %v6392_v5  ;;  %v6408_v1 = vld [vmem:[#allocation9 + $0x78] sm:$0xff]  ;;  %v6409_v5 = vld [vmem:[#allocation9 + $0x60] sm:$0xff] }
 0xf64   :  { %4416 = vmatpush1.msra.mxu0 %v6393_v61  ;;  %4487 = vmatpush1.msra.mxu1 %v6394_v24  ;;  %v6410_v61 = vld [vmem:[#allocation9 + $0x70] sm:$0xff]  ;;  %v6411_v24 = vld [vmem:[#allocation9 + $0x48] sm:$0xff] }
 0xf65   :  { %4417 = vmatprep.subr.mxu0 %v6395_v53  ;;  %4488 = vmatprep.subr.mxu1 %v6396_v0  ;;  %v6412_v53 = vld [vmem:[#allocation9 + $0x58] sm:$0xff]  ;;  %v6413_v0 = vld [vmem:[#allocation9 + $0x40] sm:$0xff] }
 0xf66   :  { %4418 = vmatpush1.msra.mxu0 %v6397_v59  ;;  %4489 = vmatpush1.msra.mxu1 %v6398_v38  ;;  %v6414_v59 = vld [vmem:[#allocation9 + $0x50] sm:$0xff]  ;;  %v6415_v38 = vld [vmem:[#allocation9 + $0x28] sm:$0xff] }
 0xf67   :  { %4419 = vmatprep.subr.mxu0 %v6399_v58  ;;  %4490 = vmatprep.subr.mxu1 %v6400_v8  ;;  %v6416_v58 = vld [vmem:[#allocation9 + $0x38] sm:$0xff]  ;;  %v6417_v8 = vld [vmem:[#allocation9 + $0x20] sm:$0xff] }
 0xf68   :  { %4420 = vmatpush1.msra.mxu0 %v6401_v14  ;;  %4491 = vmatpush1.msra.mxu1 %v6402_v10  ;;  %v6418_v14 = vld [vmem:[#allocation9 + $0x30] sm:$0xff]  ;;  %v6419_v10 = vld [vmem:[#allocation9 + $0x8] sm:$0xff] }
 0xf69   :  { %4421 = vmatprep.subr.mxu0 %v6403_v35  ;;  %4492 = vmatprep.subr.mxu1 %v6404_v48  ;;  %v6420_v35 = vld [vmem:[#allocation9 + $0x18] sm:$0xff]  ;;  %v6421_v48 = vld [vmem:[#allocation9] sm:$0xff] }
 0xf6a   :  { %4422 = vmatpush1.msra.mxu0 %v6405_v33  ;;  %4493 = vmatpush1.msra.mxu1 %v6406_v31  ;;  %v6422_v33 = vld [vmem:[#allocation9 + $0x10] sm:$0xff]  ;;  %v6423_v31 = vld [vmem:[#allocation9 + $0x3e8] sm:$0xff] }
 0xf6b   :  { %4423 = vmatprep.subr.mxu0 %v6407_v11  ;;  %4494 = vmatprep.subr.mxu1 %v6408_v1  ;;  %v6424_v11 = vld [vmem:[#allocation9 + $0x3f8] sm:$0xff]  ;;  %v6425_v1 = vld [vmem:[#allocation9 + $0x3e0] sm:$0xff] }
 0xf6c   :  { %4424 = vmatpush1.msra.mxu0 %v6409_v5  ;;  %4495 = vmatpush1.msra.mxu1 %v6410_v61  ;;  %v6426_v5 = vld [vmem:[#allocation9 + $0x3f0] sm:$0xff]  ;;  %v6427_v61 = vld [vmem:[#allocation9 + $0x3c8] sm:$0xff] }
 0xf6d   :  { %4425 = vmatprep.subr.mxu0 %v6411_v24  ;;  %4496 = vmatprep.subr.mxu1 %v6412_v53  ;;  %v6428_v24 = vld [vmem:[#allocation9 + $0x3d8] sm:$0xff]  ;;  %v6429_v53 = vld [vmem:[#allocation9 + $0x3c0] sm:$0xff] }
 0xf6e   :  { %4426 = vmatpush1.msra.mxu0 %v6413_v0  ;;  %4497 = vmatpush1.msra.mxu1 %v6414_v59  ;;  %v6430_v0 = vld [vmem:[#allocation9 + $0x3d0] sm:$0xff]  ;;  %v6431_v59 = vld [vmem:[#allocation9 + $0x3a8] sm:$0xff] }
 0xf6f   :  { %4427 = vmatprep.subr.mxu0 %v6415_v38  ;;  %4498 = vmatprep.subr.mxu1 %v6416_v58  ;;  %v6432_v38 = vld [vmem:[#allocation9 + $0x3b8] sm:$0xff]  ;;  %v6433_v58 = vld [vmem:[#allocation9 + $0x3a0] sm:$0xff] }
 0xf70   :  { %4428 = vmatpush1.msra.mxu0 %v6417_v8  ;;  %4499 = vmatpush1.msra.mxu1 %v6418_v14  ;;  %v6434_v8 = vld [vmem:[#allocation9 + $0x3b0] sm:$0xff]  ;;  %v6435_v14 = vld [vmem:[#allocation9 + $0x388] sm:$0xff] }
 0xf71   :  { %4429 = vmatprep.subr.mxu0 %v6419_v10  ;;  %4500 = vmatprep.subr.mxu1 %v6420_v35  ;;  %v6436_v10 = vld [vmem:[#allocation9 + $0x398] sm:$0xff]  ;;  %v6437_v35 = vld [vmem:[#allocation9 + $0x380] sm:$0xff] }
 0xf72   :  { %4430 = vmatpush1.msra.mxu0 %v6421_v48  ;;  %4501 = vmatpush1.msra.mxu1 %v6422_v33  ;;  %v6438_v48 = vld [vmem:[#allocation9 + $0x390] sm:$0xff]  ;;  %v6439_v33 = vld [vmem:[#allocation9 + $0x368] sm:$0xff] }
 0xf73   :  { %4431 = vmatprep.subr.mxu0 %v6423_v31  ;;  %4502 = vmatprep.subr.mxu1 %v6424_v11  ;;  %v6440_v31 = vld [vmem:[#allocation9 + $0x378] sm:$0xff]  ;;  %v6441_v11 = vld [vmem:[#allocation9 + $0x360] sm:$0xff] }
 0xf74   :  { %4432 = vmatpush2.msra.mxu0 %v6425_v1  ;;  %4503 = vmatpush2.msra.mxu1 %v6426_v5  ;;  %v6442_v1 = vld [vmem:[#allocation9 + $0x370] sm:$0xff]  ;;  %v6443_v5 = vld [vmem:[#allocation9 + $0x348] sm:$0xff] }
 0xf75   :  { %4433 = vmatprep.subr.mxu0 %v6427_v61  ;;  %4504 = vmatprep.subr.mxu1 %v6428_v24  ;;  %v6444_v61 = vld [vmem:[#allocation9 + $0x358] sm:$0xff]  ;;  %v6445_v24 = vld [vmem:[#allocation9 + $0x340] sm:$0xff] }
 0xf76   :  { %4434 = vmatpush2.msra.mxu0 %v6429_v53  ;;  %4505 = vmatpush2.msra.mxu1 %v6430_v0  ;;  %v6446_v53 = vld [vmem:[#allocation9 + $0x350] sm:$0xff]  ;;  %v6447_v0 = vld [vmem:[#allocation9 + $0x328] sm:$0xff] }
 0xf77   :  { %4435 = vmatprep.subr.mxu0 %v6431_v59  ;;  %4506 = vmatprep.subr.mxu1 %v6432_v38  ;;  %v6448_v59 = vld [vmem:[#allocation9 + $0x338] sm:$0xff]  ;;  %v6449_v38 = vld [vmem:[#allocation9 + $0x320] sm:$0xff] }
 0xf78   :  { %4436 = vmatpush2.msra.mxu0 %v6433_v58  ;;  %4507 = vmatpush2.msra.mxu1 %v6434_v8  ;;  %v6450_v58 = vld [vmem:[#allocation9 + $0x330] sm:$0xff]  ;;  %v6451_v8 = vld [vmem:[#allocation9 + $0x308] sm:$0xff] }
 0xf79   :  { %4437 = vmatprep.subr.mxu0 %v6435_v14  ;;  %4508 = vmatprep.subr.mxu1 %v6436_v10  ;;  %v6452_v14 = vld [vmem:[#allocation9 + $0x318] sm:$0xff]  ;;  %v6453_v10 = vld [vmem:[#allocation9 + $0x300] sm:$0xff] }
 0xf7a   :  { %4438 = vmatpush2.msra.mxu0 %v6437_v35  ;;  %4509 = vmatpush2.msra.mxu1 %v6438_v48  ;;  %v6454_v35 = vld [vmem:[#allocation9 + $0x310] sm:$0xff]  ;;  %v6455_v48 = vld [vmem:[#allocation9 + $0x2e8] sm:$0xff] }
 0xf7b   :  { %4439 = vmatprep.subr.mxu0 %v6439_v33  ;;  %4510 = vmatprep.subr.mxu1 %v6440_v31  ;;  %v6456_v33 = vld [vmem:[#allocation9 + $0x2f8] sm:$0xff]  ;;  %v6457_v31 = vld [vmem:[#allocation9 + $0x2e0] sm:$0xff] }
 0xf7c   :  { %4440 = vmatpush2.msra.mxu0 %v6441_v11  ;;  %4511 = vmatpush2.msra.mxu1 %v6442_v1  ;;  %v6458_v11 = vld [vmem:[#allocation9 + $0x2f0] sm:$0xff]  ;;  %v6459_v1 = vld [vmem:[#allocation9 + $0x2c8] sm:$0xff] }
 0xf7d   :  { %4441 = vmatprep.subr.mxu0 %v6443_v5  ;;  %4512 = vmatprep.subr.mxu1 %v6444_v61  ;;  %v6460_v5 = vld [vmem:[#allocation9 + $0x2d8] sm:$0xff]  ;;  %v6461_v61 = vld [vmem:[#allocation9 + $0x2c0] sm:$0xff] }
 0xf7e   :  { %4442 = vmatpush2.msra.mxu0 %v6445_v24  ;;  %4513 = vmatpush2.msra.mxu1 %v6446_v53  ;;  %v6462_v24 = vld [vmem:[#allocation9 + $0x2d0] sm:$0xff]  ;;  %v6463_v53 = vld [vmem:[#allocation9 + $0x2a8] sm:$0xff] }
 0xf7f   :  { %4443 = vmatprep.subr.mxu0 %v6447_v0  ;;  %4514 = vmatprep.subr.mxu1 %v6448_v59  ;;  %v6464_v0 = vld [vmem:[#allocation9 + $0x2b8] sm:$0xff]  ;;  %v6465_v59 = vld [vmem:[#allocation9 + $0x2a0] sm:$0xff] }
 0xf80   :  { %4444 = vmatpush2.msra.mxu0 %v6449_v38  ;;  %4515 = vmatpush2.msra.mxu1 %v6450_v58  ;;  %v6466_v38 = vld [vmem:[#allocation9 + $0x2b0] sm:$0xff]  ;;  %v6467_v58 = vld [vmem:[#allocation9 + $0x288] sm:$0xff] }
 0xf81   :  { %4445 = vmatprep.subr.mxu0 %v6451_v8  ;;  %4516 = vmatprep.subr.mxu1 %v6452_v14  ;;  %v6468_v8 = vld [vmem:[#allocation9 + $0x298] sm:$0xff]  ;;  %v6469_v14 = vld [vmem:[#allocation9 + $0x280] sm:$0xff] }
 0xf82   :  { %4446 = vmatpush2.msra.mxu0 %v6453_v10  ;;  %4517 = vmatpush2.msra.mxu1 %v6454_v35  ;;  %v6470_v10 = vld [vmem:[#allocation9 + $0x290] sm:$0xff]  ;;  %v6471_v35 = vld [vmem:[#allocation9 + $0x268] sm:$0xff] }
 0xf83   :  { %4447 = vmatprep.subr.mxu0 %v6455_v48  ;;  %4518 = vmatprep.subr.mxu1 %v6456_v33  ;;  %v6472_v48 = vld [vmem:[#allocation9 + $0x278] sm:$0xff]  ;;  %v6473_v33 = vld [vmem:[#allocation9 + $0x260] sm:$0xff] }
 0xf84   :  { %4448 = vmatpush2.msra.mxu0 %v6457_v31  ;;  %4519 = vmatpush2.msra.mxu1 %v6458_v11  ;;  %v6474_v31 = vld [vmem:[#allocation9 + $0x270] sm:$0xff]  ;;  %v6475_v11 = vld [vmem:[#allocation9 + $0x248] sm:$0xff] }
 0xf85   :  { %4449 = vmatprep.subr.mxu0 %v6459_v1  ;;  %4520 = vmatprep.subr.mxu1 %v6460_v5  ;;  %v6476_v1 = vld [vmem:[#allocation9 + $0x258] sm:$0xff]  ;;  %v6477_v5 = vld [vmem:[#allocation9 + $0x240] sm:$0xff] }
 0xf86   :  { %4450 = vmatpush2.msra.mxu0 %v6461_v61  ;;  %4521 = vmatpush2.msra.mxu1 %v6462_v24  ;;  %v6478_v61 = vld [vmem:[#allocation9 + $0x250] sm:$0xff]  ;;  %v6479_v24 = vld [vmem:[#allocation9 + $0x228] sm:$0xff] }
 0xf87   :  { %4451 = vmatprep.subr.mxu0 %v6463_v53  ;;  %4522 = vmatprep.subr.mxu1 %v6464_v0  ;;  %v6480_v53 = vld [vmem:[#allocation9 + $0x238] sm:$0xff]  ;;  %v6481_v0 = vld [vmem:[#allocation9 + $0x220] sm:$0xff] }
 0xf88   :  { %4452 = vmatpush2.msra.mxu0 %v6465_v59  ;;  %4523 = vmatpush2.msra.mxu1 %v6466_v38  ;;  %v6482_v59 = vld [vmem:[#allocation9 + $0x230] sm:$0xff]  ;;  %v6483_v38 = vld [vmem:[#allocation9 + $0x208] sm:$0xff] }
 0xf89   :  { %4453 = vmatprep.subr.mxu0 %v6467_v58  ;;  %4524 = vmatprep.subr.mxu1 %v6468_v8  ;;  %v6484_v58 = vld [vmem:[#allocation9 + $0x218] sm:$0xff]  ;;  %v6485_v8 = vld [vmem:[#allocation9 + $0x200] sm:$0xff] }
 0xf8a   :  { %4454 = vmatpush2.msra.mxu0 %v6469_v14  ;;  %4525 = vmatpush2.msra.mxu1 %v6470_v10  ;;  %v6486_v14 = vld [vmem:[#allocation9 + $0x210] sm:$0xff]  ;;  %v6487_v10 = vld [vmem:[#allocation10 + $0x1e8] sm:$0xff] }
 0xf8b   :  { %4455 = vmatprep.subr.mxu0 %v6471_v35  ;;  %4526 = vmatprep.subr.mxu1 %v6472_v48  ;;  %v6488_v35 = vld [vmem:[#allocation10 + $0x1f8] sm:$0xff] }
 0xf8c   :  { %4456 = vmatpush2.msra.mxu0 %v6473_v33  ;;  %4527 = vmatpush2.msra.mxu1 %v6474_v31 }
 0xf8d   :  { %4457 = vmatprep.subr.mxu0 %v6475_v11  ;;  %4528 = vmatprep.subr.mxu1 %v6476_v1 }
 0xf8e   :  { %4458 = vmatpush2.msra.mxu0 %v6477_v5  ;;  %4529 = vmatpush2.msra.mxu1 %v6478_v61 }
 0xf8f   :  { %4459 = vmatprep.subr.mxu0 %v6479_v24  ;;  %4530 = vmatprep.subr.mxu1 %v6480_v53 }
 0xf90   :  { %4460 = vmatpush2.msra.mxu0 %v6481_v0  ;;  %4531 = vmatpush2.msra.mxu1 %v6482_v59 }
 0xf91   :  { %4461 = vmatprep.subr.mxu0 %v6483_v38  ;;  %4532 = vmatprep.subr.mxu1 %v6484_v58 }
 0xf92   :  { %4462 = vmatpush2.msra.mxu0 %v6485_v8  ;;  %4533 = vmatpush2.msra.mxu1 %v6486_v14 }
 0xf93   :  { %4565 = vmatprep.subr.mxu0 %v6487_v10  ;;  %4636 = vmatprep.subr.mxu1 %v6488_v35 }
 0xff0   :  { %v4103_v48 = vpop.f32.mrf.mxu0  ;;  %v4174_v5 = vpop.f32.mrf.mxu1 }
 0xff1   :  { %v4104_v33 = vadd.f32 %v4103_v48, %v13745_v13  ;;  %v4175_v38 = vadd.f32 %v4174_v5, %v13748_v56 }
 0xff2   :  { %v4105_v31 = vpop.f32.mrf.mxu0  ;;  %v4176_v24 = vpop.f32.mrf.mxu1 }
 0xff3   :  { %v4931_v11 = vmul.f32 -1.442695, %v4104_v33  ;;  %v4106_v1 = vadd.f32 %v4105_v31, %v13746_v30  ;;  %v4177_v53 = vadd.f32 %v4176_v24, %v13747_v36 }
 0xff5   :  { %5274 = vpow2.f32 %v4931_v11  ;;  %v4932_v61 = vmul.f32 -1.442695, %v4106_v1  ;;  %v4933_v0 = vmul.f32 -1.442695, %v4177_v53 }
 0xff7   :  { %5276 = vpow2.f32 %v4932_v61 }
 0xff8   :  { %5278 = vpow2.f32 %v4933_v0  ;;  %v4204_v0 = vstv %s4934_s19 }
0x1002   :  { %v5275_v59 = vpop.eup %5274 }
0x1003   :  { %v4188_v58 = vadd.f32 1.0, %v5275_v59 }
0x1004   :  { %v5277_v8 = vpop.eup %5276 }
0x1005   :  { %5280 = vrcp.f32 %v4188_v58  ;;  %v4189_v14 = vadd.f32 1.0, %v5277_v8  ;;  %v5279_v10 = vpop.eup %5278 }
0x1006   :  { %5282 = vtanh.f32 %v4175_v38  ;;  %v4190_v24 = vadd.f32 1.0, %v5279_v10 }
0x1007   :  { %5284 = vrcp.f32 %v4189_v14  ;;  %v6489_v14 = vld [vmem:[#allocation6] sm:$0xf] }
0x1008   :  { %5286 = vrcp.f32 %v4190_v24  ;;  %v4205_v56 = vmul.f32 %v6489_v14, %v4204_v0  ;;  %v6491_v14 = vld [vmem:[#allocation10 + $0x1f0] sm:$0xff] }
0x1011   :  { %v4272_v35 = vpop.f32.mrf.mxu0  ;;  %v4343_v48 = vpop.f32.mrf.mxu1 }
0x1012   :  { %v5281_v33 = vpop.eup %5280 }
0x1013   :  { %v5283_v31 = vpop.eup %5282  ;;  %v4274_v11 = vpop.f32.mrf.mxu0 }
0x1014   :  { %v4345_v1 = vpop.f32.mrf.mxu1  ;;  %v5285_v61 = vpop.eup %5284  ;;  %v4352_v53 = vcombine.low %v4272_v35, %v4274_v11  ;;  %v4199_v5 = vmul.f32 %v5283_v31, %v5281_v33 }
0x1015   :  { %v4353_v36 = vcombine.low %v4343_v48, %v4345_v1  ;;  %v4198_v59 = vmul.f32 %v5285_v61, %v10881_v20  ;;  %v5287_v20 = vpop.eup %5286 }
0x1016   :  { %v4360_v58 = vrot.slane %v4352_v53, %v6813_v12 }
0x1017   :  { %v4367_v38 = vrot.slane %v4353_v36, %v6813_v12  ;;  %v11181_v8 = vadd.f32 %v4199_v5, %v4198_v59 }
0x1019   :  { %v4368_v30 = vcombine.low %v4360_v58, %v4367_v38  ;;  %5288 = vtanh.f32 %v11181_v8 }
0x101b   :  { %v4375_v10 = vrot.slane %v4368_v30, %v6813_v12 }
0x101d   :  { %v4377_v35 = vadd.f32 %v4375_v10, %v4205_v56  ;;  %v6492_v10 = vld [vmem:[#allocation10 + $0x1c8] sm:$0xff] }
0x101f   :  { %v4378_v48 = vadd.f32 %v4377_v35, %v6823_v29  ;;  %v6493_v35 = vld [vmem:[#allocation10 + $0x1d8] sm:$0xff] }
0x1021   :  { %v4935_v33 = vmul.f32 -1.442695, %v4378_v48 }
0x1023   :  { %5290 = vpow2.f32 %v4935_v33  ;;  %v6496_v33 = vld [vmem:[#allocation10 + $0x1a8] sm:$0xff] }
0x1024   :  { %5292 = vtanh.f32 %v4378_v48  ;;  %v6494_v48 = vld [vmem:[#allocation10 + $0x1c0] sm:$0xff] }
0x1026   :  { %v5289_v31 = vpop.eup %5288 }
0x1027   :  { %v4202_v11 = vmul.f32 %v5289_v31, %v5287_v20  ;;  %v6497_v20 = vld [vmem:[#allocation10 + $0x1b8] sm:$0xff]  ;;  %v6498_v31 = vld [vmem:[#allocation10 + $0x1a0] sm:$0xff] }
0x1029   :  { %v4747_v36 = vrot.slane %v4202_v11, 2 }
0x102b   :  { %v11187_v1 = vsel %vm4762_vm5, %v10888_v57, %v4747_v36  ;;  %v6490_v57 = vld [vmem:[#allocation10 + $0x1e0] sm:$0xff]  ;;  %v6499_v36 = vld [vmem:[#allocation10 + $0x1b0] sm:$0xff] }
0x1030   :  { %v5291_v61 = vpop.eup %5290 }
0x1031   :  { %v4382_v24 = vadd.f32 1.0, %v5291_v61  ;;  %v5293_v53 = vpop.eup %5292  ;;  %v6501_v61 = vld [vmem:[#allocation10 + $0x198] sm:$0xff] }
0x1032   :  { %v4391_v30 = vrot.slane %v5293_v53, 2  ;;  %v6503_v53 = vld [vmem:[#allocation10 + $0x190] sm:$0xff] }
0x1033   :  { %5294 = vrcp.f32 %v4382_v24  ;;  %v6502_v24 = vld [vmem:[#allocation10 + $0x180] sm:$0xff] }
0x1040   :  { %v5295_v5 = vpop.eup %5294 }
0x1041   :  { %v4387_v12 = vrot.slane %v5295_v5, 1  ;;  %v4393_v56 = vmul.f32 %v5295_v5, %v4391_v30  ;;  %v4396_v0 = vrot.slane %v5295_v5, 3  ;;  %v6504_v5 = vld [vmem:[#allocation10 + $0x168] sm:$0xff]  ;;  %v6506_v30 = vld [vmem:[#allocation10 + $0x160] sm:$0xff] }
0x1043   :  { %v4389_v29 = vmul.f32 %v4387_v12, %v10891_v32  ;;  %v6495_v32 = vld [vmem:[#allocation10 + $0x1d0] sm:$0xff]  ;;  %v6505_v12 = vld [vmem:[#allocation10 + $0x178] sm:$0xff] }
0x1045   :  { %v4394_v59 = vadd.f32 %v4393_v56, %v4389_v29  ;;  %v6507_v29 = vld [vmem:[#allocation10 + $0x170] sm:$0xff]  ;;  %v6508_v56 = vld [vmem:[#allocation10 + $0x148] sm:$0xff] }
0x1047   :  { %5296 = vtanh.f32 %v4394_v59  ;;  %v6509_v59 = vld [vmem:[#allocation10 + $0x158] sm:$0xff] }
0x1054   :  { %v5297_v58 = vpop.eup %5296 }
0x1055   :  { %v4398_v38 = vmul.f32 %v5297_v58, %v4396_v0  ;;  %v6510_v0 = vld [vmem:[#allocation10 + $0x140] sm:$0xff]  ;;  %v6511_v58 = vld [vmem:[#allocation10 + $0x150] sm:$0xff] }
0x1057   :  { %4464 = vmatmul.mubr.f32.vlgmr.msra.gmra.mxu0 %v4398_v38  ;;  %4535 = vmatmul.mubr.f32.vlgmr.msra.gmra.mxu1 %v4398_v38  ;;  %v6512_v38 = vld [vmem:[#allocation10 + $0x128] sm:$0xff] }
0x1058   :  { %4629 = vmatprep.mubr.f32.mxu0 %v4202_v11  ;;  %4700 = vmatprep.mubr.f32.mxu1 %v4202_v11  ;;  %v6500_v11 = vld [vmem:[#allocation10 + $0x188] sm:$0xff] }
0x1059   :  { %4566 = vmatpush1.msra.mxu0 %v6490_v57  ;;  %4637 = vmatpush1.msra.mxu1 %v6491_v14  ;;  %v6513_v57 = vld [vmem:[#allocation10 + $0x138] sm:$0xff]  ;;  %v6514_v14 = vld [vmem:[#allocation10 + $0x120] sm:$0xff] }
0x105a   :  { %4567 = vmatprep.subr.mxu0 %v6492_v10  ;;  %4638 = vmatprep.subr.mxu1 %v6493_v35  ;;  %v6515_v10 = vld [vmem:[#allocation10 + $0x130] sm:$0xff]  ;;  %v6516_v35 = vld [vmem:[#allocation10 + $0x108] sm:$0xff] }
0x105b   :  { %4568 = vmatpush1.msra.mxu0 %v6494_v48  ;;  %4639 = vmatpush1.msra.mxu1 %v6495_v32  ;;  %v6517_v48 = vld [vmem:[#allocation10 + $0x118] sm:$0xff]  ;;  %v6518_v32 = vld [vmem:[#allocation10 + $0x100] sm:$0xff] }
0x105c   :  { %4569 = vmatprep.subr.mxu0 %v6496_v33  ;;  %4640 = vmatprep.subr.mxu1 %v6497_v20  ;;  %v6519_v33 = vld [vmem:[#allocation10 + $0x110] sm:$0xff]  ;;  %v6520_v20 = vld [vmem:[#allocation10 + $0xe8] sm:$0xff] }
0x105d   :  { %4570 = vmatpush1.msra.mxu0 %v6498_v31  ;;  %4641 = vmatpush1.msra.mxu1 %v6499_v36  ;;  %v6521_v31 = vld [vmem:[#allocation10 + $0xf8] sm:$0xff]  ;;  %v6522_v36 = vld [vmem:[#allocation10 + $0xe0] sm:$0xff] }
0x105e   :  { %4571 = vmatprep.subr.mxu0 %v6500_v11  ;;  %4642 = vmatprep.subr.mxu1 %v6501_v61  ;;  %v6523_v11 = vld [vmem:[#allocation10 + $0xf0] sm:$0xff]  ;;  %v6524_v61 = vld [vmem:[#allocation10 + $0xc8] sm:$0xff] }
0x105f   :  { %4572 = vmatpush1.msra.mxu0 %v6502_v24  ;;  %4643 = vmatpush1.msra.mxu1 %v6503_v53  ;;  %v6525_v24 = vld [vmem:[#allocation10 + $0xd8] sm:$0xff]  ;;  %v6526_v53 = vld [vmem:[#allocation10 + $0xc0] sm:$0xff] }
0x1060   :  { %4573 = vmatprep.subr.mxu0 %v6504_v5  ;;  %4644 = vmatprep.subr.mxu1 %v6505_v12  ;;  %v6527_v5 = vld [vmem:[#allocation10 + $0xd0] sm:$0xff]  ;;  %v6528_v12 = vld [vmem:[#allocation10 + $0xa8] sm:$0xff] }
0x1061   :  { %4574 = vmatpush1.msra.mxu0 %v6506_v30  ;;  %4645 = vmatpush1.msra.mxu1 %v6507_v29  ;;  %v6529_v30 = vld [vmem:[#allocation10 + $0xb8] sm:$0xff]  ;;  %v6530_v29 = vld [vmem:[#allocation10 + $0xa0] sm:$0xff] }
0x1062   :  { %4575 = vmatprep.subr.mxu0 %v6508_v56  ;;  %4646 = vmatprep.subr.mxu1 %v6509_v59  ;;  %v6531_v56 = vld [vmem:[#allocation10 + $0xb0] sm:$0xff]  ;;  %v6532_v59 = vld [vmem:[#allocation10 + $0x88] sm:$0xff] }
0x1063   :  { %4576 = vmatpush1.msra.mxu0 %v6510_v0  ;;  %4647 = vmatpush1.msra.mxu1 %v6511_v58  ;;  %v6533_v0 = vld [vmem:[#allocation10 + $0x98] sm:$0xff]  ;;  %v6534_v58 = vld [vmem:[#allocation10 + $0x80] sm:$0xff] }
0x1064   :  { %4577 = vmatprep.subr.mxu0 %v6512_v38  ;;  %4648 = vmatprep.subr.mxu1 %v6513_v57  ;;  %v6535_v38 = vld [vmem:[#allocation10 + $0x90] sm:$0xff]  ;;  %v6536_v57 = vld [vmem:[#allocation10 + $0x68] sm:$0xff] }
0x1065   :  { %4578 = vmatpush1.msra.mxu0 %v6514_v14  ;;  %4649 = vmatpush1.msra.mxu1 %v6515_v10  ;;  %v6537_v14 = vld [vmem:[#allocation10 + $0x78] sm:$0xff]  ;;  %v6538_v10 = vld [vmem:[#allocation10 + $0x60] sm:$0xff] }
0x1066   :  { %4579 = vmatprep.subr.mxu0 %v6516_v35  ;;  %4650 = vmatprep.subr.mxu1 %v6517_v48  ;;  %v6539_v35 = vld [vmem:[#allocation10 + $0x70] sm:$0xff]  ;;  %v6540_v48 = vld [vmem:[#allocation10 + $0x48] sm:$0xff] }
0x1067   :  { %4580 = vmatpush1.msra.mxu0 %v6518_v32  ;;  %4651 = vmatpush1.msra.mxu1 %v6519_v33  ;;  %v6541_v32 = vld [vmem:[#allocation10 + $0x58] sm:$0xff]  ;;  %v6542_v33 = vld [vmem:[#allocation10 + $0x40] sm:$0xff] }
0x1068   :  { %4581 = vmatprep.subr.mxu0 %v6520_v20  ;;  %4652 = vmatprep.subr.mxu1 %v6521_v31  ;;  %v6543_v20 = vld [vmem:[#allocation10 + $0x50] sm:$0xff]  ;;  %v6544_v31 = vld [vmem:[#allocation10 + $0x28] sm:$0xff] }
0x1069   :  { %4582 = vmatpush1.msra.mxu0 %v6522_v36  ;;  %4653 = vmatpush1.msra.mxu1 %v6523_v11  ;;  %v6545_v36 = vld [vmem:[#allocation10 + $0x38] sm:$0xff]  ;;  %v6546_v11 = vld [vmem:[#allocation10 + $0x20] sm:$0xff] }
0x106a   :  { %4583 = vmatprep.subr.mxu0 %v6524_v61  ;;  %4654 = vmatprep.subr.mxu1 %v6525_v24  ;;  %v6547_v61 = vld [vmem:[#allocation10 + $0x30] sm:$0xff]  ;;  %v6548_v24 = vld [vmem:[#allocation10 + $0x8] sm:$0xff] }
0x106b   :  { %4584 = vmatpush1.msra.mxu0 %v6526_v53  ;;  %4655 = vmatpush1.msra.mxu1 %v6527_v5  ;;  %v6549_v53 = vld [vmem:[#allocation10 + $0x18] sm:$0xff] }
0x106c   :  { %4585 = vmatprep.subr.mxu0 %v6528_v12  ;;  %4656 = vmatprep.subr.mxu1 %v6529_v30 }
0x106d   :  { %4586 = vmatpush1.msra.mxu0 %v6530_v29  ;;  %4657 = vmatpush1.msra.mxu1 %v6531_v56  ;;  %v13856_v29 = vld [vmem:[#allocation53_spill] sm:$0xff] }
0x106e   :  { %4587 = vmatprep.subr.mxu0 %v6532_v59  ;;  %4658 = vmatprep.subr.mxu1 %v6533_v0 }
0x106f   :  { %4588 = vmatpush1.msra.mxu0 %v6534_v58  ;;  %4659 = vmatpush1.msra.mxu1 %v6535_v38 }
0x1070   :  { %4589 = vmatprep.subr.mxu0 %v6536_v57  ;;  %4660 = vmatprep.subr.mxu1 %v6537_v14 }
0x1071   :  { %4590 = vmatpush1.msra.mxu0 %v6538_v10  ;;  %4661 = vmatpush1.msra.mxu1 %v6539_v35 }
0x1072   :  { %4591 = vmatprep.subr.mxu0 %v6540_v48  ;;  %4662 = vmatprep.subr.mxu1 %v6541_v32 }
0x1073   :  { %4592 = vmatpush1.msra.mxu0 %v6542_v33  ;;  %4663 = vmatpush1.msra.mxu1 %v6543_v20 }
0x1074   :  { %4593 = vmatprep.subr.mxu0 %v6544_v31  ;;  %4664 = vmatprep.subr.mxu1 %v6545_v36 }
0x1075   :  { %4594 = vmatpush1.msra.mxu0 %v6546_v11  ;;  %4665 = vmatpush1.msra.mxu1 %v6547_v61 }
0x1076   :  { %4595 = vmatprep.subr.mxu0 %v6548_v24  ;;  %4666 = vmatprep.subr.mxu1 %v6549_v53 }
0x1077   :  { %4596 = vmatpush1.msra.mxu0 %v10958_v15  ;;  %4667 = vmatpush1.msra.mxu1 %v10961_v60  ;;  %v13823_v15 = vld [vmem:[#allocation293_spill] sm:$0xff]  ;;  %v13824_v60 = vld [vmem:[#allocation294_spill] sm:$0xff] }
0x1078   :  { %4597 = vmatprep.subr.mxu0 %v10964_v2  ;;  %4668 = vmatprep.subr.mxu1 %v10967_v41  ;;  %v13825_v2 = vld [vmem:[#allocation295_spill] sm:$0xff]  ;;  %v13826_v41 = vld [vmem:[#allocation253_spill] sm:$0xff] }
0x1079   :  { %4598 = vmatpush2.msra.mxu0 %v10970_v43  ;;  %4669 = vmatpush2.msra.mxu1 %v10973_v3  ;;  %v13827_v43 = vld [vmem:[#allocation22_spill] sm:$0xff]  ;;  %v13828_v3 = vld [vmem:[#allocation23_spill] sm:$0xff] }
0x107a   :  { %4599 = vmatprep.subr.mxu0 %v10976_v39  ;;  %4670 = vmatprep.subr.mxu1 %v10979_v45  ;;  %v13829_v39 = vld [vmem:[#allocation24_spill] sm:$0xff]  ;;  %v13830_v45 = vld [vmem:[#allocation25_spill] sm:$0xff] }
0x107b   :  { %4600 = vmatpush2.msra.mxu0 %v10982_v47  ;;  %4671 = vmatpush2.msra.mxu1 %v10985_v17  ;;  %v13831_v47 = vld [vmem:[#allocation26_spill] sm:$0xff]  ;;  %v13832_v17 = vld [vmem:[#allocation27_spill] sm:$0xff] }
0x107c   :  { %4601 = vmatprep.subr.mxu0 %v10988_v46  ;;  %4672 = vmatprep.subr.mxu1 %v10991_v54  ;;  %v13833_v46 = vld [vmem:[#allocation28_spill] sm:$0xff]  ;;  %v13834_v54 = vld [vmem:[#allocation29_spill] sm:$0xff] }
0x107d   :  { %4602 = vmatpush2.msra.mxu0 %v10994_v62  ;;  %4673 = vmatpush2.msra.mxu1 %v10997_v16  ;;  %v13835_v62 = vld [vmem:[#allocation30_spill] sm:$0xff]  ;;  %v13836_v16 = vld [vmem:[#allocation31_spill] sm:$0xff] }
0x107e   :  { %4603 = vmatprep.subr.mxu0 %v11000_v42  ;;  %4674 = vmatprep.subr.mxu1 %v11003_v50  ;;  %v13837_v42 = vld [vmem:[#allocation32_spill] sm:$0xff]  ;;  %v13838_v50 = vld [vmem:[#allocation33_spill] sm:$0xff] }
0x107f   :  { %4604 = vmatpush2.msra.mxu0 %v11006_v7  ;;  %4675 = vmatpush2.msra.mxu1 %v11009_v63  ;;  %v13839_v7 = vld [vmem:[#allocation34_spill] sm:$0xff]  ;;  %v13840_v63 = vld [vmem:[#allocation35_spill] sm:$0xff] }
0x1080   :  { %4605 = vmatprep.subr.mxu0 %v11012_v44  ;;  %4676 = vmatprep.subr.mxu1 %v11015_v52  ;;  %v13841_v44 = vld [vmem:[#allocation36_spill] sm:$0xff]  ;;  %v13842_v52 = vld [vmem:[#allocation37_spill] sm:$0xff] }
0x1081   :  { %4606 = vmatpush2.msra.mxu0 %v11018_v18  ;;  %4677 = vmatpush2.msra.mxu1 %v11021_v4  ;;  %v13843_v18 = vld [vmem:[#allocation38_spill] sm:$0xff]  ;;  %v13844_v4 = vld [vmem:[#allocation39_spill] sm:$0xff] }
0x1082   :  { %4607 = vmatprep.subr.mxu0 %v11024_v26  ;;  %4678 = vmatprep.subr.mxu1 %v11027_v27  ;;  %v13845_v26 = vld [vmem:[#allocation40_spill] sm:$0xff]  ;;  %v13846_v27 = vld [vmem:[#allocation41_spill] sm:$0xff] }
0x1083   :  { %4608 = vmatpush2.msra.mxu0 %v11030_v25  ;;  %4679 = vmatpush2.msra.mxu1 %v11033_v23  ;;  %v13847_v25 = vld [vmem:[#allocation42_spill] sm:$0xff]  ;;  %v13848_v23 = vld [vmem:[#allocation43_spill] sm:$0xff] }
0x1084   :  { %4609 = vmatprep.subr.mxu0 %v11036_v19  ;;  %4680 = vmatprep.subr.mxu1 %v11039_v22  ;;  %v13849_v19 = vld [vmem:[#allocation44_spill] sm:$0xff]  ;;  %v13850_v22 = vld [vmem:[#allocation45_spill] sm:$0xff] }
0x1085   :  { %4610 = vmatpush2.msra.mxu0 %v11042_v6  ;;  %4681 = vmatpush2.msra.mxu1 %v11045_v37  ;;  %v13851_v6 = vld [vmem:[#allocation46_spill] sm:$0xff]  ;;  %v13852_v37 = vld [vmem:[#allocation47_spill] sm:$0xff] }
0x1086   :  { %4611 = vmatprep.subr.mxu0 %v11048_v28  ;;  %4682 = vmatprep.subr.mxu1 %v11051_v9  ;;  %v13853_v28 = vld [vmem:[#allocation48_spill] sm:$0xff]  ;;  %v13854_v9 = vld [vmem:[#allocation49_spill] sm:$0xff] }
0x1087   :  { %4612 = vmatpush2.msra.mxu0 %v11054_v40  ;;  %4683 = vmatpush2.msra.mxu1 %v11057_v34  ;;  %v13855_v34 = vld [vmem:[#allocation52_spill] sm:$0xff] }
0x1088   :  { %4613 = vmatprep.subr.mxu0 %v13823_v15  ;;  %4684 = vmatprep.subr.mxu1 %v13824_v60  ;;  %v4781_v60 = vld [vmem:[#allocation13 + $0x78] sm:$0xff] }
0x1089   :  { %4614 = vmatpush2.msra.mxu0 %v13825_v2  ;;  %4685 = vmatpush2.msra.mxu1 %v13826_v41  ;;  %v4780_v2 = vld [vmem:[#allocation13 + $0x70] sm:$0xff]  ;;  %v4779_v41 = vld [vmem:[#allocation13 + $0x68] sm:$0xff] }
0x108a   :  { %4615 = vmatprep.subr.mxu0 %v13827_v43  ;;  %4686 = vmatprep.subr.mxu1 %v13828_v3  ;;  %v4777_v43 = vld [vmem:[#allocation13 + $0x58] sm:$0xff]  ;;  %v4776_v3 = vld [vmem:[#allocation13 + $0x50] sm:$0xff] }
0x108b   :  { %4616 = vmatpush2.msra.mxu0 %v13829_v39  ;;  %4687 = vmatpush2.msra.mxu1 %v13830_v45  ;;  %v4775_v39 = vld [vmem:[#allocation13 + $0x48] sm:$0xff]  ;;  %v4774_v45 = vld [vmem:[#allocation13 + $0x40] sm:$0xff] }
0x108c   :  { %4617 = vmatprep.subr.mxu0 %v13831_v47  ;;  %4688 = vmatprep.subr.mxu1 %v13832_v17  ;;  %v4773_v47 = vld [vmem:[#allocation13 + $0x38] sm:$0xff]  ;;  %v4772_v17 = vld [vmem:[#allocation13 + $0x30] sm:$0xff] }
0x108d   :  { %4618 = vmatpush2.msra.mxu0 %v13833_v46  ;;  %4689 = vmatpush2.msra.mxu1 %v13834_v54  ;;  %v4771_v46 = vld [vmem:[#allocation13 + $0x28] sm:$0xff]  ;;  %v4770_v54 = vld [vmem:[#allocation13 + $0x20] sm:$0xff] }
0x108e   :  { %4619 = vmatprep.subr.mxu0 %v13835_v62  ;;  %4690 = vmatprep.subr.mxu1 %v13836_v16  ;;  %v4769_v62 = vld [vmem:[#allocation13 + $0x18] sm:$0xff]  ;;  %v4768_v16 = vld [vmem:[#allocation13 + $0x10] sm:$0xff] }
0x108f   :  { %4620 = vmatpush2.msra.mxu0 %v13837_v42  ;;  %4691 = vmatpush2.msra.mxu1 %v13838_v50  ;;  %v4767_v42 = vld [vmem:[#allocation13 + $0x8] sm:$0xff]  ;;  %v4766_v50 = vld [vmem:[#allocation13] sm:$0xff] }
0x1090   :  { %4621 = vmatprep.subr.mxu0 %v13839_v7  ;;  %4692 = vmatprep.subr.mxu1 %v13840_v63 }
0x1091   :  { %4622 = vmatpush2.msra.mxu0 %v13841_v44  ;;  %4693 = vmatpush2.msra.mxu1 %v13842_v52 }
0x1092   :  { %4623 = vmatprep.subr.mxu0 %v13843_v18  ;;  %4694 = vmatprep.subr.mxu1 %v13844_v4  ;;  %v13857_v18 = vld [vmem:[#allocation249_spill] sm:$0xff] }
0x1093   :  { %4624 = vmatpush2.msra.mxu0 %v13845_v26  ;;  %4695 = vmatpush2.msra.mxu1 %v13846_v27 }
0x1094   :  { %4625 = vmatprep.subr.mxu0 %v13847_v25  ;;  %4696 = vmatprep.subr.mxu1 %v13848_v23  ;;  %v13858_v23 = vld [vmem:[#allocation251_spill] sm:$0xff] }
0x1095   :  { %4626 = vmatpush2.msra.mxu0 %v13849_v19  ;;  %4697 = vmatpush2.msra.mxu1 %v13850_v22 }
0x1096   :  { %4627 = vmatprep.subr.mxu0 %v13851_v6  ;;  %4698 = vmatprep.subr.mxu1 %v13852_v37  ;;  %v13859_v37 = vld [vmem:[#allocation252_spill] sm:$0xff] }
0x1097   :  { %4628 = vmatpush2.msra.mxu0 %v13853_v28  ;;  %4699 = vmatpush2.msra.mxu1 %v13854_v9 }
0x1098   :  { %4960 = vmatprep.subr.mxu0 %v13613_v21 }
0x1117   :  { %v4465_v40 = vpop.f32.mrf.mxu0  ;;  %v4536_v59 = vpop.f32.mrf.mxu1 }
0x1118   :  { %v4466_v5 = vadd.f32 %v4465_v40, %v13855_v34  ;;  %v4537_v10 = vadd.f32 %v4536_v59, %v12473_v55 }
0x1119   :  { %v4467_v12 = vpop.f32.mrf.mxu0  ;;  %v4538_v58 = vpop.f32.mrf.mxu1 }
0x111a   :  { %v4936_v30 = vmul.f32 -1.442695, %v4466_v5  ;;  %v4468_v56 = vadd.f32 %v4467_v12, %v13856_v29  ;;  %v4539_v38 = vadd.f32 %v4538_v58, %v12472_v51 }
0x111c   :  { %5298 = vpow2.f32 %v4936_v30  ;;  %v4937_v0 = vmul.f32 -1.442695, %v4468_v56  ;;  %v4938_v57 = vmul.f32 -1.442695, %v4539_v38 }
0x111e   :  { %5300 = vpow2.f32 %v4937_v0 }
0x111f   :  { %5302 = vpow2.f32 %v4938_v57 }
0x1129   :  { %v5299_v14 = vpop.eup %5298 }
0x112a   :  { %v4550_v35 = vadd.f32 1.0, %v5299_v14 }
0x112b   :  { %v5301_v48 = vpop.eup %5300 }
0x112c   :  { %5304 = vrcp.f32 %v4550_v35  ;;  %v4551_v32 = vadd.f32 1.0, %v5301_v48  ;;  %v5303_v33 = vpop.eup %5302 }
0x112d   :  { %5306 = vtanh.f32 %v4537_v10  ;;  %v4552_v11 = vadd.f32 1.0, %v5303_v33  ;;  %v4942_v10 = vld [vmem:[%s11297_s7] ss:$0 sm:$0xff] }
0x112e   :  { %5308 = vrcp.f32 %v4551_v32 }
0x112f   :  { %5310 = vrcp.f32 %v4552_v11 }
0x1139   :  { %v5305_v20 = vpop.eup %5304 }
0x113a   :  { %v5307_v31 = vpop.eup %5306 }
0x113b   :  { %v5309_v36 = vpop.eup %5308  ;;  %v4561_v61 = vmul.f32 %v5307_v31, %v5305_v20 }
0x113c   :  { %v4560_v24 = vmul.f32 %v5309_v36, %v11161_v49  ;;  %v5311_v53 = vpop.eup %5310  ;;  %v4778_v49 = vld [vmem:[#allocation13 + $0x60] sm:$0xff] }
0x113e   :  { %v4562_v51 = vadd.f32 %v4561_v61, %v4560_v24 }
0x1140   :  { %5312 = vtanh.f32 %v4562_v51 }
0x114d   :  { %v5313_v55 = vpop.eup %5312 }
0x114e   :  { %v4564_v15 = vmul.f32 %v5313_v55, %v5311_v53 }
0x1150   :  { %4630 = vmatmul.mubr.f32.vlgmr.msra.gmra.mxu0 %v4564_v15  ;;  %4701 = vmatmul.mubr.f32.vlgmr.msra.gmra.mxu1 %v4564_v15 }
0x1151   :  { %4961 = vmatpush3.msra.mxu0 %v4781_v60  ;;  %4992 = vmatprep.mubr.msk.f32.mxu0 %vm6723_vm6, %v13613_v21 }
0x1152   :  { %4962 = vmatprep.subr.mxu0 %v13613_v21 }
0x1153   :  { %4963 = vmatpush3.msra.mxu0 %v4780_v2 }
0x1154   :  { %4964 = vmatprep.subr.mxu0 %v13613_v21 }
0x1155   :  { %4965 = vmatpush3.msra.mxu0 %v4779_v41 }
0x1156   :  { %4966 = vmatprep.subr.mxu0 %v13613_v21 }
0x1157   :  { %4967 = vmatpush3.msra.mxu0 %v4778_v49 }
0x1158   :  { %4968 = vmatprep.subr.mxu0 %v13613_v21 }
0x1159   :  { %4969 = vmatpush3.msra.mxu0 %v4777_v43 }
0x115a   :  { %4970 = vmatprep.subr.mxu0 %v13613_v21 }
0x115b   :  { %4971 = vmatpush3.msra.mxu0 %v4776_v3 }
0x115c   :  { %4972 = vmatprep.subr.mxu0 %v13613_v21 }
0x115d   :  { %4973 = vmatpush3.msra.mxu0 %v4775_v39 }
0x115e   :  { %4974 = vmatprep.subr.mxu0 %v13613_v21 }
0x115f   :  { %4975 = vmatpush3.msra.mxu0 %v4774_v45 }
0x1160   :  { %4976 = vmatprep.subr.mxu0 %v13613_v21 }
0x1161   :  { %4977 = vmatpush3.msra.mxu0 %v4773_v47 }
0x1162   :  { %4978 = vmatprep.subr.mxu0 %v13613_v21 }
0x1163   :  { %4979 = vmatpush3.msra.mxu0 %v4772_v17 }
0x1164   :  { %4980 = vmatprep.subr.mxu0 %v13613_v21 }
0x1165   :  { %4981 = vmatpush3.msra.mxu0 %v4771_v46 }
0x1166   :  { %4982 = vmatprep.subr.mxu0 %v13613_v21 }
0x1167   :  { %4983 = vmatpush3.msra.mxu0 %v4770_v54 }
0x1168   :  { %4984 = vmatprep.subr.mxu0 %v13613_v21 }
0x1169   :  { %4985 = vmatpush3.msra.mxu0 %v4769_v62 }
0x116a   :  { %4986 = vmatprep.subr.mxu0 %v13613_v21 }
0x116b   :  { %4987 = vmatpush3.msra.mxu0 %v4768_v16 }
0x116c   :  { %4988 = vmatprep.subr.mxu0 %v13613_v21 }
0x116d   :  { %4989 = vmatpush3.msra.mxu0 %v4767_v42 }
0x116e   :  { %4990 = vmatprep.subr.mxu0 %v13613_v21 }
0x116f   :  { %4991 = vmatpush3.msra.mxu0 %v4766_v50 }
0x1210   :  { %v4631_v7 = vpop.f32.mrf.mxu0  ;;  %v4702_v26 = vpop.f32.mrf.mxu1 }
0x1211   :  { %v4632_v63 = vadd.f32 %v4631_v7, %v13745_v13  ;;  %v4703_v28 = vadd.f32 %v4702_v26, %v13859_v37 }
0x1212   :  { %v4633_v44 = vpop.f32.mrf.mxu0  ;;  %v4704_v25 = vpop.f32.mrf.mxu1 }
0x1213   :  { %v4939_v52 = vmul.f32 -1.442695, %v4632_v63  ;;  %v4634_v4 = vadd.f32 %v4633_v44, %v13857_v18  ;;  %v4705_v19 = vadd.f32 %v4704_v25, %v13858_v23 }
0x1215   :  { %5314 = vpow2.f32 %v4939_v52  ;;  %v4940_v27 = vmul.f32 -1.442695, %v4634_v4  ;;  %v4941_v22 = vmul.f32 -1.442695, %v4705_v19 }
0x1217   :  { %5316 = vpow2.f32 %v4940_v27 }
0x1218   :  { %5318 = vpow2.f32 %v4941_v22 }
0x1222   :  { %v5315_v6 = vpop.eup %5314 }
0x1223   :  { %v4716_v21 = vadd.f32 1.0, %v5315_v6 }
0x1224   :  { %v5317_v9 = vpop.eup %5316 }
0x1225   :  { %5320 = vrcp.f32 %v4716_v21  ;;  %v4717_v13 = vadd.f32 1.0, %v5317_v9  ;;  %v5319_v40 = vpop.eup %5318 }
0x1226   :  { %5322 = vtanh.f32 %v4703_v28  ;;  %v4718_v30 = vadd.f32 1.0, %v5319_v40 }
0x1227   :  { %5324 = vrcp.f32 %v4717_v13 }
0x1228   :  { %5326 = vrcp.f32 %v4718_v30 }
0x1232   :  { %v5321_v34 = vpop.eup %5320 }
0x1233   :  { %v5323_v5 = vpop.eup %5322 }
0x1234   :  { %v5325_v12 = vpop.eup %5324  ;;  %v4727_v29 = vmul.f32 %v5323_v5, %v5321_v34 }
0x1235   :  { %v4726_v56 = vmul.f32 %v5325_v12, %v11181_v8  ;;  %v5327_v0 = vpop.eup %5326 }
0x1237   :  { %v4728_v59 = vadd.f32 %v4727_v29, %v4726_v56 }
0x1239   :  { %5328 = vtanh.f32 %v4728_v59 }
0x1246   :  { %v5329_v58 = vpop.eup %5328 }
0x1247   :  { %v4730_v38 = vmul.f32 %v5329_v58, %v5327_v0 }
0x1249   :  { %v4750_v57 = vrot.slane %v4730_v38, 1 }
0x124b   :  { %v4765_v14 = vsel %vm4764_vm7, %v11187_v1, %v4750_v57 }
0x124c   :  { %4993 = vmatmul.mubr.f32.vlgmr.msra.gmra.mxu0 %v4765_v14 }
0x130c   :  { %v4855_v35 = vpop.f32.mrf.mxu0 }
0x130d   :  { %v4856_v48 = vadd.f32 %v4942_v10, %v4855_v35 }
0x130e   :  { %v4994_v8 = vpop.f32.mrf.mxu0 }
0x130f   :  { %4859 = vst [vmem:[#allocation15] sm:$0xff] %v4856_v48 }
0x1310   :  { %6689 = shalt.err (!%p6686_p6)
}
0x1311   :  { %4869 = dma.vmem_to_hbm [thread:$0]  %s4867_s23, 128, %s11298_s8, [#allocation4]  }
0x1312   :  { %6708 = dma.done.wait [#allocation4], 128  }
0x1313   :  { %6709 = vsyncadd [#allocation4], 4294967168 }
0x1314   :  { %4873 = vsyncpa [#allocation3], 1 }
0x1315   :  { %4874 = vsyncpa [#allocation8], 1 }
0x1316   :  { %4875 = vsyncpa [#allocation11], 1 }
0x1317   :  { %4876 = vsyncpa [#allocation14], 1 }
0x1318   :  { %4877 = vsyncpa [#allocation4], 1 }
0x1319   :  { %4878 = vsyncpa [#allocation5], 1 }

</bundles_post_ra>
